<compile_context>
chip_gen: v5e
topology: v5e:2x2
jax: 0.10.0
libtpu: 0.0.40
codegen_flags: <defaults>
</compile_context>

<pallas_src>
import functools

import jax
import jax.numpy as jnp
import numpy as np
from jax import lax
from jax.experimental import pallas as pl
from jax.experimental.pallas import tpu as pltpu

BN_EPS = 1e-5
LANE = 128
VMEM_LIMIT = 48 * 1024 * 1024          # headroom on v7x (64 MiB physical VMEM)


def _round_up(x, m):
    return (x + m - 1) // m * m


def _choose_m_tiling(m):
    """Largest-first tile for the BN-apply pass; pad M when nothing divides."""
    for cand in (2048, 1024, 512, 256, 128, 64, 32, 16, 8):
        if m % cand == 0:
            return m, cand
    tm = 512 if m >= 512 else _round_up(m, 8)
    return _round_up(m, tm), tm


# ----------------------------- Pallas kernel bodies ----------------------------- #
def _conv3x3_stats_kernel(*refs, apply_input_bn):
    """3x3 conv (stride 1, pad 1, no bias) on one image + per-image BN partial stats.

    refs (apply_input_bn=False): xpad, w, y, psum, pssq
    refs (apply_input_bn=True):  xpad, scale, shift, w, y, psum, pssq

    xpad : (1, H+2, W+2, C_p) bf16   zero-halo tile (raw pre-BN prev-conv output when
                                     apply_input_bn=True)
    scale/shift : (1, C_p) f32       folded BN of the PREVIOUS conv, fused (+ReLU) here
    w    : (9*C_p, C_p) bf16         HWIO weights flattened to K x N
    y    : (1, H*W, C_p) bf16        raw (pre-BN) conv output
    psum/pssq : (1, 1, C_p) f32      this image's channel sum / sum-of-squares (f32 acc)
    """
    if apply_input_bn:
        x_ref, scale_ref, shift_ref, w_ref, y_ref, sum_ref, ssq_ref = refs
    else:
        x_ref, w_ref, y_ref, sum_ref, ssq_ref = refs
        scale_ref = shift_ref = None

    _, hp, wp, c_p = x_ref.shape
    h, w = hp - 2, wp - 2

    if apply_input_bn:
        scale = scale_ref[...].reshape(1, 1, c_p)
        shift = shift_ref[...].reshape(1, 1, c_p)
        pi = lax.broadcasted_iota(jnp.int32, (h, w, 1), 0)
        qi = lax.broadcasted_iota(jnp.int32, (h, w, 1), 1)

    # 9 shifted (H, W, C_p) halo windows, concatenated on the lane axis ->
    # ONE K = 9*C_p bf16 MXU matmul with f32 accumulation.
    taps = []
    for dh in range(3):
        for dw in range(3):
            t = x_ref[0, dh:dh + h, dw:dw + w, :]                 # (H, W, C_p) bf16
            if apply_input_bn:
                # Fused BN(prev conv) + ReLU. Tap positions that land in the 1-pixel
                # zero halo would become relu(shift) != 0, so mask them back to zero.
                tf = jnp.maximum(t.astype(jnp.float32) * scale + shift, 0.0)
                conds = []
                if dh == 0:
                    conds.append(pi >= 1)
                if dh == 2:
                    conds.append(pi <= h - 2)
                if dw == 0:
                    conds.append(qi >= 1)
                if dw == 2:
                    conds.append(qi <= w - 2)
                if conds:
                    valid = functools.reduce(lambda a, b: a & b, conds)
                    tf = jnp.where(valid, tf, 0.0)
                t = tf.astype(jnp.bfloat16)
            taps.append(t.reshape(h * w, c_p))
    xm = jnp.concatenate(taps, axis=-1)                           # (H*W, 9*C_p) bf16

    acc = jnp.dot(xm, w_ref[...], preferred_element_type=jnp.float32)
    y_ref[0] = acc.astype(y_ref.dtype)                            # bf16 writeback

    # Per-image partial statistics straight from the f32 accumulator.
    # Distinct output block per grid step -> grid axis stays "parallel" (megacore OK).
    sum_ref[0] = jnp.sum(acc, axis=0, keepdims=True)
    ssq_ref[0] = jnp.sum(acc * acc, axis=0, keepdims=True)


def _bn_residual_relu_kernel(y_ref, scale_ref, shift_ref, res_ref, o_ref):
    """BN2 apply (+ identity residual) + ReLU, tiled over M, lane-dense output."""
    y = y_ref[...].astype(jnp.float32) * scale_ref[...] + shift_ref[...]
    y = y + res_ref[...].astype(jnp.float32)
    o_ref[...] = jnp.maximum(y, 0.0).astype(o_ref.dtype)


# --------------------------------- JAX wrappers ---------------------------------- #
def _conv3x3_raw(xpad, w_flat, scale_shift, n, h, w):
    """Whole-batch 3x3 conv (s=1,p=1,no bias) -> raw bf16 output + reduced BN stats.

    scale_shift: None, or (scale, shift) (1, C_p) f32 of the previous conv's BN to
    fuse (+ReLU) into this conv's tap read.
    """
    c_p = w_flat.shape[-1]
    apply_bn = scale_shift is not None

    halo_spec = pl.BlockSpec((1, h + 2, w + 2, c_p), lambda i: (i, 0, 0, 0))
    vec_spec = pl.BlockSpec((1, c_p), lambda i: (0, 0))
    w_spec = pl.BlockSpec((9 * c_p, c_p), lambda i: (0, 0))

    in_specs, args = [halo_spec], [xpad]
    if apply_bn:
        in_specs += [vec_spec, vec_spec]
        args += list(scale_shift)
    in_specs.append(w_spec)
    args.append(w_flat)

    # TODO(synk): also tile pass 1 over image rows (halo row windows) for deeper
    # pipelining / lower per-step VMEM at 56x56-scale feature maps.
    y, s, q = pl.pallas_call(
        functools.partial(_conv3x3_stats_kernel, apply_input_bn=apply_bn),
        grid=(n,),
        in_specs=in_specs,
        out_specs=[
            pl.BlockSpec((1, h * w, c_p), lambda i: (i, 0, 0)),
            pl.BlockSpec((1, 1, c_p), lambda i: (i, 0, 0)),
            pl.BlockSpec((1, 1, c_p), lambda i: (i, 0, 0)),
        ],
        out_shape=[
            jax.ShapeDtypeStruct((n, h * w, c_p), jnp.bfloat16),
            jax.ShapeDtypeStruct((n, 1, c_p), jnp.float32),
            jax.ShapeDtypeStruct((n, 1, c_p), jnp.float32),
        ],
        compiler_params=pltpu.CompilerParams(
            dimension_semantics=("parallel",),
            vmem_limit_bytes=VMEM_LIMIT,
        ),
    )(*args)
    # Tiny (N, 1, C_p) partials -> reduce in XLA.
    return y, jnp.sum(s, axis=0), jnp.sum(q, axis=0)


def _bn_fold(s, q, gamma_row, beta_row, count):
    """Training-mode BatchNorm2d folded to per-channel scale/shift (f32)."""
    mean = s / count
    var = q / count - mean * mean                     # biased variance
    scale = gamma_row * lax.rsqrt(var + BN_EPS)
    shift = beta_row - mean * scale
    return scale, shift


def _bn_residual_relu(y2d, scale, shift, res2d, out_dtype):
    m, c_p = y2d.shape
    m_pad, tm = _choose_m_tiling(m)
    if m_pad != m:
        y2d = jnp.pad(y2d, ((0, m_pad - m), (0, 0)))
        res2d = jnp.pad(res2d, ((0, m_pad - m), (0, 0)))
    row_spec = pl.BlockSpec((tm, c_p), lambda i: (i, 0))
    vec_spec = pl.BlockSpec((1, c_p), lambda i: (0, 0))
    out = pl.pallas_call(
        _bn_residual_relu_kernel,
        grid=(m_pad // tm,),
        in_specs=[row_spec, vec_spec, vec_spec, row_spec],
        out_specs=row_spec,
        out_shape=jax.ShapeDtypeStruct((m_pad, c_p), out_dtype),
        compiler_params=pltpu.CompilerParams(
            dimension_semantics=("parallel",),
            vmem_limit_bytes=VMEM_LIMIT,
        ),
    )(y2d, scale, shift, res2d)
    return out[:m]


def residual_block(x_nchw, w1, g1, b1, w2, g2, b2, stride=1, shortcut=None):
    """Forward of ResidualBlock with the identity (shortcut=None) path."""
    # TODO(synk): strided first conv / projection ("right") shortcut not implemented
    # -- only the shortcut=None identity path of the module.
    assert stride == 1 and shortcut is None
    n, c, h, w = x_nchw.shape
    cout = w1.shape[-1]
    assert cout == c, "identity residual requires in_channels == out_channels"

    c_p = _round_up(c, LANE)
    m = n * h * w

    def prep_w(wt):
        wp = jnp.pad(wt, ((0, 0), (0, 0), (0, c_p - wt.shape[2]),
                          (0, c_p - wt.shape[3])))
        return wp.reshape(9 * c_p, c_p).astype(jnp.bfloat16)

    def prep_gb(g, b):
        gp = jnp.pad(g.astype(jnp.float32), (0, c_p - c),
                     constant_values=1.0).reshape(1, c_p)
        bp = jnp.pad(b.astype(jnp.float32), (0, c_p - c)).reshape(1, c_p)
        return gp, bp

    w1f, w2f = prep_w(w1), prep_w(w2)
    g1p, b1p = prep_gb(g1, b1)
    g2p, b2p = prep_gb(g2, b2)

    # NCHW -> NHWC, lane-dense channel pad, bf16; this tensor is also conv2's residual.
    x_b = jnp.pad(jnp.transpose(x_nchw, (0, 2, 3, 1)),
                  ((0, 0), (0, 0), (0, 0), (0, c_p - c))).astype(jnp.bfloat16)
    x_halo = jnp.pad(x_b, ((0, 0), (1, 1), (1, 1), (0, 0)))

    # conv1: raw (pre-BN) bf16 output + BN1 stats. BN1/ReLU are NOT applied here.
    y1, s1, q1 = _conv3x3_raw(x_halo, w1f, None, n, h, w)
    scale1, shift1 = _bn_fold(s1, q1, g1p, b1p, float(m))

    # TODO(synk): write y1 directly in halo layout from pass 1 (in-kernel partial
    # store) to drop this one remaining XLA pad of the intermediate.
    y1_halo = jnp.pad(y1.reshape(n, h, w, c_p), ((0, 0), (1, 1), (1, 1), (0, 0)))

    # conv2 with BN1 + ReLU fused into its tap read; raw bf16 output + BN2 stats.
    y2, s2, q2 = _conv3x3_raw(y1_halo, w2f, (scale1, shift1), n, h, w)
    scale2, shift2 = _bn_fold(s2, q2, g2p, b2p, float(m))

    # BN2 apply + identity residual + ReLU.
    out = _bn_residual_relu(y2.reshape(m, c_p), scale2, shift2,
                            x_b.reshape(m, c_p), jnp.float32)

    out = out.reshape(n, h, w, c_p)[:, :, :, :c]
    return jnp.transpose(out, (0, 3, 1, 2))                      # NHWC -> NCHW


# ------------------------------ pure-JAX reference ------------------------------- #
def _ref_residual_block(x_nchw, w1, g1, b1, w2, g2, b2):
    """Reference mirrors the kernel's bf16 MXU operands (f32 accumulation/BN)."""
    x = jnp.transpose(x_nchw, (0, 2, 3, 1)).astype(jnp.float32)

    def conv_bn(inp, wt, g, b):
        y = lax.conv_general_dilated(
            inp.astype(jnp.bfloat16), wt.astype(jnp.bfloat16),
            window_strides=(1, 1), padding=((1, 1), (1, 1)),
            dimension_numbers=("NHWC", "HWIO", "NHWC"),
            preferred_element_type=jnp.float32)
        mean = jnp.mean(y, axis=(0, 1, 2))
        var = jnp.var(y, axis=(0, 1, 2))
        return (y - mean) * lax.rsqrt(var + BN_EPS) * g + b

    h = jnp.maximum(conv_bn(x, w1, g1, b1), 0.0)
    o = jnp.maximum(conv_bn(h, w2, g2, b2) + x, 0.0)
    return jnp.transpose(o, (0, 3, 1, 2))


# -------------------------------------- main -------------------------------------- #
if __name__ == "__main__":
    N, C, H, W = 2, 4, 16, 16          # in_channels == out_channels, stride = 1
    key = jax.random.PRNGKey(0)
    kx, kw1, kw2 = jax.random.split(key, 3)

    x = jax.random.normal(kx, (N, C, H, W), jnp.float32)            # NCHW input
    w1 = jax.random.normal(kw1, (3, 3, C, C), jnp.float32) * 0.2    # HWIO
    w2 = jax.random.normal(kw2, (3, 3, C, C), jnp.float32) * 0.2    # HWIO
    g1 = jnp.ones((C,), jnp.float32)    # BatchNorm2d default affine params
    b1 = jnp.zeros((C,), jnp.float32)
    g2 = jnp.ones((C,), jnp.float32)
    b2 = jnp.zeros((C,), jnp.float32)

    out = jax.jit(residual_block)(x, w1, g1, b1, w2, g2, b2)
    out = jax.block_until_ready(out)

    ref = jax.block_until_ready(_ref_residual_block(x, w1, g1, b1, w2, g2, b2))
    np.testing.assert_allclose(np.asarray(out), np.asarray(ref),
                               rtol=2e-2, atol=2e-2)
    assert out.shape == (N, C, H, W)
    print("KERNEL_OK")
</pallas_src>

<mosaic_0001>
module attributes {stable_mosaic.version = 11 : i64} {
  func.func @_conv3x3_stats_kernel(%arg0: i32, %arg1: memref<1x18x18x128xbf16, #tpu.memory_space<vmem>>, %arg2: memref<1152x128xbf16, #tpu.memory_space<vmem>>, %arg3: memref<1x256x128xbf16, #tpu.memory_space<vmem>>, %arg4: memref<1x1x128xf32, #tpu.memory_space<vmem>>, %arg5: memref<1x1x128xf32, #tpu.memory_space<vmem>>) attributes {dimension_semantics = [#tpu.dimension_semantics<parallel>], iteration_bounds = array<i64: 2>, scalar_prefetch = 0 : i64, scratch_operands = 0 : i64, tpu.core_type = #tpu.core_type<tc>, window_params = [{transform_indices = @transform_0, window_bounds = array<i64: 1, 18, 18, 128>}, {pipeline_mode = #tpu.pipeline_mode<synchronous>, transform_indices = @transform_1, window_bounds = array<i64: 1152, 128>}, {transform_indices = @transform_2, window_bounds = array<i64: 1, 256, 128>}, {transform_indices = @transform_3, window_bounds = array<i64: 1, 1, 128>}, {transform_indices = @transform_4, window_bounds = array<i64: 1, 1, 128>}]} {
    %c0 = arith.constant 0 : index
    %c0_0 = arith.constant 0 : index
    %c0_1 = arith.constant 0 : index
    %c0_2 = arith.constant 0 : index
    %0 = vector.load %arg1[%c0, %c0_0, %c0_1, %c0_2] : memref<1x18x18x128xbf16, #tpu.memory_space<vmem>>, vector<1x16x16x128xbf16>
    %1 = vector.shape_cast %0 : vector<1x16x16x128xbf16> to vector<16x16x128xbf16>
    %2 = vector.shape_cast %1 : vector<16x16x128xbf16> to vector<256x128xbf16>
    %c0_3 = arith.constant 0 : index
    %c0_4 = arith.constant 0 : index
    %c1 = arith.constant 1 : index
    %c0_5 = arith.constant 0 : index
    %3 = vector.load %arg1[%c0_3, %c0_4, %c1, %c0_5] : memref<1x18x18x128xbf16, #tpu.memory_space<vmem>>, vector<1x16x16x128xbf16>
    %4 = vector.shape_cast %3 : vector<1x16x16x128xbf16> to vector<16x16x128xbf16>
    %5 = vector.shape_cast %4 : vector<16x16x128xbf16> to vector<256x128xbf16>
    %c0_6 = arith.constant 0 : index
    %c0_7 = arith.constant 0 : index
    %c2 = arith.constant 2 : index
    %c0_8 = arith.constant 0 : index
    %6 = vector.load %arg1[%c0_6, %c0_7, %c2, %c0_8] : memref<1x18x18x128xbf16, #tpu.memory_space<vmem>>, vector<1x16x16x128xbf16>
    %7 = vector.shape_cast %6 : vector<1x16x16x128xbf16> to vector<16x16x128xbf16>
    %8 = vector.shape_cast %7 : vector<16x16x128xbf16> to vector<256x128xbf16>
    %c0_9 = arith.constant 0 : index
    %c1_10 = arith.constant 1 : index
    %c0_11 = arith.constant 0 : index
    %c0_12 = arith.constant 0 : index
    %9 = vector.load %arg1[%c0_9, %c1_10, %c0_11, %c0_12] : memref<1x18x18x128xbf16, #tpu.memory_space<vmem>>, vector<1x16x16x128xbf16>
    %10 = vector.shape_cast %9 : vector<1x16x16x128xbf16> to vector<16x16x128xbf16>
    %11 = vector.shape_cast %10 : vector<16x16x128xbf16> to vector<256x128xbf16>
    %c0_13 = arith.constant 0 : index
    %c1_14 = arith.constant 1 : index
    %c1_15 = arith.constant 1 : index
    %c0_16 = arith.constant 0 : index
    %12 = vector.load %arg1[%c0_13, %c1_14, %c1_15, %c0_16] : memref<1x18x18x128xbf16, #tpu.memory_space<vmem>>, vector<1x16x16x128xbf16>
    %13 = vector.shape_cast %12 : vector<1x16x16x128xbf16> to vector<16x16x128xbf16>
    %14 = vector.shape_cast %13 : vector<16x16x128xbf16> to vector<256x128xbf16>
    %c0_17 = arith.constant 0 : index
    %c1_18 = arith.constant 1 : index
    %c2_19 = arith.constant 2 : index
    %c0_20 = arith.constant 0 : index
    %15 = vector.load %arg1[%c0_17, %c1_18, %c2_19, %c0_20] : memref<1x18x18x128xbf16, #tpu.memory_space<vmem>>, vector<1x16x16x128xbf16>
    %16 = vector.shape_cast %15 : vector<1x16x16x128xbf16> to vector<16x16x128xbf16>
    %17 = vector.shape_cast %16 : vector<16x16x128xbf16> to vector<256x128xbf16>
    %c0_21 = arith.constant 0 : index
    %c2_22 = arith.constant 2 : index
    %c0_23 = arith.constant 0 : index
    %c0_24 = arith.constant 0 : index
    %18 = vector.load %arg1[%c0_21, %c2_22, %c0_23, %c0_24] : memref<1x18x18x128xbf16, #tpu.memory_space<vmem>>, vector<1x16x16x128xbf16>
    %19 = vector.shape_cast %18 : vector<1x16x16x128xbf16> to vector<16x16x128xbf16>
    %20 = vector.shape_cast %19 : vector<16x16x128xbf16> to vector<256x128xbf16>
    %c0_25 = arith.constant 0 : index
    %c2_26 = arith.constant 2 : index
    %c1_27 = arith.constant 1 : index
    %c0_28 = arith.constant 0 : index
    %21 = vector.load %arg1[%c0_25, %c2_26, %c1_27, %c0_28] : memref<1x18x18x128xbf16, #tpu.memory_space<vmem>>, vector<1x16x16x128xbf16>
    %22 = vector.shape_cast %21 : vector<1x16x16x128xbf16> to vector<16x16x128xbf16>
    %23 = vector.shape_cast %22 : vector<16x16x128xbf16> to vector<256x128xbf16>
    %c0_29 = arith.constant 0 : index
    %c2_30 = arith.constant 2 : index
    %c2_31 = arith.constant 2 : index
    %c0_32 = arith.constant 0 : index
    %24 = vector.load %arg1[%c0_29, %c2_30, %c2_31, %c0_32] : memref<1x18x18x128xbf16, #tpu.memory_space<vmem>>, vector<1x16x16x128xbf16>
    %25 = vector.shape_cast %24 : vector<1x16x16x128xbf16> to vector<16x16x128xbf16>
    %26 = vector.shape_cast %25 : vector<16x16x128xbf16> to vector<256x128xbf16>
    %27 = tpu.concatenate %2, %5, %8, %11, %14, %17, %20, %23, %26 in 1 : vector<256x128xbf16>, vector<256x128xbf16>, vector<256x128xbf16>, vector<256x128xbf16>, vector<256x128xbf16>, vector<256x128xbf16>, vector<256x128xbf16>, vector<256x128xbf16>, vector<256x128xbf16> -> vector<256x1152xbf16>
    %c0_33 = arith.constant 0 : index
    %c0_34 = arith.constant 0 : index
    %28 = vector.load %arg2[%c0_33, %c0_34] : memref<1152x128xbf16, #tpu.memory_space<vmem>>, vector<1152x128xbf16>
    %cst = arith.constant dense<0.000000e+00> : vector<256x128xf32>
    %29 = tpu.matmul %27, %28, %cst {dimension_numbers = #tpu.dot_dimension_numbers<[1], [0], [0], [1], [0, 0, 1, 1], [], []>} : vector<256x1152xbf16>, vector<1152x128xbf16>, vector<256x128xf32> -> vector<256x128xf32>
    %30 = arith.truncf %29 : vector<256x128xf32> to vector<256x128xbf16>
    %c0_35 = arith.constant 0 : index
    %c0_36 = arith.constant 0 : index
    %c0_37 = arith.constant 0 : index
    %31 = vector.load %arg3[%c0_35, %c0_36, %c0_37] : memref<1x256x128xbf16, #tpu.memory_space<vmem>>, vector<1x256x128xbf16>
    %32 = vector.shape_cast %31 : vector<1x256x128xbf16> to vector<256x128xbf16>
    %33 = vector.shape_cast %30 : vector<256x128xbf16> to vector<1x256x128xbf16>
    tpu.vector_store %arg3[%c0_35, %c0_36, %c0_37], %33 {strides = array<i32>} : memref<1x256x128xbf16, #tpu.memory_space<vmem>>, vector<1x256x128xbf16>,
    %cst_38 = arith.constant dense<0.000000e+00> : vector<128xf32>
    %34 = vector.multi_reduction <add>, %29, %cst_38 [0] : vector<256x128xf32> to vector<128xf32>
    %35 = vector.shape_cast %34 : vector<128xf32> to vector<1x128xf32>
    %c0_39 = arith.constant 0 : index
    %c0_40 = arith.constant 0 : index
    %c0_41 = arith.constant 0 : index
    %36 = vector.load %arg4[%c0_39, %c0_40, %c0_41] : memref<1x1x128xf32, #tpu.memory_space<vmem>>, vector<1x1x128xf32>
    %37 = vector.shape_cast %36 : vector<1x1x128xf32> to vector<1x128xf32>
    %38 = vector.shape_cast %35 : vector<1x128xf32> to vector<1x1x128xf32>
    tpu.vector_store %arg4[%c0_39, %c0_40, %c0_41], %38 {strides = array<i32>} : memref<1x1x128xf32, #tpu.memory_space<vmem>>, vector<1x1x128xf32>,
    %39 = arith.mulf %29, %29 : vector<256x128xf32>
    %cst_42 = arith.constant dense<0.000000e+00> : vector<128xf32>
    %40 = vector.multi_reduction <add>, %39, %cst_42 [0] : vector<256x128xf32> to vector<128xf32>
    %41 = vector.shape_cast %40 : vector<128xf32> to vector<1x128xf32>
    %c0_43 = arith.constant 0 : index
    %c0_44 = arith.constant 0 : index
    %c0_45 = arith.constant 0 : index
    %42 = vector.load %arg5[%c0_43, %c0_44, %c0_45] : memref<1x1x128xf32, #tpu.memory_space<vmem>>, vector<1x1x128xf32>
    %43 = vector.shape_cast %42 : vector<1x1x128xf32> to vector<1x128xf32>
    %44 = vector.shape_cast %41 : vector<1x128xf32> to vector<1x1x128xf32>
    tpu.vector_store %arg5[%c0_43, %c0_44, %c0_45], %44 {strides = array<i32>} : memref<1x1x128xf32, #tpu.memory_space<vmem>>, vector<1x1x128xf32>,
    return
  }
  func.func @transform_0(%arg0: i32) -> (i32, i32, i32, i32) {
    %c0_i32 = arith.constant 0 : i32
    %c0_i32_0 = arith.constant 0 : i32
    %c0_i32_1 = arith.constant 0 : i32
    %c0_i32_2 = arith.constant 0 : i32
    return %arg0, %c0_i32, %c0_i32_0, %c0_i32_1 : i32, i32, i32, i32
  }
  func.func @transform_1(%arg0: i32) -> (i32, i32) {
    %c0_i32 = arith.constant 0 : i32
    %c0_i32_0 = arith.constant 0 : i32
    %c0_i32_1 = arith.constant 0 : i32
    return %c0_i32, %c0_i32_0 : i32, i32
  }
  func.func @transform_2(%arg0: i32) -> (i32, i32, i32) {
    %c0_i32 = arith.constant 0 : i32
    %c0_i32_0 = arith.constant 0 : i32
    %c0_i32_1 = arith.constant 0 : i32
    return %arg0, %c0_i32, %c0_i32_0 : i32, i32, i32
  }
  func.func @transform_3(%arg0: i32) -> (i32, i32, i32) {
    %c0_i32 = arith.constant 0 : i32
    %c0_i32_0 = arith.constant 0 : i32
    %c0_i32_1 = arith.constant 0 : i32
    return %arg0, %c0_i32, %c0_i32_0 : i32, i32, i32
  }
  func.func @transform_4(%arg0: i32) -> (i32, i32, i32) {
    %c0_i32 = arith.constant 0 : i32
    %c0_i32_0 = arith.constant 0 : i32
    %c0_i32_1 = arith.constant 0 : i32
    return %arg0, %c0_i32, %c0_i32_0 : i32, i32, i32
  }
}

module attributes {stable_mosaic.version = 11 : i64} {
  func.func @_bn_residual_relu_kernel(%arg0: i32, %arg1: memref<512x128xbf16, #tpu.memory_space<vmem>>, %arg2: memref<1x128xf32, #tpu.memory_space<vmem>>, %arg3: memref<1x128xf32, #tpu.memory_space<vmem>>, %arg4: memref<512x128xbf16, #tpu.memory_space<vmem>>, %arg5: memref<512x128xf32, #tpu.memory_space<vmem>>) attributes {dimension_semantics = [#tpu.dimension_semantics<parallel>], iteration_bounds = array<i64: 1>, scalar_prefetch = 0 : i64, scratch_operands = 0 : i64, tpu.core_type = #tpu.core_type<tc>, window_params = [{transform_indices = @transform_0, window_bounds = array<i64: 512, 128>}, {pipeline_mode = #tpu.pipeline_mode<synchronous>, transform_indices = @transform_1, window_bounds = array<i64: 1, 128>}, {pipeline_mode = #tpu.pipeline_mode<synchronous>, transform_indices = @transform_2, window_bounds = array<i64: 1, 128>}, {transform_indices = @transform_3, window_bounds = array<i64: 512, 128>}, {transform_indices = @transform_4, window_bounds = array<i64: 512, 128>}]} {
    %c0 = arith.constant 0 : index
    %c0_0 = arith.constant 0 : index
    %0 = vector.load %arg1[%c0, %c0_0] : memref<512x128xbf16, #tpu.memory_space<vmem>>, vector<512x128xbf16>
    %1 = arith.extf %0 : vector<512x128xbf16> to vector<512x128xf32>
    %c0_1 = arith.constant 0 : index
    %c0_2 = arith.constant 0 : index
    %2 = vector.load %arg2[%c0_1, %c0_2] : memref<1x128xf32, #tpu.memory_space<vmem>>, vector<1x128xf32>
    %3 = vector.broadcast %2 : vector<1x128xf32> to vector<512x128xf32>
    %4 = arith.mulf %1, %3 : vector<512x128xf32>
    %c0_3 = arith.constant 0 : index
    %c0_4 = arith.constant 0 : index
    %5 = vector.load %arg3[%c0_3, %c0_4] : memref<1x128xf32, #tpu.memory_space<vmem>>, vector<1x128xf32>
    %6 = vector.broadcast %5 : vector<1x128xf32> to vector<512x128xf32>
    %7 = arith.addf %4, %6 : vector<512x128xf32>
    %c0_5 = arith.constant 0 : index
    %c0_6 = arith.constant 0 : index
    %8 = vector.load %arg4[%c0_5, %c0_6] : memref<512x128xbf16, #tpu.memory_space<vmem>>, vector<512x128xbf16>
    %9 = arith.extf %8 : vector<512x128xbf16> to vector<512x128xf32>
    %10 = arith.addf %7, %9 : vector<512x128xf32>
    %cst = arith.constant 0.000000e+00 : f32
    %11 = vector.broadcast %cst : f32 to vector<512x128xf32>
    %12 = arith.maximumf %10, %11 : vector<512x128xf32>
    %c0_7 = arith.constant 0 : index
    %c0_8 = arith.constant 0 : index
    %13 = vector.load %arg5[%c0_7, %c0_8] : memref<512x128xf32, #tpu.memory_space<vmem>>, vector<512x128xf32>
    tpu.vector_store %arg5[%c0_7, %c0_8], %12 {strides = array<i32>} : memref<512x128xf32, #tpu.memory_space<vmem>>, vector<512x128xf32>,
    return
  }
  func.func @transform_0(%arg0: i32) -> (i32, i32) {
    %c0_i32 = arith.constant 0 : i32
    %c0_i32_0 = arith.constant 0 : i32
    return %arg0, %c0_i32 : i32, i32
  }
  func.func @transform_1(%arg0: i32) -> (i32, i32) {
    %c0_i32 = arith.constant 0 : i32
    %c0_i32_0 = arith.constant 0 : i32
    %c0_i32_1 = arith.constant 0 : i32
    return %c0_i32, %c0_i32_0 : i32, i32
  }
  func.func @transform_2(%arg0: i32) -> (i32, i32) {
    %c0_i32 = arith.constant 0 : i32
    %c0_i32_0 = arith.constant 0 : i32
    %c0_i32_1 = arith.constant 0 : i32
    return %c0_i32, %c0_i32_0 : i32, i32
  }
  func.func @transform_3(%arg0: i32) -> (i32, i32) {
    %c0_i32 = arith.constant 0 : i32
    %c0_i32_0 = arith.constant 0 : i32
    return %arg0, %c0_i32 : i32, i32
  }
  func.func @transform_4(%arg0: i32) -> (i32, i32) {
    %c0_i32 = arith.constant 0 : i32
    %c0_i32_0 = arith.constant 0 : i32
    return %arg0, %c0_i32 : i32, i32
  }
}

module attributes {stable_mosaic.version = 11 : i64} {
  func.func @_conv3x3_stats_kernel(%arg0: i32, %arg1: memref<1x18x18x128xbf16, #tpu.memory_space<vmem>>, %arg2: memref<1x128xf32, #tpu.memory_space<vmem>>, %arg3: memref<1x128xf32, #tpu.memory_space<vmem>>, %arg4: memref<1152x128xbf16, #tpu.memory_space<vmem>>, %arg5: memref<1x256x128xbf16, #tpu.memory_space<vmem>>, %arg6: memref<1x1x128xf32, #tpu.memory_space<vmem>>, %arg7: memref<1x1x128xf32, #tpu.memory_space<vmem>>) attributes {dimension_semantics = [#tpu.dimension_semantics<parallel>], iteration_bounds = array<i64: 2>, scalar_prefetch = 0 : i64, scratch_operands = 0 : i64, tpu.core_type = #tpu.core_type<tc>, window_params = [{transform_indices = @transform_0, window_bounds = array<i64: 1, 18, 18, 128>}, {pipeline_mode = #tpu.pipeline_mode<synchronous>, transform_indices = @transform_1, window_bounds = array<i64: 1, 128>}, {pipeline_mode = #tpu.pipeline_mode<synchronous>, transform_indices = @transform_2, window_bounds = array<i64: 1, 128>}, {pipeline_mode = #tpu.pipeline_mode<synchronous>, transform_indices = @transform_3, window_bounds = array<i64: 1152, 128>}, {transform_indices = @transform_4, window_bounds = array<i64: 1, 256, 128>}, {transform_indices = @transform_5, window_bounds = array<i64: 1, 1, 128>}, {transform_indices = @transform_6, window_bounds = array<i64: 1, 1, 128>}]} {
    %c0 = arith.constant 0 : index
    %c0_0 = arith.constant 0 : index
    %0 = vector.load %arg2[%c0, %c0_0] : memref<1x128xf32, #tpu.memory_space<vmem>>, vector<1x128xf32>
    %1 = vector.shape_cast %0 : vector<1x128xf32> to vector<1x1x128xf32>
    %c0_1 = arith.constant 0 : index
    %c0_2 = arith.constant 0 : index
    %2 = vector.load %arg3[%c0_1, %c0_2] : memref<1x128xf32, #tpu.memory_space<vmem>>, vector<1x128xf32>
    %3 = vector.shape_cast %2 : vector<1x128xf32> to vector<1x1x128xf32>
    %4 = tpu.iota {dimensions = array<i32: 0>} : vector<16x16x1xi32>
    %5 = tpu.iota {dimensions = array<i32: 1>} : vector<16x16x1xi32>
    %c0_3 = arith.constant 0 : index
    %c0_4 = arith.constant 0 : index
    %c0_5 = arith.constant 0 : index
    %c0_6 = arith.constant 0 : index
    %6 = vector.load %arg1[%c0_3, %c0_4, %c0_5, %c0_6] : memref<1x18x18x128xbf16, #tpu.memory_space<vmem>>, vector<1x16x16x128xbf16>
    %7 = vector.shape_cast %6 : vector<1x16x16x128xbf16> to vector<16x16x128xbf16>
    %8 = arith.extf %7 : vector<16x16x128xbf16> to vector<16x16x128xf32>
    %9 = vector.broadcast %1 : vector<1x1x128xf32> to vector<16x16x128xf32>
    %10 = arith.mulf %8, %9 : vector<16x16x128xf32>
    %11 = vector.broadcast %3 : vector<1x1x128xf32> to vector<16x16x128xf32>
    %12 = arith.addf %10, %11 : vector<16x16x128xf32>
    %cst = arith.constant 0.000000e+00 : f32
    %13 = vector.broadcast %cst : f32 to vector<16x16x128xf32>
    %14 = arith.maximumf %12, %13 : vector<16x16x128xf32>
    %c1_i32 = arith.constant 1 : i32
    %15 = vector.broadcast %c1_i32 : i32 to vector<16x16x1xi32>
    %16 = arith.cmpi sge, %4, %15 : vector<16x16x1xi32>
    %c1_i32_7 = arith.constant 1 : i32
    %17 = vector.broadcast %c1_i32_7 : i32 to vector<16x16x1xi32>
    %18 = arith.cmpi sge, %5, %17 : vector<16x16x1xi32>
    %19 = arith.andi %16, %18 : vector<16x16x1xi1>
    %cst_8 = arith.constant 0.000000e+00 : f32
    %20 = vector.shape_cast %19 : vector<16x16x1xi1> to vector<16x16x1xi1>
    %21 = vector.broadcast %20 : vector<16x16x1xi1> to vector<16x16x128xi1>
    %22 = vector.broadcast %cst_8 : f32 to vector<16x16x128xf32>
    %23 = arith.select %21, %14, %22 : vector<16x16x128xi1>, vector<16x16x128xf32>
    %24 = arith.truncf %23 : vector<16x16x128xf32> to vector<16x16x128xbf16>
    %25 = vector.shape_cast %24 : vector<16x16x128xbf16> to vector<256x128xbf16>
    %c0_9 = arith.constant 0 : index
    %c0_10 = arith.constant 0 : index
    %c1 = arith.constant 1 : index
    %c0_11 = arith.constant 0 : index
    %26 = vector.load %arg1[%c0_9, %c0_10, %c1, %c0_11] : memref<1x18x18x128xbf16, #tpu.memory_space<vmem>>, vector<1x16x16x128xbf16>
    %27 = vector.shape_cast %26 : vector<1x16x16x128xbf16> to vector<16x16x128xbf16>
    %28 = arith.extf %27 : vector<16x16x128xbf16> to vector<16x16x128xf32>
    %29 = vector.broadcast %1 : vector<1x1x128xf32> to vector<16x16x128xf32>
    %30 = arith.mulf %28, %29 : vector<16x16x128xf32>
    %31 = vector.broadcast %3 : vector<1x1x128xf32> to vector<16x16x128xf32>
    %32 = arith.addf %30, %31 : vector<16x16x128xf32>
    %cst_12 = arith.constant 0.000000e+00 : f32
    %33 = vector.broadcast %cst_12 : f32 to vector<16x16x128xf32>
    %34 = arith.maximumf %32, %33 : vector<16x16x128xf32>
    %c1_i32_13 = arith.constant 1 : i32
    %35 = vector.broadcast %c1_i32_13 : i32 to vector<16x16x1xi32>
    %36 = arith.cmpi sge, %4, %35 : vector<16x16x1xi32>
    %cst_14 = arith.constant 0.000000e+00 : f32
    %37 = vector.shape_cast %36 : vector<16x16x1xi1> to vector<16x16x1xi1>
    %38 = vector.broadcast %37 : vector<16x16x1xi1> to vector<16x16x128xi1>
    %39 = vector.broadcast %cst_14 : f32 to vector<16x16x128xf32>
    %40 = arith.select %38, %34, %39 : vector<16x16x128xi1>, vector<16x16x128xf32>
    %41 = arith.truncf %40 : vector<16x16x128xf32> to vector<16x16x128xbf16>
    %42 = vector.shape_cast %41 : vector<16x16x128xbf16> to vector<256x128xbf16>
    %c0_15 = arith.constant 0 : index
    %c0_16 = arith.constant 0 : index
    %c2 = arith.constant 2 : index
    %c0_17 = arith.constant 0 : index
    %43 = vector.load %arg1[%c0_15, %c0_16, %c2, %c0_17] : memref<1x18x18x128xbf16, #tpu.memory_space<vmem>>, vector<1x16x16x128xbf16>
    %44 = vector.shape_cast %43 : vector<1x16x16x128xbf16> to vector<16x16x128xbf16>
    %45 = arith.extf %44 : vector<16x16x128xbf16> to vector<16x16x128xf32>
    %46 = vector.broadcast %1 : vector<1x1x128xf32> to vector<16x16x128xf32>
    %47 = arith.mulf %45, %46 : vector<16x16x128xf32>
    %48 = vector.broadcast %3 : vector<1x1x128xf32> to vector<16x16x128xf32>
    %49 = arith.addf %47, %48 : vector<16x16x128xf32>
    %cst_18 = arith.constant 0.000000e+00 : f32
    %50 = vector.broadcast %cst_18 : f32 to vector<16x16x128xf32>
    %51 = arith.maximumf %49, %50 : vector<16x16x128xf32>
    %c1_i32_19 = arith.constant 1 : i32
    %52 = vector.broadcast %c1_i32_19 : i32 to vector<16x16x1xi32>
    %53 = arith.cmpi sge, %4, %52 : vector<16x16x1xi32>
    %c14_i32 = arith.constant 14 : i32
    %54 = vector.broadcast %c14_i32 : i32 to vector<16x16x1xi32>
    %55 = arith.cmpi sle, %5, %54 : vector<16x16x1xi32>
    %56 = arith.andi %53, %55 : vector<16x16x1xi1>
    %cst_20 = arith.constant 0.000000e+00 : f32
    %57 = vector.shape_cast %56 : vector<16x16x1xi1> to vector<16x16x1xi1>
    %58 = vector.broadcast %57 : vector<16x16x1xi1> to vector<16x16x128xi1>
    %59 = vector.broadcast %cst_20 : f32 to vector<16x16x128xf32>
    %60 = arith.select %58, %51, %59 : vector<16x16x128xi1>, vector<16x16x128xf32>
    %61 = arith.truncf %60 : vector<16x16x128xf32> to vector<16x16x128xbf16>
    %62 = vector.shape_cast %61 : vector<16x16x128xbf16> to vector<256x128xbf16>
    %c0_21 = arith.constant 0 : index
    %c1_22 = arith.constant 1 : index
    %c0_23 = arith.constant 0 : index
    %c0_24 = arith.constant 0 : index
    %63 = vector.load %arg1[%c0_21, %c1_22, %c0_23, %c0_24] : memref<1x18x18x128xbf16, #tpu.memory_space<vmem>>, vector<1x16x16x128xbf16>
    %64 = vector.shape_cast %63 : vector<1x16x16x128xbf16> to vector<16x16x128xbf16>
    %65 = arith.extf %64 : vector<16x16x128xbf16> to vector<16x16x128xf32>
    %66 = vector.broadcast %1 : vector<1x1x128xf32> to vector<16x16x128xf32>
    %67 = arith.mulf %65, %66 : vector<16x16x128xf32>
    %68 = vector.broadcast %3 : vector<1x1x128xf32> to vector<16x16x128xf32>
    %69 = arith.addf %67, %68 : vector<16x16x128xf32>
    %cst_25 = arith.constant 0.000000e+00 : f32
    %70 = vector.broadcast %cst_25 : f32 to vector<16x16x128xf32>
    %71 = arith.maximumf %69, %70 : vector<16x16x128xf32>
    %c1_i32_26 = arith.constant 1 : i32
    %72 = vector.broadcast %c1_i32_26 : i32 to vector<16x16x1xi32>
    %73 = arith.cmpi sge, %5, %72 : vector<16x16x1xi32>
    %cst_27 = arith.constant 0.000000e+00 : f32
    %74 = vector.shape_cast %73 : vector<16x16x1xi1> to vector<16x16x1xi1>
    %75 = vector.broadcast %74 : vector<16x16x1xi1> to vector<16x16x128xi1>
    %76 = vector.broadcast %cst_27 : f32 to vector<16x16x128xf32>
    %77 = arith.select %75, %71, %76 : vector<16x16x128xi1>, vector<16x16x128xf32>
    %78 = arith.truncf %77 : vector<16x16x128xf32> to vector<16x16x128xbf16>
    %79 = vector.shape_cast %78 : vector<16x16x128xbf16> to vector<256x128xbf16>
    %c0_28 = arith.constant 0 : index
    %c1_29 = arith.constant 1 : index
    %c1_30 = arith.constant 1 : index
    %c0_31 = arith.constant 0 : index
    %80 = vector.load %arg1[%c0_28, %c1_29, %c1_30, %c0_31] : memref<1x18x18x128xbf16, #tpu.memory_space<vmem>>, vector<1x16x16x128xbf16>
    %81 = vector.shape_cast %80 : vector<1x16x16x128xbf16> to vector<16x16x128xbf16>
    %82 = arith.extf %81 : vector<16x16x128xbf16> to vector<16x16x128xf32>
    %83 = vector.broadcast %1 : vector<1x1x128xf32> to vector<16x16x128xf32>
    %84 = arith.mulf %82, %83 : vector<16x16x128xf32>
    %85 = vector.broadcast %3 : vector<1x1x128xf32> to vector<16x16x128xf32>
    %86 = arith.addf %84, %85 : vector<16x16x128xf32>
    %cst_32 = arith.constant 0.000000e+00 : f32
    %87 = vector.broadcast %cst_32 : f32 to vector<16x16x128xf32>
    %88 = arith.maximumf %86, %87 : vector<16x16x128xf32>
    %89 = arith.truncf %88 : vector<16x16x128xf32> to vector<16x16x128xbf16>
    %90 = vector.shape_cast %89 : vector<16x16x128xbf16> to vector<256x128xbf16>
    %c0_33 = arith.constant 0 : index
    %c1_34 = arith.constant 1 : index
    %c2_35 = arith.constant 2 : index
    %c0_36 = arith.constant 0 : index
    %91 = vector.load %arg1[%c0_33, %c1_34, %c2_35, %c0_36] : memref<1x18x18x128xbf16, #tpu.memory_space<vmem>>, vector<1x16x16x128xbf16>
    %92 = vector.shape_cast %91 : vector<1x16x16x128xbf16> to vector<16x16x128xbf16>
    %93 = arith.extf %92 : vector<16x16x128xbf16> to vector<16x16x128xf32>
    %94 = vector.broadcast %1 : vector<1x1x128xf32> to vector<16x16x128xf32>
    %95 = arith.mulf %93, %94 : vector<16x16x128xf32>
    %96 = vector.broadcast %3 : vector<1x1x128xf32> to vector<16x16x128xf32>
    %97 = arith.addf %95, %96 : vector<16x16x128xf32>
    %cst_37 = arith.constant 0.000000e+00 : f32
    %98 = vector.broadcast %cst_37 : f32 to vector<16x16x128xf32>
    %99 = arith.maximumf %97, %98 : vector<16x16x128xf32>
    %c14_i32_38 = arith.constant 14 : i32
    %100 = vector.broadcast %c14_i32_38 : i32 to vector<16x16x1xi32>
    %101 = arith.cmpi sle, %5, %100 : vector<16x16x1xi32>
    %cst_39 = arith.constant 0.000000e+00 : f32
    %102 = vector.shape_cast %101 : vector<16x16x1xi1> to vector<16x16x1xi1>
    %103 = vector.broadcast %102 : vector<16x16x1xi1> to vector<16x16x128xi1>
    %104 = vector.broadcast %cst_39 : f32 to vector<16x16x128xf32>
    %105 = arith.select %103, %99, %104 : vector<16x16x128xi1>, vector<16x16x128xf32>
    %106 = arith.truncf %105 : vector<16x16x128xf32> to vector<16x16x128xbf16>
    %107 = vector.shape_cast %106 : vector<16x16x128xbf16> to vector<256x128xbf16>
    %c0_40 = arith.constant 0 : index
    %c2_41 = arith.constant 2 : index
    %c0_42 = arith.constant 0 : index
    %c0_43 = arith.constant 0 : index
    %108 = vector.load %arg1[%c0_40, %c2_41, %c0_42, %c0_43] : memref<1x18x18x128xbf16, #tpu.memory_space<vmem>>, vector<1x16x16x128xbf16>
    %109 = vector.shape_cast %108 : vector<1x16x16x128xbf16> to vector<16x16x128xbf16>
    %110 = arith.extf %109 : vector<16x16x128xbf16> to vector<16x16x128xf32>
    %111 = vector.broadcast %1 : vector<1x1x128xf32> to vector<16x16x128xf32>
    %112 = arith.mulf %110, %111 : vector<16x16x128xf32>
    %113 = vector.broadcast %3 : vector<1x1x128xf32> to vector<16x16x128xf32>
    %114 = arith.addf %112, %113 : vector<16x16x128xf32>
    %cst_44 = arith.constant 0.000000e+00 : f32
    %115 = vector.broadcast %cst_44 : f32 to vector<16x16x128xf32>
    %116 = arith.maximumf %114, %115 : vector<16x16x128xf32>
    %c14_i32_45 = arith.constant 14 : i32
    %117 = vector.broadcast %c14_i32_45 : i32 to vector<16x16x1xi32>
    %118 = arith.cmpi sle, %4, %117 : vector<16x16x1xi32>
    %c1_i32_46 = arith.constant 1 : i32
    %119 = vector.broadcast %c1_i32_46 : i32 to vector<16x16x1xi32>
    %120 = arith.cmpi sge, %5, %119 : vector<16x16x1xi32>
    %121 = arith.andi %118, %120 : vector<16x16x1xi1>
    %cst_47 = arith.constant 0.000000e+00 : f32
    %122 = vector.shape_cast %121 : vector<16x16x1xi1> to vector<16x16x1xi1>
    %123 = vector.broadcast %122 : vector<16x16x1xi1> to vector<16x16x128xi1>
    %124 = vector.broadcast %cst_47 : f32 to vector<16x16x128xf32>
    %125 = arith.select %123, %116, %124 : vector<16x16x128xi1>, vector<16x16x128xf32>
    %126 = arith.truncf %125 : vector<16x16x128xf32> to vector<16x16x128xbf16>
    %127 = vector.shape_cast %126 : vector<16x16x128xbf16> to vector<256x128xbf16>
    %c0_48 = arith.constant 0 : index
    %c2_49 = arith.constant 2 : index
    %c1_50 = arith.constant 1 : index
    %c0_51 = arith.constant 0 : index
    %128 = vector.load %arg1[%c0_48, %c2_49, %c1_50, %c0_51] : memref<1x18x18x128xbf16, #tpu.memory_space<vmem>>, vector<1x16x16x128xbf16>
    %129 = vector.shape_cast %128 : vector<1x16x16x128xbf16> to vector<16x16x128xbf16>
    %130 = arith.extf %129 : vector<16x16x128xbf16> to vector<16x16x128xf32>
    %131 = vector.broadcast %1 : vector<1x1x128xf32> to vector<16x16x128xf32>
    %132 = arith.mulf %130, %131 : vector<16x16x128xf32>
    %133 = vector.broadcast %3 : vector<1x1x128xf32> to vector<16x16x128xf32>
    %134 = arith.addf %132, %133 : vector<16x16x128xf32>
    %cst_52 = arith.constant 0.000000e+00 : f32
    %135 = vector.broadcast %cst_52 : f32 to vector<16x16x128xf32>
    %136 = arith.maximumf %134, %135 : vector<16x16x128xf32>
    %c14_i32_53 = arith.constant 14 : i32
    %137 = vector.broadcast %c14_i32_53 : i32 to vector<16x16x1xi32>
    %138 = arith.cmpi sle, %4, %137 : vector<16x16x1xi32>
    %cst_54 = arith.constant 0.000000e+00 : f32
    %139 = vector.shape_cast %138 : vector<16x16x1xi1> to vector<16x16x1xi1>
    %140 = vector.broadcast %139 : vector<16x16x1xi1> to vector<16x16x128xi1>
    %141 = vector.broadcast %cst_54 : f32 to vector<16x16x128xf32>
    %142 = arith.select %140, %136, %141 : vector<16x16x128xi1>, vector<16x16x128xf32>
    %143 = arith.truncf %142 : vector<16x16x128xf32> to vector<16x16x128xbf16>
    %144 = vector.shape_cast %143 : vector<16x16x128xbf16> to vector<256x128xbf16>
    %c0_55 = arith.constant 0 : index
    %c2_56 = arith.constant 2 : index
    %c2_57 = arith.constant 2 : index
    %c0_58 = arith.constant 0 : index
    %145 = vector.load %arg1[%c0_55, %c2_56, %c2_57, %c0_58] : memref<1x18x18x128xbf16, #tpu.memory_space<vmem>>, vector<1x16x16x128xbf16>
    %146 = vector.shape_cast %145 : vector<1x16x16x128xbf16> to vector<16x16x128xbf16>
    %147 = arith.extf %146 : vector<16x16x128xbf16> to vector<16x16x128xf32>
    %148 = vector.broadcast %1 : vector<1x1x128xf32> to vector<16x16x128xf32>
    %149 = arith.mulf %147, %148 : vector<16x16x128xf32>
    %150 = vector.broadcast %3 : vector<1x1x128xf32> to vector<16x16x128xf32>
    %151 = arith.addf %149, %150 : vector<16x16x128xf32>
    %cst_59 = arith.constant 0.000000e+00 : f32
    %152 = vector.broadcast %cst_59 : f32 to vector<16x16x128xf32>
    %153 = arith.maximumf %151, %152 : vector<16x16x128xf32>
    %c14_i32_60 = arith.constant 14 : i32
    %154 = vector.broadcast %c14_i32_60 : i32 to vector<16x16x1xi32>
    %155 = arith.cmpi sle, %4, %154 : vector<16x16x1xi32>
    %c14_i32_61 = arith.constant 14 : i32
    %156 = vector.broadcast %c14_i32_61 : i32 to vector<16x16x1xi32>
    %157 = arith.cmpi sle, %5, %156 : vector<16x16x1xi32>
    %158 = arith.andi %155, %157 : vector<16x16x1xi1>
    %cst_62 = arith.constant 0.000000e+00 : f32
    %159 = vector.shape_cast %158 : vector<16x16x1xi1> to vector<16x16x1xi1>
    %160 = vector.broadcast %159 : vector<16x16x1xi1> to vector<16x16x128xi1>
    %161 = vector.broadcast %cst_62 : f32 to vector<16x16x128xf32>
    %162 = arith.select %160, %153, %161 : vector<16x16x128xi1>, vector<16x16x128xf32>
    %163 = arith.truncf %162 : vector<16x16x128xf32> to vector<16x16x128xbf16>
    %164 = vector.shape_cast %163 : vector<16x16x128xbf16> to vector<256x128xbf16>
    %165 = tpu.concatenate %25, %42, %62, %79, %90, %107, %127, %144, %164 in 1 : vector<256x128xbf16>, vector<256x128xbf16>, vector<256x128xbf16>, vector<256x128xbf16>, vector<256x128xbf16>, vector<256x128xbf16>, vector<256x128xbf16>, vector<256x128xbf16>, vector<256x128xbf16> -> vector<256x1152xbf16>
    %c0_63 = arith.constant 0 : index
    %c0_64 = arith.constant 0 : index
    %166 = vector.load %arg4[%c0_63, %c0_64] : memref<1152x128xbf16, #tpu.memory_space<vmem>>, vector<1152x128xbf16>
    %cst_65 = arith.constant dense<0.000000e+00> : vector<256x128xf32>
    %167 = tpu.matmul %165, %166, %cst_65 {dimension_numbers = #tpu.dot_dimension_numbers<[1], [0], [0], [1], [0, 0, 1, 1], [], []>} : vector<256x1152xbf16>, vector<1152x128xbf16>, vector<256x128xf32> -> vector<256x128xf32>
    %168 = arith.truncf %167 : vector<256x128xf32> to vector<256x128xbf16>
    %c0_66 = arith.constant 0 : index
    %c0_67 = arith.constant 0 : index
    %c0_68 = arith.constant 0 : index
    %169 = vector.load %arg5[%c0_66, %c0_67, %c0_68] : memref<1x256x128xbf16, #tpu.memory_space<vmem>>, vector<1x256x128xbf16>
    %170 = vector.shape_cast %169 : vector<1x256x128xbf16> to vector<256x128xbf16>
    %171 = vector.shape_cast %168 : vector<256x128xbf16> to vector<1x256x128xbf16>
    tpu.vector_store %arg5[%c0_66, %c0_67, %c0_68], %171 {strides = array<i32>} : memref<1x256x128xbf16, #tpu.memory_space<vmem>>, vector<1x256x128xbf16>,
    %cst_69 = arith.constant dense<0.000000e+00> : vector<128xf32>
    %172 = vector.multi_reduction <add>, %167, %cst_69 [0] : vector<256x128xf32> to vector<128xf32>
    %173 = vector.shape_cast %172 : vector<128xf32> to vector<1x128xf32>
    %c0_70 = arith.constant 0 : index
    %c0_71 = arith.constant 0 : index
    %c0_72 = arith.constant 0 : index
    %174 = vector.load %arg6[%c0_70, %c0_71, %c0_72] : memref<1x1x128xf32, #tpu.memory_space<vmem>>, vector<1x1x128xf32>
    %175 = vector.shape_cast %174 : vector<1x1x128xf32> to vector<1x128xf32>
    %176 = vector.shape_cast %173 : vector<1x128xf32> to vector<1x1x128xf32>
    tpu.vector_store %arg6[%c0_70, %c0_71, %c0_72], %176 {strides = array<i32>} : memref<1x1x128xf32, #tpu.memory_space<vmem>>, vector<1x1x128xf32>,
    %177 = arith.mulf %167, %167 : vector<256x128xf32>
    %cst_73 = arith.constant dense<0.000000e+00> : vector<128xf32>
    %178 = vector.multi_reduction <add>, %177, %cst_73 [0] : vector<256x128xf32> to vector<128xf32>
    %179 = vector.shape_cast %178 : vector<128xf32> to vector<1x128xf32>
    %c0_74 = arith.constant 0 : index
    %c0_75 = arith.constant 0 : index
    %c0_76 = arith.constant 0 : index
    %180 = vector.load %arg7[%c0_74, %c0_75, %c0_76] : memref<1x1x128xf32, #tpu.memory_space<vmem>>, vector<1x1x128xf32>
    %181 = vector.shape_cast %180 : vector<1x1x128xf32> to vector<1x128xf32>
    %182 = vector.shape_cast %179 : vector<1x128xf32> to vector<1x1x128xf32>
    tpu.vector_store %arg7[%c0_74, %c0_75, %c0_76], %182 {strides = array<i32>} : memref<1x1x128xf32, #tpu.memory_space<vmem>>, vector<1x1x128xf32>,
    return
  }
  func.func @transform_0(%arg0: i32) -> (i32, i32, i32, i32) {
    %c0_i32 = arith.constant 0 : i32
    %c0_i32_0 = arith.constant 0 : i32
    %c0_i32_1 = arith.constant 0 : i32
    %c0_i32_2 = arith.constant 0 : i32
    return %arg0, %c0_i32, %c0_i32_0, %c0_i32_1 : i32, i32, i32, i32
  }
  func.func @transform_1(%arg0: i32) -> (i32, i32) {
    %c0_i32 = arith.constant 0 : i32
    %c0_i32_0 = arith.constant 0 : i32
    %c0_i32_1 = arith.constant 0 : i32
    return %c0_i32, %c0_i32_0 : i32, i32
  }
  func.func @transform_2(%arg0: i32) -> (i32, i32) {
    %c0_i32 = arith.constant 0 : i32
    %c0_i32_0 = arith.constant 0 : i32
    %c0_i32_1 = arith.constant 0 : i32
    return %c0_i32, %c0_i32_0 : i32, i32
  }
  func.func @transform_3(%arg0: i32) -> (i32, i32) {
    %c0_i32 = arith.constant 0 : i32
    %c0_i32_0 = arith.constant 0 : i32
    %c0_i32_1 = arith.constant 0 : i32
    return %c0_i32, %c0_i32_0 : i32, i32
  }
  func.func @transform_4(%arg0: i32) -> (i32, i32, i32) {
    %c0_i32 = arith.constant 0 : i32
    %c0_i32_0 = arith.constant 0 : i32
    %c0_i32_1 = arith.constant 0 : i32
    return %arg0, %c0_i32, %c0_i32_0 : i32, i32, i32
  }
  func.func @transform_5(%arg0: i32) -> (i32, i32, i32) {
    %c0_i32 = arith.constant 0 : i32
    %c0_i32_0 = arith.constant 0 : i32
    %c0_i32_1 = arith.constant 0 : i32
    return %arg0, %c0_i32, %c0_i32_0 : i32, i32, i32
  }
  func.func @transform_6(%arg0: i32) -> (i32, i32, i32) {
    %c0_i32 = arith.constant 0 : i32
    %c0_i32_0 = arith.constant 0 : i32
    %c0_i32_1 = arith.constant 0 : i32
    return %arg0, %c0_i32, %c0_i32_0 : i32, i32, i32
  }
}

</mosaic_0001>

<bundles_post_ra>
// kernel: residual_block.5
= control target key start
LH: loop header
LB: loop body
LE: loop exit
PB: predicated region body
PF: predicated region fallthrough
CT: control target
= control target key end

     0   :  { %s1472_s0 = inlined_call_operand.vmem [shape: bf16[512,128], index: 0, kind: input, shape index: {}]   ;;  %s1473_s1 = inlined_call_operand.vmem [shape: f32[1,128], index: 1, kind: input, shape index: {}]   ;;  %s1474_s2 = inlined_call_operand.vmem [shape: f32[1,128], index: 2, kind: input, shape index: {}]   ;;  %s1475_s3 = inlined_call_operand.vmem [shape: bf16[512,128], index: 3, kind: input, shape index: {}]   ;;  %s1476_s4 = inlined_call_operand.vmem [shape: f32[512,128], index: 4, kind: output, shape index: {}]  }
   0x1   :  { %v606_v0 = vld [vmem:[%s1472_s0] sm:$0xff]   ;;  %v861_v8 = vld [vmem:[%s1472_s0 + $0x8] sm:$0xff]   ;;  %v862_v10 = vld [vmem:[%s1472_s0 + $0x10] sm:$0xff]  }
   0x2   :  { %v956_v1 = vld [vmem:[%s1473_s1] ss:$0 sm:$0xff]  ;;  %v607_v2 = vunpack.c.l.bf16 %v606_v0  ;;  %v608_v5 = vunpack.c.h.bf16 %v606_v0  ;;  %v892_v9 = vld [vmem:[%s1475_s3 + $0x8] sm:$0xff]   ;;  %v611_v13 = vunpack.c.l.bf16 %v861_v8  ;;  %v893_v15 = vld [vmem:[%s1475_s3 + $0x10] sm:$0xff]   ;;  %v612_v17 = vunpack.c.h.bf16 %v861_v8 }
   0x3   :  { %v961_v3 = vld [vmem:[%s1474_s2] ss:$0 sm:$0xff]  ;;  %v739_v14 = vunpack.c.l.bf16 %v892_v9  ;;  %v863_v16 = vld [vmem:[%s1472_s0 + $0x18] sm:$0xff]   ;;  %v740_v18 = vunpack.c.h.bf16 %v892_v9  ;;  %v615_v19 = vunpack.c.l.bf16 %v862_v10  ;;  %v743_v20 = vunpack.c.l.bf16 %v893_v15  ;;  %v865_v52 = vld [vmem:[%s1472_s0 + $0x28] sm:$0xff]  }
   0x4   :  { %v734_v4 = vld [vmem:[%s1475_s3] sm:$0xff]   ;;  %v149_v11 = vmul.f32 %v956_v1, %v607_v2  ;;  %v150_v12 = vmul.f32 %v956_v1, %v608_v5  ;;  %v151_v23 = vmul.f32 %v956_v1, %v611_v13  ;;  %v616_v24 = vunpack.c.h.bf16 %v862_v10  ;;  %v894_v25 = vld [vmem:[%s1475_s3 + $0x18] sm:$0xff]   ;;  %v896_v57 = vld [vmem:[%s1475_s3 + $0x28] sm:$0xff]  }
   0x5   :  { %v735_v6 = vunpack.c.l.bf16 %v734_v4  ;;  %v736_v7 = vunpack.c.h.bf16 %v734_v4  ;;  %v152_v26 = vmul.f32 %v956_v1, %v612_v17  ;;  %v153_v27 = vmul.f32 %v956_v1, %v615_v19  ;;  %v864_v38 = vld [vmem:[%s1472_s0 + $0x20] sm:$0xff]   ;;  %v866_v62 = vld [vmem:[%s1472_s0 + $0x30] sm:$0xff]  }
   0x6   :  { %v217_v21 = vadd.f32 %v961_v3, %v149_v11  ;;  %v218_v22 = vadd.f32 %v961_v3, %v150_v12  ;;  %v744_v28 = vunpack.c.h.bf16 %v893_v15  ;;  %v619_v29 = vunpack.c.l.bf16 %v863_v16  ;;  %v895_v47 = vld [vmem:[%s1475_s3 + $0x20] sm:$0xff]   ;;  %v897_v5 = vld [vmem:[%s1475_s3 + $0x30] sm:$0xff]  }
   0x7   :  { %v219_v32 = vadd.f32 %v961_v3, %v151_v23  ;;  %v154_v33 = vmul.f32 %v956_v1, %v616_v24  ;;  %v220_v34 = vadd.f32 %v961_v3, %v152_v26  ;;  %v221_v35 = vadd.f32 %v961_v3, %v153_v27  ;;  %v898_v23 = vld [vmem:[%s1475_s3 + $0x38] sm:$0xff]  }
   0x8   :  { %v409_v30 = vadd.f32 %v735_v6, %v217_v21  ;;  %v410_v31 = vadd.f32 %v736_v7, %v218_v22  ;;  %v155_v36 = vmul.f32 %v956_v1, %v619_v29  ;;  %v747_v37 = vunpack.c.l.bf16 %v894_v25 }
   0x9   :  { %v411_v41 = vadd.f32 %v739_v14, %v219_v32  ;;  %v222_v42 = vadd.f32 %v961_v3, %v154_v33  ;;  %v412_v43 = vadd.f32 %v740_v18, %v220_v34  ;;  %v413_v44 = vadd.f32 %v743_v20, %v221_v35  ;;  %v867_v18 = vld [vmem:[%s1472_s0 + $0x38] sm:$0xff]   ;;  %v868_v32 = vld [vmem:[%s1472_s0 + $0x40] sm:$0xff]  }
   0xa   :  { %v473_v39 = vmax.f32 %v409_v30, 0.0  ;;  %v474_v40 = vmax.f32 %v410_v31, 0.0  ;;  %v223_v45 = vadd.f32 %v961_v3, %v155_v36  ;;  %v620_v46 = vunpack.c.h.bf16 %v863_v16 }
   0xb   :  { %v475_v48 = vmax.f32 %v411_v41, 0.0  ;;  %v414_v49 = vadd.f32 %v744_v28, %v222_v42  ;;  %v748_v50 = vunpack.c.h.bf16 %v894_v25  ;;  %v623_v51 = vunpack.c.l.bf16 %v864_v38 }
   0xc   :  { %537 = vst [vmem:[%s1476_s4] sm:$0xff] %v473_v39  ;;  %v476_v53 = vmax.f32 %v412_v43, 0.0  ;;  %v477_v54 = vmax.f32 %v413_v44, 0.0  ;;  %v415_v55 = vadd.f32 %v747_v37, %v223_v45  ;;  %v156_v56 = vmul.f32 %v956_v1, %v620_v46  ;;  %v899_v37 = vld [vmem:[%s1475_s3 + $0x40] sm:$0xff]   ;;  %v869_v46 = vld [vmem:[%s1472_s0 + $0x48] sm:$0xff]  }
   0xd   :  { %538 = vst [vmem:[%s1476_s4 + $0x8] sm:$0xff] %v474_v40  ;;  %v478_v58 = vmax.f32 %v414_v49, 0.0  ;;  %v157_v59 = vmul.f32 %v956_v1, %v623_v51  ;;  %v751_v60 = vunpack.c.l.bf16 %v895_v47  ;;  %v624_v61 = vunpack.c.h.bf16 %v864_v38 }
   0xe   :  { %539 = vst [vmem:[%s1476_s4 + $0x10] sm:$0xff] %v475_v48  ;;  %v479_v63 = vmax.f32 %v415_v55, 0.0  ;;  %v224_v0 = vadd.f32 %v961_v3, %v156_v56  ;;  %v752_v2 = vunpack.c.h.bf16 %v895_v47  ;;  %v627_v4 = vunpack.c.l.bf16 %v865_v52  ;;  %v900_v47 = vld [vmem:[%s1475_s3 + $0x48] sm:$0xff]   ;;  %v870_v56 = vld [vmem:[%s1472_s0 + $0x50] sm:$0xff]  }
   0xf   :  { %540 = vst [vmem:[%s1476_s4 + $0x18] sm:$0xff] %v476_v53  ;;  %v225_v6 = vadd.f32 %v961_v3, %v157_v59  ;;  %v158_v7 = vmul.f32 %v956_v1, %v624_v61  ;;  %v755_v8 = vunpack.c.l.bf16 %v896_v57  ;;  %v628_v9 = vunpack.c.h.bf16 %v865_v52 }
  0x10   :  { %541 = vst [vmem:[%s1476_s4 + $0x20] sm:$0xff] %v477_v54  ;;  %v416_v10 = vadd.f32 %v748_v50, %v224_v0  ;;  %v159_v11 = vmul.f32 %v956_v1, %v627_v4  ;;  %v756_v12 = vunpack.c.h.bf16 %v896_v57  ;;  %v631_v13 = vunpack.c.l.bf16 %v866_v62 }
  0x11   :  { %542 = vst [vmem:[%s1476_s4 + $0x28] sm:$0xff] %v478_v58  ;;  %v417_v14 = vadd.f32 %v751_v60, %v225_v6  ;;  %v226_v15 = vadd.f32 %v961_v3, %v158_v7  ;;  %v160_v16 = vmul.f32 %v956_v1, %v628_v9  ;;  %v759_v17 = vunpack.c.l.bf16 %v897_v5 }
  0x12   :  { %543 = vst [vmem:[%s1476_s4 + $0x30] sm:$0xff] %v479_v63  ;;  %v480_v19 = vmax.f32 %v416_v10, 0.0  ;;  %v227_v20 = vadd.f32 %v961_v3, %v159_v11  ;;  %v161_v21 = vmul.f32 %v956_v1, %v631_v13  ;;  %v632_v22 = vunpack.c.h.bf16 %v866_v62 }
  0x13   :  { %v481_v24 = vmax.f32 %v417_v14, 0.0  ;;  %v418_v25 = vadd.f32 %v752_v2, %v226_v15  ;;  %v228_v26 = vadd.f32 %v961_v3, %v160_v16  ;;  %v760_v27 = vunpack.c.h.bf16 %v897_v5  ;;  %v901_v2 = vld [vmem:[%s1475_s3 + $0x50] sm:$0xff]  }
  0x14   :  { %544 = vst [vmem:[%s1476_s4 + $0x38] sm:$0xff] %v480_v19  ;;  %v419_v28 = vadd.f32 %v755_v8, %v227_v20  ;;  %v229_v29 = vadd.f32 %v961_v3, %v161_v21  ;;  %v162_v30 = vmul.f32 %v956_v1, %v632_v22  ;;  %v635_v31 = vunpack.c.l.bf16 %v867_v18 }
  0x15   :  { %545 = vst [vmem:[%s1476_s4 + $0x40] sm:$0xff] %v481_v24  ;;  %v482_v33 = vmax.f32 %v418_v25, 0.0  ;;  %v420_v34 = vadd.f32 %v756_v12, %v228_v26  ;;  %v763_v35 = vunpack.c.l.bf16 %v898_v23  ;;  %v636_v36 = vunpack.c.h.bf16 %v867_v18  ;;  %v871_v12 = vld [vmem:[%s1472_s0 + $0x58] sm:$0xff]   ;;  %v872_v26 = vld [vmem:[%s1472_s0 + $0x60] sm:$0xff]  }
  0x16   :  { %v483_v38 = vmax.f32 %v419_v28, 0.0  ;;  %v421_v39 = vadd.f32 %v759_v17, %v229_v29  ;;  %v230_v40 = vadd.f32 %v961_v3, %v162_v30  ;;  %v163_v41 = vmul.f32 %v956_v1, %v635_v31  ;;  %v902_v17 = vld [vmem:[%s1475_s3 + $0x58] sm:$0xff]   ;;  %v903_v31 = vld [vmem:[%s1475_s3 + $0x60] sm:$0xff]  }
  0x17   :  { %546 = vst [vmem:[%s1476_s4 + $0x48] sm:$0xff] %v482_v33  ;;  %v484_v42 = vmax.f32 %v420_v34, 0.0  ;;  %v164_v43 = vmul.f32 %v956_v1, %v636_v36  ;;  %v764_v44 = vunpack.c.h.bf16 %v898_v23  ;;  %v639_v45 = vunpack.c.l.bf16 %v868_v32 }
  0x18   :  { %547 = vst [vmem:[%s1476_s4 + $0x50] sm:$0xff] %v483_v38  ;;  %v485_v48 = vmax.f32 %v421_v39, 0.0  ;;  %v422_v49 = vadd.f32 %v760_v27, %v230_v40  ;;  %v231_v50 = vadd.f32 %v961_v3, %v163_v41  ;;  %v767_v51 = vunpack.c.l.bf16 %v899_v37  ;;  %v873_v40 = vld [vmem:[%s1472_s0 + $0x68] sm:$0xff]  }
  0x19   :  { %548 = vst [vmem:[%s1476_s4 + $0x58] sm:$0xff] %v484_v42  ;;  %v232_v52 = vadd.f32 %v961_v3, %v164_v43  ;;  %v165_v53 = vmul.f32 %v956_v1, %v639_v45  ;;  %v640_v54 = vunpack.c.h.bf16 %v868_v32  ;;  %v768_v55 = vunpack.c.h.bf16 %v899_v37  ;;  %v904_v41 = vld [vmem:[%s1475_s3 + $0x68] sm:$0xff]  }
  0x1a   :  { %549 = vst [vmem:[%s1476_s4 + $0x60] sm:$0xff] %v485_v48  ;;  %v486_v57 = vmax.f32 %v422_v49, 0.0  ;;  %v423_v58 = vadd.f32 %v763_v35, %v231_v50  ;;  %v643_v59 = vunpack.c.l.bf16 %v869_v46  ;;  %v771_v60 = vunpack.c.l.bf16 %v900_v47  ;;  %v874_v50 = vld [vmem:[%s1472_s0 + $0x70] sm:$0xff]  }
  0x1b   :  { %v424_v61 = vadd.f32 %v764_v44, %v232_v52  ;;  %v233_v62 = vadd.f32 %v961_v3, %v165_v53  ;;  %v166_v63 = vmul.f32 %v956_v1, %v640_v54  ;;  %v644_v0 = vunpack.c.h.bf16 %v869_v46 }
  0x1c   :  { %550 = vst [vmem:[%s1476_s4 + $0x68] sm:$0xff] %v486_v57  ;;  %v487_v4 = vmax.f32 %v423_v58, 0.0  ;;  %v167_v5 = vmul.f32 %v956_v1, %v643_v59  ;;  %v772_v6 = vunpack.c.h.bf16 %v900_v47  ;;  %v647_v7 = vunpack.c.l.bf16 %v870_v56  ;;  %v905_v59 = vld [vmem:[%s1475_s3 + $0x70] sm:$0xff]  }
  0x1d   :  { %v488_v8 = vmax.f32 %v424_v61, 0.0  ;;  %v425_v9 = vadd.f32 %v767_v51, %v233_v62  ;;  %v234_v10 = vadd.f32 %v961_v3, %v166_v63  ;;  %v168_v11 = vmul.f32 %v956_v1, %v644_v0 }
  0x1e   :  { %551 = vst [vmem:[%s1476_s4 + $0x70] sm:$0xff] %v487_v4  ;;  %v235_v13 = vadd.f32 %v961_v3, %v167_v5  ;;  %v169_v14 = vmul.f32 %v956_v1, %v647_v7  ;;  %v775_v15 = vunpack.c.l.bf16 %v901_v2  ;;  %v648_v16 = vunpack.c.h.bf16 %v870_v56 }
  0x1f   :  { %552 = vst [vmem:[%s1476_s4 + $0x78] sm:$0xff] %v488_v8  ;;  %v489_v18 = vmax.f32 %v425_v9, 0.0  ;;  %v426_v19 = vadd.f32 %v768_v55, %v234_v10  ;;  %v236_v20 = vadd.f32 %v961_v3, %v168_v11  ;;  %v776_v21 = vunpack.c.h.bf16 %v901_v2  ;;  %v906_v11 = vld [vmem:[%s1475_s3 + $0x78] sm:$0xff]  }
  0x20   :  { %v427_v22 = vadd.f32 %v771_v60, %v235_v13  ;;  %v237_v23 = vadd.f32 %v961_v3, %v169_v14  ;;  %v170_v24 = vmul.f32 %v956_v1, %v648_v16  ;;  %v651_v25 = vunpack.c.l.bf16 %v871_v12 }
  0x21   :  { %553 = vst [vmem:[%s1476_s4 + $0x80] sm:$0xff] %v489_v18  ;;  %v490_v27 = vmax.f32 %v426_v19, 0.0  ;;  %v428_v28 = vadd.f32 %v772_v6, %v236_v20  ;;  %v779_v29 = vunpack.c.l.bf16 %v902_v17  ;;  %v652_v30 = vunpack.c.h.bf16 %v871_v12  ;;  %v875_v6 = vld [vmem:[%s1472_s0 + $0x78] sm:$0xff]   ;;  %v876_v20 = vld [vmem:[%s1472_s0 + $0x80] sm:$0xff]  }
  0x22   :  { %v491_v32 = vmax.f32 %v427_v22, 0.0  ;;  %v429_v33 = vadd.f32 %v775_v15, %v237_v23  ;;  %v238_v34 = vadd.f32 %v961_v3, %v170_v24  ;;  %v171_v35 = vmul.f32 %v956_v1, %v651_v25  ;;  %v907_v25 = vld [vmem:[%s1475_s3 + $0x80] sm:$0xff]  }
  0x23   :  { %554 = vst [vmem:[%s1476_s4 + $0x88] sm:$0xff] %v490_v27  ;;  %v492_v36 = vmax.f32 %v428_v28, 0.0  ;;  %v172_v37 = vmul.f32 %v956_v1, %v652_v30  ;;  %v780_v38 = vunpack.c.h.bf16 %v902_v17  ;;  %v655_v39 = vunpack.c.l.bf16 %v872_v26 }
  0x24   :  { %555 = vst [vmem:[%s1476_s4 + $0x90] sm:$0xff] %v491_v32  ;;  %v493_v42 = vmax.f32 %v429_v33, 0.0  ;;  %v430_v43 = vadd.f32 %v776_v21, %v238_v34  ;;  %v239_v44 = vadd.f32 %v961_v3, %v171_v35  ;;  %v783_v45 = vunpack.c.l.bf16 %v903_v31  ;;  %v877_v34 = vld [vmem:[%s1472_s0 + $0x88] sm:$0xff]  }
  0x25   :  { %556 = vst [vmem:[%s1476_s4 + $0x98] sm:$0xff] %v492_v36  ;;  %v240_v46 = vadd.f32 %v961_v3, %v172_v37  ;;  %v173_v47 = vmul.f32 %v956_v1, %v655_v39  ;;  %v656_v48 = vunpack.c.h.bf16 %v872_v26  ;;  %v784_v49 = vunpack.c.h.bf16 %v903_v31  ;;  %v908_v35 = vld [vmem:[%s1475_s3 + $0x88] sm:$0xff]  }
  0x26   :  { %557 = vst [vmem:[%s1476_s4 + $0xa0] sm:$0xff] %v493_v42  ;;  %v494_v51 = vmax.f32 %v430_v43, 0.0  ;;  %v431_v52 = vadd.f32 %v779_v29, %v239_v44  ;;  %v659_v53 = vunpack.c.l.bf16 %v873_v40  ;;  %v787_v54 = vunpack.c.l.bf16 %v904_v41  ;;  %v878_v44 = vld [vmem:[%s1472_s0 + $0x90] sm:$0xff]  }
  0x27   :  { %v432_v55 = vadd.f32 %v780_v38, %v240_v46  ;;  %v241_v56 = vadd.f32 %v961_v3, %v173_v47  ;;  %v174_v57 = vmul.f32 %v956_v1, %v656_v48  ;;  %v660_v58 = vunpack.c.h.bf16 %v873_v40 }
  0x28   :  { %558 = vst [vmem:[%s1476_s4 + $0xa8] sm:$0xff] %v494_v51  ;;  %v495_v60 = vmax.f32 %v431_v52, 0.0  ;;  %v175_v61 = vmul.f32 %v956_v1, %v659_v53  ;;  %v788_v62 = vunpack.c.h.bf16 %v904_v41  ;;  %v663_v63 = vunpack.c.l.bf16 %v874_v50  ;;  %v909_v53 = vld [vmem:[%s1475_s3 + $0x90] sm:$0xff]  }
  0x29   :  { %v496_v0 = vmax.f32 %v432_v55, 0.0  ;;  %v433_v2 = vadd.f32 %v783_v45, %v241_v56  ;;  %v242_v4 = vadd.f32 %v961_v3, %v174_v57  ;;  %v176_v5 = vmul.f32 %v956_v1, %v660_v58 }
  0x2a   :  { %559 = vst [vmem:[%s1476_s4 + $0xb0] sm:$0xff] %v495_v60  ;;  %v243_v7 = vadd.f32 %v961_v3, %v175_v61  ;;  %v177_v8 = vmul.f32 %v956_v1, %v663_v63  ;;  %v791_v9 = vunpack.c.l.bf16 %v905_v59  ;;  %v664_v10 = vunpack.c.h.bf16 %v874_v50 }
  0x2b   :  { %560 = vst [vmem:[%s1476_s4 + $0xb8] sm:$0xff] %v496_v0  ;;  %v497_v12 = vmax.f32 %v433_v2, 0.0  ;;  %v434_v13 = vadd.f32 %v784_v49, %v242_v4  ;;  %v244_v14 = vadd.f32 %v961_v3, %v176_v5  ;;  %v792_v15 = vunpack.c.h.bf16 %v905_v59  ;;  %v910_v5 = vld [vmem:[%s1475_s3 + $0x98] sm:$0xff]  }
  0x2c   :  { %v435_v16 = vadd.f32 %v787_v54, %v243_v7  ;;  %v245_v17 = vadd.f32 %v961_v3, %v177_v8  ;;  %v178_v18 = vmul.f32 %v956_v1, %v664_v10  ;;  %v667_v19 = vunpack.c.l.bf16 %v875_v6 }
  0x2d   :  { %561 = vst [vmem:[%s1476_s4 + $0xc0] sm:$0xff] %v497_v12  ;;  %v498_v21 = vmax.f32 %v434_v13, 0.0  ;;  %v436_v22 = vadd.f32 %v788_v62, %v244_v14  ;;  %v795_v23 = vunpack.c.l.bf16 %v906_v11  ;;  %v668_v24 = vunpack.c.h.bf16 %v875_v6  ;;  %v879_v62 = vld [vmem:[%s1472_s0 + $0x98] sm:$0xff]   ;;  %v880_v14 = vld [vmem:[%s1472_s0 + $0xa0] sm:$0xff]  }
  0x2e   :  { %v499_v26 = vmax.f32 %v435_v16, 0.0  ;;  %v437_v27 = vadd.f32 %v791_v9, %v245_v17  ;;  %v246_v28 = vadd.f32 %v961_v3, %v178_v18  ;;  %v179_v29 = vmul.f32 %v956_v1, %v667_v19  ;;  %v911_v19 = vld [vmem:[%s1475_s3 + $0xa0] sm:$0xff]  }
  0x2f   :  { %562 = vst [vmem:[%s1476_s4 + $0xc8] sm:$0xff] %v498_v21  ;;  %v500_v30 = vmax.f32 %v436_v22, 0.0  ;;  %v180_v31 = vmul.f32 %v956_v1, %v668_v24  ;;  %v796_v32 = vunpack.c.h.bf16 %v906_v11  ;;  %v671_v33 = vunpack.c.l.bf16 %v876_v20 }
  0x30   :  { %563 = vst [vmem:[%s1476_s4 + $0xd0] sm:$0xff] %v499_v26  ;;  %v501_v36 = vmax.f32 %v437_v27, 0.0  ;;  %v438_v37 = vadd.f32 %v792_v15, %v246_v28  ;;  %v247_v38 = vadd.f32 %v961_v3, %v179_v29  ;;  %v799_v39 = vunpack.c.l.bf16 %v907_v25  ;;  %v881_v28 = vld [vmem:[%s1472_s0 + $0xa8] sm:$0xff]  }
  0x31   :  { %564 = vst [vmem:[%s1476_s4 + $0xd8] sm:$0xff] %v500_v30  ;;  %v248_v40 = vadd.f32 %v961_v3, %v180_v31  ;;  %v181_v41 = vmul.f32 %v956_v1, %v671_v33  ;;  %v672_v42 = vunpack.c.h.bf16 %v876_v20  ;;  %v800_v43 = vunpack.c.h.bf16 %v907_v25  ;;  %v912_v29 = vld [vmem:[%s1475_s3 + $0xa8] sm:$0xff]  }
  0x32   :  { %565 = vst [vmem:[%s1476_s4 + $0xe0] sm:$0xff] %v501_v36  ;;  %v502_v45 = vmax.f32 %v438_v37, 0.0  ;;  %v439_v46 = vadd.f32 %v795_v23, %v247_v38  ;;  %v675_v47 = vunpack.c.l.bf16 %v877_v34  ;;  %v803_v48 = vunpack.c.l.bf16 %v908_v35  ;;  %v882_v38 = vld [vmem:[%s1472_s0 + $0xb0] sm:$0xff]  }
  0x33   :  { %v440_v49 = vadd.f32 %v796_v32, %v248_v40  ;;  %v249_v50 = vadd.f32 %v961_v3, %v181_v41  ;;  %v182_v51 = vmul.f32 %v956_v1, %v672_v42  ;;  %v676_v52 = vunpack.c.h.bf16 %v877_v34 }
  0x34   :  { %566 = vst [vmem:[%s1476_s4 + $0xe8] sm:$0xff] %v502_v45  ;;  %v503_v54 = vmax.f32 %v439_v46, 0.0  ;;  %v183_v55 = vmul.f32 %v956_v1, %v675_v47  ;;  %v804_v56 = vunpack.c.h.bf16 %v908_v35  ;;  %v679_v57 = vunpack.c.l.bf16 %v878_v44  ;;  %v913_v47 = vld [vmem:[%s1475_s3 + $0xb0] sm:$0xff]  }
  0x35   :  { %v504_v58 = vmax.f32 %v440_v49, 0.0  ;;  %v441_v59 = vadd.f32 %v799_v39, %v249_v50  ;;  %v250_v60 = vadd.f32 %v961_v3, %v182_v51  ;;  %v184_v61 = vmul.f32 %v956_v1, %v676_v52 }
  0x36   :  { %567 = vst [vmem:[%s1476_s4 + $0xf0] sm:$0xff] %v503_v54  ;;  %v251_v63 = vadd.f32 %v961_v3, %v183_v55  ;;  %v185_v0 = vmul.f32 %v956_v1, %v679_v57  ;;  %v807_v2 = vunpack.c.l.bf16 %v909_v53  ;;  %v680_v4 = vunpack.c.h.bf16 %v878_v44 }
  0x37   :  { %568 = vst [vmem:[%s1476_s4 + $0xf8] sm:$0xff] %v504_v58  ;;  %v505_v6 = vmax.f32 %v441_v59, 0.0  ;;  %v442_v7 = vadd.f32 %v800_v43, %v250_v60  ;;  %v252_v8 = vadd.f32 %v961_v3, %v184_v61  ;;  %v808_v9 = vunpack.c.h.bf16 %v909_v53  ;;  %v914_v61 = vld [vmem:[%s1475_s3 + $0xb8] sm:$0xff]  }
  0x38   :  { %v443_v10 = vadd.f32 %v803_v48, %v251_v63  ;;  %v253_v11 = vadd.f32 %v961_v3, %v185_v0  ;;  %v186_v12 = vmul.f32 %v956_v1, %v680_v4  ;;  %v683_v13 = vunpack.c.l.bf16 %v879_v62 }
  0x39   :  { %569 = vst [vmem:[%s1476_s4 + $0x100] sm:$0xff] %v505_v6  ;;  %v506_v15 = vmax.f32 %v442_v7, 0.0  ;;  %v444_v16 = vadd.f32 %v804_v56, %v252_v8  ;;  %v811_v17 = vunpack.c.l.bf16 %v910_v5  ;;  %v684_v18 = vunpack.c.h.bf16 %v879_v62  ;;  %v883_v56 = vld [vmem:[%s1472_s0 + $0xb8] sm:$0xff]   ;;  %v884_v8 = vld [vmem:[%s1472_s0 + $0xc0] sm:$0xff]  }
  0x3a   :  { %v507_v20 = vmax.f32 %v443_v10, 0.0  ;;  %v445_v21 = vadd.f32 %v807_v2, %v253_v11  ;;  %v254_v22 = vadd.f32 %v961_v3, %v186_v12  ;;  %v187_v23 = vmul.f32 %v956_v1, %v683_v13  ;;  %v915_v13 = vld [vmem:[%s1475_s3 + $0xc0] sm:$0xff]  }
  0x3b   :  { %570 = vst [vmem:[%s1476_s4 + $0x108] sm:$0xff] %v506_v15  ;;  %v508_v24 = vmax.f32 %v444_v16, 0.0  ;;  %v188_v25 = vmul.f32 %v956_v1, %v684_v18  ;;  %v812_v26 = vunpack.c.h.bf16 %v910_v5  ;;  %v687_v27 = vunpack.c.l.bf16 %v880_v14 }
  0x3c   :  { %571 = vst [vmem:[%s1476_s4 + $0x110] sm:$0xff] %v507_v20  ;;  %v509_v30 = vmax.f32 %v445_v21, 0.0  ;;  %v446_v31 = vadd.f32 %v808_v9, %v254_v22  ;;  %v255_v32 = vadd.f32 %v961_v3, %v187_v23  ;;  %v815_v33 = vunpack.c.l.bf16 %v911_v19  ;;  %v885_v22 = vld [vmem:[%s1472_s0 + $0xc8] sm:$0xff]  }
  0x3d   :  { %572 = vst [vmem:[%s1476_s4 + $0x118] sm:$0xff] %v508_v24  ;;  %v256_v34 = vadd.f32 %v961_v3, %v188_v25  ;;  %v189_v35 = vmul.f32 %v956_v1, %v687_v27  ;;  %v688_v36 = vunpack.c.h.bf16 %v880_v14  ;;  %v816_v37 = vunpack.c.h.bf16 %v911_v19  ;;  %v916_v23 = vld [vmem:[%s1475_s3 + $0xc8] sm:$0xff]  }
  0x3e   :  { %573 = vst [vmem:[%s1476_s4 + $0x120] sm:$0xff] %v509_v30  ;;  %v510_v39 = vmax.f32 %v446_v31, 0.0  ;;  %v447_v40 = vadd.f32 %v811_v17, %v255_v32  ;;  %v691_v41 = vunpack.c.l.bf16 %v881_v28  ;;  %v819_v42 = vunpack.c.l.bf16 %v912_v29  ;;  %v886_v32 = vld [vmem:[%s1472_s0 + $0xd0] sm:$0xff]  }
  0x3f   :  { %v448_v43 = vadd.f32 %v812_v26, %v256_v34  ;;  %v257_v44 = vadd.f32 %v961_v3, %v189_v35  ;;  %v190_v45 = vmul.f32 %v956_v1, %v688_v36  ;;  %v692_v46 = vunpack.c.h.bf16 %v881_v28 }
  0x40   :  { %574 = vst [vmem:[%s1476_s4 + $0x128] sm:$0xff] %v510_v39  ;;  %v511_v48 = vmax.f32 %v447_v40, 0.0  ;;  %v191_v49 = vmul.f32 %v956_v1, %v691_v41  ;;  %v820_v50 = vunpack.c.h.bf16 %v912_v29  ;;  %v695_v51 = vunpack.c.l.bf16 %v882_v38  ;;  %v917_v41 = vld [vmem:[%s1475_s3 + $0xd0] sm:$0xff]  }
  0x41   :  { %v512_v52 = vmax.f32 %v448_v43, 0.0  ;;  %v449_v53 = vadd.f32 %v815_v33, %v257_v44  ;;  %v258_v54 = vadd.f32 %v961_v3, %v190_v45  ;;  %v192_v55 = vmul.f32 %v956_v1, %v692_v46 }
  0x42   :  { %575 = vst [vmem:[%s1476_s4 + $0x130] sm:$0xff] %v511_v48  ;;  %v259_v57 = vadd.f32 %v961_v3, %v191_v49  ;;  %v193_v58 = vmul.f32 %v956_v1, %v695_v51  ;;  %v823_v59 = vunpack.c.l.bf16 %v913_v47  ;;  %v696_v60 = vunpack.c.h.bf16 %v882_v38 }
  0x43   :  { %576 = vst [vmem:[%s1476_s4 + $0x138] sm:$0xff] %v512_v52  ;;  %v513_v62 = vmax.f32 %v449_v53, 0.0  ;;  %v450_v63 = vadd.f32 %v816_v37, %v258_v54  ;;  %v260_v0 = vadd.f32 %v961_v3, %v192_v55  ;;  %v824_v2 = vunpack.c.h.bf16 %v913_v47  ;;  %v918_v55 = vld [vmem:[%s1475_s3 + $0xd8] sm:$0xff]  }
  0x44   :  { %v451_v4 = vadd.f32 %v819_v42, %v259_v57  ;;  %v261_v5 = vadd.f32 %v961_v3, %v193_v58  ;;  %v194_v6 = vmul.f32 %v956_v1, %v696_v60  ;;  %v699_v7 = vunpack.c.l.bf16 %v883_v56 }
  0x45   :  { %577 = vst [vmem:[%s1476_s4 + $0x140] sm:$0xff] %v513_v62  ;;  %v514_v9 = vmax.f32 %v450_v63, 0.0  ;;  %v452_v10 = vadd.f32 %v820_v50, %v260_v0  ;;  %v827_v11 = vunpack.c.l.bf16 %v914_v61  ;;  %v700_v12 = vunpack.c.h.bf16 %v883_v56  ;;  %v887_v50 = vld [vmem:[%s1472_s0 + $0xd8] sm:$0xff]   ;;  %v888_v0 = vld [vmem:[%s1472_s0 + $0xe0] sm:$0xff]  }
  0x46   :  { %v515_v14 = vmax.f32 %v451_v4, 0.0  ;;  %v453_v15 = vadd.f32 %v823_v59, %v261_v5  ;;  %v262_v16 = vadd.f32 %v961_v3, %v194_v6  ;;  %v195_v17 = vmul.f32 %v956_v1, %v699_v7  ;;  %v919_v7 = vld [vmem:[%s1475_s3 + $0xe0] sm:$0xff]  }
  0x47   :  { %578 = vst [vmem:[%s1476_s4 + $0x148] sm:$0xff] %v514_v9  ;;  %v516_v18 = vmax.f32 %v452_v10, 0.0  ;;  %v196_v19 = vmul.f32 %v956_v1, %v700_v12  ;;  %v828_v20 = vunpack.c.h.bf16 %v914_v61  ;;  %v703_v21 = vunpack.c.l.bf16 %v884_v8 }
  0x48   :  { %579 = vst [vmem:[%s1476_s4 + $0x150] sm:$0xff] %v515_v14  ;;  %v517_v24 = vmax.f32 %v453_v15, 0.0  ;;  %v454_v25 = vadd.f32 %v824_v2, %v262_v16  ;;  %v263_v26 = vadd.f32 %v961_v3, %v195_v17  ;;  %v831_v27 = vunpack.c.l.bf16 %v915_v13  ;;  %v889_v16 = vld [vmem:[%s1472_s0 + $0xe8] sm:$0xff]  }
  0x49   :  { %580 = vst [vmem:[%s1476_s4 + $0x158] sm:$0xff] %v516_v18  ;;  %v264_v28 = vadd.f32 %v961_v3, %v196_v19  ;;  %v197_v29 = vmul.f32 %v956_v1, %v703_v21  ;;  %v704_v30 = vunpack.c.h.bf16 %v884_v8  ;;  %v832_v31 = vunpack.c.h.bf16 %v915_v13  ;;  %v920_v17 = vld [vmem:[%s1475_s3 + $0xe8] sm:$0xff]  }
  0x4a   :  { %581 = vst [vmem:[%s1476_s4 + $0x160] sm:$0xff] %v517_v24  ;;  %v518_v33 = vmax.f32 %v454_v25, 0.0  ;;  %v455_v34 = vadd.f32 %v827_v11, %v263_v26  ;;  %v707_v35 = vunpack.c.l.bf16 %v885_v22  ;;  %v835_v36 = vunpack.c.l.bf16 %v916_v23  ;;  %v890_v26 = vld [vmem:[%s1472_s0 + $0xf0] sm:$0xff]  }
  0x4b   :  { %v456_v37 = vadd.f32 %v828_v20, %v264_v28  ;;  %v265_v38 = vadd.f32 %v961_v3, %v197_v29  ;;  %v198_v39 = vmul.f32 %v956_v1, %v704_v30  ;;  %v708_v40 = vunpack.c.h.bf16 %v885_v22 }
  0x4c   :  { %582 = vst [vmem:[%s1476_s4 + $0x168] sm:$0xff] %v518_v33  ;;  %v519_v42 = vmax.f32 %v455_v34, 0.0  ;;  %v199_v43 = vmul.f32 %v956_v1, %v707_v35  ;;  %v836_v44 = vunpack.c.h.bf16 %v916_v23  ;;  %v711_v45 = vunpack.c.l.bf16 %v886_v32  ;;  %v921_v35 = vld [vmem:[%s1475_s3 + $0xf0] sm:$0xff]  }
  0x4d   :  { %v520_v46 = vmax.f32 %v456_v37, 0.0  ;;  %v457_v47 = vadd.f32 %v831_v27, %v265_v38  ;;  %v266_v48 = vadd.f32 %v961_v3, %v198_v39  ;;  %v200_v49 = vmul.f32 %v956_v1, %v708_v40 }
  0x4e   :  { %583 = vst [vmem:[%s1476_s4 + $0x170] sm:$0xff] %v519_v42  ;;  %v267_v51 = vadd.f32 %v961_v3, %v199_v43  ;;  %v201_v52 = vmul.f32 %v956_v1, %v711_v45  ;;  %v839_v53 = vunpack.c.l.bf16 %v917_v41  ;;  %v712_v54 = vunpack.c.h.bf16 %v886_v32 }
  0x4f   :  { %584 = vst [vmem:[%s1476_s4 + $0x178] sm:$0xff] %v520_v46  ;;  %v521_v56 = vmax.f32 %v457_v47, 0.0  ;;  %v458_v57 = vadd.f32 %v832_v31, %v266_v48  ;;  %v268_v58 = vadd.f32 %v961_v3, %v200_v49  ;;  %v840_v59 = vunpack.c.h.bf16 %v917_v41  ;;  %v922_v49 = vld [vmem:[%s1475_s3 + $0xf8] sm:$0xff]  }
  0x50   :  { %v459_v60 = vadd.f32 %v835_v36, %v267_v51  ;;  %v269_v61 = vadd.f32 %v961_v3, %v201_v52  ;;  %v202_v62 = vmul.f32 %v956_v1, %v712_v54  ;;  %v715_v63 = vunpack.c.l.bf16 %v887_v50 }
  0x51   :  { %585 = vst [vmem:[%s1476_s4 + $0x180] sm:$0xff] %v521_v56  ;;  %v522_v2 = vmax.f32 %v458_v57, 0.0  ;;  %v460_v4 = vadd.f32 %v836_v44, %v268_v58  ;;  %v843_v5 = vunpack.c.l.bf16 %v918_v55  ;;  %v716_v6 = vunpack.c.h.bf16 %v887_v50  ;;  %v891_v44 = vld [vmem:[%s1472_s0 + $0xf8] sm:$0xff]  }
  0x52   :  { %v523_v8 = vmax.f32 %v459_v60, 0.0  ;;  %v461_v9 = vadd.f32 %v839_v53, %v269_v61  ;;  %v270_v10 = vadd.f32 %v961_v3, %v202_v62  ;;  %v203_v11 = vmul.f32 %v956_v1, %v715_v63 }
  0x53   :  { %586 = vst [vmem:[%s1476_s4 + $0x188] sm:$0xff] %v522_v2  ;;  %v524_v12 = vmax.f32 %v460_v4, 0.0  ;;  %v204_v13 = vmul.f32 %v956_v1, %v716_v6  ;;  %v844_v14 = vunpack.c.h.bf16 %v918_v55  ;;  %v719_v15 = vunpack.c.l.bf16 %v888_v0 }
  0x54   :  { %587 = vst [vmem:[%s1476_s4 + $0x190] sm:$0xff] %v523_v8  ;;  %v525_v18 = vmax.f32 %v461_v9, 0.0  ;;  %v462_v19 = vadd.f32 %v840_v59, %v270_v10  ;;  %v271_v20 = vadd.f32 %v961_v3, %v203_v11  ;;  %v847_v21 = vunpack.c.l.bf16 %v919_v7 }
  0x55   :  { %588 = vst [vmem:[%s1476_s4 + $0x198] sm:$0xff] %v524_v12  ;;  %v272_v22 = vadd.f32 %v961_v3, %v204_v13  ;;  %v205_v23 = vmul.f32 %v956_v1, %v719_v15  ;;  %v720_v24 = vunpack.c.h.bf16 %v888_v0  ;;  %v848_v25 = vunpack.c.h.bf16 %v919_v7 }
  0x56   :  { %589 = vst [vmem:[%s1476_s4 + $0x1a0] sm:$0xff] %v525_v18  ;;  %v526_v27 = vmax.f32 %v462_v19, 0.0  ;;  %v463_v28 = vadd.f32 %v843_v5, %v271_v20  ;;  %v723_v29 = vunpack.c.l.bf16 %v889_v16  ;;  %v851_v30 = vunpack.c.l.bf16 %v920_v17 }
  0x57   :  { %v464_v31 = vadd.f32 %v844_v14, %v272_v22  ;;  %v273_v32 = vadd.f32 %v961_v3, %v205_v23  ;;  %v206_v33 = vmul.f32 %v956_v1, %v720_v24  ;;  %v724_v34 = vunpack.c.h.bf16 %v889_v16 }
  0x58   :  { %590 = vst [vmem:[%s1476_s4 + $0x1a8] sm:$0xff] %v526_v27  ;;  %v527_v36 = vmax.f32 %v463_v28, 0.0  ;;  %v207_v37 = vmul.f32 %v956_v1, %v723_v29  ;;  %v852_v38 = vunpack.c.h.bf16 %v920_v17  ;;  %v727_v39 = vunpack.c.l.bf16 %v890_v26 }
  0x59   :  { %v528_v40 = vmax.f32 %v464_v31, 0.0  ;;  %v465_v41 = vadd.f32 %v847_v21, %v273_v32  ;;  %v274_v42 = vadd.f32 %v961_v3, %v206_v33  ;;  %v208_v43 = vmul.f32 %v956_v1, %v724_v34 }
  0x5a   :  { %591 = vst [vmem:[%s1476_s4 + $0x1b0] sm:$0xff] %v527_v36  ;;  %v275_v45 = vadd.f32 %v961_v3, %v207_v37  ;;  %v209_v46 = vmul.f32 %v956_v1, %v727_v39  ;;  %v855_v47 = vunpack.c.l.bf16 %v921_v35  ;;  %v728_v48 = vunpack.c.h.bf16 %v890_v26 }
  0x5b   :  { %592 = vst [vmem:[%s1476_s4 + $0x1b8] sm:$0xff] %v528_v40  ;;  %v529_v50 = vmax.f32 %v465_v41, 0.0  ;;  %v466_v51 = vadd.f32 %v848_v25, %v274_v42  ;;  %v276_v52 = vadd.f32 %v961_v3, %v208_v43  ;;  %v856_v53 = vunpack.c.h.bf16 %v921_v35 }
  0x5c   :  { %v467_v54 = vadd.f32 %v851_v30, %v275_v45  ;;  %v277_v55 = vadd.f32 %v961_v3, %v209_v46  ;;  %v210_v56 = vmul.f32 %v956_v1, %v728_v48  ;;  %v731_v57 = vunpack.c.l.bf16 %v891_v44 }
  0x5d   :  { %593 = vst [vmem:[%s1476_s4 + $0x1c0] sm:$0xff] %v529_v50  ;;  %v530_v58 = vmax.f32 %v466_v51, 0.0  ;;  %v468_v59 = vadd.f32 %v852_v38, %v276_v52  ;;  %v859_v60 = vunpack.c.l.bf16 %v922_v49  ;;  %v732_v61 = vunpack.c.h.bf16 %v891_v44 }
  0x5e   :  { %v531_v62 = vmax.f32 %v467_v54, 0.0  ;;  %v469_v63 = vadd.f32 %v855_v47, %v277_v55  ;;  %v278_v0 = vadd.f32 %v961_v3, %v210_v56  ;;  %v211_v2 = vmul.f32 %v956_v1, %v731_v57 }
  0x5f   :  { %594 = vst [vmem:[%s1476_s4 + $0x1c8] sm:$0xff] %v530_v58  ;;  %v532_v4 = vmax.f32 %v468_v59, 0.0  ;;  %v212_v5 = vmul.f32 %v956_v1, %v732_v61  ;;  %v860_v6 = vunpack.c.h.bf16 %v922_v49 }
  0x60   :  { %595 = vst [vmem:[%s1476_s4 + $0x1d0] sm:$0xff] %v531_v62  ;;  %v533_v7 = vmax.f32 %v469_v63, 0.0  ;;  %v470_v8 = vadd.f32 %v856_v53, %v278_v0  ;;  %v279_v9 = vadd.f32 %v961_v3, %v211_v2 }
  0x61   :  { %596 = vst [vmem:[%s1476_s4 + $0x1d8] sm:$0xff] %v532_v4  ;;  %v280_v10 = vadd.f32 %v961_v3, %v212_v5 }
  0x62   :  { %597 = vst [vmem:[%s1476_s4 + $0x1e0] sm:$0xff] %v533_v7  ;;  %v534_v1 = vmax.f32 %v470_v8, 0.0  ;;  %v471_v11 = vadd.f32 %v859_v60, %v279_v9 }
  0x63   :  { %v472_v12 = vadd.f32 %v860_v6, %v280_v10 }
  0x64   :  { %598 = vst [vmem:[%s1476_s4 + $0x1e8] sm:$0xff] %v534_v1  ;;  %v535_v13 = vmax.f32 %v471_v11, 0.0 }
  0x65   :  { %v536_v14 = vmax.f32 %v472_v12, 0.0 }
  0x66   :  { %599 = vst [vmem:[%s1476_s4 + $0x1f0] sm:$0xff] %v535_v13 }
  0x67   :  { %600 = vst [vmem:[%s1476_s4 + $0x1f8] sm:$0xff] %v536_v14 }

// kernel: residual_block.3
= control target key start
LH: loop header
LB: loop body
LE: loop exit
PB: predicated region body
PF: predicated region fallthrough
CT: control target
= control target key end

     0   :  { %s5305_s15 = smov 0   ;;  %s6772_s0 = inlined_call_operand.vmem [shape: bf16[2,18,18,128], index: 0, kind: input, shape index: {}]   ;;  %s6773_s1 = inlined_call_operand.vmem [shape: bf16[1152,128], index: 1, kind: input, shape index: {}]   ;;  %s6774_s2 = inlined_call_operand.vmem [shape: bf16[2,256,128], index: 2, kind: output, shape index: {0}]   ;;  %s6775_s3 = inlined_call_operand.vmem [shape: f32[2,1,128], index: 3, kind: output, shape index: {1}]   ;;  %s6776_s4 = inlined_call_operand.vmem [shape: f32[2,1,128], index: 4, kind: output, shape index: {2}]  }
   0x1 LB: > { %s4325_s16 = sadd.s32 4294967295, %s5278_s15   ;;  %p4329_p0 = scmp.ge.s32.totalorder %s5278_s15, 1  ;;  %s5278_s15 = sphi %s5305_s15, %s15_s15  }
   0x2   : > { %p167_p1 = scmp.lt.s32.totalorder %s5278_s15, 3 }
   0x4   : > { %p168_p2 = pnand %p4329_p0, %p167_p1 }
   0x6   : > { %171 = sbr.rel (%p168_p2) target bundleno = 766 (0x2fe), region = 28 }
   0xb   : > { %v5047_v0 = vld [vmem:[%s6773_s1 + $0x38] sm:$0xff]  ;;  %v5046_v1 = vld [vmem:[%s6773_s1 + $0x30] sm:$0xff]  ;;  %v5045_v2 = vld [vmem:[%s6773_s1 + $0x28] sm:$0xff]  ;;  %p199_p3 = scmp.lt.s32.totalorder %s4325_s16, 1  ;;  %vm263_vm0 = vsmask.f32 3328 }
   0xc   : > { %5207 = vmatpush.bf16.msra.mxu1 %v5047_v0  ;;  %5208 = vmatpush.bf16.msra.mxu2 %v5047_v0  ;;  %v5044_v3 = vld [vmem:[%s6773_s1 + $0x20] sm:$0xff]  ;;  %v5043_v4 = vld [vmem:[%s6773_s1 + $0x18] sm:$0xff]  ;;  %v5042_v5 = vld [vmem:[%s6773_s1 + $0x10] sm:$0xff]  ;;  %vm264_vm1 = vsmask.f32 7440  ;;  %vm714_vm2 = vcmask 1042432  }
   0xd   : > { %5209 = vmatpush.bf16.msra.mxu3 %v5047_v0  ;;  %3247 = vmatpush.bf16.msra.mxu0 %v5047_v0  ;;  %s6798_s16 = smov (!%p199_p3, %s4325_s16), 1  ;;  %v5041_v6 = vld [vmem:[%s6773_s1 + $0x8] sm:$0xff]  ;;  %v5040_v7 = vld [vmem:[%s6773_s1] sm:$0xff]  ;;  %v5063_v8 = vld [vmem:[%s6773_s1 + $0xb8] sm:$0xff]  ;;  %vm715_vm3 = vcmask 1046532  }
   0xe   : > { %s5231_s5 = smul.u32 216, %s6798_s16  ;;  %v5071_v9 = vld [vmem:[%s6773_s1 + $0xf8] sm:$0xff]  ;;  %v5062_v16 = vld [vmem:[%s6773_s1 + $0xb0] sm:$0xff]  ;;  %v5061_v20 = vld [vmem:[%s6773_s1 + $0xa8] sm:$0xff]  ;;  %s4991_s26 = sshll.u32 %s6798_s16, 7 }
   0xf   : > { %v5055_v14 = vld [vmem:[%s6773_s1 + $0x78] sm:$0xff]  ;;  %v5070_v17 = vld [vmem:[%s6773_s1 + $0xf0] sm:$0xff]  ;;  %v5069_v21 = vld [vmem:[%s6773_s1 + $0xe8] sm:$0xff]  ;;  %s6554_s29 = scalar_lea.vmem %s6774_s2, %s4991_s26  ;;  %s214_s8 = scalar_lea.vmem %s6776_s4, %s6798_s16 }
  0x10   : > { %5210 = vmatpush.bf16.msra.mxu1 %v5046_v1  ;;  %5211 = vmatpush.bf16.msra.mxu2 %v5046_v1  ;;  %s5347_s10 = scalar_lea.vmem %s6772_s0, %s5231_s5  ;;  %v5079_v15 = vld [vmem:[%s6773_s1 + $0x138] sm:$0xff]  ;;  %v5054_v18 = vld [vmem:[%s6773_s1 + $0x70] sm:$0xff]  ;;  %v5053_v22 = vld [vmem:[%s6773_s1 + $0x68] sm:$0xff]  ;;  %s211_s5 = scalar_lea.vmem %s6775_s3, %s6798_s16 }
  0x11   : > { %5212 = vmatpush.bf16.msra.mxu3 %v5046_v1  ;;  %3248 = vmatpush.bf16.msra.mxu0 %v5046_v1  ;;  %v4996_v10 = vld [vmem:[%s5347_s10 + $0x30] sm:$0xff]  ;;  %v5000_v11 = vld [vmem:[%s5347_s10 + $0x60] sm:$0xff]  ;;  %v5077_v23 = vld [vmem:[%s6773_s1 + $0x128] sm:$0xff] }
  0x12   : > { %v5004_v12 = vld [vmem:[%s5347_s10 + $0x90] sm:$0xff]  ;;  %v4992_v13 = vld [vmem:[%s5347_s10] sm:$0xff]  ;;  %v5059_v28 = vld [vmem:[%s6773_s1 + $0x98] sm:$0xff] }
  0x13   : > { %v5078_v19 = vld [vmem:[%s6773_s1 + $0x130] sm:$0xff]  ;;  %v5060_v24 = vld [vmem:[%s6773_s1 + $0xa0] sm:$0xff]  ;;  %v5067_v29 = vld [vmem:[%s6773_s1 + $0xd8] sm:$0xff] }
  0x14   : > { %5213 = vmatpush.bf16.msra.mxu1 %v5045_v2  ;;  %5214 = vmatpush.bf16.msra.mxu2 %v5045_v2  ;;  %v5068_v25 = vld [vmem:[%s6773_s1 + $0xe0] sm:$0xff]  ;;  %v5001_v31 = vld [vmem:[%s5347_s10 + $0x6c] sm:$0xff]  ;;  %v5051_v34 = vld [vmem:[%s6773_s1 + $0x58] sm:$0xff] }
  0x15   : > { %5215 = vmatpush.bf16.msra.mxu3 %v5045_v2  ;;  %3249 = vmatpush.bf16.msra.mxu0 %v5045_v2  ;;  %v5052_v26 = vld [vmem:[%s6773_s1 + $0x60] sm:$0xff]  ;;  %v4993_v33 = vld [vmem:[%s5347_s10 + $0xc] sm:$0xff]  ;;  %v5075_v35 = vld [vmem:[%s6773_s1 + $0x118] sm:$0xff] }
  0x16   : > { %v5076_v27 = vld [vmem:[%s6773_s1 + $0x120] sm:$0xff]  ;;  %v5058_v36 = vld [vmem:[%s6773_s1 + $0x90] sm:$0xff]  ;;  %v5057_v40 = vld [vmem:[%s6773_s1 + $0x88] sm:$0xff] }
  0x17   : > { %v4997_v30 = vld [vmem:[%s5347_s10 + $0x3c] sm:$0xff]  ;;  %v5066_v37 = vld [vmem:[%s6773_s1 + $0xd0] sm:$0xff]  ;;  %v5065_v41 = vld [vmem:[%s6773_s1 + $0xc8] sm:$0xff] }
  0x18   : > { %5216 = vmatpush.bf16.msra.mxu1 %v5044_v3  ;;  %5217 = vmatpush.bf16.msra.mxu2 %v5044_v3  ;;  %v5005_v32 = vld [vmem:[%s5347_s10 + $0x9c] sm:$0xff]  ;;  %v5050_v38 = vld [vmem:[%s6773_s1 + $0x50] sm:$0xff]  ;;  %v5049_v42 = vld [vmem:[%s6773_s1 + $0x48] sm:$0xff] }
  0x19   : > { %5218 = vmatpush.bf16.msra.mxu3 %v5044_v3  ;;  %3250 = vmatpush.bf16.msra.mxu0 %v5044_v3  ;;  %v5074_v39 = vld [vmem:[%s6773_s1 + $0x110] sm:$0xff]  ;;  %v5073_v43 = vld [vmem:[%s6773_s1 + $0x108] sm:$0xff]  ;;  %v5056_v44 = vld [vmem:[%s6773_s1 + $0x80] sm:$0xff] }
  0x1a   : > { %v5064_v45 = vld [vmem:[%s6773_s1 + $0xc0] sm:$0xff]  ;;  %v4998_v48 = vld [vmem:[%s5347_s10 + $0x48] sm:$0xff]  ;;  %v5002_v49 = vld [vmem:[%s5347_s10 + $0x78] sm:$0xff] }
  0x1b   : > { %v5048_v46 = vld [vmem:[%s6773_s1 + $0x40] sm:$0xff]  ;;  %v5006_v50 = vld [vmem:[%s5347_s10 + $0xa8] sm:$0xff]  ;;  %v4994_v51 = vld [vmem:[%s5347_s10 + $0x18] sm:$0xff] }
  0x1c   : > { %5219 = vmatpush.bf16.msra.mxu1 %v5043_v4  ;;  %5220 = vmatpush.bf16.msra.mxu2 %v5043_v4  ;;  %v5072_v47 = vld [vmem:[%s6773_s1 + $0x100] sm:$0xff]  ;;  %v4349_v54 = vld [vmem:[%s5347_s10 + $0xc] sm:$0xf]  ;;  %v5095_v55 = vld [vmem:[%s6773_s1 + $0x1b8] sm:$0xff] }
  0x1d   : > { %5221 = vmatpush.bf16.msra.mxu3 %v5043_v4  ;;  %3251 = vmatpush.bf16.msra.mxu0 %v5043_v4  ;;  %v215_v52 = vld [vmem:[%s5347_s10] sm:$0xf]  ;;  %v5459_v53 = vld [vmem:[%s5347_s10 + $0x4] sm:$0xf]  ;;  %v4350_v56 = vld [vmem:[%s5347_s10 + $0x10] sm:$0xf] }
  0x1e   : > { %v5103_v57 = vld [vmem:[%s6773_s1 + $0x1f8] sm:$0xff]  ;;  %v267_v60 = vshrl.u32 %v215_v52, 16  ;;  %v270_v61 = vshll.u32 %v215_v52, 16  ;;  %v276_v62 = vshll.u32 %v5459_v53, 16  ;;  %v280_v63 = vshrl.u32 %v5459_v53, 16  ;;  %vm5490_vm4 = vmor %vm263_vm0, %vm264_vm1 }
  0x1f   : > { %v5087_v58 = vld [vmem:[%s6773_s1 + $0x178] sm:$0xff]  ;;  %v879_v0 = vshrl.u32 %v4349_v54, 16  ;;  %v882_v1 = vshll.u32 %v4349_v54, 16  ;;  %v888_v2 = vshll.u32 %v4350_v56, 16  ;;  %v892_v3 = vshrl.u32 %v4350_v56, 16  ;;  %vm5494_vm5 = vmor %vm714_vm2, %vm715_vm3 }
  0x20   : > { %5222 = vmatpush.bf16.msra.mxu1 %v5042_v5  ;;  %5223 = vmatpush.bf16.msra.mxu2 %v5042_v5  ;;  %v5111_v59 = vld [vmem:[%s6773_s1 + $0x238] sm:$0xff]  ;;  %v247_v4 = vld [vmem:[%s5347_s10 + $0x8] sm:$0x1] }
  0x21   : > { %5224 = vmatpush.bf16.msra.mxu3 %v5042_v5  ;;  %3252 = vmatpush.bf16.msra.mxu0 %v5042_v5  ;;  %v269_v5 = vrot.slane %v267_v60, 4 }
  0x24   : > { %5225 = vmatpush.bf16.msra.mxu1 %v5041_v6  ;;  %5226 = vmatpush.bf16.msra.mxu2 %v5041_v6 }
  0x25   : > { %5227 = vmatpush.bf16.msra.mxu3 %v5041_v6  ;;  %3253 = vmatpush.bf16.msra.mxu0 %v5041_v6  ;;  %v272_v6 = vrot.slane %v270_v61, 5 }
  0x28   : > { %5228 = vmatpush.bf16.msra.mxu1 %v5040_v7  ;;  %5229 = vmatpush.bf16.msra.mxu2 %v5040_v7 }
  0x29   : > { %5230 = vmatpush.bf16.msra.mxu3 %v5040_v7  ;;  %3254 = vmatpush.bf16.msra.mxu0 %v5040_v7  ;;  %v278_v7 = vrot.slane %v276_v62, 5 }
  0x2b   : > { %3275 = vmatmul.bf16.vlgmr.msra.gmra.mxu1 %v4996_v10  ;;  %3295 = vmatmul.bf16.vlgmr.msra.gmra.mxu2 %v5000_v11  ;;  %v884_v10 = vrot.slane %v882_v1, 5  ;;  %v890_v11 = vrot.slane %v888_v2, 5 }
  0x2c   : > { %3425 = vmatpush.bf16.msrb.mxu2 %v5063_v8  ;;  %3315 = vmatmul.bf16.vlgmr.msra.gmra.mxu3 %v5004_v12  ;;  %v282_v8 = vrot.slane %v280_v63, 4  ;;  %v894_v12 = vrot.slane %v892_v3, 4 }
  0x2d   : > { %3514 = vmatpush.bf16.msrb.mxu3 %v5071_v9  ;;  %3255 = vmatmul.bf16.vlgmr.msra.gmra.mxu0 %v4992_v13  ;;  %v881_v9 = vrot.slane %v879_v0, 4  ;;  %v4381_v13 = vld [vmem:[%s5347_s10 + $0x14] sm:$0x1] }
  0x2e   : > { %3336 = vmatpush.bf16.msrb.mxu1 %v5055_v14  ;;  %3603 = vmatpush.bf16.msrb.mxu0 %v5079_v15  ;;  %v286_v14 = vshll.u32 %v247_v4, 16  ;;  %v4999_v15 = vld [vmem:[%s5347_s10 + $0x54] sm:$0xff] }
  0x30   : > { %3426 = vmatpush.bf16.msrb.mxu2 %v5062_v16  ;;  %v273_v16 = vor.u32 %v272_v6, %v269_v5  ;;  %v651_v6 = vld [vmem:[%s5347_s10 + $0xc] sm:$0xe] }
  0x31   : > { %3515 = vmatpush.bf16.msrb.mxu3 %v5070_v17  ;;  %v283_v17 = vor.u32 %v282_v8, %v278_v7 }
  0x32   : > { %3337 = vmatpush.bf16.msrb.mxu1 %v5054_v18  ;;  %3604 = vmatpush.bf16.msrb.mxu0 %v5078_v19  ;;  %v719_v18 = vrot.slane %v5459_v53, 5  ;;  %v5003_v19 = vld [vmem:[%s5347_s10 + $0x84] sm:$0xff] }
  0x34   : > { %3427 = vmatpush.bf16.msrb.mxu2 %v5061_v20  ;;  %v650_v20 = vld [vmem:[%s5347_s10] sm:$0xe] }
  0x35   : > { %3516 = vmatpush.bf16.msrb.mxu3 %v5069_v21  ;;  %v885_v21 = vor.u32 %v884_v10, %v881_v9 }
  0x36   : > { %3338 = vmatpush.bf16.msrb.mxu1 %v5053_v22  ;;  %3605 = vmatpush.bf16.msrb.mxu0 %v5077_v23  ;;  %v895_v22 = vor.u32 %v894_v12, %v890_v11  ;;  %v898_v23 = vshll.u32 %v4381_v13, 16 }
  0x38   : > { %3428 = vmatpush.bf16.msrb.mxu2 %v5060_v24  ;;  %v5007_v24 = vld [vmem:[%s5347_s10 + $0xb4] sm:$0xff] }
  0x39   : > { %3517 = vmatpush.bf16.msrb.mxu3 %v5068_v25  ;;  %v4995_v25 = vld [vmem:[%s5347_s10 + $0x24] sm:$0xff] }
  0x3a   : > { %3339 = vmatpush.bf16.msrb.mxu1 %v5052_v26  ;;  %3606 = vmatpush.bf16.msrb.mxu0 %v5076_v27  ;;  %v288_v26 = vrot.slane %v286_v14, 5  ;;  %v217_v27 = vld [vmem:[%s5347_s10 + $0xc] sm:$0xf] }
  0x3b   : > { %3280 = vmatmul.bf16.gmra.mxu1 %v4997_v30  ;;  %3300 = vmatmul.bf16.gmra.mxu2 %v5001_v31  ;;  %v274_v30 = vrot.slane %v273_v16, 4  ;;  %v284_v31 = vrot.slane %v283_v17, 4  ;;  %v5008_v16 = vld [vmem:[%s5347_s10 + $0xc] sm:$0xff] }
  0x3c   : > { %3429 = vmatpush.bf16.msrb.mxu2 %v5059_v28  ;;  %3320 = vmatmul.bf16.gmra.mxu3 %v5005_v32  ;;  %v5487_v28 = vld [vmem:[%s5347_s10 + $0x10] sm:$0xf]  ;;  %v4333_v32 = vrot.slane %v650_v20, 9 }
  0x3d   : > { %3518 = vmatpush.bf16.msrb.mxu3 %v5067_v29  ;;  %3260 = vmatmul.bf16.gmra.mxu0 %v4993_v33  ;;  %v721_v33 = vrot.slane %v719_v18, 4  ;;  %v726_v5 = vrot.slane %v5487_v28, 5 }
  0x3e   : > { %3340 = vmatpush.bf16.msrb.mxu1 %v5051_v34  ;;  %3607 = vmatpush.bf16.msrb.mxu0 %v5075_v35  ;;  %v722_v35 = vrot.slane %v247_v4, 5 }
  0x3f   : > { %v728_v20 = vrot.slane %v726_v5, 4 }
  0x40   : > { %3430 = vmatpush.bf16.msrb.mxu2 %v5058_v36  ;;  %v886_v36 = vrot.slane %v885_v21, 4 }
  0x41   : > { %3519 = vmatpush.bf16.msrb.mxu3 %v5066_v37  ;;  %v896_v37 = vrot.slane %v895_v22, 4 }
  0x42   : > { %3341 = vmatpush.bf16.msrb.mxu1 %v5050_v38  ;;  %3608 = vmatpush.bf16.msrb.mxu0 %v5074_v39  ;;  %v900_v38 = vrot.slane %v898_v23, 5  ;;  %v291_v39 = vshrl.u32 %v217_v27, 16 }
  0x44   : > { %3431 = vmatpush.bf16.msrb.mxu2 %v5057_v40  ;;  %v294_v40 = vshll.u32 %v217_v27, 16  ;;  %v293_v52 = vrot.slane %v291_v39, 4  ;;  %v4353_v27 = vld [vmem:[%s5347_s10 + $0x24] sm:$0xf] }
  0x45   : > { %3520 = vmatpush.bf16.msrb.mxu3 %v5065_v41  ;;  %v300_v41 = vshll.u32 %v5487_v28, 16 }
  0x46   : > { %3342 = vmatpush.bf16.msrb.mxu1 %v5049_v42  ;;  %3609 = vmatpush.bf16.msrb.mxu0 %v5073_v43  ;;  %v304_v42 = vshrl.u32 %v5487_v28, 16  ;;  %v279_v43 = vsel %vm5490_vm4, %v274_v30, %v278_v7  ;;  %v296_v53 = vrot.slane %v294_v40, 5  ;;  %v4354_v28 = vld [vmem:[%s5347_s10 + $0x28] sm:$0xf] }
  0x47   : > { %v5515_v54 = vrot.slane %v300_v41, 5  ;;  %v2127_v60 = vunpack.c.l.b16 %v279_v43  ;;  %v5110_v41 = vld [vmem:[%s6773_s1 + $0x230] sm:$0xff] }
  0x48   : > { %3432 = vmatpush.bf16.msrb.mxu2 %v5056_v44  ;;  %v720_v44 = vsel %vm5494_vm5, %v4333_v32, %v719_v18  ;;  %v297_v3 = vor.u32 %v296_v53, %v293_v52 }
  0x49   : > { %3521 = vmatpush.bf16.msrb.mxu3 %v5064_v45  ;;  %v4351_v45 = vld [vmem:[%s5347_s10 + $0x18] sm:$0xf]  ;;  %v2191_v62 = vunpack.c.l.b16 %v720_v44 }
  0x4a   : > { %3343 = vmatpush.bf16.msrb.mxu1 %v5048_v46  ;;  %3610 = vmatpush.bf16.msrb.mxu0 %v5072_v47  ;;  %v4352_v46 = vld [vmem:[%s5347_s10 + $0x1c] sm:$0xf]  ;;  %v289_v47 = vsel %vm5490_vm4, %v284_v31, %v288_v26  ;;  %v903_v56 = vshrl.u32 %v4351_v45, 16  ;;  %v298_v17 = vrot.slane %v297_v3, 4  ;;  %v4383_v3 = vld [vmem:[%s5347_s10 + $0x2c] sm:$0x1] }
  0x4b   : > { %3285 = vmatmul.bf16.gmra.mxu1 %v4998_v48  ;;  %3305 = vmatmul.bf16.gmra.mxu2 %v5002_v49  ;;  %v723_v48 = vsel %vm5494_vm5, %v721_v33, %v722_v35  ;;  %v891_v49 = vsel %vm5490_vm4, %v886_v36, %v890_v11  ;;  %v2128_v61 = vunpack.c.l.b16 %v289_v47  ;;  %v4382_v11 = vld [vmem:[%s5347_s10 + $0x20] sm:$0x1]  ;;  %v5524_v26 = vld [vmem:[%s5347_s10 + $0x1c] sm:$0xf]  ;;  %v5094_v33 = vld [vmem:[%s6773_s1 + $0x1b0] sm:$0xff]  ;;  %v930_v47 = vshll.u32 %v4353_v27, 16 }
  0x4c   : > { %3325 = vmatmul.bf16.gmra.mxu3 %v5006_v50  ;;  %3781 = vmatpush.bf16.msra.mxu2 %v5095_v55  ;;  %v901_v50 = vsel %vm5490_vm4, %v896_v37, %v900_v38  ;;  %v306_v55 = vrot.slane %v304_v42, 4  ;;  %v2192_v63 = vunpack.c.l.b16 %v723_v48  ;;  %v2335_v0 = vunpack.c.l.b16 %v891_v49  ;;  %v5102_v35 = vld [vmem:[%s6773_s1 + $0x1f0] sm:$0xff] }
  0x4d   : > { %3265 = vmatmul.bf16.gmra.mxu0 %v4994_v51  ;;  %3870 = vmatpush.bf16.msra.mxu3 %v5103_v57  ;;  %v248_v51 = vld [vmem:[%s5347_s10 + $0x14] sm:$0x1]  ;;  %v906_v57 = vshll.u32 %v4351_v45, 16  ;;  %v2336_v1 = vunpack.c.l.b16 %v901_v50  ;;  %v905_v7 = vrot.slane %v903_v56, 4  ;;  %v2159_v12 = vpack.c.b16 %v2128_v61, %v2127_v60  ;;  %v249_v56 = vld [vmem:[%s5347_s10 + $0x20] sm:$0x1] }
  0x4e   : > { %3692 = vmatpush.bf16.msra.mxu1 %v5087_v58  ;;  %3959 = vmatpush.bf16.msra.mxu0 %v5111_v59  ;;  %v912_v58 = vshll.u32 %v4352_v46, 16  ;;  %v916_v59 = vshrl.u32 %v4352_v46, 16  ;;  %v310_v2 = vshll.u32 %v248_v51, 16  ;;  %v307_v4 = vor.u32 %v306_v55, %v5515_v54  ;;  %v5086_v36 = vld [vmem:[%s6773_s1 + $0x170] sm:$0xff] }
  0x4f   : > { %v908_v8 = vrot.slane %v906_v57, 5  ;;  %v2223_v13 = vpack.c.b16 %v2192_v63, %v2191_v62  ;;  %v2367_v14 = vpack.c.b16 %v2336_v1, %v2335_v0  ;;  %v729_v21 = vrot.slane %v248_v51, 5 }
  0x50   : > { %v914_v9 = vrot.slane %v912_v58, 5  ;;  %v918_v10 = vrot.slane %v916_v59, 4  ;;  %v308_v18 = vrot.slane %v307_v4, 4  ;;  %v303_v30 = vsel %vm5490_vm4, %v298_v17, %v5515_v54  ;;  %3782 = vmatpush.bf16.msra.mxu2 %v5094_v33  ;;  %v221_v17 = vld [vmem:[%s5347_s10 + $0x24] sm:$0xf] }
  0x51   : > { %v909_v22 = vor.u32 %v908_v8, %v905_v7  ;;  %v730_v37 = vsel %vm5494_vm5, %v728_v20, %v729_v21  ;;  %v324_v44 = vshll.u32 %v5524_v26, 16  ;;  %v328_v45 = vshrl.u32 %v5524_v26, 16  ;;  %3871 = vmatpush.bf16.msra.mxu3 %v5102_v35  ;;  %v4355_v35 = vld [vmem:[%s5347_s10 + $0x30] sm:$0xf] }
  0x52   : > { %v919_v23 = vor.u32 %v918_v10, %v914_v9  ;;  %v927_v46 = vshrl.u32 %v4353_v27, 16  ;;  %v936_v48 = vshll.u32 %v4354_v28, 16  ;;  %v940_v49 = vshrl.u32 %v4354_v28, 16  ;;  %3693 = vmatpush.bf16.msra.mxu1 %v5086_v36  ;;  %3960 = vmatpush.bf16.msra.mxu0 %v5110_v41  ;;  %v652_v10 = vld [vmem:[%s5347_s10 + $0x18] sm:$0xe] }
  0x53   : > { %v910_v38 = vrot.slane %v909_v22, 4  ;;  %v2129_v50 = vunpack.c.l.b16 %v303_v30  ;;  %v2194_v53 = vunpack.c.l.b16 %v730_v37  ;;  %v326_v59 = vrot.slane %v324_v44, 5  ;;  %v4356_v36 = vld [vmem:[%s5347_s10 + $0x34] sm:$0xf] }
  0x54   : > { %v920_v39 = vrot.slane %v919_v23, 4  ;;  %v330_v60 = vrot.slane %v328_v45, 4  ;;  %v929_v61 = vrot.slane %v927_v46, 4  ;;  %v932_v62 = vrot.slane %v930_v47, 5  ;;  %v5581_v45 = vld [vmem:[%s5347_s10 + $0x2c] sm:$0x1] }
  0x55   : > { %v915_v54 = vsel %vm5490_vm4, %v910_v38, %v914_v9  ;;  %v938_v63 = vrot.slane %v936_v48, 5  ;;  %v942_v0 = vrot.slane %v940_v49, 4  ;;  %v334_v4 = vshll.u32 %v249_v56, 16 }
  0x56   : > { %v2337_v1 = vunpack.c.l.b16 %v915_v54  ;;  %v331_v7 = vor.u32 %v330_v60, %v326_v59  ;;  %v733_v8 = vrot.slane %v5524_v26, 5  ;;  %v4335_v21 = vrot.slane %v652_v10, 9 }
  0x57   : > { %v736_v23 = vrot.slane %v249_v56, 5  ;;  %v339_v27 = vshrl.u32 %v221_v17, 16  ;;  %v342_v28 = vshll.u32 %v221_v17, 16  ;;  %v951_v46 = vshrl.u32 %v4355_v35, 16 }
  0x58   : > { %v332_v20 = vrot.slane %v331_v7, 4  ;;  %v735_v22 = vrot.slane %v733_v8, 4  ;;  %v734_v37 = vsel %vm5494_vm5, %v4335_v21, %v733_v8  ;;  %v954_v47 = vshll.u32 %v4355_v35, 16 }
  0x59   : > { %v341_v41 = vrot.slane %v339_v27, 4  ;;  %v960_v48 = vshll.u32 %v4356_v36, 16  ;;  %v964_v49 = vshrl.u32 %v4356_v36, 16  ;;  %v743_v17 = vrot.slane %v5581_v45, 5 }
  0x5a   : > { %v737_v38 = vsel %vm5494_vm5, %v735_v22, %v736_v23  ;;  %v956_v60 = vrot.slane %v954_v47, 5 }
  0x5b   : > { %3290 = vmatmul.bf16.gmra.mxu1 %v4999_v15  ;;  %3310 = vmatmul.bf16.gmra.mxu2 %v5003_v19  ;;  %v312_v15 = vrot.slane %v310_v2, 5  ;;  %v4334_v19 = vrot.slane %v651_v6, 9 }
  0x5c   : > { %3330 = vmatmul.bf16.gmra.mxu3 %v5007_v24  ;;  %v922_v24 = vshll.u32 %v4382_v11, 16  ;;  %v933_v11 = vor.u32 %v932_v62, %v929_v61  ;;  %v962_v61 = vrot.slane %v960_v48, 5  ;;  %v966_v62 = vrot.slane %v964_v49, 4 }
  0x5d   : > { %3270 = vmatmul.bf16.gmra.mxu0 %v4995_v25  ;;  %v219_v25 = vld [vmem:[%s5347_s10 + $0x18] sm:$0xf]  ;;  %v313_v31 = vsel %vm5490_vm4, %v308_v18, %v312_v15  ;;  %v727_v32 = vsel %vm5494_vm5, %v4334_v19, %v726_v5  ;;  %v5562_v18 = vld [vmem:[%s5347_s10 + $0x28] sm:$0xf] }
  0x5e   : > { %v924_v40 = vrot.slane %v922_v24, 5  ;;  %v315_v42 = vshrl.u32 %v219_v25, 16  ;;  %v318_v43 = vshll.u32 %v219_v25, 16  ;;  %v2130_v51 = vunpack.c.l.b16 %v313_v31 }
  0x5f   : > { %v2193_v52 = vunpack.c.l.b16 %v727_v32  ;;  %v934_v24 = vrot.slane %v933_v11, 4  ;;  %v348_v30 = vshll.u32 %v5562_v18, 16  ;;  %v352_v31 = vshrl.u32 %v5562_v18, 16 }
  0x60   : > { %v925_v55 = vsel %vm5490_vm4, %v920_v39, %v924_v40  ;;  %v317_v57 = vrot.slane %v315_v42, 4  ;;  %v320_v58 = vrot.slane %v318_v43, 5  ;;  %v2160_v5 = vpack.c.b16 %v2130_v51, %v2129_v50 }
  0x61   : > { %v2338_v2 = vunpack.c.l.b16 %v925_v55  ;;  %v2224_v9 = vpack.c.b16 %v2194_v53, %v2193_v52  ;;  %v939_v39 = vsel %vm5490_vm4, %v934_v24, %v938_v63  ;;  %v344_v42 = vrot.slane %v342_v28, 5 }
  0x62   : > { %v321_v6 = vor.u32 %v320_v58, %v317_v57  ;;  %v350_v43 = vrot.slane %v348_v30, 5  ;;  %v354_v44 = vrot.slane %v352_v31, 4  ;;  %v2195_v52 = vunpack.c.l.b16 %v734_v37  ;;  %v4358_v30 = vld [vmem:[%s5347_s10 + $0x40] sm:$0xf] }
  0x63   : > { %v2368_v15 = vpack.c.b16 %v2338_v2, %v2337_v1  ;;  %v2196_v53 = vunpack.c.l.b16 %v737_v38  ;;  %v2339_v54 = vunpack.c.l.b16 %v939_v39  ;;  %v345_v56 = vor.u32 %v344_v42, %v341_v41  ;;  %v5010_v2 = vld [vmem:[%s5347_s10 + $0x24] sm:$0xff] }
  0x64   : > { %v322_v19 = vrot.slane %v321_v6, 4  ;;  %v355_v57 = vor.u32 %v354_v44, %v350_v43  ;;  %v358_v58 = vshll.u32 %v5581_v45, 16  ;;  %v653_v6 = vld [vmem:[%s5347_s10 + $0x24] sm:$0xe]  ;;  %v740_v7 = vrot.slane %v5562_v18, 5  ;;  %v5093_v18 = vld [vmem:[%s6773_s1 + $0x1a8] sm:$0xff] }
  0x65   : > { %v2225_v1 = vpack.c.b16 %v2196_v53, %v2195_v52  ;;  %v967_v10 = vor.u32 %v966_v62, %v962_v61  ;;  %3783 = vmatpush.bf16.msra.mxu2 %v5093_v18  ;;  %v984_v41 = vshll.u32 %v4358_v30, 16  ;;  %v988_v42 = vshrl.u32 %v4358_v30, 16 }
  0x66   : > { %v327_v32 = vsel %vm5490_vm4, %v322_v19, %v326_v59  ;;  %v953_v59 = vrot.slane %v951_v46, 4  ;;  %v356_v8 = vrot.slane %v355_v57, 4  ;;  %v4357_v19 = vld [vmem:[%s5347_s10 + $0x3c] sm:$0xf] }
  0x67   : > { %v2131_v50 = vunpack.c.l.b16 %v327_v32  ;;  %v968_v23 = vrot.slane %v967_v10, 4  ;;  %v975_v31 = vshrl.u32 %v4357_v19, 16  ;;  %v978_v32 = vshll.u32 %v4357_v19, 16 }
  0x69   : > { %v980_v52 = vrot.slane %v978_v32, 5 }
  0x6b   : > { %3344 = vmatmul.bf16.vlgmr.msrb.gmra.mxu1 %v2159_v12  ;;  %3433 = vmatmul.bf16.vlgmr.msrb.gmra.mxu2 %v2223_v13  ;;  %v943_v12 = vor.u32 %v942_v0, %v938_v63  ;;  %v946_v13 = vshll.u32 %v4383_v3, 16  ;;  %v4384_v63 = vld [vmem:[%s5347_s10 + $0x38] sm:$0x1] }
  0x6c   : > { %3522 = vmatmul.bf16.vlgmr.msrb.gmra.mxu3 %v5008_v16  ;;  %v336_v16 = vrot.slane %v334_v4, 5  ;;  %v346_v4 = vrot.slane %v345_v56, 4  ;;  %v970_v11 = vshll.u32 %v4384_v63, 16  ;;  %v990_v56 = vrot.slane %v988_v42, 4  ;;  %v654_v63 = vld [vmem:[%s5347_s10 + $0x30] sm:$0xe] }
  0x6d   : > { %3611 = vmatmul.bf16.vlgmr.msrb.gmra.mxu0 %v2367_v14  ;;  %v5009_v14 = vld [vmem:[%s5347_s10 + $0x18] sm:$0xff]  ;;  %v944_v25 = vrot.slane %v943_v12, 4  ;;  %v948_v26 = vrot.slane %v946_v13, 5  ;;  %v4336_v12 = vrot.slane %v653_v6, 9  ;;  %v223_v13 = vld [vmem:[%s5347_s10 + $0x30] sm:$0xf] }
  0x6e   : > { %v337_v33 = vsel %vm5490_vm4, %v332_v20, %v336_v16  ;;  %v742_v16 = vrot.slane %v740_v7, 4  ;;  %v5101_v20 = vld [vmem:[%s6773_s1 + $0x1e8] sm:$0xff]  ;;  %v972_v24 = vrot.slane %v970_v11, 5  ;;  %v225_v6 = vld [vmem:[%s5347_s10 + $0x3c] sm:$0xf]  ;;  %v4337_v10 = vrot.slane %v654_v63, 9 }
  0x6f   : > { %v949_v40 = vsel %vm5490_vm4, %v944_v25, %v948_v26  ;;  %v2132_v51 = vunpack.c.l.b16 %v337_v33  ;;  %v363_v25 = vshrl.u32 %v223_v13, 16  ;;  %v366_v26 = vshll.u32 %v223_v13, 16  ;;  %3872 = vmatpush.bf16.msra.mxu3 %v5101_v20  ;;  %v5085_v33 = vld [vmem:[%s6773_s1 + $0x168] sm:$0xff]  ;;  %v5628_v11 = vld [vmem:[%s5347_s10 + $0x40] sm:$0xf] }
  0x70   : > { %v2340_v55 = vunpack.c.l.b16 %v949_v40  ;;  %v741_v37 = vsel %vm5494_vm5, %v4336_v12, %v740_v7  ;;  %v744_v38 = vsel %vm5494_vm5, %v742_v16, %v743_v17  ;;  %v973_v40 = vsel %vm5490_vm4, %v968_v23, %v972_v24  ;;  %3694 = vmatpush.bf16.msra.mxu1 %v5085_v33  ;;  %v4359_v17 = vld [vmem:[%s5347_s10 + $0x48] sm:$0xf]  ;;  %v252_v42 = vld [vmem:[%s5347_s10 + $0x44] sm:$0x1] }
  0x71   : > { %v2161_v0 = vpack.c.b16 %v2132_v51, %v2131_v50  ;;  %v365_v44 = vrot.slane %v363_v25, 4  ;;  %v368_v45 = vrot.slane %v366_v26, 5  ;;  %v2197_v48 = vunpack.c.l.b16 %v741_v37  ;;  %v251_v50 = vld [vmem:[%s5347_s10 + $0x38] sm:$0x1] }
  0x72   : > { %v2369_v3 = vpack.c.b16 %v2340_v55, %v2339_v54  ;;  %v2198_v49 = vunpack.c.l.b16 %v744_v38  ;;  %v977_v51 = vrot.slane %v975_v31, 4  ;;  %v2342_v54 = vunpack.c.l.b16 %v973_v40 }
  0x73   : > { %v986_v55 = vrot.slane %v984_v41, 5  ;;  %v369_v57 = vor.u32 %v368_v45, %v365_v44  ;;  %v750_v13 = vrot.slane %v251_v50, 5  ;;  %v390_v16 = vshll.u32 %v225_v6, 16 }
  0x74   : > { %v2226_v62 = vpack.c.b16 %v2198_v49, %v2197_v48  ;;  %v396_v20 = vshll.u32 %v5628_v11, 16  ;;  %v1002_v30 = vshll.u32 %v4359_v17, 16 }
  0x75   : > { %v370_v7 = vrot.slane %v369_v57, 4  ;;  %v392_v32 = vrot.slane %v390_v16, 5  ;;  %v5100_v16 = vld [vmem:[%s6773_s1 + $0x1e0] sm:$0xff] }
  0x76   : > { %v5646_v37 = vrot.slane %v396_v20, 5  ;;  %3873 = vmatpush.bf16.msra.mxu3 %v5100_v16 }
  0x7b   : > { %3349 = vmatmul.bf16.gmra.mxu1 %v2160_v5  ;;  %3438 = vmatmul.bf16.gmra.mxu2 %v2224_v9  ;;  %v360_v5 = vrot.slane %v358_v58, 5  ;;  %v957_v9 = vor.u32 %v956_v60, %v953_v59  ;;  %v382_v59 = vshll.u32 %v251_v50, 16  ;;  %v4385_v60 = vld [vmem:[%s5347_s10 + $0x44] sm:$0x1] }
  0x7c   : > { %3527 = vmatmul.bf16.gmra.mxu3 %v5009_v14  ;;  %v5590_v14 = vld [vmem:[%s5347_s10 + $0x34] sm:$0xf] }
  0x7d   : > { %3616 = vmatmul.bf16.gmra.mxu0 %v2368_v15  ;;  %v351_v15 = vsel %vm5490_vm4, %v346_v4, %v350_v43  ;;  %v361_v21 = vsel %vm5490_vm4, %v356_v8, %v360_v5  ;;  %v958_v22 = vrot.slane %v957_v9, 4  ;;  %v372_v27 = vshll.u32 %v5590_v14, 16  ;;  %v5109_v43 = vld [vmem:[%s6773_s1 + $0x228] sm:$0xff] }
  0x7e   : > { %v376_v28 = vshrl.u32 %v5590_v14, 16  ;;  %v2133_v35 = vunpack.c.l.b16 %v351_v15  ;;  %v2134_v36 = vunpack.c.l.b16 %v361_v21  ;;  %3961 = vmatpush.bf16.msra.mxu0 %v5109_v43  ;;  %v991_v4 = vor.u32 %v990_v56, %v986_v55 }
  0x7f   : > { %v963_v39 = vsel %vm5490_vm4, %v958_v22, %v962_v61  ;;  %v374_v46 = vrot.slane %v372_v27, 5  ;;  %v994_v5 = vshll.u32 %v4385_v60, 16  ;;  %v384_v9 = vrot.slane %v382_v59, 5  ;;  %v4360_v22 = vld [vmem:[%s5347_s10 + $0x4c] sm:$0xf]  ;;  %v5012_v60 = vld [vmem:[%s5347_s10 + $0x3c] sm:$0xff] }
  0x80   : > { %v378_v47 = vrot.slane %v376_v28, 4  ;;  %v2341_v53 = vunpack.c.l.b16 %v963_v39  ;;  %v2162_v61 = vpack.c.b16 %v2134_v36, %v2133_v35  ;;  %v992_v18 = vrot.slane %v991_v4, 4 }
  0x81   : > { %v996_v19 = vrot.slane %v994_v5, 5  ;;  %v400_v21 = vshrl.u32 %v5628_v11, 16  ;;  %v375_v23 = vsel %vm5490_vm4, %v370_v7, %v374_v46  ;;  %v999_v28 = vshrl.u32 %v4359_v17, 16  ;;  %v227_v7 = vld [vmem:[%s5347_s10 + $0x48] sm:$0xf] }
  0x82   : > { %v379_v58 = vor.u32 %v378_v47, %v374_v46  ;;  %v1008_v33 = vshll.u32 %v4360_v22, 16  ;;  %v1012_v35 = vshrl.u32 %v4360_v22, 16  ;;  %v2135_v39 = vunpack.c.l.b16 %v375_v23 }
  0x83   : > { %v997_v36 = vsel %vm5490_vm4, %v992_v18, %v996_v19  ;;  %v402_v38 = vrot.slane %v400_v21, 4  ;;  %v1001_v45 = vrot.slane %v999_v28, 4  ;;  %v1004_v46 = vrot.slane %v1002_v30, 5 }
  0x84   : > { %v380_v8 = vrot.slane %v379_v58, 4  ;;  %v2344_v47 = vunpack.c.l.b16 %v997_v36  ;;  %v5649_v49 = vrot.slane %v1008_v33, 5  ;;  %v1014_v50 = vrot.slane %v1012_v35, 4 }
  0x85   : > { %v1005_v58 = vor.u32 %v1004_v46, %v1001_v45  ;;  %v411_v17 = vshrl.u32 %v227_v7, 16  ;;  %v414_v18 = vshll.u32 %v227_v7, 16  ;;  %v253_v46 = vld [vmem:[%s5347_s10 + $0x50] sm:$0x1] }
  0x86   : > { %v385_v24 = vsel %vm5490_vm4, %v380_v8, %v384_v9  ;;  %v1015_v63 = vor.u32 %v1014_v50, %v5649_v49  ;;  %v5663_v8 = vld [vmem:[%s5347_s10 + $0x4c] sm:$0xf] }
  0x87   : > { %v2136_v40 = vunpack.c.l.b16 %v385_v24  ;;  %v1006_v9 = vrot.slane %v1005_v58, 4  ;;  %v420_v19 = vshll.u32 %v5663_v8, 16  ;;  %v424_v20 = vshrl.u32 %v5663_v8, 16 }
  0x89   : > { %v2163_v56 = vpack.c.b16 %v2136_v40, %v2135_v39  ;;  %v1011_v33 = vsel %vm5490_vm4, %v1006_v9, %v5649_v49  ;;  %v5700_v39 = vrot.slane %v420_v19, 5  ;;  %v426_v40 = vrot.slane %v424_v20, 4 }
  0x8b   : > { %3354 = vmatmul.bf16.gmra.mxu1 %v2161_v0  ;;  %3443 = vmatmul.bf16.gmra.mxu2 %v2225_v1  ;;  %v747_v0 = vrot.slane %v5590_v14, 5  ;;  %v981_v1 = vor.u32 %v980_v52, %v977_v51  ;;  %v387_v14 = vshrl.u32 %v225_v6, 16  ;;  %v403_v51 = vor.u32 %v402_v38, %v5646_v37 }
  0x8c   : > { %3532 = vmatmul.bf16.gmra.mxu3 %v5010_v2  ;;  %v5011_v2 = vld [vmem:[%s5347_s10 + $0x30] sm:$0xff]  ;;  %v406_v52 = vshll.u32 %v252_v42, 16  ;;  %v757_v6 = vrot.slane %v252_v42, 5  ;;  %v416_v38 = vrot.slane %v414_v18, 5  ;;  %v5724_v18 = vld [vmem:[%s5347_s10 + $0x58] sm:$0xf] }
  0x8d   : > { %3621 = vmatmul.bf16.gmra.mxu0 %v2369_v3  ;;  %v2370_v3 = vpack.c.b16 %v2342_v54, %v2341_v53  ;;  %v749_v12 = vrot.slane %v747_v0, 4  ;;  %v982_v15 = vrot.slane %v981_v1, 4  ;;  %v748_v25 = vsel %vm5494_vm5, %v4337_v10, %v747_v0  ;;  %v4386_v53 = vld [vmem:[%s5347_s10 + $0x50] sm:$0x1]  ;;  %v655_v54 = vld [vmem:[%s5347_s10 + $0x3c] sm:$0xe] }
  0x8e   : > { %v389_v31 = vrot.slane %v387_v14, 4  ;;  %v2199_v41 = vunpack.c.l.b16 %v748_v25  ;;  %v1018_v0 = vshll.u32 %v4386_v53, 16  ;;  %v4338_v4 = vrot.slane %v655_v54, 9  ;;  %v4361_v10 = vld [vmem:[%s5347_s10 + $0x54] sm:$0xf] }
  0x8f   : > { %v751_v26 = vsel %vm5494_vm5, %v749_v12, %v750_v13  ;;  %v987_v27 = vsel %vm5490_vm4, %v982_v15, %v986_v55  ;;  %v754_v55 = vrot.slane %v5628_v11, 5  ;;  %v1016_v12 = vrot.slane %v1015_v63, 4  ;;  %v5092_v15 = vld [vmem:[%s6773_s1 + $0x1a0] sm:$0xff]  ;;  %v4362_v14 = vld [vmem:[%s5347_s10 + $0x58] sm:$0xf] }
  0x90   : > { %v2200_v43 = vunpack.c.l.b16 %v751_v26  ;;  %v2343_v44 = vunpack.c.l.b16 %v987_v27  ;;  %v393_v48 = vor.u32 %v392_v32, %v389_v31  ;;  %v1020_v13 = vrot.slane %v1018_v0, 5  ;;  %3784 = vmatpush.bf16.msra.mxu2 %v5092_v15  ;;  %v5084_v31 = vld [vmem:[%s6773_s1 + $0x160] sm:$0xff]  ;;  %v4387_v53 = vld [vmem:[%s5347_s10 + $0x5c] sm:$0x1]  ;;  %v656_v63 = vld [vmem:[%s5347_s10 + $0x48] sm:$0xe] }
  0x91   : > { %v756_v5 = vrot.slane %v754_v55, 4  ;;  %v755_v23 = vsel %vm5494_vm5, %v4338_v4, %v754_v55  ;;  %v1023_v26 = vshrl.u32 %v4361_v10, 16  ;;  %v1026_v27 = vshll.u32 %v4361_v10, 16  ;;  %3695 = vmatpush.bf16.msra.mxu1 %v5084_v31 }
  0x92   : > { %v2227_v57 = vpack.c.b16 %v2200_v43, %v2199_v41  ;;  %v1032_v28 = vshll.u32 %v4362_v14, 16  ;;  %v1036_v30 = vshrl.u32 %v4362_v14, 16  ;;  %v1021_v35 = vsel %vm5490_vm4, %v1016_v12, %v1020_v13  ;;  %v5108_v41 = vld [vmem:[%s6773_s1 + $0x220] sm:$0xff] }
  0x93   : > { %v758_v24 = vsel %vm5494_vm5, %v756_v5, %v757_v6  ;;  %3962 = vmatpush.bf16.msra.mxu0 %v5108_v41  ;;  %v427_v55 = vor.u32 %v426_v40, %v5700_v39  ;;  %v5013_v5 = vld [vmem:[%s5347_s10 + $0x48] sm:$0xff]  ;;  %v764_v13 = vrot.slane %v253_v46, 5 }
  0x94   : > { %v2202_v45 = vunpack.c.l.b16 %v758_v24  ;;  %v5706_v49 = vrot.slane %v1032_v28, 5  ;;  %v1038_v50 = vrot.slane %v1036_v30, 4 }
  0x95   : > { %v428_v10 = vrot.slane %v427_v55, 4  ;;  %v254_v55 = vld [vmem:[%s5347_s10 + $0x5c] sm:$0x1] }
  0x9b   : > { %3359 = vmatmul.bf16.gmra.mxu1 %v2162_v61  ;;  %3448 = vmatmul.bf16.gmra.mxu2 %v2226_v62  ;;  %v2371_v61 = vpack.c.b16 %v2344_v47, %v2343_v44  ;;  %v394_v62 = vrot.slane %v393_v48, 4  ;;  %v2201_v44 = vunpack.c.l.b16 %v755_v23  ;;  %v1025_v47 = vrot.slane %v1023_v26, 4  ;;  %v4364_v23 = vld [vmem:[%s5347_s10 + $0x64] sm:$0xf] }
  0x9c   : > { %3537 = vmatmul.bf16.gmra.mxu3 %v5011_v2  ;;  %v404_v2 = vrot.slane %v403_v51, 4  ;;  %v1028_v48 = vrot.slane %v1026_v27, 5  ;;  %v2345_v51 = vunpack.c.l.b16 %v1011_v33 }
  0x9d   : > { %3626 = vmatmul.bf16.gmra.mxu0 %v2370_v3  ;;  %v408_v3 = vrot.slane %v406_v52, 5  ;;  %v399_v11 = vsel %vm5490_vm4, %v394_v62, %v5646_v37  ;;  %v413_v37 = vrot.slane %v411_v17, 4  ;;  %v2346_v52 = vunpack.c.l.b16 %v1021_v35  ;;  %v229_v17 = vld [vmem:[%s5347_s10 + $0x54] sm:$0xf] }
  0x9e   : > { %v2137_v42 = vunpack.c.l.b16 %v399_v11  ;;  %v2228_v62 = vpack.c.b16 %v2202_v45, %v2201_v44  ;;  %v1029_v0 = vor.u32 %v1028_v48, %v1025_v47  ;;  %v4339_v11 = vrot.slane %v656_v63, 9  ;;  %v4388_v63 = vld [vmem:[%s5347_s10 + $0x68] sm:$0x1] }
  0x9f   : > { %v409_v22 = vsel %vm5490_vm4, %v404_v2, %v408_v3  ;;  %v417_v54 = vor.u32 %v416_v38, %v413_v37  ;;  %v1039_v2 = vor.u32 %v1038_v50, %v5706_v49  ;;  %v1042_v3 = vshll.u32 %v4387_v53, 16 }
  0xa0   : > { %v2138_v43 = vunpack.c.l.b16 %v409_v22  ;;  %v2372_v6 = vpack.c.b16 %v2346_v52, %v2345_v51  ;;  %v1030_v15 = vrot.slane %v1029_v0, 4  ;;  %v4363_v22 = vld [vmem:[%s5347_s10 + $0x60] sm:$0xf]  ;;  %v435_v28 = vshrl.u32 %v229_v17, 16 }
  0xa1   : > { %v418_v9 = vrot.slane %v417_v54, 4  ;;  %v1040_v14 = vrot.slane %v1039_v2, 4  ;;  %v1044_v16 = vrot.slane %v1042_v3, 5  ;;  %v438_v30 = vshll.u32 %v229_v17, 16 }
  0xa2   : > { %v2164_v58 = vpack.c.b16 %v2138_v43, %v2137_v42  ;;  %v1035_v33 = vsel %vm5490_vm4, %v1030_v15, %v5706_v49  ;;  %v444_v37 = vshll.u32 %v5724_v18, 16  ;;  %v448_v38 = vshrl.u32 %v5724_v18, 16  ;;  %v657_v15 = vld [vmem:[%s5347_s10 + $0x54] sm:$0xe] }
  0xa3   : > { %v423_v19 = vsel %vm5490_vm4, %v418_v9, %v5700_v39  ;;  %v1045_v35 = vsel %vm5490_vm4, %v1040_v14, %v1044_v16  ;;  %v1047_v40 = vshrl.u32 %v4363_v22, 16  ;;  %v1050_v41 = vshll.u32 %v4363_v22, 16  ;;  %v231_v22 = vld [vmem:[%s5347_s10 + $0x60] sm:$0xf] }
  0xa4   : > { %v1056_v42 = vshll.u32 %v4364_v23, 16  ;;  %v1060_v43 = vshrl.u32 %v4364_v23, 16  ;;  %v2139_v45 = vunpack.c.l.b16 %v423_v19  ;;  %v437_v49 = vrot.slane %v435_v28, 4  ;;  %v5773_v28 = vld [vmem:[%s5347_s10 + $0x64] sm:$0xf] }
  0xa5   : > { %v440_v50 = vrot.slane %v438_v30, 5  ;;  %v2347_v51 = vunpack.c.l.b16 %v1035_v33  ;;  %v2348_v52 = vunpack.c.l.b16 %v1045_v35  ;;  %v5752_v53 = vrot.slane %v444_v37, 5 }
  0xa6   : > { %v450_v54 = vrot.slane %v448_v38, 4  ;;  %v1066_v17 = vshll.u32 %v4388_v63, 16  ;;  %v771_v30 = vrot.slane %v254_v55, 5  ;;  %v5091_v38 = vld [vmem:[%s6773_s1 + $0x198] sm:$0xff] }
  0xa7   : > { %v441_v3 = vor.u32 %v440_v50, %v437_v49  ;;  %3785 = vmatpush.bf16.msra.mxu2 %v5091_v38  ;;  %v4389_v38 = vld [vmem:[%s5347_s10 + $0x74] sm:$0x1] }
  0xa8   : > { %v5655_v59 = vpop.f32.mrf.mxu1  ;;  %v451_v9 = vor.u32 %v450_v54, %v5752_v53  ;;  %v1068_v37 = vrot.slane %v1066_v17, 5  ;;  %v255_v17 = vld [vmem:[%s5347_s10 + $0x68] sm:$0x1] }
  0xaa   : > { %v5659_v1 = vpop.f32.mrf.mxu0  ;;  %v452_v23 = vrot.slane %v451_v9, 4  ;;  %v5107_v9 = vld [vmem:[%s6773_s1 + $0x218] sm:$0xff] }
  0xab   : > { %3364 = vmatmul.bf16.gmra.mxu1 %v2163_v56  ;;  %3453 = vmatmul.bf16.gmra.mxu2 %v2227_v57  ;;  %v430_v56 = vshll.u32 %v253_v46, 16 }
  0xac   : > { %3542 = vmatmul.bf16.gmra.mxu3 %v5012_v60  ;;  %v761_v60 = vrot.slane %v5663_v8, 5  ;;  %3963 = vmatpush.bf16.msra.mxu0 %v5107_v9  ;;  %v778_v9 = vrot.slane %v255_v17, 5 }
  0xad   : > { %3631 = vmatmul.bf16.gmra.mxu0 %v2371_v61  ;;  %v432_v8 = vrot.slane %v430_v56, 5  ;;  %v1049_v56 = vrot.slane %v1047_v40, 4  ;;  %v5099_v40 = vld [vmem:[%s6773_s1 + $0x1d8] sm:$0xff] }
  0xae   : > { %v5678_v21 = vpop.f32.mrf.mxu2  ;;  %v763_v12 = vrot.slane %v761_v60, 4  ;;  %v762_v26 = vsel %vm5494_vm5, %v4339_v11, %v761_v60  ;;  %v5755_v60 = vrot.slane %v1056_v42, 5  ;;  %v462_v42 = vshll.u32 %v231_v22, 16  ;;  %3874 = vmatpush.bf16.msra.mxu3 %v5099_v40 }
  0xaf   : > { %v5686_v25 = vpop.f32.mrf.mxu3  ;;  %v433_v20 = vsel %vm5490_vm4, %v428_v10, %v432_v8  ;;  %v2203_v47 = vunpack.c.l.b16 %v762_v26  ;;  %v454_v10 = vshll.u32 %v254_v55, 16  ;;  %v768_v8 = vrot.slane %v5724_v18, 5 }
  0xb0   : > { %v5691_v32 = vpop.f32.mrf.mxu1  ;;  %v765_v27 = vsel %vm5494_vm5, %v763_v12, %v764_v13  ;;  %v2140_v46 = vunpack.c.l.b16 %v433_v20  ;;  %v5014_v12 = vld [vmem:[%s5347_s10 + $0x54] sm:$0xff]  ;;  %v2373_v13 = vpack.c.b16 %v2348_v52, %v2347_v51  ;;  %v442_v20 = vrot.slane %v441_v3, 4 }
  0xb1   : > { %v2204_v48 = vunpack.c.l.b16 %v765_v27  ;;  %v456_v26 = vrot.slane %v454_v10, 5  ;;  %v4340_v27 = vrot.slane %v657_v15, 9  ;;  %v770_v18 = vrot.slane %v768_v8, 4 }
  0xb2   : > { %v5698_v36 = vpop.f32.mrf.mxu0  ;;  %v2165_v2 = vpack.c.b16 %v2140_v46, %v2139_v45  ;;  %v468_v45 = vshll.u32 %v5773_v28, 16  ;;  %v472_v46 = vshrl.u32 %v5773_v28, 16  ;;  %v447_v50 = vsel %vm5490_vm4, %v442_v20, %v5752_v53 }
  0xb3   : > { %v457_v51 = vsel %vm5490_vm4, %v452_v23, %v456_v26  ;;  %v769_v54 = vsel %vm5494_vm5, %v4340_v27, %v768_v8  ;;  %v772_v55 = vsel %vm5494_vm5, %v770_v18, %v771_v30 }
  0xb4   : > { %v5813_v8 = vrot.slane %v468_v45, 5  ;;  %v2142_v15 = vunpack.c.l.b16 %v457_v51  ;;  %v775_v45 = vrot.slane %v5773_v28, 5 }
  0xb6   : > { %v5710_v57 = vpop.f32.mrf.mxu2 }
  0xb7   : > { %v5713_v61 = vpop.f32.mrf.mxu3 }
  0xb8   : > { %6781 = vst [vmem:[#allocation2_spill] sm:$0xff] %v5713_v61  ;;  %v5717_v4 = vpop.f32.mrf.mxu1 }
  0xba   : > { %v5720_v7 = vpop.f32.mrf.mxu0 }
  0xbb   : > { %3369 = vmatmul.bf16.gmra.mxu1 %v2164_v58  ;;  %3458 = vmatmul.bf16.gmra.mxu2 %v2228_v62  ;;  %v1052_v58 = vrot.slane %v1050_v41, 5  ;;  %v1062_v62 = vrot.slane %v1060_v43, 4  ;;  %v459_v41 = vshrl.u32 %v231_v22, 16 }
  0xbc   : > { %3547 = vmatmul.bf16.gmra.mxu3 %v5013_v5 }
  0xbd   : > { %3636 = vmatmul.bf16.gmra.mxu0 %v2372_v6  ;;  %v2229_v6 = vpack.c.b16 %v2204_v48, %v2203_v47  ;;  %v1053_v14 = vor.u32 %v1052_v58, %v1049_v56  ;;  %v1063_v16 = vor.u32 %v1062_v62, %v5755_v60  ;;  %v4365_v47 = vld [vmem:[%s5347_s10 + $0x6c] sm:$0xf]  ;;  %v4366_v48 = vld [vmem:[%s5347_s10 + $0x70] sm:$0xf]  ;;  %v461_v10 = vrot.slane %v459_v41, 4 }
  0xbe   : > { %v5733_v24 = vpop.f32.mrf.mxu2  ;;  %v1071_v62 = vshrl.u32 %v4365_v47, 16  ;;  %v1074_v63 = vshll.u32 %v4365_v47, 16  ;;  %v1084_v3 = vshrl.u32 %v4366_v48, 16  ;;  %v5015_v47 = vld [vmem:[%s5347_s10 + $0x60] sm:$0xff] }
  0xbf   : > { %v5739_v31 = vpop.f32.mrf.mxu3  ;;  %v1054_v33 = vrot.slane %v1053_v14, 4  ;;  %v1064_v35 = vrot.slane %v1063_v16, 4  ;;  %v2205_v14 = vunpack.c.l.b16 %v769_v54  ;;  %v2206_v16 = vunpack.c.l.b16 %v772_v55 }
  0xc0   : > { %6782 = vst [vmem:[#allocation3_spill] sm:$0xff] %v5739_v31  ;;  %v5748_v39 = vpop.f32.mrf.mxu1  ;;  %v1073_v23 = vrot.slane %v1071_v62, 4  ;;  %v1076_v26 = vrot.slane %v1074_v63, 5  ;;  %v1086_v18 = vrot.slane %v1084_v3, 4  ;;  %v5834_v62 = vld [vmem:[%s5347_s10 + $0x70] sm:$0xf] }
  0xc1   : > { %v1059_v56 = vsel %vm5490_vm4, %v1054_v33, %v5755_v60  ;;  %v1069_v58 = vsel %vm5490_vm4, %v1064_v35, %v1068_v37  ;;  %v464_v60 = vrot.slane %v462_v42, 5  ;;  %v478_v37 = vshll.u32 %v255_v17, 16 }
  0xc2   : > { %v5750_v44 = vpop.f32.mrf.mxu0  ;;  %v2349_v20 = vunpack.c.l.b16 %v1059_v56  ;;  %v2350_v22 = vunpack.c.l.b16 %v1069_v58  ;;  %v2230_v42 = vpack.c.b16 %v2206_v16, %v2205_v14  ;;  %v1077_v54 = vor.u32 %v1076_v26, %v1073_v23  ;;  %v233_v58 = vld [vmem:[%s5347_s10 + $0x6c] sm:$0xf]  ;;  %v4368_v26 = vld [vmem:[%s5347_s10 + $0x7c] sm:$0xf] }
  0xc3   : > { %v465_v33 = vor.u32 %v464_v60, %v461_v10  ;;  %v1090_v56 = vshll.u32 %v4389_v38, 16  ;;  %v480_v3 = vrot.slane %v478_v37, 5  ;;  %v483_v10 = vshrl.u32 %v233_v58, 16 }
  0xc4   : > { %v486_v60 = vshll.u32 %v233_v58, 16  ;;  %v1078_v14 = vrot.slane %v1077_v54, 4 }
  0xc5   : > { %v466_v63 = vrot.slane %v465_v33, 4 }
  0xc6   : > { %v5758_v0 = vpop.f32.mrf.mxu2 }
  0xc7   : > { %v5760_v5 = vpop.f32.mrf.mxu3  ;;  %v471_v23 = vsel %vm5490_vm4, %v466_v63, %v5813_v8 }
  0xc8   : > { %6783 = vst [vmem:[#allocation4_spill] sm:$0xff] %v5760_v5  ;;  %v5764_v11 = vpop.f32.mrf.mxu1  ;;  %v2143_v58 = vunpack.c.l.b16 %v471_v23  ;;  %v4390_v23 = vld [vmem:[%s5347_s10 + $0x80] sm:$0x1] }
  0xca   : > { %v5769_v19 = vpop.f32.mrf.mxu0 }
  0xcb   : > { %3374 = vmatmul.bf16.gmra.mxu1 %v2165_v2  ;;  %3463 = vmatmul.bf16.gmra.mxu2 %v2229_v6  ;;  %v1080_v2 = vshll.u32 %v4366_v48, 16  ;;  %v5083_v6 = vld [vmem:[%s6773_s1 + $0x158] sm:$0xff]  ;;  %v2374_v48 = vpack.c.b16 %v2350_v22, %v2349_v20  ;;  %v1092_v20 = vrot.slane %v1090_v56, 5  ;;  %v1108_v56 = vshrl.u32 %v4368_v26, 16 }
  0xcc   : > { %3552 = vmatmul.bf16.gmra.mxu3 %v5014_v12  ;;  %v474_v12 = vrot.slane %v472_v46, 4  ;;  %3696 = vmatpush.bf16.msra.mxu1 %v5083_v6  ;;  %v777_v6 = vrot.slane %v775_v45, 4 }
  0xcd   : > { %3641 = vmatmul.bf16.gmra.mxu0 %v2373_v13  ;;  %v2141_v13 = vunpack.c.l.b16 %v447_v50  ;;  %v5816_v27 = vrot.slane %v1080_v2, 5  ;;  %v658_v50 = vld [vmem:[%s5347_s10 + $0x60] sm:$0xe] }
  0xce   : > { %v5781_v43 = vpop.f32.mrf.mxu2  ;;  %v475_v35 = vor.u32 %v474_v12, %v5813_v8  ;;  %v4341_v28 = vrot.slane %v658_v50, 9  ;;  %v492_v12 = vshll.u32 %v5834_v62, 16 }
  0xcf   : > { %v5787_v49 = vpop.f32.mrf.mxu3  ;;  %v2166_v41 = vpack.c.b16 %v2142_v15, %v2141_v13  ;;  %v1087_v55 = vor.u32 %v1086_v18, %v5816_v27  ;;  %v496_v13 = vshrl.u32 %v5834_v62, 16  ;;  %v4367_v15 = vld [vmem:[%s5347_s10 + $0x78] sm:$0xf]  ;;  %v1083_v54 = vsel %vm5490_vm4, %v1078_v14, %v5816_v27 }
  0xd0   : > { %6784 = vst [vmem:[#allocation5_spill] sm:$0xff] %v5787_v49  ;;  %v5794_v52 = vpop.f32.mrf.mxu1  ;;  %v476_v2 = vrot.slane %v475_v35, 4  ;;  %v776_v33 = vsel %vm5494_vm5, %v4341_v28, %v775_v45  ;;  %v779_v35 = vsel %vm5494_vm5, %v777_v6, %v778_v9  ;;  %v1095_v37 = vshrl.u32 %v4367_v15, 16 }
  0xd1   : > { %v1088_v16 = vrot.slane %v1087_v55, 4  ;;  %v1098_v38 = vshll.u32 %v4367_v15, 16  ;;  %v5855_v8 = vrot.slane %v492_v12, 5  ;;  %v1104_v55 = vshll.u32 %v4368_v26, 16 }
  0xd2   : > { %v5805_v53 = vpop.f32.mrf.mxu0  ;;  %v481_v17 = vsel %vm5490_vm4, %v476_v2, %v480_v3  ;;  %v5865_v2 = vld [vmem:[%s5347_s10 + $0x74] sm:$0x1]  ;;  %v2207_v3 = vunpack.c.l.b16 %v776_v33  ;;  %v2208_v28 = vunpack.c.l.b16 %v779_v35  ;;  %v1097_v6 = vrot.slane %v1095_v37, 4  ;;  %v659_v35 = vld [vmem:[%s5347_s10 + $0x6c] sm:$0xe] }
  0xd3   : > { %v1093_v45 = vsel %vm5490_vm4, %v1088_v16, %v1092_v20  ;;  %v2144_v63 = vunpack.c.l.b16 %v481_v17  ;;  %v1100_v9 = vrot.slane %v1098_v38, 5  ;;  %v5869_v15 = vrot.slane %v1104_v55, 5 }
  0xd4   : > { %v1110_v14 = vrot.slane %v1108_v56, 4  ;;  %v782_v20 = vrot.slane %v5834_v62, 5  ;;  %v2231_v33 = vpack.c.b16 %v2208_v28, %v2207_v3  ;;  %v785_v28 = vrot.slane %v5865_v2, 5 }
  0xd5   : > { %v2167_v26 = vpack.c.b16 %v2144_v63, %v2143_v58  ;;  %v1101_v37 = vor.u32 %v1100_v9, %v1097_v6  ;;  %v5885_v58 = vld [vmem:[%s5347_s10 + $0x7c] sm:$0xf]  ;;  %v4342_v63 = vrot.slane %v659_v35, 9  ;;  %v4369_v9 = vld [vmem:[%s5347_s10 + $0x84] sm:$0xf] }
  0xd6   : > { %v5818_v30 = vpop.f32.mrf.mxu2  ;;  %v1111_v56 = vor.u32 %v1110_v14, %v5869_v15  ;;  %v784_v3 = vrot.slane %v782_v20, 4  ;;  %v5098_v14 = vld [vmem:[%s6773_s1 + $0x1d0] sm:$0xff]  ;;  %v1119_v35 = vshrl.u32 %v4369_v9, 16 }
  0xd7   : > { %v5822_v40 = vpop.f32.mrf.mxu3  ;;  %v1102_v6 = vrot.slane %v1101_v37, 4  ;;  %v1122_v37 = vshll.u32 %v4369_v9, 16  ;;  %3875 = vmatpush.bf16.msra.mxu3 %v5098_v14  ;;  %v783_v49 = vsel %vm5494_vm5, %v4342_v63, %v782_v20  ;;  %v257_v63 = vld [vmem:[%s5347_s10 + $0x80] sm:$0x1] }
  0xd8   : > { %6785 = vst [vmem:[#allocation6_spill] sm:$0xff] %v5822_v40  ;;  %v5825_v46 = vpop.f32.mrf.mxu1 }
  0xda   : > { %v5829_v51 = vpop.f32.mrf.mxu0 }
  0xdb   : > { %3379 = vmatmul.bf16.gmra.mxu1 %v2166_v41  ;;  %3468 = vmatmul.bf16.gmra.mxu2 %v2230_v42  ;;  %v485_v42 = vrot.slane %v483_v10, 4  ;;  %v2351_v10 = vunpack.c.l.b16 %v1083_v54 }
  0xdc   : > { %3557 = vmatmul.bf16.gmra.mxu3 %v5015_v47  ;;  %v488_v47 = vrot.slane %v486_v60, 5  ;;  %v2352_v60 = vunpack.c.l.b16 %v1093_v45 }
  0xdd   : > { %3646 = vmatmul.bf16.gmra.mxu0 %v2374_v48  ;;  %v498_v48 = vrot.slane %v496_v13, 4  ;;  %v502_v13 = vshll.u32 %v5865_v2, 16 }
  0xde   : > { %v5839_v22 = vpop.f32.mrf.mxu2  ;;  %v489_v12 = vor.u32 %v488_v47, %v485_v42  ;;  %v5016_v42 = vld [vmem:[%s5347_s10 + $0x6c] sm:$0xff]  ;;  %v2375_v47 = vpack.c.b16 %v2352_v60, %v2351_v10  ;;  %v4370_v10 = vld [vmem:[%s5347_s10 + $0x88] sm:$0xf] }
  0xdf   : > { %v5847_v18 = vpop.f32.mrf.mxu3  ;;  %v499_v27 = vor.u32 %v498_v48, %v5855_v8  ;;  %v504_v62 = vrot.slane %v502_v13, 5  ;;  %v5090_v13 = vld [vmem:[%s6773_s1 + $0x190] sm:$0xff] }
  0xe0   : > { %6786 = vst [vmem:[#allocation7_spill] sm:$0xff] %v5847_v18  ;;  %v5853_v41 = vpop.f32.mrf.mxu1  ;;  %v490_v48 = vrot.slane %v489_v12, 4  ;;  %v235_v18 = vld [vmem:[%s5347_s10 + $0x78] sm:$0xf]  ;;  %v516_v12 = vshll.u32 %v5885_v58, 16  ;;  %3786 = vmatpush.bf16.msra.mxu2 %v5090_v13 }
  0xe1   : > { %v500_v54 = vrot.slane %v499_v27, 4  ;;  %v510_v60 = vshll.u32 %v235_v18, 16  ;;  %v520_v27 = vshrl.u32 %v5885_v58, 16 }
  0xe2   : > { %v5857_v50 = vpop.f32.mrf.mxu0  ;;  %v495_v2 = vsel %vm5490_vm4, %v490_v48, %v5855_v8  ;;  %v786_v8 = vsel %vm5494_vm5, %v784_v3, %v785_v28  ;;  %v5106_v3 = vld [vmem:[%s6773_s1 + $0x210] sm:$0xff]  ;;  %v1121_v28 = vrot.slane %v1119_v35, 4  ;;  %v789_v35 = vrot.slane %v5885_v58, 5 }
  0xe3   : > { %v522_v9 = vrot.slane %v520_v27, 4  ;;  %v2145_v14 = vunpack.c.l.b16 %v495_v2  ;;  %v4391_v2 = vld [vmem:[%s5347_s10 + $0x8c] sm:$0x1]  ;;  %3964 = vmatpush.bf16.msra.mxu0 %v5106_v3  ;;  %v5017_v3 = vld [vmem:[%s5347_s10 + $0x78] sm:$0xff] }
  0xe6   : > { %v5871_v16 = vpop.f32.mrf.mxu2 }
  0xe7   : > { %v5875_v17 = vpop.f32.mrf.mxu3 }
  0xe8   : > { %6787 = vst [vmem:[#allocation8_spill] sm:$0xff] %v5875_v17  ;;  %v3345_v38 = vpop.f32.mrf.mxu1  ;;  %v1114_v17 = vshll.u32 %v4390_v23, 16  ;;  %v505_v23 = vsel %vm5490_vm4, %v500_v54, %v504_v62  ;;  %v512_v62 = vrot.slane %v510_v60, 5  ;;  %v2209_v60 = vunpack.c.l.b16 %v783_v49 }
  0xe9   : > { %v3346_v45 = vadd.f32 %v3345_v38, %v5659_v1  ;;  %v507_v1 = vshrl.u32 %v235_v18, 16  ;;  %v1112_v18 = vrot.slane %v1111_v56, 4  ;;  %v1128_v38 = vshll.u32 %v4370_v10, 16 }
  0xea   : > { %v5880_v55 = vpop.f32.mrf.mxu0  ;;  %v5910_v56 = vrot.slane %v516_v12, 5  ;;  %v2210_v12 = vunpack.c.l.b16 %v786_v8 }
  0xeb   : > { %3384 = vmatmul.bf16.gmra.mxu1 %v2167_v26  ;;  %3473 = vmatmul.bf16.gmra.mxu2 %v2231_v33  ;;  %v1116_v26 = vrot.slane %v1114_v17, 5  ;;  %v1107_v17 = vsel %vm5490_vm4, %v1102_v6, %v5869_v15  ;;  %v509_v54 = vrot.slane %v507_v1, 4  ;;  %v5082_v15 = vld [vmem:[%s6773_s1 + $0x150] sm:$0xff]  ;;  %v1124_v6 = vrot.slane %v1122_v37, 5 }
  0xec   : > { %3562 = vmatmul.bf16.gmra.mxu3 %v5016_v42  ;;  %v1132_v42 = vshrl.u32 %v4370_v10, 16  ;;  %v2146_v1 = vunpack.c.l.b16 %v505_v23  ;;  %v2353_v27 = vunpack.c.l.b16 %v1107_v17  ;;  %3697 = vmatpush.bf16.msra.mxu1 %v5082_v15  ;;  %v1138_v23 = vshll.u32 %v4391_v2, 16 }
  0xed   : > { %3651 = vmatmul.bf16.gmra.mxu0 %v2375_v47  ;;  %v1117_v20 = vsel %vm5490_vm4, %v1112_v18, %v1116_v26  ;;  %v513_v26 = vor.u32 %v512_v62, %v509_v54  ;;  %v2232_v5 = vpack.c.b16 %v2210_v12, %v2209_v60  ;;  %v237_v60 = vld [vmem:[%s5347_s10 + $0x84] sm:$0xf]  ;;  %v5935_v12 = vld [vmem:[%s5347_s10 + $0x88] sm:$0xf] }
  0xee   : > { %v3434_v33 = vpop.f32.mrf.mxu2  ;;  %v2354_v18 = vunpack.c.l.b16 %v1117_v20  ;;  %v2168_v17 = vpack.c.b16 %v2146_v1, %v2145_v14  ;;  %v1140_v1 = vrot.slane %v1138_v23, 5 }
  0xef   : > { %v3435_v47 = vadd.f32 %v3434_v33, %v3346_v45  ;;  %v3523_v40 = vpop.f32.mrf.mxu3  ;;  %v523_v33 = vor.u32 %v522_v9, %v5910_v56  ;;  %v514_v54 = vrot.slane %v513_v26, 4  ;;  %v531_v26 = vshrl.u32 %v237_v60, 16 }
  0xf0   : > { %v3347_v48 = vpop.f32.mrf.mxu1  ;;  %v2376_v20 = vpack.c.b16 %v2354_v18, %v2353_v27 }
  0xf1   : > { %v3524_v10 = vadd.f32 %v3523_v40, %v3435_v47  ;;  %v3348_v45 = vadd.f32 %v3347_v48, %v5698_v36  ;;  %v5922_v40 = vrot.slane %v1128_v38, 5  ;;  %v1134_v36 = vrot.slane %v1132_v42, 4  ;;  %v660_v48 = vld [vmem:[%s5347_s10 + $0x78] sm:$0xe] }
  0xf2   : > { %v3614_v13 = vpop.f32.mrf.mxu0  ;;  %v526_v47 = vshll.u32 %v257_v63, 16  ;;  %v1125_v38 = vor.u32 %v1124_v6, %v1121_v28  ;;  %v524_v62 = vrot.slane %v523_v33, 4  ;;  %v4343_v28 = vrot.slane %v660_v48, 9 }
  0xf3   : > { %v1135_v42 = vor.u32 %v1134_v36, %v5922_v40  ;;  %v791_v6 = vrot.slane %v789_v35, 4  ;;  %v5938_v27 = vadd.f32 %v5880_v55, %v3524_v10  ;;  %v534_v33 = vshll.u32 %v237_v60, 16 }
  0xf4   : > { %v528_v9 = vrot.slane %v526_v47, 5  ;;  %v1126_v36 = vrot.slane %v1125_v38, 4  ;;  %v4372_v47 = vld [vmem:[%s5347_s10 + $0x94] sm:$0xf] }
  0xf5   : > { %v1136_v14 = vrot.slane %v1135_v42, 4 }
  0xf6   : > { %v3436_v37 = vpop.f32.mrf.mxu2  ;;  %v529_v18 = vsel %vm5490_vm4, %v524_v62, %v528_v9  ;;  %v1131_v10 = vsel %vm5490_vm4, %v1126_v36, %v5922_v40  ;;  %v536_v62 = vrot.slane %v534_v33, 5 }
  0xf7   : > { %v3437_v49 = vadd.f32 %v3436_v37, %v3348_v45  ;;  %v3525_v8 = vpop.f32.mrf.mxu3  ;;  %v792_v45 = vrot.slane %v257_v63, 5  ;;  %v4371_v63 = vld [vmem:[%s5347_s10 + $0x90] sm:$0xf] }
  0xf8   : > { %v3350_v15 = vpop.f32.mrf.mxu1  ;;  %v1143_v38 = vshrl.u32 %v4371_v63, 16  ;;  %v1146_v42 = vshll.u32 %v4371_v63, 16 }
  0xf9   : > { %v3526_v31 = vadd.f32 %v3525_v8, %v3437_v49  ;;  %v3351_v58 = vadd.f32 %v3350_v15, %v5720_v7  ;;  %v519_v7 = vsel %vm5490_vm4, %v514_v54, %v5910_v56  ;;  %v1141_v56 = vsel %vm5490_vm4, %v1136_v14, %v1140_v1 }
  0xfa   : > { %v5931_v61 = vpop.f32.mrf.mxu0  ;;  %v2147_v49 = vunpack.c.l.b16 %v519_v7  ;;  %v2148_v8 = vunpack.c.l.b16 %v529_v18  ;;  %v1156_v15 = vshrl.u32 %v4372_v47, 16  ;;  %v533_v54 = vrot.slane %v531_v26, 4  ;;  %v661_v26 = vld [vmem:[%s5347_s10 + $0x84] sm:$0xe] }
  0xfb   : > { %3389 = vmatmul.bf16.gmra.mxu1 %v2168_v17  ;;  %3478 = vmatmul.bf16.gmra.mxu2 %v2232_v5  ;;  %v5940_v2 = vadd.f32 %v3614_v13, %v3526_v31  ;;  %v790_v5 = vsel %vm5494_vm5, %v4343_v28, %v789_v35  ;;  %v793_v31 = vsel %vm5494_vm5, %v791_v6, %v792_v45  ;;  %v540_v13 = vshll.u32 %v5935_v12, 16  ;;  %v258_v45 = vld [vmem:[%s5347_s10 + $0x8c] sm:$0x1] }
  0xfc   : > { %3567 = vmatmul.bf16.gmra.mxu3 %v5017_v3  ;;  %v544_v35 = vshrl.u32 %v5935_v12, 16  ;;  %v1152_v17 = vshll.u32 %v4372_v47, 16  ;;  %v2211_v9 = vunpack.c.l.b16 %v790_v5  ;;  %v2355_v28 = vunpack.c.l.b16 %v1131_v10  ;;  %v4392_v47 = vld [vmem:[%s5347_s10 + $0x98] sm:$0x1] }
  0xfd   : > { %3656 = vmatmul.bf16.gmra.mxu0 %v2376_v20  ;;  %v2356_v6 = vunpack.c.l.b16 %v1141_v56  ;;  %v5962_v36 = vrot.slane %v540_v13, 5  ;;  %v1145_v1 = vrot.slane %v1143_v38, 4  ;;  %v1148_v60 = vrot.slane %v1146_v42, 5 }
  0xfe   : > { %v3439_v55 = vpop.f32.mrf.mxu2  ;;  %v546_v14 = vrot.slane %v544_v35, 4  ;;  %v796_v7 = vrot.slane %v5935_v12, 5  ;;  %v5965_v63 = vrot.slane %v1152_v17, 5  ;;  %v537_v18 = vor.u32 %v536_v62, %v533_v54  ;;  %v5018_v12 = vld [vmem:[%s5347_s10 + $0x84] sm:$0xff] }
  0xff   : > { %v3440_v37 = vadd.f32 %v3439_v55, %v3351_v58  ;;  %v3528_v48 = vpop.f32.mrf.mxu3  ;;  %v2212_v58 = vunpack.c.l.b16 %v793_v31  ;;  %v2169_v5 = vpack.c.b16 %v2148_v8, %v2147_v49  ;;  %v550_v31 = vshll.u32 %v258_v45, 16 }
 0x100   : > { %v3352_v23 = vpop.f32.mrf.mxu1  ;;  %v2377_v13 = vpack.c.b16 %v2356_v6, %v2355_v28  ;;  %v4344_v38 = vrot.slane %v661_v26, 9  ;;  %v798_v42 = vrot.slane %v796_v7, 4  ;;  %v1162_v17 = vshll.u32 %v4392_v47, 16  ;;  %v5977_v6 = vld [vmem:[%s5347_s10 + $0x94] sm:$0xf]  ;;  %v5097_v47 = vld [vmem:[%s6773_s1 + $0x1c8] sm:$0xff] }
 0x101   : > { %v3529_v3 = vadd.f32 %v3528_v48, %v3440_v37  ;;  %v3353_v40 = vadd.f32 %v3352_v23, %v5750_v44  ;;  %v1158_v44 = vrot.slane %v1156_v15, 4  ;;  %v2233_v55 = vpack.c.b16 %v2212_v58, %v2211_v9  ;;  %v239_v9 = vld [vmem:[%s5347_s10 + $0x90] sm:$0xf]  ;;  %v4374_v26 = vld [vmem:[%s5347_s10 + $0xa0] sm:$0xf]  ;;  %3876 = vmatpush.bf16.msra.mxu3 %v5097_v47 }
 0x102   : > { %v3619_v20 = vpop.f32.mrf.mxu0  ;;  %v547_v37 = vor.u32 %v546_v14, %v5962_v36  ;;  %v1149_v48 = vor.u32 %v1148_v60, %v1145_v1  ;;  %v799_v54 = vrot.slane %v258_v45, 5  ;;  %v552_v62 = vrot.slane %v550_v31, 5  ;;  %v4373_v14 = vld [vmem:[%s5347_s10 + $0x9c] sm:$0xf] }
 0x103   : > { %v1159_v23 = vor.u32 %v1158_v44, %v5965_v63  ;;  %v5981_v1 = vadd.f32 %v5931_v61, %v3529_v3  ;;  %v1164_v44 = vrot.slane %v1162_v17, 5  ;;  %v1167_v31 = vshrl.u32 %v4373_v14, 16 }
 0x104   : > { %v548_v58 = vrot.slane %v547_v37, 4  ;;  %v1150_v28 = vrot.slane %v1149_v48, 4  ;;  %v800_v3 = vsel %vm5494_vm5, %v798_v42, %v799_v54  ;;  %v1176_v37 = vshll.u32 %v4374_v26, 16 }
 0x105   : > { %v1160_v45 = vrot.slane %v1159_v23, 4  ;;  %v1180_v48 = vshrl.u32 %v4374_v26, 16 }
 0x106   : > { %v3441_v33 = vpop.f32.mrf.mxu2  ;;  %v1155_v42 = vsel %vm5490_vm4, %v1150_v28, %v5965_v63  ;;  %v5105_v63 = vld [vmem:[%s6773_s1 + $0x208] sm:$0xff] }
 0x107   : > { %v3442_v10 = vadd.f32 %v3441_v33, %v3353_v40  ;;  %v3530_v56 = vpop.f32.mrf.mxu3  ;;  %v538_v40 = vrot.slane %v537_v18, 4  ;;  %v5089_v18 = vld [vmem:[%s6773_s1 + $0x188] sm:$0xff]  ;;  %v1165_v23 = vsel %vm5490_vm4, %v1160_v45, %v1164_v44  ;;  %v6020_v44 = vrot.slane %v1176_v37, 5  ;;  %3965 = vmatpush.bf16.msra.mxu0 %v5105_v63  ;;  %v241_v63 = vld [vmem:[%s5347_s10 + $0x9c] sm:$0xf] }
 0x108   : > { %v3355_v35 = vpop.f32.mrf.mxu1  ;;  %3787 = vmatpush.bf16.msra.mxu2 %v5089_v18  ;;  %v1182_v18 = vrot.slane %v1180_v48, 4  ;;  %v2357_v26 = vunpack.c.l.b16 %v1155_v42  ;;  %v2358_v47 = vunpack.c.l.b16 %v1165_v23  ;;  %v5019_v42 = vld [vmem:[%s5347_s10 + $0x90] sm:$0xff] }
 0x109   : > { %v3531_v15 = vadd.f32 %v3530_v56, %v3442_v10  ;;  %v3356_v49 = vadd.f32 %v3355_v35, %v5769_v19  ;;  %v797_v19 = vsel %vm5494_vm5, %v4344_v38, %v796_v7  ;;  %v543_v61 = vsel %vm5490_vm4, %v538_v40, %v5962_v36  ;;  %v6010_v40 = vld [vmem:[%s5347_s10 + $0x98] sm:$0x1] }
 0x10a   : > { %v5973_v8 = vpop.f32.mrf.mxu0  ;;  %v558_v7 = vshll.u32 %v239_v9, 16  ;;  %v1170_v10 = vshll.u32 %v4373_v14, 16  ;;  %v553_v36 = vsel %vm5490_vm4, %v548_v58, %v552_v62  ;;  %v2214_v38 = vunpack.c.l.b16 %v800_v3 }
 0x10b   : > { %3394 = vmatmul.bf16.gmra.mxu1 %v2169_v5  ;;  %3483 = vmatmul.bf16.gmra.mxu2 %v2233_v55  ;;  %v5983_v60 = vadd.f32 %v3619_v20, %v3531_v15  ;;  %v555_v20 = vshrl.u32 %v239_v9, 16  ;;  %v564_v5 = vshll.u32 %v5977_v6, 16  ;;  %v568_v55 = vshrl.u32 %v5977_v6, 16  ;;  %v5081_v9 = vld [vmem:[%s6773_s1 + $0x148] sm:$0xff] }
 0x10c   : > { %3572 = vmatmul.bf16.gmra.mxu3 %v5018_v12  ;;  %v2213_v12 = vunpack.c.l.b16 %v797_v19  ;;  %v560_v62 = vrot.slane %v558_v7, 5  ;;  %v1169_v14 = vrot.slane %v1167_v31, 4  ;;  %v1172_v19 = vrot.slane %v1170_v10, 5  ;;  %3698 = vmatpush.bf16.msra.mxu1 %v5081_v9 }
 0x10d   : > { %3661 = vmatmul.bf16.gmra.mxu0 %v2377_v13  ;;  %v557_v54 = vrot.slane %v555_v20, 4  ;;  %v6018_v58 = vrot.slane %v564_v5, 5  ;;  %v570_v28 = vrot.slane %v568_v55, 4  ;;  %v2150_v45 = vunpack.c.l.b16 %v553_v36  ;;  %v4393_v20 = vld [vmem:[%s5347_s10 + $0xa4] sm:$0x1] }
 0x10e   : > { %v3444_v33 = vpop.f32.mrf.mxu2  ;;  %v574_v3 = vshll.u32 %v6010_v40, 16  ;;  %v803_v7 = vrot.slane %v5977_v6, 5  ;;  %v2234_v5 = vpack.c.b16 %v2214_v38, %v2213_v12  ;;  %v1173_v10 = vor.u32 %v1172_v19, %v1169_v14 }
 0x10f   : > { %v3445_v56 = vadd.f32 %v3444_v33, %v3356_v49  ;;  %v3533_v13 = vpop.f32.mrf.mxu3  ;;  %v561_v55 = vor.u32 %v560_v62, %v557_v54  ;;  %v571_v31 = vor.u32 %v570_v28, %v6018_v58  ;;  %v1183_v37 = vor.u32 %v1182_v18, %v6020_v44 }
 0x110   : > { %v3357_v35 = vpop.f32.mrf.mxu1  ;;  %v1186_v48 = vshll.u32 %v4393_v20, 16  ;;  %v2378_v23 = vpack.c.b16 %v2358_v47, %v2357_v26  ;;  %v576_v6 = vrot.slane %v574_v3, 5  ;;  %v805_v62 = vrot.slane %v803_v7, 4  ;;  %v4376_v47 = vld [vmem:[%s5347_s10 + $0xac] sm:$0xf] }
 0x111   : > { %v3534_v17 = vadd.f32 %v3533_v13, %v3445_v56  ;;  %v3358_v15 = vadd.f32 %v3357_v35, %v5805_v53  ;;  %v2149_v53 = vunpack.c.l.b16 %v543_v61  ;;  %v662_v61 = vld [vmem:[%s5347_s10 + $0x90] sm:$0xe]  ;;  %v562_v28 = vrot.slane %v561_v55, 4 }
 0x112   : > { %v3624_v49 = vpop.f32.mrf.mxu0  ;;  %v4345_v54 = vrot.slane %v662_v61, 9  ;;  %v572_v14 = vrot.slane %v571_v31, 4  ;;  %v806_v19 = vrot.slane %v6010_v40, 5  ;;  %v1184_v18 = vrot.slane %v1183_v37, 4 }
 0x113   : > { %v2170_v36 = vpack.c.b16 %v2150_v45, %v2149_v53  ;;  %v1174_v53 = vrot.slane %v1173_v10, 4  ;;  %v4375_v45 = vld [vmem:[%s5347_s10 + $0xa8] sm:$0xf]  ;;  %v1188_v26 = vrot.slane %v1186_v48, 5  ;;  %v579_v20 = vshrl.u32 %v241_v63, 16 }
 0x114   : > { %v804_v31 = vsel %vm5494_vm5, %v4345_v54, %v803_v7  ;;  %v1194_v61 = vshll.u32 %v4375_v45, 16  ;;  %v577_v37 = vsel %vm5490_vm4, %v572_v14, %v576_v6 }
 0x115   : > { %v1179_v7 = vsel %vm5490_vm4, %v1174_v53, %v6020_v44  ;;  %v1189_v48 = vsel %vm5490_vm4, %v1184_v18, %v1188_v26  ;;  %v2215_v14 = vunpack.c.l.b16 %v804_v31  ;;  %v2152_v18 = vunpack.c.l.b16 %v577_v37 }
 0x116   : > { %v3446_v33 = vpop.f32.mrf.mxu2  ;;  %v2359_v26 = vunpack.c.l.b16 %v1179_v7  ;;  %v243_v7 = vld [vmem:[%s5347_s10 + $0xa8] sm:$0xf] }
 0x117   : > { %v3447_v56 = vadd.f32 %v3446_v33, %v3358_v15  ;;  %v3535_v13 = vpop.f32.mrf.mxu3  ;;  %v6034_v15 = vld [vmem:[%s5347_s10 + $0xa0] sm:$0xf]  ;;  %v582_v33 = vshll.u32 %v241_v63, 16  ;;  %v260_v63 = vld [vmem:[%s5347_s10 + $0xa4] sm:$0x1] }
 0x118   : > { %v3360_v35 = vpop.f32.mrf.mxu1  ;;  %v588_v55 = vshll.u32 %v6034_v15, 16  ;;  %v592_v40 = vshrl.u32 %v6034_v15, 16 }
 0x119   : > { %v3536_v9 = vadd.f32 %v3535_v13, %v3447_v56  ;;  %v3361_v12 = vadd.f32 %v3360_v35, %v5829_v51  ;;  %v6040_v51 = vadd.f32 %v5973_v8, %v3534_v17  ;;  %v567_v8 = vsel %vm5490_vm4, %v562_v28, %v6018_v58 }
 0x11a   : > { %v6030_v38 = vpop.f32.mrf.mxu0  ;;  %v807_v17 = vsel %vm5494_vm5, %v805_v62, %v806_v19  ;;  %v1204_v56 = vshrl.u32 %v4376_v47, 16  ;;  %v581_v58 = vrot.slane %v579_v20, 4  ;;  %v1196_v28 = vrot.slane %v1194_v61, 5  ;;  %v4394_v20 = vld [vmem:[%s5347_s10 + $0xb0] sm:$0x1] }
 0x11b   : > { %3399 = vmatmul.bf16.gmra.mxu1 %v2170_v36  ;;  %3488 = vmatmul.bf16.gmra.mxu2 %v2234_v5  ;;  %v6042_v3 = vadd.f32 %v3624_v49, %v3536_v9  ;;  %v1191_v5 = vshrl.u32 %v4375_v45, 16  ;;  %v1200_v49 = vshll.u32 %v4376_v47, 16  ;;  %v594_v9 = vrot.slane %v592_v40, 4 }
 0x11c   : > { %3577 = vmatmul.bf16.gmra.mxu3 %v5019_v42  ;;  %v584_v42 = vrot.slane %v582_v33, 5  ;;  %v2216_v44 = vunpack.c.l.b16 %v807_v17  ;;  %v1206_v53 = vrot.slane %v1204_v56, 4  ;;  %v2151_v45 = vunpack.c.l.b16 %v567_v8 }
 0x11d   : > { %6788 = vst [vmem:[#allocation9_spill] sm:$0xff] %v6042_v3  ;;  %3666 = vmatmul.bf16.gmra.mxu0 %v2378_v23  ;;  %v6060_v23 = vrot.slane %v588_v55, 5  ;;  %v1193_v6 = vrot.slane %v1191_v5, 4  ;;  %v6064_v19 = vrot.slane %v1200_v49, 5  ;;  %v2360_v47 = vunpack.c.l.b16 %v1189_v48  ;;  %v663_v5 = vld [vmem:[%s5347_s10 + $0x9c] sm:$0xe] }
 0x11e   : > { %v3449_v10 = vpop.f32.mrf.mxu2  ;;  %v598_v33 = vshll.u32 %v260_v63, 16  ;;  %v585_v55 = vor.u32 %v584_v42, %v581_v58  ;;  %v1210_v17 = vshll.u32 %v4394_v20, 16  ;;  %v2171_v56 = vpack.c.b16 %v2152_v18, %v2151_v45 }
 0x11f   : > { %v3450_v13 = vadd.f32 %v3449_v10, %v3361_v12  ;;  %v3538_v36 = vpop.f32.mrf.mxu3  ;;  %v595_v40 = vor.u32 %v594_v9, %v6060_v23  ;;  %v1197_v61 = vor.u32 %v1196_v28, %v1193_v6  ;;  %v1207_v10 = vor.u32 %v1206_v53, %v6064_v19  ;;  %v6074_v9 = vld [vmem:[%s5347_s10 + $0xac] sm:$0xf] }
 0x120   : > { %v3362_v35 = vpop.f32.mrf.mxu1  ;;  %v2379_v37 = vpack.c.b16 %v2360_v47, %v2359_v26  ;;  %v813_v42 = vrot.slane %v260_v63, 5  ;;  %v586_v3 = vrot.slane %v585_v55, 4  ;;  %v603_v45 = vshrl.u32 %v243_v7, 16  ;;  %v5088_v47 = vld [vmem:[%s6773_s1 + $0x180] sm:$0xff] }
 0x121   : > { %v3539_v54 = vadd.f32 %v3538_v36, %v3450_v13  ;;  %v3363_v12 = vadd.f32 %v3362_v35, %v5857_v50  ;;  %v810_v50 = vrot.slane %v6034_v15, 5  ;;  %v2235_v13 = vpack.c.b16 %v2216_v44, %v2215_v14  ;;  %v5020_v36 = vld [vmem:[%s5347_s10 + $0x9c] sm:$0xff]  ;;  %3788 = vmatpush.bf16.msra.mxu2 %v5088_v47 }
 0x122   : > { %v3629_v62 = vpop.f32.mrf.mxu0  ;;  %v600_v35 = vrot.slane %v598_v33, 5  ;;  %v4346_v15 = vrot.slane %v663_v5, 9  ;;  %v596_v53 = vrot.slane %v595_v40, 4  ;;  %v1198_v20 = vrot.slane %v1197_v61, 4  ;;  %v5096_v33 = vld [vmem:[%s6773_s1 + $0x1c0] sm:$0xff] }
 0x123   : > { %v812_v58 = vrot.slane %v810_v50, 4  ;;  %v606_v14 = vshll.u32 %v243_v7, 16  ;;  %v612_v44 = vshll.u32 %v6074_v9, 16  ;;  %v616_v63 = vshrl.u32 %v6074_v9, 16  ;;  %v4378_v5 = vld [vmem:[%s5347_s10 + $0xb8] sm:$0xf]  ;;  %3877 = vmatpush.bf16.msra.mxu3 %v5096_v33 }
 0x124   : > { %v6081_v18 = vadd.f32 %v6030_v38, %v3539_v54  ;;  %v591_v40 = vsel %vm5490_vm4, %v586_v3, %v6060_v23  ;;  %v811_v38 = vsel %vm5494_vm5, %v4346_v15, %v810_v50  ;;  %v664_v33 = vld [vmem:[%s5347_s10 + $0xa8] sm:$0xe] }
 0x125   : > { %v814_v54 = vsel %vm5494_vm5, %v812_v58, %v813_v42  ;;  %v2217_v58 = vunpack.c.l.b16 %v811_v38 }
 0x126   : > { %v3451_v31 = vpop.f32.mrf.mxu2  ;;  %v2218_v42 = vunpack.c.l.b16 %v814_v54 }
 0x127   : > { %v3452_v8 = vadd.f32 %v3451_v31, %v3363_v12  ;;  %v3540_v49 = vpop.f32.mrf.mxu3  ;;  %v1208_v12 = vrot.slane %v1207_v10, 4  ;;  %v1212_v31 = vrot.slane %v1210_v17, 5  ;;  %v601_v10 = vsel %vm5490_vm4, %v596_v53, %v600_v35  ;;  %v5104_v53 = vld [vmem:[%s6773_s1 + $0x200] sm:$0xff] }
 0x128   : > { %v3365_v48 = vpop.f32.mrf.mxu1  ;;  %v605_v17 = vrot.slane %v603_v45, 4  ;;  %v1228_v35 = vshrl.u32 %v4378_v5, 16  ;;  %v817_v45 = vrot.slane %v6074_v9, 5  ;;  %3966 = vmatpush.bf16.msra.mxu0 %v5104_v53  ;;  %v245_v53 = vld [vmem:[%s5347_s10 + $0xb4] sm:$0xf] }
 0x129   : > { %v3541_v6 = vadd.f32 %v3540_v49, %v3452_v8  ;;  %v3366_v55 = vadd.f32 %v3365_v48, %v5655_v59  ;;  %v1203_v59 = vsel %vm5490_vm4, %v1198_v20, %v6064_v19  ;;  %v608_v8 = vrot.slane %v606_v14, 5 }
 0x12a   : > { %v6076_v28 = vpop.f32.mrf.mxu0  ;;  %v1213_v50 = vsel %vm5490_vm4, %v1208_v12, %v1212_v31  ;;  %v6108_v49 = vrot.slane %v612_v44, 5  ;;  %v1224_v48 = vshll.u32 %v4378_v5, 16  ;;  %v2153_v20 = vunpack.c.l.b16 %v591_v40 }
 0x12b   : > { %3404 = vmatmul.bf16.gmra.mxu1 %v2171_v56  ;;  %3493 = vmatmul.bf16.gmra.mxu2 %v2235_v13  ;;  %v6083_v26 = vadd.f32 %v3629_v62, %v3541_v6  ;;  %v4377_v62 = vld [vmem:[%s5347_s10 + $0xb4] sm:$0xf]  ;;  %v618_v56 = vrot.slane %v616_v63, 4  ;;  %v5080_v6 = vld [vmem:[%s6773_s1 + $0x140] sm:$0xff]  ;;  %v2154_v12 = vunpack.c.l.b16 %v601_v10  ;;  %v609_v31 = vor.u32 %v608_v8, %v605_v17 }
 0x12c   : > { %3582 = vmatmul.bf16.gmra.mxu3 %v5020_v36  ;;  %v261_v36 = vld [vmem:[%s5347_s10 + $0xb0] sm:$0x1]  ;;  %v1218_v7 = vshll.u32 %v4377_v62, 16  ;;  %v2361_v14 = vunpack.c.l.b16 %v1203_v59  ;;  %v2362_v44 = vunpack.c.l.b16 %v1213_v50  ;;  %3699 = vmatpush.bf16.msra.mxu1 %v5080_v6  ;;  %v6120_v54 = vrot.slane %v1224_v48, 5  ;;  %v5021_v48 = vld [vmem:[%s5347_s10 + $0xa8] sm:$0xff] }
 0x12d   : > { %3671 = vmatmul.bf16.gmra.mxu0 %v2379_v37  ;;  %v1215_v37 = vshrl.u32 %v4377_v62, 16  ;;  %v619_v63 = vor.u32 %v618_v56, %v6108_v49  ;;  %v622_v47 = vshll.u32 %v261_v36, 16  ;;  %v1230_v62 = vrot.slane %v1228_v35, 4 }
 0x12e   : > { %v3454_v61 = vpop.f32.mrf.mxu2  ;;  %v1220_v38 = vrot.slane %v1218_v7, 5  ;;  %v2236_v5 = vpack.c.b16 %v2218_v42, %v2217_v58  ;;  %v610_v9 = vrot.slane %v609_v31, 4  ;;  %v4347_v59 = vrot.slane %v664_v33, 9  ;;  %v6135_v31 = vld [vmem:[%s5347_s10 + $0xb8] sm:$0xf] }
 0x12f   : > { %v3455_v3 = vadd.f32 %v3454_v61, %v3366_v55  ;;  %v3543_v23 = vpop.f32.mrf.mxu3  ;;  %v1217_v55 = vrot.slane %v1215_v37, 4  ;;  %v4395_v61 = vld [vmem:[%s5347_s10 + $0xbc] sm:$0x1]  ;;  %v819_v17 = vrot.slane %v817_v45, 4  ;;  %v820_v8 = vrot.slane %v261_v36, 5 }
 0x130   : > { %v3367_v13 = vpop.f32.mrf.mxu1  ;;  %v2172_v50 = vpack.c.b16 %v2154_v12, %v2153_v20  ;;  %v620_v56 = vrot.slane %v619_v63, 4  ;;  %v624_v37 = vrot.slane %v622_v47, 5  ;;  %v2380_v35 = vpack.c.b16 %v2362_v44, %v2361_v14  ;;  %v6138_v14 = vld [vmem:[%s5347_s10 + $0x10] sm:$0xf]  ;;  %v4379_v47 = vld [vmem:[%s5347_s10 + $0xc0] sm:$0xf] }
 0x131   : > { %v3544_v19 = vadd.f32 %v3543_v23, %v3455_v3  ;;  %v3368_v40 = vadd.f32 %v3367_v13, %v5691_v32  ;;  %v1221_v32 = vor.u32 %v1220_v38, %v1217_v55  ;;  %v1231_v13 = vor.u32 %v1230_v62, %v6120_v54  ;;  %v4380_v33 = vld [vmem:[%s5347_s10 + $0xc4] sm:$0xf] }
 0x132   : > { %v3634_v15 = vpop.f32.mrf.mxu0  ;;  %v1234_v58 = vshll.u32 %v4395_v61, 16  ;;  %v615_v36 = vsel %vm5490_vm4, %v610_v9, %v6108_v49  ;;  %v818_v20 = vsel %vm5494_vm5, %v4347_v59, %v817_v45  ;;  %v821_v12 = vsel %vm5494_vm5, %v819_v17, %v820_v8 }
 0x133   : > { %v1328_v44 = vrot.slane %v6138_v14, 5  ;;  %v625_v63 = vsel %vm5490_vm4, %v620_v56, %v624_v37  ;;  %v6146_v49 = vadd.f32 %v6076_v28, %v3544_v19  ;;  %v1222_v55 = vrot.slane %v1221_v32, 4 }
 0x134   : > { %v1232_v38 = vrot.slane %v1231_v13, 4  ;;  %v1236_v62 = vrot.slane %v1234_v58, 5  ;;  %v640_v9 = vshrl.u32 %v6135_v31, 16  ;;  %v1239_v17 = vshrl.u32 %v4379_v47, 16 }
 0x135   : > { %v1242_v8 = vshll.u32 %v4379_v47, 16  ;;  %v1248_v28 = vshll.u32 %v4380_v33, 16  ;;  %v1252_v19 = vshrl.u32 %v4380_v33, 16  ;;  %v2220_v56 = vunpack.c.l.b16 %v821_v12  ;;  %v5241_v33 = vld [vmem:[%s5347_s10 + $0x14] sm:$0x1] }
 0x136   : > { %v3456_v10 = vpop.f32.mrf.mxu2 }
 0x137   : > { %v3457_v3 = vadd.f32 %v3456_v10, %v3368_v40  ;;  %v3545_v23 = vpop.f32.mrf.mxu3  ;;  %v627_v40 = vshrl.u32 %v245_v53, 16  ;;  %v630_v10 = vshll.u32 %v245_v53, 16  ;;  %v642_v53 = vrot.slane %v640_v9, 4  ;;  %v4397_v9 = vld [vmem:[%s5347_s10 + $0xc] sm:$0xe] }
 0x138   : > { %v3370_v7 = vpop.f32.mrf.mxu1  ;;  %v1244_v12 = vrot.slane %v1242_v8, 5  ;;  %v1254_v47 = vrot.slane %v1252_v19, 4  ;;  %v824_v8 = vrot.slane %v6135_v31, 5 }
 0x139   : > { %v3546_v42 = vadd.f32 %v3545_v23, %v3457_v3  ;;  %v3371_v61 = vadd.f32 %v3370_v7, %v5717_v4  ;;  %v2155_v23 = vunpack.c.l.b16 %v615_v36  ;;  %v1227_v4 = vsel %vm5490_vm4, %v1222_v55, %v6120_v54  ;;  %v262_v36 = vld [vmem:[%s5347_s10 + $0xbc] sm:$0x1] }
 0x13a   : > { %v3637_v6 = vpop.f32.mrf.mxu0  ;;  %v1237_v7 = vsel %vm5490_vm4, %v1232_v38, %v1236_v62  ;;  %v632_v58 = vrot.slane %v630_v10, 5  ;;  %v1330_v54 = vrot.slane %v1328_v44, 4  ;;  %v1331_v55 = vrot.slane %v5241_v33, 5  ;;  %v665_v33 = vld [vmem:[%s5347_s10 + $0xb4] sm:$0xe] }
 0x13b   : > { %3409 = vmatmul.bf16.gmra.mxu1 %v2172_v50  ;;  %3498 = vmatmul.bf16.gmra.mxu2 %v2236_v5  ;;  %v6148_v45 = vadd.f32 %v3634_v15, %v3546_v42  ;;  %v636_v5 = vshll.u32 %v6135_v31, 16  ;;  %v2219_v50 = vunpack.c.l.b16 %v818_v20  ;;  %v1241_v20 = vrot.slane %v1239_v17, 4 }
 0x13c   : > { %3587 = vmatmul.bf16.gmra.mxu3 %v5021_v48  ;;  %v2156_v48 = vunpack.c.l.b16 %v625_v63  ;;  %v6161_v63 = vrot.slane %v1248_v28, 5  ;;  %v2364_v10 = vunpack.c.l.b16 %v1237_v7  ;;  %v646_v17 = vshll.u32 %v262_v36, 16 }
 0x13d   : > { %3676 = vmatmul.bf16.gmra.mxu0 %v2380_v35  ;;  %v629_v35 = vrot.slane %v627_v40, 4  ;;  %v6158_v42 = vrot.slane %v636_v5, 5  ;;  %v2237_v40 = vpack.c.b16 %v2220_v56, %v2219_v50  ;;  %v4396_v5 = vld [vmem:[%s5347_s10 + $0xc8] sm:$0x1]  ;;  %v4413_v28 = vrot.slane %v4397_v9, 9 }
 0x13e   : > { %v3459_v59 = vpop.f32.mrf.mxu2  ;;  %v2173_v62 = vpack.c.b16 %v2156_v48, %v2155_v23  ;;  %v1255_v23 = vor.u32 %v1254_v47, %v6161_v63  ;;  %v1258_v48 = vshll.u32 %v4396_v5, 16  ;;  %v1332_v31 = vsel %vm5494_vm5, %v1330_v54, %v1331_v55 }
 0x13f   : > { %v3460_v15 = vadd.f32 %v3459_v59, %v3371_v61  ;;  %v3548_v3 = vpop.f32.mrf.mxu3  ;;  %v2363_v61 = vunpack.c.l.b16 %v1227_v4  ;;  %v5022_v4 = vld [vmem:[%s5347_s10 + $0xb4] sm:$0xff]  ;;  %v826_v47 = vrot.slane %v824_v8, 4  ;;  %v827_v9 = vrot.slane %v262_v36, 5 }
 0x140   : > { %v3372_v37 = vpop.f32.mrf.mxu1  ;;  %v1256_v54 = vrot.slane %v1255_v23, 4  ;;  %v1260_v55 = vrot.slane %v1258_v48, 5 }
 0x141   : > { %v3549_v32 = vadd.f32 %v3548_v3, %v3460_v15  ;;  %v3373_v59 = vadd.f32 %v3372_v37, %v5748_v39  ;;  %v633_v15 = vor.u32 %v632_v58, %v629_v35  ;;  %v643_v3 = vor.u32 %v642_v53, %v6158_v42 }
 0x142   : > { %v3639_v13 = vpop.f32.mrf.mxu0  ;;  %v1329_v39 = vsel %vm5494_vm5, %v4413_v28, %v1328_v44  ;;  %v2381_v7 = vpack.c.b16 %v2364_v10, %v2363_v61  ;;  %v6189_v28 = vld [vmem:[%s5347_s10 + $0x1c] sm:$0xf] }
 0x143   : > { %v6166_v38 = vadd.f32 %v3637_v6, %v3549_v32  ;;  %v1245_v6 = vor.u32 %v1244_v12, %v1241_v20  ;;  %v2399_v35 = vunpack.c.l.b16 %v1329_v39  ;;  %v2400_v32 = vunpack.c.l.b16 %v1332_v31 }
 0x144   : > { %v648_v20 = vrot.slane %v646_v17, 5  ;;  %v4348_v12 = vrot.slane %v665_v33, 9  ;;  %v634_v5 = vrot.slane %v633_v15, 4  ;;  %v644_v14 = vrot.slane %v643_v3, 4  ;;  %v4429_v17 = vld [vmem:[%s5347_s10 + $0x18] sm:$0xf] }
 0x145   : > { %v1246_v44 = vrot.slane %v1245_v6, 4  ;;  %v1261_v33 = vsel %vm5490_vm4, %v1256_v54, %v1260_v55  ;;  %v1491_v23 = vshll.u32 %v4429_v17, 16 }
 0x146   : > { %v3461_v19 = vpop.f32.mrf.mxu2  ;;  %v639_v36 = vsel %vm5490_vm4, %v634_v5, %v6158_v42  ;;  %v649_v3 = vsel %vm5490_vm4, %v644_v14, %v648_v20  ;;  %v1488_v42 = vshrl.u32 %v4429_v17, 16  ;;  %v4461_v5 = vld [vmem:[%s5347_s10 + $0x20] sm:$0x1] }
 0x147   : > { %v3462_v50 = vadd.f32 %v3461_v19, %v3373_v59  ;;  %v3550_v56 = vpop.f32.mrf.mxu3  ;;  %v6182_v59 = vpack.c.b16 %v2400_v32, %v2399_v35  ;;  %v2157_v39 = vunpack.c.l.b16 %v639_v36  ;;  %v5023_v17 = vld [vmem:[%s5347_s10 + $0xc0] sm:$0xff] }
 0x148   : > { %v3375_v37 = vpop.f32.mrf.mxu1  ;;  %v1490_v32 = vrot.slane %v1488_v42, 4 }
 0x149   : > { %v3551_v58 = vadd.f32 %v3550_v56, %v3462_v50  ;;  %v3376_v10 = vadd.f32 %v3375_v37, %v5764_v11  ;;  %v1251_v11 = vsel %vm5490_vm4, %v1246_v44, %v6161_v63  ;;  %v1501_v50 = vshrl.u32 %v6189_v28, 16 }
 0x14a   : > { %v3642_v53 = vpop.f32.mrf.mxu0  ;;  %v2366_v63 = vunpack.c.l.b16 %v1261_v33 }
 0x14b   : > { %3414 = vmatmul.bf16.gmra.mxu1 %v2173_v62  ;;  %3503 = vmatmul.bf16.gmra.mxu2 %v2237_v40  ;;  %v6184_v61 = vadd.f32 %v3639_v13, %v3551_v58  ;;  %v825_v62 = vsel %vm5494_vm5, %v4348_v12, %v824_v8  ;;  %v828_v40 = vsel %vm5494_vm5, %v826_v47, %v827_v9  ;;  %v1497_v8 = vshll.u32 %v6189_v28, 16 }
 0x14c   : > { %3592 = vmatmul.bf16.gmra.mxu3 %v5022_v4  ;;  %v2221_v31 = vunpack.c.l.b16 %v825_v62  ;;  %v2222_v37 = vunpack.c.l.b16 %v828_v40  ;;  %v2158_v4 = vunpack.c.l.b16 %v649_v3  ;;  %v1493_v58 = vrot.slane %v1491_v23, 5  ;;  %v4431_v3 = vld [vmem:[%s5347_s10 + $0x24] sm:$0xf] }
 0x14d   : > { %3681 = vmatmul.bf16.gmra.mxu0 %v2381_v7  ;;  %v2365_v7 = vunpack.c.l.b16 %v1251_v11  ;;  %v1499_v20 = vrot.slane %v1497_v8, 5  ;;  %v1503_v12 = vrot.slane %v1501_v50, 4  ;;  %v1507_v62 = vshll.u32 %v4461_v5, 16  ;;  %v6216_v11 = vld [vmem:[%s5347_s10 + $0x28] sm:$0xf] }
 0x14e   : > { %v3464_v19 = vpop.f32.mrf.mxu2  ;;  %v2174_v54 = vpack.c.b16 %v2158_v4, %v2157_v39  ;;  %v2238_v55 = vpack.c.b16 %v2222_v37, %v2221_v31  ;;  %v1940_v39 = vrot.slane %v4461_v5, 5  ;;  %v1515_v37 = vshll.u32 %v4431_v3, 16 }
 0x14f   : > { %v3465_v13 = vadd.f32 %v3464_v19, %v3376_v10  ;;  %v3553_v15 = vpop.f32.mrf.mxu3  ;;  %v2382_v19 = vpack.c.b16 %v2366_v63, %v2365_v7  ;;  %v1504_v36 = vor.u32 %v1503_v12, %v1499_v20  ;;  %v1509_v23 = vrot.slane %v1507_v62, 5 }
 0x150   : > { %v3377_v6 = vpop.f32.mrf.mxu1  ;;  %v1521_v4 = vshll.u32 %v6216_v11, 16  ;;  %v1525_v7 = vshrl.u32 %v6216_v11, 16 }
 0x151   : > { %v3554_v56 = vadd.f32 %v3553_v15, %v3465_v13  ;;  %v3378_v47 = vadd.f32 %v3377_v6, %v5794_v52  ;;  %v1937_v15 = vrot.slane %v6189_v28, 5  ;;  %v4477_v52 = vld [vmem:[%s5347_s10 + $0x18] sm:$0xe]  ;;  %v1505_v42 = vrot.slane %v1504_v36, 4 }
 0x152   : > { %v3644_v48 = vpop.f32.mrf.mxu0  ;;  %v4493_v50 = vrot.slane %v4477_v52, 9  ;;  %v1512_v28 = vshrl.u32 %v4431_v3, 16  ;;  %v4398_v3 = vld [vmem:[%s5347_s10 + $0x18] sm:$0xe] }
 0x153   : > { %v6207_v35 = vadd.f32 %v3642_v53, %v3554_v56  ;;  %v1494_v53 = vor.u32 %v1493_v58, %v1490_v32  ;;  %v1939_v56 = vrot.slane %v1937_v15, 4 }
 0x154   : > { %v1938_v5 = vsel %vm5494_vm5, %v4493_v50, %v1937_v15 }
 0x155   : > { %v1495_v6 = vrot.slane %v1494_v53, 4  ;;  %v2607_v53 = vunpack.c.l.b16 %v1938_v5 }
 0x156   : > { %v3466_v14 = vpop.f32.mrf.mxu2 }
 0x157   : > { %v3467_v9 = vadd.f32 %v3466_v14, %v3378_v47  ;;  %v3555_v44 = vpop.f32.mrf.mxu3  ;;  %v1500_v58 = vsel %vm5490_vm4, %v1495_v6, %v1499_v20  ;;  %v1510_v47 = vsel %vm5490_vm4, %v1505_v42, %v1509_v23  ;;  %v1941_v14 = vsel %vm5494_vm5, %v1939_v56, %v1940_v39  ;;  %v5024_v56 = vld [vmem:[%s5347_s10 + $0x18] sm:$0xff] }
 0x158   : > { %v3380_v10 = vpop.f32.mrf.mxu1  ;;  %v2608_v36 = vunpack.c.l.b16 %v1941_v14 }
 0x159   : > { %v3556_v40 = vadd.f32 %v3555_v44, %v3467_v9  ;;  %v3381_v8 = vadd.f32 %v3380_v10, %v5825_v46  ;;  %v1514_v9 = vrot.slane %v1512_v28, 4  ;;  %v1517_v44 = vrot.slane %v1515_v37, 5  ;;  %v4462_v10 = vld [vmem:[%s5347_s10 + $0x2c] sm:$0x1]  ;;  %v4478_v37 = vld [vmem:[%s5347_s10 + $0x24] sm:$0xe] }
 0x15a   : > { %v3647_v13 = vpop.f32.mrf.mxu0  ;;  %v1531_v23 = vshll.u32 %v4462_v10, 16  ;;  %v2639_v28 = vpack.c.b16 %v2608_v36, %v2607_v53  ;;  %v4494_v5 = vrot.slane %v4478_v37, 9  ;;  %v1947_v14 = vrot.slane %v4462_v10, 5 }
 0x15b   : > { %3419 = vmatmul.bf16.gmra.mxu1 %v2174_v54  ;;  %3508 = vmatmul.bf16.gmra.mxu2 %v2238_v55  ;;  %v6218_v33 = vadd.f32 %v3644_v48, %v3556_v40  ;;  %v1523_v54 = vrot.slane %v1521_v4, 5  ;;  %v1527_v55 = vrot.slane %v1525_v7, 4  ;;  %v5242_v40 = vld [vmem:[%s5347_s10 + $0x1c] sm:$0xf]  ;;  %v1518_v6 = vor.u32 %v1517_v44, %v1514_v9 }
 0x15c   : > { %3597 = vmatmul.bf16.gmra.mxu3 %v5023_v17  ;;  %v2543_v17 = vunpack.c.l.b16 %v1500_v58  ;;  %v1335_v15 = vrot.slane %v5242_v40, 5 }
 0x15d   : > { %3686 = vmatmul.bf16.gmra.mxu0 %v2382_v19  ;;  %v2544_v19 = vunpack.c.l.b16 %v1510_v47  ;;  %v1528_v42 = vor.u32 %v1527_v55, %v1523_v54  ;;  %v1519_v58 = vrot.slane %v1518_v6, 4  ;;  %v1533_v47 = vrot.slane %v1531_v23, 5  ;;  %v4433_v55 = vld [vmem:[%s5347_s10 + $0x30] sm:$0xf] }
 0x15e   : > { %v3469_v31 = vpop.f32.mrf.mxu2 }
 0x15f   : > { %v3470_v48 = vadd.f32 %v3469_v31, %v3381_v8  ;;  %v3558_v63 = vpop.f32.mrf.mxu3  ;;  %v2575_v31 = vpack.c.b16 %v2544_v19, %v2543_v17  ;;  %v6247_v17 = vld [vmem:[%s5347_s10 + $0x34] sm:$0xf]  ;;  %v1524_v36 = vsel %vm5490_vm4, %v1519_v58, %v1523_v54 }
 0x160   : > { %v3382_v32 = vpop.f32.mrf.mxu1  ;;  %v1545_v6 = vshll.u32 %v6247_v17, 16 }
 0x161   : > { %v3559_v12 = vadd.f32 %v3558_v63, %v3470_v48  ;;  %v3383_v62 = vadd.f32 %v3382_v32, %v5853_v41  ;;  %v4414_v41 = vrot.slane %v4398_v3, 9  ;;  %v1337_v48 = vrot.slane %v1335_v15, 4  ;;  %v5243_v63 = vld [vmem:[%s5347_s10 + $0x20] sm:$0x1] }
 0x162   : > { %v3649_v46 = vpop.f32.mrf.mxu0  ;;  %v1338_v32 = vrot.slane %v5243_v63, 5  ;;  %v1536_v3 = vshrl.u32 %v4433_v55, 16 }
 0x163   : > { %v6232_v20 = vadd.f32 %v3647_v13, %v3559_v12  ;;  %v1944_v13 = vrot.slane %v6216_v11, 5  ;;  %v1529_v12 = vrot.slane %v1528_v42, 4  ;;  %v1336_v53 = vsel %vm5494_vm5, %v4414_v41, %v1335_v15 }
 0x164   : > { %v1539_v15 = vshll.u32 %v4433_v55, 16  ;;  %v1549_v42 = vshrl.u32 %v6247_v17, 16  ;;  %v1538_v37 = vrot.slane %v1536_v3, 4  ;;  %v6265_v41 = vrot.slane %v1545_v6, 5  ;;  %v4435_v3 = vld [vmem:[%s5347_s10 + $0x3c] sm:$0xf] }
 0x165   : > { %v1946_v11 = vrot.slane %v1944_v13, 4 }
 0x166   : > { %v3471_v52 = vpop.f32.mrf.mxu2 }
 0x167   : > { %v3472_v8 = vadd.f32 %v3471_v52, %v3383_v62  ;;  %v3560_v50 = vpop.f32.mrf.mxu3  ;;  %v1534_v62 = vsel %vm5490_vm4, %v1529_v12, %v1533_v47  ;;  %v1948_v40 = vsel %vm5494_vm5, %v1946_v11, %v1947_v14  ;;  %v5025_v11 = vld [vmem:[%s5347_s10 + $0x24] sm:$0xff] }
 0x168   : > { %v3385_v39 = vpop.f32.mrf.mxu1 }
 0x169   : > { %v3561_v4 = vadd.f32 %v3560_v50, %v3472_v8  ;;  %v3386_v44 = vadd.f32 %v3385_v39, %v5678_v21  ;;  %v1945_v21 = vsel %vm5494_vm5, %v4494_v5, %v1944_v13  ;;  %v2401_v8 = vunpack.c.l.b16 %v1336_v53  ;;  %v4399_v53 = vld [vmem:[%s5347_s10 + $0x24] sm:$0xe] }
 0x16a   : > { %v3652_v7 = vpop.f32.mrf.mxu0  ;;  %v2546_v39 = vunpack.c.l.b16 %v1534_v62  ;;  %v2609_v13 = vunpack.c.l.b16 %v1945_v21  ;;  %v1951_v62 = vrot.slane %v6247_v17, 5  ;;  %v4479_v21 = vld [vmem:[%s5347_s10 + $0x30] sm:$0xe] }
 0x16b   : > { %3700 = vmatmul.bf16.vlgmr.msra.gmra.mxu1 %v6182_v59  ;;  %3789 = vmatmul.bf16.vlgmr.msra.gmra.mxu2 %v5024_v56  ;;  %v6242_v9 = vadd.f32 %v3649_v46, %v3561_v4  ;;  %v1339_v59 = vsel %vm5494_vm5, %v1337_v48, %v1338_v32  ;;  %v2545_v56 = vunpack.c.l.b16 %v1524_v36  ;;  %v1541_v4 = vrot.slane %v1539_v15, 5  ;;  %v4463_v32 = vld [vmem:[%s5347_s10 + $0x38] sm:$0x1]  ;;  %v6277_v15 = vld [vmem:[%s5347_s10 + $0x40] sm:$0xf] }
 0x16c   : > { %3878 = vmatmul.bf16.vlgmr.msra.gmra.mxu3 %v2575_v31  ;;  %v2402_v50 = vunpack.c.l.b16 %v1339_v59  ;;  %v2610_v31 = vunpack.c.l.b16 %v1948_v40  ;;  %v1551_v48 = vrot.slane %v1549_v42, 4  ;;  %v4415_v40 = vrot.slane %v4399_v53, 9  ;;  %v5245_v42 = vld [vmem:[%s5347_s10 + $0x2c] sm:$0x1] }
 0x16d   : > { %3967 = vmatmul.bf16.vlgmr.msra.gmra.mxu0 %v2639_v28  ;;  %v2576_v14 = vpack.c.b16 %v2546_v39, %v2545_v56  ;;  %v1542_v59 = vor.u32 %v1541_v4, %v1538_v37  ;;  %v4495_v17 = vrot.slane %v4479_v21, 9  ;;  %v1560_v4 = vshrl.u32 %v4435_v3, 16 }
 0x16e   : > { %v3474_v19 = vpop.f32.mrf.mxu2  ;;  %v2432_v5 = vpack.c.b16 %v2402_v50, %v2401_v8  ;;  %v1552_v36 = vor.u32 %v1551_v48, %v6265_v41  ;;  %v1563_v48 = vshll.u32 %v4435_v3, 16 }
 0x16f   : > { %v3475_v10 = vadd.f32 %v3474_v19, %v3386_v44  ;;  %v3563_v46 = vpop.f32.mrf.mxu3  ;;  %v5244_v44 = vld [vmem:[%s5347_s10 + $0x28] sm:$0xf]  ;;  %v2640_v19 = vpack.c.b16 %v2610_v31, %v2609_v13  ;;  %v1543_v8 = vrot.slane %v1542_v59, 4  ;;  %v1953_v13 = vrot.slane %v1951_v62, 4 }
 0x170   : > { %v3387_v52 = vpop.f32.mrf.mxu1  ;;  %v1553_v50 = vrot.slane %v1552_v36, 4  ;;  %v1954_v31 = vrot.slane %v4463_v32, 5  ;;  %v1565_v53 = vrot.slane %v1563_v48, 5  ;;  %v1958_v48 = vrot.slane %v6277_v15, 5 }
 0x171   : > { %v3564_v54 = vadd.f32 %v3563_v46, %v3475_v10  ;;  %v3388_v63 = vadd.f32 %v3387_v52, %v5710_v57  ;;  %v1555_v57 = vshll.u32 %v4463_v32, 16  ;;  %v1548_v32 = vsel %vm5490_vm4, %v1543_v8, %v6265_v41 }
 0x172   : > { %v3654_v23 = vpop.f32.mrf.mxu0 }
 0x173   : > { %v6263_v28 = vadd.f32 %v3652_v7, %v3564_v54  ;;  %v1342_v7 = vrot.slane %v5244_v44, 5  ;;  %v1345_v54 = vrot.slane %v5245_v42, 5  ;;  %v1557_v56 = vrot.slane %v1555_v57, 5 }
 0x175   : > { %v1344_v52 = vrot.slane %v1342_v7, 4  ;;  %v1558_v44 = vsel %vm5490_vm4, %v1553_v50, %v1557_v56  ;;  %v4400_v56 = vld [vmem:[%s5347_s10 + $0x30] sm:$0xe] }
 0x176   : > { %v3476_v58 = vpop.f32.mrf.mxu2 }
 0x177   : > { %v3477_v12 = vadd.f32 %v3476_v58, %v3388_v63  ;;  %v3565_v47 = vpop.f32.mrf.mxu3  ;;  %v1569_v63 = vshll.u32 %v6277_v15, 16 }
 0x178   : > { %v3390_v55 = vpop.f32.mrf.mxu1 }
 0x179   : > { %v3566_v10 = vadd.f32 %v3565_v47, %v3477_v12  ;;  %v3391_v39 = vadd.f32 %v3390_v55, %v5733_v24  ;;  %v1346_v24 = vsel %vm5494_vm5, %v1344_v52, %v1345_v54  ;;  %v1952_v55 = vsel %vm5494_vm5, %v4495_v17, %v1951_v62  ;;  %v5246_v54 = vld [vmem:[%s5347_s10 + $0x34] sm:$0xf] }
 0x17a   : > { %v3657_v46 = vpop.f32.mrf.mxu0  ;;  %v6298_v59 = vrot.slane %v1569_v63, 5  ;;  %v2404_v41 = vunpack.c.l.b16 %v1346_v24  ;;  %v2548_v52 = vunpack.c.l.b16 %v1558_v44  ;;  %v2611_v3 = vunpack.c.l.b16 %v1952_v55 }
 0x17b   : > { %3705 = vmatmul.bf16.gmra.mxu1 %v2432_v5  ;;  %3794 = vmatmul.bf16.gmra.mxu2 %v5025_v11  ;;  %v6279_v6 = vadd.f32 %v3654_v23, %v3566_v10  ;;  %v1573_v23 = vshrl.u32 %v6277_v15, 16  ;;  %v1343_v5 = vsel %vm5494_vm5, %v4415_v40, %v1342_v7  ;;  %v1562_v7 = vrot.slane %v1560_v4, 4  ;;  %v4464_v10 = vld [vmem:[%s5347_s10 + $0x44] sm:$0x1]  ;;  %v5026_v4 = vld [vmem:[%s5347_s10 + $0x30] sm:$0xff] }
 0x17c   : > { %3883 = vmatmul.bf16.gmra.mxu3 %v2576_v14  ;;  %v2403_v57 = vunpack.c.l.b16 %v1343_v5  ;;  %v2547_v40 = vunpack.c.l.b16 %v1548_v32  ;;  %v1349_v8 = vrot.slane %v5246_v54, 5  ;;  %v4416_v5 = vrot.slane %v4400_v56, 9  ;;  %v5247_v32 = vld [vmem:[%s5347_s10 + $0x38] sm:$0x1] }
 0x17d   : > { %3972 = vmatmul.bf16.gmra.mxu0 %v2640_v19  ;;  %v1955_v19 = vsel %vm5494_vm5, %v1953_v13, %v1954_v31  ;;  %v1575_v36 = vrot.slane %v1573_v23, 4  ;;  %v1579_v13 = vshll.u32 %v4464_v10, 16  ;;  %v1961_v15 = vrot.slane %v4464_v10, 5 }
 0x17e   : > { %v3479_v37 = vpop.f32.mrf.mxu2  ;;  %v2612_v42 = vunpack.c.l.b16 %v1955_v19  ;;  %v2577_v23 = vpack.c.b16 %v2548_v52, %v2547_v40  ;;  %v1351_v24 = vrot.slane %v1349_v8, 4  ;;  %v6316_v40 = vld [vmem:[%s5347_s10 + $0x4c] sm:$0xf] }
 0x17f   : > { %v3480_v58 = vadd.f32 %v3479_v37, %v3391_v39  ;;  %v3568_v12 = vpop.f32.mrf.mxu3  ;;  %v1566_v39 = vor.u32 %v1565_v53, %v1562_v7  ;;  %v1576_v17 = vor.u32 %v1575_v36, %v6298_v59  ;;  %v2433_v37 = vpack.c.b16 %v2404_v41, %v2403_v57  ;;  %v4437_v41 = vld [vmem:[%s5347_s10 + $0x48] sm:$0xf] }
 0x180   : > { %v3392_v47 = vpop.f32.mrf.mxu1  ;;  %v1581_v19 = vrot.slane %v1579_v13, 5  ;;  %v1960_v53 = vrot.slane %v1958_v48, 4  ;;  %v1597_v13 = vshrl.u32 %v6316_v40, 16 }
 0x181   : > { %v3569_v11 = vadd.f32 %v3568_v12, %v3480_v58  ;;  %v3393_v62 = vadd.f32 %v3392_v47, %v5758_v0  ;;  %v2641_v58 = vpack.c.b16 %v2612_v42, %v2611_v3  ;;  %v4480_v0 = vld [vmem:[%s5347_s10 + $0x3c] sm:$0xe]  ;;  %v1567_v44 = vrot.slane %v1566_v39, 4 }
 0x182   : > { %v3659_v14 = vpop.f32.mrf.mxu0  ;;  %v1577_v55 = vrot.slane %v1576_v17, 4  ;;  %v4496_v7 = vrot.slane %v4480_v0, 9  ;;  %v1350_v3 = vsel %vm5494_vm5, %v4416_v5, %v1349_v8  ;;  %v1584_v8 = vshrl.u32 %v4437_v41, 16 }
 0x183   : > { %v6301_v21 = vadd.f32 %v3657_v46, %v3569_v11  ;;  %v1352_v11 = vrot.slane %v5247_v32, 5  ;;  %v1572_v10 = vsel %vm5490_vm4, %v1567_v44, %v6298_v59  ;;  %v1587_v39 = vshll.u32 %v4437_v41, 16 }
 0x184   : > { %v1582_v54 = vsel %vm5490_vm4, %v1577_v55, %v1581_v19  ;;  %v1593_v17 = vshll.u32 %v6316_v40, 16  ;;  %v1586_v0 = vrot.slane %v1584_v8, 4  ;;  %v4439_v8 = vld [vmem:[%s5347_s10 + $0x54] sm:$0xf] }
 0x185   : > { %v1353_v42 = vsel %vm5494_vm5, %v1351_v24, %v1352_v11  ;;  %v1599_v24 = vrot.slane %v1597_v13, 4  ;;  %v4465_v11 = vld [vmem:[%s5347_s10 + $0x50] sm:$0x1]  ;;  %v5249_v13 = vld [vmem:[%s5347_s10 + $0x44] sm:$0x1] }
 0x186   : > { %v3481_v50 = vpop.f32.mrf.mxu2  ;;  %v6335_v5 = vrot.slane %v1593_v17, 5 }
 0x187   : > { %v3482_v31 = vadd.f32 %v3481_v50, %v3393_v62  ;;  %v3570_v46 = vpop.f32.mrf.mxu3  ;;  %v1962_v50 = vsel %vm5494_vm5, %v1960_v53, %v1961_v15  ;;  %v5027_v53 = vld [vmem:[%s5347_s10 + $0x3c] sm:$0xff] }
 0x188   : > { %v3395_v63 = vpop.f32.mrf.mxu1 }
 0x189   : > { %v3571_v12 = vadd.f32 %v3570_v46, %v3482_v31  ;;  %v3396_v57 = vadd.f32 %v3395_v63, %v5781_v43  ;;  %v1959_v43 = vsel %vm5494_vm5, %v4496_v7, %v1958_v48  ;;  %v2405_v46 = vunpack.c.l.b16 %v1350_v3  ;;  %v4401_v3 = vld [vmem:[%s5347_s10 + $0x3c] sm:$0xe] }
 0x18a   : > { %v3662_v47 = vpop.f32.mrf.mxu0  ;;  %v2550_v63 = vunpack.c.l.b16 %v1582_v54  ;;  %v2613_v48 = vunpack.c.l.b16 %v1959_v43  ;;  %v1965_v54 = vrot.slane %v6316_v40, 5  ;;  %v4481_v43 = vld [vmem:[%s5347_s10 + $0x48] sm:$0xe] }
 0x18b   : > { %3710 = vmatmul.bf16.gmra.mxu1 %v2433_v37  ;;  %3799 = vmatmul.bf16.gmra.mxu2 %v5026_v4  ;;  %v6311_v36 = vadd.f32 %v3659_v14, %v3571_v12  ;;  %v2406_v37 = vunpack.c.l.b16 %v1353_v42  ;;  %v2549_v4 = vunpack.c.l.b16 %v1572_v10  ;;  %v1589_v12 = vrot.slane %v1587_v39, 5  ;;  %v6347_v39 = vld [vmem:[%s5347_s10 + $0x58] sm:$0xf] }
 0x18c   : > { %3888 = vmatmul.bf16.gmra.mxu3 %v2577_v23  ;;  %v2614_v23 = vunpack.c.l.b16 %v1962_v50  ;;  %v1600_v10 = vor.u32 %v1599_v24, %v6335_v5  ;;  %v4417_v50 = vrot.slane %v4401_v3, 9  ;;  %v4497_v40 = vrot.slane %v4481_v43, 9 }
 0x18d   : > { %3977 = vmatmul.bf16.gmra.mxu0 %v2641_v58  ;;  %v2434_v7 = vpack.c.b16 %v2406_v37, %v2405_v46  ;;  %v2578_v15 = vpack.c.b16 %v2550_v63, %v2549_v4  ;;  %v1590_v42 = vor.u32 %v1589_v12, %v1586_v0  ;;  %v1608_v12 = vshrl.u32 %v4439_v8, 16 }
 0x18e   : > { %v3484_v52 = vpop.f32.mrf.mxu2  ;;  %v1601_v37 = vrot.slane %v1600_v10, 4  ;;  %v1611_v24 = vshll.u32 %v4439_v8, 16 }
 0x18f   : > { %v3485_v14 = vadd.f32 %v3484_v52, %v3396_v57  ;;  %v3573_v62 = vpop.f32.mrf.mxu3  ;;  %v5248_v57 = vld [vmem:[%s5347_s10 + $0x40] sm:$0xf]  ;;  %v2642_v52 = vpack.c.b16 %v2614_v23, %v2613_v48  ;;  %v1591_v46 = vrot.slane %v1590_v42, 4  ;;  %v1967_v48 = vrot.slane %v1965_v54, 4 }
 0x190   : > { %v3397_v56 = vpop.f32.mrf.mxu1  ;;  %v1968_v23 = vrot.slane %v4465_v11, 5  ;;  %v1613_v3 = vrot.slane %v1611_v24, 5  ;;  %v1972_v24 = vrot.slane %v6347_v39, 5 }
 0x191   : > { %v3574_v59 = vadd.f32 %v3573_v62, %v3485_v14  ;;  %v3398_v32 = vadd.f32 %v3397_v56, %v5818_v30  ;;  %v1603_v30 = vshll.u32 %v4465_v11, 16  ;;  %v1596_v11 = vsel %vm5490_vm4, %v1591_v46, %v6335_v5 }
 0x192   : > { %v3664_v31 = vpop.f32.mrf.mxu0 }
 0x193   : > { %v6333_v58 = vadd.f32 %v3662_v47, %v3574_v59  ;;  %v1356_v47 = vrot.slane %v5248_v57, 5  ;;  %v1359_v59 = vrot.slane %v5249_v13, 5  ;;  %v1605_v4 = vrot.slane %v1603_v30, 5 }
 0x195   : > { %v1358_v56 = vrot.slane %v1356_v47, 4  ;;  %v1606_v57 = vsel %vm5490_vm4, %v1601_v37, %v1605_v4  ;;  %v4402_v4 = vld [vmem:[%s5347_s10 + $0x48] sm:$0xe] }
 0x196   : > { %v3486_v44 = vpop.f32.mrf.mxu2 }
 0x197   : > { %v3487_v55 = vadd.f32 %v3486_v44, %v3398_v32  ;;  %v3575_v19 = vpop.f32.mrf.mxu3  ;;  %v1617_v32 = vshll.u32 %v6347_v39, 16 }
 0x198   : > { %v3400_v41 = vpop.f32.mrf.mxu1 }
 0x199   : > { %v3576_v14 = vadd.f32 %v3575_v19, %v3487_v55  ;;  %v3401_v63 = vadd.f32 %v3400_v41, %v5839_v22  ;;  %v1360_v22 = vsel %vm5494_vm5, %v1358_v56, %v1359_v59  ;;  %v1966_v41 = vsel %vm5494_vm5, %v4497_v40, %v1965_v54  ;;  %v5250_v59 = vld [vmem:[%s5347_s10 + $0x4c] sm:$0xf] }
 0x19a   : > { %v3667_v62 = vpop.f32.mrf.mxu0  ;;  %v6368_v42 = vrot.slane %v1617_v32, 5  ;;  %v2408_v5 = vunpack.c.l.b16 %v1360_v22  ;;  %v2552_v56 = vunpack.c.l.b16 %v1606_v57  ;;  %v2615_v8 = vunpack.c.l.b16 %v1966_v41 }
 0x19b   : > { %3715 = vmatmul.bf16.gmra.mxu1 %v2434_v7  ;;  %3804 = vmatmul.bf16.gmra.mxu2 %v5027_v53  ;;  %v6349_v17 = vadd.f32 %v3664_v31, %v3576_v14  ;;  %v1621_v31 = vshrl.u32 %v6347_v39, 16  ;;  %v1357_v7 = vsel %vm5494_vm5, %v4417_v50, %v1356_v47  ;;  %v1610_v47 = vrot.slane %v1608_v12, 4  ;;  %v4466_v14 = vld [vmem:[%s5347_s10 + $0x5c] sm:$0x1]  ;;  %v5028_v12 = vld [vmem:[%s5347_s10 + $0x48] sm:$0xff] }
 0x19c   : > { %3893 = vmatmul.bf16.gmra.mxu3 %v2578_v15  ;;  %v2407_v30 = vunpack.c.l.b16 %v1357_v7  ;;  %v2551_v50 = vunpack.c.l.b16 %v1596_v11  ;;  %v1363_v46 = vrot.slane %v5250_v59, 5  ;;  %v4418_v7 = vrot.slane %v4402_v4, 9  ;;  %v5251_v11 = vld [vmem:[%s5347_s10 + $0x50] sm:$0x1] }
 0x19d   : > { %3982 = vmatmul.bf16.gmra.mxu0 %v2642_v52  ;;  %v1969_v52 = vsel %vm5494_vm5, %v1967_v48, %v1968_v23  ;;  %v1623_v10 = vrot.slane %v1621_v31, 4  ;;  %v1627_v48 = vshll.u32 %v4466_v14, 16  ;;  %v1975_v39 = vrot.slane %v4466_v14, 5 }
 0x19e   : > { %v3489_v0 = vpop.f32.mrf.mxu2  ;;  %v2616_v13 = vunpack.c.l.b16 %v1969_v52  ;;  %v2579_v31 = vpack.c.b16 %v2552_v56, %v2551_v50  ;;  %v1365_v22 = vrot.slane %v1363_v46, 4  ;;  %v6386_v50 = vld [vmem:[%s5347_s10 + $0x64] sm:$0xf] }
 0x19f   : > { %v3490_v44 = vadd.f32 %v3489_v0, %v3401_v63  ;;  %v3578_v55 = vpop.f32.mrf.mxu3  ;;  %v1614_v63 = vor.u32 %v1613_v3, %v1610_v47  ;;  %v1624_v40 = vor.u32 %v1623_v10, %v6368_v42  ;;  %v2435_v0 = vpack.c.b16 %v2408_v5, %v2407_v30  ;;  %v4441_v5 = vld [vmem:[%s5347_s10 + $0x60] sm:$0xf] }
 0x1a0   : > { %v3402_v19 = vpop.f32.mrf.mxu1  ;;  %v1629_v52 = vrot.slane %v1627_v48, 5  ;;  %v1974_v3 = vrot.slane %v1972_v24, 4  ;;  %v1645_v48 = vshrl.u32 %v6386_v50, 16 }
 0x1a1   : > { %v3579_v53 = vadd.f32 %v3578_v55, %v3490_v44  ;;  %v3403_v54 = vadd.f32 %v3402_v19, %v5871_v16  ;;  %v2643_v44 = vpack.c.b16 %v2616_v13, %v2615_v8  ;;  %v4482_v16 = vld [vmem:[%s5347_s10 + $0x54] sm:$0xe]  ;;  %v1615_v57 = vrot.slane %v1614_v63, 4 }
 0x1a2   : > { %v3669_v15 = vpop.f32.mrf.mxu0  ;;  %v1625_v41 = vrot.slane %v1624_v40, 4  ;;  %v4498_v47 = vrot.slane %v4482_v16, 9  ;;  %v1364_v8 = vsel %vm5494_vm5, %v4418_v7, %v1363_v46  ;;  %v1632_v46 = vshrl.u32 %v4441_v5, 16 }
 0x1a3   : > { %v6371_v43 = vadd.f32 %v3667_v62, %v3579_v53  ;;  %v1366_v53 = vrot.slane %v5251_v11, 5  ;;  %v1620_v14 = vsel %vm5490_vm4, %v1615_v57, %v6368_v42  ;;  %v1635_v63 = vshll.u32 %v4441_v5, 16  ;;  %v6789_v11 = vld [vmem:[#allocation2_spill] sm:$0xff]  ;;  %v4467_v57 = vld [vmem:[%s5347_s10 + $0x68] sm:$0x1] }
 0x1a4   : > { %v1630_v59 = vsel %vm5490_vm4, %v1625_v41, %v1629_v52  ;;  %v1641_v40 = vshll.u32 %v6386_v50, 16  ;;  %v1634_v16 = vrot.slane %v1632_v46, 4  ;;  %v5252_v5 = vld [vmem:[%s5347_s10 + $0x58] sm:$0xf] }
 0x1a5   : > { %v1367_v13 = vsel %vm5494_vm5, %v1365_v22, %v1366_v53  ;;  %v1647_v22 = vrot.slane %v1645_v48, 4  ;;  %v6417_v48 = vld [vmem:[%s5347_s10 + $0x70] sm:$0xf] }
 0x1a6   : > { %v3491_v37 = vpop.f32.mrf.mxu2  ;;  %v6405_v7 = vrot.slane %v1641_v40, 5  ;;  %v4443_v40 = vld [vmem:[%s5347_s10 + $0x6c] sm:$0xf] }
 0x1a7   : > { %v3492_v23 = vadd.f32 %v3491_v37, %v3403_v54  ;;  %v3580_v62 = vpop.f32.mrf.mxu3  ;;  %v1976_v37 = vsel %vm5494_vm5, %v1974_v3, %v1975_v39  ;;  %v5029_v39 = vld [vmem:[%s5347_s10 + $0x54] sm:$0xff] }
 0x1a8   : > { %v3405_v32 = vpop.f32.mrf.mxu1 }
 0x1a9   : > { %v3581_v55 = vadd.f32 %v3580_v62, %v3492_v23  ;;  %v3406_v30 = vadd.f32 %v3405_v32, %v5686_v25  ;;  %v1973_v25 = vsel %vm5494_vm5, %v4498_v47, %v1972_v24  ;;  %v2409_v62 = vunpack.c.l.b16 %v1364_v8 }
 0x1aa   : > { %v3672_v19 = vpop.f32.mrf.mxu0  ;;  %v2554_v32 = vunpack.c.l.b16 %v1630_v59  ;;  %v2617_v24 = vunpack.c.l.b16 %v1973_v25 }
 0x1ab   : > { %3720 = vmatmul.bf16.gmra.mxu1 %v2435_v0  ;;  %3809 = vmatmul.bf16.gmra.mxu2 %v5028_v12  ;;  %v6381_v10 = vadd.f32 %v3669_v15, %v3581_v55  ;;  %v2410_v0 = vunpack.c.l.b16 %v1367_v13  ;;  %v2553_v12 = vunpack.c.l.b16 %v1620_v14  ;;  %v1637_v55 = vrot.slane %v1635_v63, 5  ;;  %v4403_v13 = vld [vmem:[%s5347_s10 + $0x54] sm:$0xe] }
 0x1ac   : > { %3898 = vmatmul.bf16.gmra.mxu3 %v2579_v31  ;;  %v2618_v31 = vunpack.c.l.b16 %v1976_v37  ;;  %v1979_v37 = vrot.slane %v6386_v50, 5  ;;  %v4419_v46 = vrot.slane %v4403_v13, 9 }
 0x1ad   : > { %3987 = vmatmul.bf16.gmra.mxu0 %v2643_v44  ;;  %v2436_v3 = vpack.c.b16 %v2410_v0, %v2409_v62  ;;  %v1638_v14 = vor.u32 %v1637_v55, %v1634_v16  ;;  %v5253_v62 = vld [vmem:[%s5347_s10 + $0x5c] sm:$0x1] }
 0x1ae   : > { %v3494_v56 = vpop.f32.mrf.mxu2  ;;  %v2644_v8 = vpack.c.b16 %v2618_v31, %v2617_v24  ;;  %v1373_v0 = vrot.slane %v5253_v62, 5  ;;  %v6790_v31 = vld [vmem:[#allocation3_spill] sm:$0xff]  ;;  %v1981_v55 = vrot.slane %v1979_v37, 4 }
 0x1af   : > { %v3495_v15 = vadd.f32 %v3494_v56, %v3406_v30  ;;  %v3583_v54 = vpop.f32.mrf.mxu3  ;;  %v2580_v30 = vpack.c.b16 %v2554_v32, %v2553_v12  ;;  %v1639_v12 = vrot.slane %v1638_v14, 4 }
 0x1b0   : > { %v3407_v4 = vpop.f32.mrf.mxu1 }
 0x1b1   : > { %v3584_v42 = vadd.f32 %v3583_v54, %v3495_v15  ;;  %v3408_v53 = vadd.f32 %v3407_v4, %v6789_v11  ;;  %v1648_v15 = vor.u32 %v1647_v22, %v6405_v7  ;;  %v1651_v54 = vshll.u32 %v4467_v57, 16  ;;  %v4483_v4 = vld [vmem:[%s5347_s10 + $0x60] sm:$0xe] }
 0x1b2   : > { %v3674_v23 = vpop.f32.mrf.mxu0  ;;  %v4499_v50 = vrot.slane %v4483_v4, 9  ;;  %v1982_v22 = vrot.slane %v4467_v57, 5  ;;  %v1644_v57 = vsel %vm5490_vm4, %v1639_v12, %v6405_v7 }
 0x1b3   : > { %v6403_v44 = vadd.f32 %v3672_v19, %v3584_v42  ;;  %v1370_v19 = vrot.slane %v5252_v5, 5  ;;  %v1649_v32 = vrot.slane %v1648_v15, 4  ;;  %v1653_v24 = vrot.slane %v1651_v54, 5 }
 0x1b4   : > { %v1980_v14 = vsel %vm5494_vm5, %v4499_v50, %v1979_v37  ;;  %v1983_v15 = vsel %vm5494_vm5, %v1981_v55, %v1982_v22  ;;  %v2555_v62 = vunpack.c.l.b16 %v1644_v57  ;;  %v6791_v37 = vld [vmem:[#allocation4_spill] sm:$0xff]  ;;  %v4404_v55 = vld [vmem:[%s5347_s10 + $0x60] sm:$0xe] }
 0x1b5   : > { %v1372_v63 = vrot.slane %v1370_v19, 4  ;;  %v1654_v13 = vsel %vm5490_vm4, %v1649_v32, %v1653_v24  ;;  %v2619_v12 = vunpack.c.l.b16 %v1980_v14  ;;  %v2620_v32 = vunpack.c.l.b16 %v1983_v15  ;;  %v5255_v15 = vld [vmem:[%s5347_s10 + $0x68] sm:$0x1] }
 0x1b6   : > { %v3496_v41 = vpop.f32.mrf.mxu2 }
 0x1b7   : > { %v3497_v52 = vadd.f32 %v3496_v41, %v3408_v53  ;;  %v3585_v47 = vpop.f32.mrf.mxu3  ;;  %v1656_v53 = vshrl.u32 %v4443_v40, 16  ;;  %v1659_v41 = vshll.u32 %v4443_v40, 16  ;;  %v1374_v5 = vsel %vm5494_vm5, %v1372_v63, %v1373_v0  ;;  %v4468_v63 = vld [vmem:[%s5347_s10 + $0x74] sm:$0x1] }
 0x1b8   : > { %v3410_v56 = vpop.f32.mrf.mxu1  ;;  %v2412_v7 = vunpack.c.l.b16 %v1374_v5  ;;  %v2556_v0 = vunpack.c.l.b16 %v1654_v13  ;;  %v2645_v5 = vpack.c.b16 %v2620_v32, %v2619_v12  ;;  %v4420_v13 = vrot.slane %v4404_v55, 9  ;;  %v4445_v12 = vld [vmem:[%s5347_s10 + $0x78] sm:$0xf]  ;;  %v6456_v32 = vld [vmem:[%s5347_s10 + $0x7c] sm:$0xf] }
 0x1b9   : > { %v3586_v59 = vadd.f32 %v3585_v47, %v3497_v52  ;;  %v3411_v16 = vadd.f32 %v3410_v56, %v6790_v31  ;;  %v1665_v52 = vshll.u32 %v6417_v48, 16  ;;  %v1661_v54 = vrot.slane %v1659_v41, 5  ;;  %v5254_v31 = vld [vmem:[%s5347_s10 + $0x64] sm:$0xf] }
 0x1ba   : > { %v3677_v25 = vpop.f32.mrf.mxu0 }
 0x1bb   : > { %3725 = vmatmul.bf16.gmra.mxu1 %v2436_v3  ;;  %3814 = vmatmul.bf16.gmra.mxu2 %v5029_v39  ;;  %v6419_v42 = vadd.f32 %v3674_v23, %v3586_v59  ;;  %v1669_v23 = vshrl.u32 %v6417_v48, 16  ;;  %v6438_v59 = vrot.slane %v1665_v52, 5 }
 0x1bc   : > { %3903 = vmatmul.bf16.gmra.mxu3 %v2580_v30  ;;  %v1371_v30 = vsel %vm5494_vm5, %v4419_v46, %v1370_v19  ;;  %v1658_v19 = vrot.slane %v1656_v53, 4  ;;  %v1675_v53 = vshll.u32 %v4468_v63, 16 }
 0x1bd   : > { %3992 = vmatmul.bf16.gmra.mxu0 %v2644_v8  ;;  %v1671_v4 = vrot.slane %v1669_v23, 4  ;;  %v2411_v46 = vunpack.c.l.b16 %v1371_v30  ;;  %v5030_v23 = vld [vmem:[%s5347_s10 + $0x60] sm:$0xff]  ;;  %v2581_v30 = vpack.c.b16 %v2556_v0, %v2555_v62  ;;  %v6792_v62 = vld [vmem:[#allocation5_spill] sm:$0xff] }
 0x1be   : > { %v3499_v11 = vpop.f32.mrf.mxu2  ;;  %v1662_v22 = vor.u32 %v1661_v54, %v1658_v19  ;;  %v1380_v19 = vrot.slane %v5255_v15, 5 }
 0x1bf   : > { %v3500_v47 = vadd.f32 %v3499_v11, %v3411_v16  ;;  %v3588_v3 = vpop.f32.mrf.mxu3  ;;  %v1377_v16 = vrot.slane %v5254_v31, 5  ;;  %v1672_v11 = vor.u32 %v1671_v4, %v6438_v59  ;;  %v2437_v52 = vpack.c.b16 %v2412_v7, %v2411_v46 }
 0x1c0   : > { %v3412_v39 = vpop.f32.mrf.mxu1  ;;  %v1663_v54 = vrot.slane %v1662_v22, 4 }
 0x1c1   : > { %v3589_v56 = vadd.f32 %v3588_v3, %v3500_v47  ;;  %v3413_v24 = vadd.f32 %v3412_v39, %v6791_v37  ;;  %v1986_v47 = vrot.slane %v6417_v48, 5  ;;  %v4484_v39 = vld [vmem:[%s5347_s10 + $0x6c] sm:$0xe]  ;;  %v1379_v14 = vrot.slane %v1377_v16, 4 }
 0x1c2   : > { %v3679_v8 = vpop.f32.mrf.mxu0  ;;  %v1673_v4 = vrot.slane %v1672_v11, 4  ;;  %v1677_v37 = vrot.slane %v1675_v53, 5  ;;  %v4500_v46 = vrot.slane %v4484_v39, 9  ;;  %v1989_v48 = vrot.slane %v4468_v63, 5 }
 0x1c3   : > { %v6441_v40 = vadd.f32 %v3677_v25, %v3589_v56  ;;  %v1988_v7 = vrot.slane %v1986_v47, 4  ;;  %v1381_v55 = vsel %vm5494_vm5, %v1379_v14, %v1380_v19  ;;  %v1668_v63 = vsel %vm5490_vm4, %v1663_v54, %v6438_v59 }
 0x1c4   : > { %v1678_v11 = vsel %vm5490_vm4, %v1673_v4, %v1677_v37  ;;  %v1987_v53 = vsel %vm5494_vm5, %v4500_v46, %v1986_v47  ;;  %v2414_v39 = vunpack.c.l.b16 %v1381_v55  ;;  %v6793_v46 = vld [vmem:[#allocation6_spill] sm:$0xff] }
 0x1c5   : > { %v2621_v47 = vunpack.c.l.b16 %v1987_v53 }
 0x1c6   : > { %v3501_v50 = vpop.f32.mrf.mxu2 }
 0x1c7   : > { %v3502_v41 = vadd.f32 %v3501_v50, %v3413_v24  ;;  %v3590_v25 = vpop.f32.mrf.mxu3  ;;  %v1378_v50 = vsel %vm5494_vm5, %v4420_v13, %v1377_v16  ;;  %v1680_v16 = vshrl.u32 %v4445_v12, 16  ;;  %v2558_v13 = vunpack.c.l.b16 %v1678_v11  ;;  %v4405_v11 = vld [vmem:[%s5347_s10 + $0x6c] sm:$0xe] }
 0x1c8   : > { %v3415_v3 = vpop.f32.mrf.mxu1 }
 0x1c9   : > { %v3591_v57 = vadd.f32 %v3590_v25, %v3502_v41  ;;  %v3416_v0 = vadd.f32 %v3415_v3, %v6792_v62  ;;  %v1990_v41 = vsel %vm5494_vm5, %v1988_v7, %v1989_v48  ;;  %v1693_v3 = vshrl.u32 %v6456_v32, 16  ;;  %v4469_v48 = vld [vmem:[%s5347_s10 + $0x80] sm:$0x1] }
 0x1ca   : > { %v3682_v56 = vpop.f32.mrf.mxu0  ;;  %v2622_v14 = vunpack.c.l.b16 %v1990_v41  ;;  %v1682_v19 = vrot.slane %v1680_v16, 4  ;;  %v1699_v16 = vshll.u32 %v4469_v48, 16 }
 0x1cb   : > { %3730 = vmatmul.bf16.gmra.mxu1 %v2437_v52  ;;  %3819 = vmatmul.bf16.gmra.mxu2 %v5030_v23  ;;  %v6451_v24 = vadd.f32 %v3679_v8, %v3591_v57  ;;  %v1683_v52 = vshll.u32 %v4445_v12, 16  ;;  %v1689_v23 = vshll.u32 %v6456_v32, 16  ;;  %v2557_v57 = vunpack.c.l.b16 %v1668_v63  ;;  %v5256_v63 = vld [vmem:[%s5347_s10 + $0x70] sm:$0xf] }
 0x1cc   : > { %3908 = vmatmul.bf16.gmra.mxu3 %v2581_v30  ;;  %v1695_v37 = vrot.slane %v1693_v3, 4  ;;  %v4485_v3 = vld [vmem:[%s5347_s10 + $0x78] sm:$0xe] }
 0x1cd   : > { %3997 = vmatmul.bf16.gmra.mxu0 %v2645_v5  ;;  %v2413_v5 = vunpack.c.l.b16 %v1378_v50  ;;  %v1685_v54 = vrot.slane %v1683_v52, 5  ;;  %v1691_v4 = vrot.slane %v1689_v23, 5  ;;  %v5031_v50 = vld [vmem:[%s5347_s10 + $0x6c] sm:$0xff]  ;;  %v2582_v55 = vpack.c.b16 %v2558_v13, %v2557_v57  ;;  %v4447_v13 = vld [vmem:[%s5347_s10 + $0x84] sm:$0xf] }
 0x1ce   : > { %v3504_v31 = vpop.f32.mrf.mxu2  ;;  %v1993_v23 = vrot.slane %v6456_v32, 5 }
 0x1cf   : > { %v3505_v8 = vadd.f32 %v3504_v31, %v3416_v0  ;;  %v3593_v22 = vpop.f32.mrf.mxu3  ;;  %v2438_v31 = vpack.c.b16 %v2414_v39, %v2413_v5  ;;  %v1686_v53 = vor.u32 %v1685_v54, %v1682_v19  ;;  %v1696_v41 = vor.u32 %v1695_v37, %v1691_v4  ;;  %v5257_v39 = vld [vmem:[%s5347_s10 + $0x74] sm:$0x1]  ;;  %v6794_v54 = vld [vmem:[#allocation7_spill] sm:$0xff] }
 0x1d0   : > { %v3417_v25 = vpop.f32.mrf.mxu1  ;;  %v1387_v57 = vrot.slane %v5257_v39, 5  ;;  %v1701_v19 = vrot.slane %v1699_v16, 5  ;;  %v1995_v32 = vrot.slane %v1993_v23, 4 }
 0x1d1   : > { %v3594_v59 = vadd.f32 %v3593_v22, %v3505_v8  ;;  %v3418_v7 = vadd.f32 %v3417_v25, %v6793_v46  ;;  %v1384_v8 = vrot.slane %v5256_v63, 5  ;;  %v2646_v22 = vpack.c.b16 %v2622_v14, %v2621_v47 }
 0x1d2   : > { %v3684_v30 = vpop.f32.mrf.mxu0  ;;  %v1687_v47 = vrot.slane %v1686_v53, 4  ;;  %v1697_v14 = vrot.slane %v1696_v41, 4 }
 0x1d3   : > { %v6473_v15 = vadd.f32 %v3682_v56, %v3594_v59  ;;  %v4421_v59 = vrot.slane %v4405_v11, 9  ;;  %v1386_v5 = vrot.slane %v1384_v8, 4 }
 0x1d6   : > { %v3506_v62 = vpop.f32.mrf.mxu2 }
 0x1d7   : > { %v3507_v0 = vadd.f32 %v3506_v62, %v3418_v7  ;;  %v3595_v12 = vpop.f32.mrf.mxu3  ;;  %v4501_v7 = vrot.slane %v4485_v3, 9  ;;  %v1996_v62 = vrot.slane %v4469_v48, 5  ;;  %v1702_v48 = vsel %vm5490_vm4, %v1697_v14, %v1701_v19 }
 0x1d8   : > { %v3420_v56 = vpop.f32.mrf.mxu1 }
 0x1d9   : > { %v3596_v52 = vadd.f32 %v3595_v12, %v3507_v0  ;;  %v3421_v37 = vadd.f32 %v3420_v56, %v6794_v54  ;;  %v6488_v0 = vld [vmem:[%s5347_s10 + $0x88] sm:$0xf]  ;;  %v1692_v56 = vsel %vm5490_vm4, %v1687_v47, %v1691_v4  ;;  %v1997_v3 = vsel %vm5494_vm5, %v1995_v32, %v1996_v62  ;;  %v4470_v62 = vld [vmem:[%s5347_s10 + $0x8c] sm:$0x1] }
 0x1da   : > { %v3687_v25 = vpop.f32.mrf.mxu0  ;;  %v1713_v53 = vshll.u32 %v6488_v0, 16  ;;  %v1717_v41 = vshrl.u32 %v6488_v0, 16  ;;  %v2624_v19 = vunpack.c.l.b16 %v1997_v3  ;;  %v2000_v3 = vrot.slane %v6488_v0, 5 }
 0x1db   : > { %3735 = vmatmul.bf16.gmra.mxu1 %v2438_v31  ;;  %3824 = vmatmul.bf16.gmra.mxu2 %v5031_v50  ;;  %v6484_v46 = vadd.f32 %v3684_v30, %v3596_v52  ;;  %v1704_v31 = vshrl.u32 %v4447_v13, 16  ;;  %v1707_v50 = vshll.u32 %v4447_v13, 16  ;;  %v1385_v30 = vsel %vm5494_vm5, %v4421_v59, %v1384_v8 }
 0x1dc   : > { %3913 = vmatmul.bf16.gmra.mxu3 %v2582_v55  ;;  %v1388_v55 = vsel %vm5494_vm5, %v1386_v5, %v1387_v57  ;;  %v1994_v8 = vsel %vm5494_vm5, %v4501_v7, %v1993_v23  ;;  %v2415_v59 = vunpack.c.l.b16 %v1385_v30  ;;  %v2559_v57 = vunpack.c.l.b16 %v1692_v56  ;;  %v4406_v56 = vld [vmem:[%s5347_s10 + $0x78] sm:$0xe] }
 0x1dd   : > { %4002 = vmatmul.bf16.gmra.mxu0 %v2646_v22  ;;  %v1706_v5 = vrot.slane %v1704_v31, 4  ;;  %v1709_v4 = vrot.slane %v1707_v50, 5  ;;  %v2416_v39 = vunpack.c.l.b16 %v1388_v55  ;;  %v2560_v13 = vunpack.c.l.b16 %v1702_v48  ;;  %v5032_v55 = vld [vmem:[%s5347_s10 + $0x78] sm:$0xff] }
 0x1de   : > { %v3509_v12 = vpop.f32.mrf.mxu2  ;;  %v2623_v14 = vunpack.c.l.b16 %v1994_v8  ;;  %v1715_v54 = vrot.slane %v1713_v53, 5  ;;  %v2003_v0 = vrot.slane %v4470_v62, 5 }
 0x1df   : > { %v3510_v63 = vadd.f32 %v3509_v12, %v3421_v37  ;;  %v3598_v11 = vpop.f32.mrf.mxu3  ;;  %v1719_v37 = vrot.slane %v1717_v41, 4  ;;  %v6795_v12 = vld [vmem:[#allocation8_spill] sm:$0xff]  ;;  %v2439_v30 = vpack.c.b16 %v2416_v39, %v2415_v59  ;;  %v2583_v48 = vpack.c.b16 %v2560_v13, %v2559_v57  ;;  %v4486_v59 = vld [vmem:[%s5347_s10 + $0x84] sm:$0xe] }
 0x1e0   : > { %v3422_v22 = vpop.f32.mrf.mxu1  ;;  %v4449_v13 = vld [vmem:[%s5347_s10 + $0x90] sm:$0xf] }
 0x1e1   : > { %v3599_v16 = vadd.f32 %v3598_v11, %v3510_v63  ;;  %v3423_v23 = vadd.f32 %v3422_v22, %v6795_v12  ;;  %v5258_v63 = vld [vmem:[%s5347_s10 + $0x7c] sm:$0xf]  ;;  %v1710_v11 = vor.u32 %v1709_v4, %v1706_v5  ;;  %v1720_v8 = vor.u32 %v1719_v37, %v1715_v54  ;;  %v5259_v4 = vld [vmem:[%s5347_s10 + $0x80] sm:$0x1] }
 0x1e2   : > { %v3689_v52 = vpop.f32.mrf.mxu0  ;;  %v1391_v32 = vrot.slane %v5258_v63, 5  ;;  %v1723_v22 = vshll.u32 %v4470_v62, 16  ;;  %v4422_v12 = vrot.slane %v4406_v56, 9  ;;  %v4502_v37 = vrot.slane %v4486_v59, 9 }
 0x1e3   : > { %v6504_v47 = vadd.f32 %v3687_v25, %v3599_v16  ;;  %v2647_v16 = vpack.c.b16 %v2624_v19, %v2623_v14  ;;  %v1721_v57 = vrot.slane %v1720_v8, 4  ;;  %v6518_v14 = vld [vmem:[%s5347_s10 + $0x94] sm:$0xf]  ;;  %v2002_v63 = vrot.slane %v2000_v3, 4 }
 0x1e4   : > { %v1393_v5 = vrot.slane %v1391_v32, 4  ;;  %v1725_v19 = vrot.slane %v1723_v22, 5  ;;  %v1728_v56 = vshrl.u32 %v4449_v13, 16  ;;  %v1741_v8 = vshrl.u32 %v6518_v14, 16 }
 0x1e6   : > { %v3511_v7 = vpop.f32.mrf.mxu2  ;;  %v1743_v59 = vrot.slane %v1741_v8, 4 }
 0x1e7   : > { %v3512_v31 = vadd.f32 %v3511_v7, %v3423_v23  ;;  %v3600_v50 = vpop.f32.mrf.mxu3  ;;  %v1394_v23 = vrot.slane %v5259_v4, 5  ;;  %v1711_v7 = vrot.slane %v1710_v11, 4  ;;  %v1392_v11 = vsel %vm5494_vm5, %v4422_v12, %v1391_v32 }
 0x1e8   : > { %v3701_v25 = vpop.f32.mrf.mxu1  ;;  %v1726_v32 = vsel %vm5490_vm4, %v1721_v57, %v1725_v19  ;;  %v2417_v22 = vunpack.c.l.b16 %v1392_v11  ;;  %v1730_v4 = vrot.slane %v1728_v56, 4  ;;  %v5033_v56 = vld [vmem:[%s5347_s10 + $0x84] sm:$0xff] }
 0x1e9   : > { %v3601_v53 = vadd.f32 %v3600_v50, %v3512_v31  ;;  %v3702_v31 = vadd.f32 %v3701_v25, %v5938_v27  ;;  %v2001_v25 = vsel %vm5494_vm5, %v4502_v37, %v2000_v3 }
 0x1ea   : > { %v3968_v41 = vpop.f32.mrf.mxu0  ;;  %v2625_v57 = vunpack.c.l.b16 %v2001_v25 }
 0x1eb   : > { %3740 = vmatmul.bf16.gmra.mxu1 %v2439_v30  ;;  %3829 = vmatmul.bf16.gmra.mxu2 %v5032_v55  ;;  %v6514_v39 = vadd.f32 %v3689_v52, %v3601_v53  ;;  %v1395_v52 = vsel %vm5494_vm5, %v1393_v5, %v1394_v23  ;;  %v1716_v30 = vsel %vm5490_vm4, %v1711_v7, %v1715_v54 }
 0x1ec   : > { %3918 = vmatmul.bf16.gmra.mxu3 %v2583_v48  ;;  %v1731_v48 = vshll.u32 %v4449_v13, 16  ;;  %v2004_v54 = vsel %vm5494_vm5, %v2002_v63, %v2003_v0  ;;  %v2418_v12 = vunpack.c.l.b16 %v1395_v52  ;;  %v2561_v5 = vunpack.c.l.b16 %v1716_v30  ;;  %v5260_v0 = vld [vmem:[%s5347_s10 + $0x88] sm:$0xf] }
 0x1ed   : > { %4007 = vmatmul.bf16.gmra.mxu0 %v2647_v16  ;;  %v1737_v16 = vshll.u32 %v6518_v14, 16  ;;  %v2626_v19 = vunpack.c.l.b16 %v2004_v54  ;;  %v1398_v11 = vrot.slane %v5260_v0, 5  ;;  %v5261_v0 = vld [vmem:[%s5347_s10 + $0x8c] sm:$0x1] }
 0x1ee   : > { %v3790_v50 = vpop.f32.mrf.mxu2  ;;  %v1733_v23 = vrot.slane %v1731_v48, 5  ;;  %v2440_v63 = vpack.c.b16 %v2418_v12, %v2417_v22  ;;  %v4407_v48 = vld [vmem:[%s5347_s10 + $0x84] sm:$0xe]  ;;  %v4487_v12 = vld [vmem:[%s5347_s10 + $0x90] sm:$0xe] }
 0x1ef   : > { %v3879_v55 = vpop.f32.mrf.mxu3  ;;  %v3791_v62 = vadd.f32 %v3790_v50, %v3702_v31  ;;  %v6535_v7 = vrot.slane %v1737_v16, 5  ;;  %v2562_v31 = vunpack.c.l.b16 %v1726_v32  ;;  %v6538_v50 = vld [vmem:[%s5347_s10 + $0x98] sm:$0x1] }
 0x1f0   : > { %v3703_v53 = vpop.f32.mrf.mxu1  ;;  %v1734_v16 = vor.u32 %v1733_v23, %v1730_v4  ;;  %v1747_v8 = vshll.u32 %v6538_v50, 16  ;;  %v1401_v4 = vrot.slane %v5261_v0, 5 }
 0x1f1   : > { %v3880_v13 = vadd.f32 %v3879_v55, %v3791_v62  ;;  %v3704_v3 = vadd.f32 %v3703_v53, %v5940_v2  ;;  %v1744_v55 = vor.u32 %v1743_v59, %v6535_v7  ;;  %v2584_v25 = vpack.c.b16 %v2562_v31, %v2561_v5  ;;  %v4451_v5 = vld [vmem:[%s5347_s10 + $0x9c] sm:$0xf] }
 0x1f2   : > { %v3970_v27 = vpop.f32.mrf.mxu0  ;;  %v2648_v2 = vpack.c.b16 %v2626_v19, %v2625_v57  ;;  %v2007_v53 = vrot.slane %v6518_v14, 5  ;;  %v1735_v59 = vrot.slane %v1734_v16, 4  ;;  %v4503_v14 = vrot.slane %v4487_v12, 9 }
 0x1f3   : > { %v3969_v62 = vadd.f32 %v3968_v41, %v3880_v13  ;;  %v1745_v41 = vrot.slane %v1744_v55, 4  ;;  %v1749_v13 = vrot.slane %v1747_v8, 5  ;;  %v2010_v19 = vrot.slane %v6538_v50, 5 }
 0x1f4   : > { %v2009_v57 = vrot.slane %v2007_v53, 4  ;;  %v1752_v8 = vshrl.u32 %v4451_v5, 16 }
 0x1f5   : > { %v4150_v31 = vmul.f32 %v3969_v62, %v3969_v62 }
 0x1f6   : > { %v3792_v37 = vpop.f32.mrf.mxu2 }
 0x1f7   : > { %v3793_v52 = vadd.f32 %v3792_v37, %v3704_v3  ;;  %v3881_v30 = vpop.f32.mrf.mxu3  ;;  %v4423_v3 = vrot.slane %v4407_v48, 9  ;;  %v1400_v37 = vrot.slane %v1398_v11, 4 }
 0x1f8   : > { %v3706_v32 = vpop.f32.mrf.mxu1 }
 0x1f9   : > { %v3882_v54 = vadd.f32 %v3881_v30, %v3793_v52  ;;  %v1399_v16 = vsel %vm5494_vm5, %v4423_v3, %v1398_v11  ;;  %v1402_v55 = vsel %vm5494_vm5, %v1400_v37, %v1401_v4  ;;  %v1750_v3 = vsel %vm5490_vm4, %v1745_v41, %v1749_v13 }
 0x1fa   : > { %v3973_v22 = vpop.f32.mrf.mxu0  ;;  %v2008_v37 = vsel %vm5494_vm5, %v4503_v14, %v2007_v53  ;;  %v2011_v4 = vsel %vm5494_vm5, %v2009_v57, %v2010_v19  ;;  %v2564_v41 = vunpack.c.l.b16 %v1750_v3  ;;  %v4472_v57 = vld [vmem:[%s5347_s10 + $0xa4] sm:$0x1] }
 0x1fb   : > { %v3971_v23 = vadd.f32 %v3970_v27, %v3882_v54  ;;  %3745 = vmatmul.bf16.gmra.mxu1 %v2440_v63  ;;  %3834 = vmatmul.bf16.gmra.mxu2 %v5033_v56  ;;  %v6558_v27 = vld [vmem:[%s5347_s10 + $0xa0] sm:$0xf]  ;;  %v3707_v56 = vadd.f32 %v3706_v32, %v5981_v1  ;;  %v1740_v1 = vsel %vm5490_vm4, %v1735_v59, %v6535_v7  ;;  %v2627_v13 = vunpack.c.l.b16 %v2008_v37 }
 0x1fc   : > { %3923 = vmatmul.bf16.gmra.mxu3 %v2584_v25  ;;  %v1755_v25 = vshll.u32 %v4451_v5, 16  ;;  %v1761_v12 = vshll.u32 %v6558_v27, 16  ;;  %v2420_v5 = vunpack.c.l.b16 %v1402_v55  ;;  %v2563_v59 = vunpack.c.l.b16 %v1740_v1  ;;  %v5262_v55 = vld [vmem:[%s5347_s10 + $0x94] sm:$0xf] }
 0x1fd   : > { %4012 = vmatmul.bf16.gmra.mxu0 %v2648_v2  ;;  %v5115_v63 = vpack.c.bf16 %v3971_v23, %v3969_v62  ;;  %v4112_v52 = vadd.f32 %v3971_v23, %v3969_v62  ;;  %v4151_v30 = vmul.f32 %v3971_v23, %v3971_v23  ;;  %v1765_v62 = vshrl.u32 %v6558_v27, 16 }
 0x1fe   : > { %v3795_v48 = vpop.f32.mrf.mxu2  ;;  %v2419_v23 = vunpack.c.l.b16 %v1399_v16 }
 0x1ff   : > { %5116 = vst [vmem:[%s6554_s29] sm:$0xff] %v5115_v63   ;;  %v4182_v2 = vadd.f32 %v4151_v30, %v4150_v31  ;;  %v3796_v54 = vadd.f32 %v3795_v48, %v3707_v56  ;;  %v3884_v50 = vpop.f32.mrf.mxu3  ;;  %v1754_v31 = vrot.slane %v1752_v8, 4  ;;  %v1757_v30 = vrot.slane %v1755_v25, 5 }
 0x200   : > { %v3708_v0 = vpop.f32.mrf.mxu1  ;;  %v6577_v56 = vrot.slane %v1761_v12, 5  ;;  %v1767_v7 = vrot.slane %v1765_v62, 4  ;;  %v2628_v48 = vunpack.c.l.b16 %v2011_v4  ;;  %v2441_v16 = vpack.c.b16 %v2420_v5, %v2419_v23  ;;  %v5034_v12 = vld [vmem:[%s5347_s10 + $0x90] sm:$0xff]  ;;  %v4488_v5 = vld [vmem:[%s5347_s10 + $0x9c] sm:$0xe] }
 0x201   : > { %v3885_v32 = vadd.f32 %v3884_v50, %v3796_v54  ;;  %v3709_v54 = vadd.f32 %v3708_v0, %v5983_v60  ;;  %v4408_v62 = vld [vmem:[%s5347_s10 + $0x90] sm:$0xe]  ;;  %v1758_v1 = vor.u32 %v1757_v30, %v1754_v31  ;;  %v1771_v60 = vshll.u32 %v4472_v57, 16 }
 0x202   : > { %v3975_v11 = vpop.f32.mrf.mxu0  ;;  %v2649_v37 = vpack.c.b16 %v2628_v48, %v2627_v13  ;;  %v2014_v0 = vrot.slane %v6558_v27, 5  ;;  %v2017_v13 = vrot.slane %v4472_v57, 5  ;;  %v6590_v48 = vld [vmem:[%s5347_s10 + $0xac] sm:$0xf] }
 0x203   : > { %v3974_v63 = vadd.f32 %v3973_v22, %v3885_v32  ;;  %v1405_v22 = vrot.slane %v5262_v55, 5  ;;  %v1768_v32 = vor.u32 %v1767_v7, %v6577_v56  ;;  %v4424_v55 = vrot.slane %v4408_v62, 9  ;;  %v4453_v7 = vld [vmem:[%s5347_s10 + $0xa8] sm:$0xf] }
 0x204   : > { %v1759_v31 = vrot.slane %v1758_v1, 4  ;;  %v2016_v27 = vrot.slane %v2014_v0, 4  ;;  %v1776_v1 = vshrl.u32 %v4453_v7, 16 }
 0x205   : > { %v4113_v53 = vadd.f32 %v4112_v52, %v3974_v63  ;;  %v4152_v14 = vmul.f32 %v3974_v63, %v3974_v63  ;;  %v2585_v52 = vpack.c.b16 %v2564_v41, %v2563_v59  ;;  %v1769_v30 = vrot.slane %v1768_v32, 4 }
 0x206   : > { %v3797_v19 = vpop.f32.mrf.mxu2  ;;  %v1773_v59 = vrot.slane %v1771_v60, 5  ;;  %v4504_v41 = vrot.slane %v4488_v5, 9  ;;  %v1779_v32 = vshll.u32 %v4453_v7, 16  ;;  %v1785_v60 = vshll.u32 %v6590_v48, 16 }
 0x207   : > { %v4183_v8 = vadd.f32 %v4182_v2, %v4152_v14  ;;  %v3798_v25 = vadd.f32 %v3797_v19, %v3709_v54  ;;  %v3886_v50 = vpop.f32.mrf.mxu3  ;;  %v1407_v2 = vrot.slane %v1405_v22, 4  ;;  %v5263_v14 = vld [vmem:[%s5347_s10 + $0x98] sm:$0x1] }
 0x208   : > { %v3711_v3 = vpop.f32.mrf.mxu1  ;;  %v1408_v54 = vrot.slane %v5263_v14, 5  ;;  %v2015_v5 = vsel %vm5494_vm5, %v4504_v41, %v2014_v0  ;;  %v1781_v7 = vrot.slane %v1779_v32, 5 }
 0x209   : > { %v3887_v4 = vadd.f32 %v3886_v50, %v3798_v25  ;;  %v3712_v14 = vadd.f32 %v3711_v3, %v6040_v51  ;;  %v1764_v51 = vsel %vm5490_vm4, %v1759_v31, %v6577_v56 }
 0x20a   : > { %v3978_v23 = vpop.f32.mrf.mxu0  ;;  %v2565_v31 = vunpack.c.l.b16 %v1764_v51 }
 0x20b   : > { %v3976_v19 = vadd.f32 %v3975_v11, %v3887_v4  ;;  %3750 = vmatmul.bf16.gmra.mxu1 %v2441_v16  ;;  %3839 = vmatmul.bf16.gmra.mxu2 %v5034_v12  ;;  %v1406_v16 = vsel %vm5494_vm5, %v4424_v55, %v1405_v22  ;;  %v1409_v12 = vsel %vm5494_vm5, %v1407_v2, %v1408_v54  ;;  %v1778_v54 = vrot.slane %v1776_v1, 4 }
 0x20c   : > { %3928 = vmatmul.bf16.gmra.mxu3 %v2585_v52  ;;  %v1774_v4 = vsel %vm5490_vm4, %v1769_v30, %v1773_v59  ;;  %v2421_v55 = vunpack.c.l.b16 %v1406_v16  ;;  %v2422_v2 = vunpack.c.l.b16 %v1409_v12  ;;  %v2629_v59 = vunpack.c.l.b16 %v2015_v5  ;;  %v5264_v12 = vld [vmem:[%s5347_s10 + $0xa0] sm:$0xf] }
 0x20d   : > { %4017 = vmatmul.bf16.gmra.mxu0 %v2649_v37  ;;  %v5120_v25 = vpack.c.bf16 %v3976_v19, %v3974_v63  ;;  %v4114_v50 = vadd.f32 %v4113_v53, %v3976_v19  ;;  %v4153_v62 = vmul.f32 %v3976_v19, %v3976_v19  ;;  %v1789_v63 = vshrl.u32 %v6590_v48, 16 }
 0x20e   : > { %v3800_v11 = vpop.f32.mrf.mxu2  ;;  %v2566_v30 = vunpack.c.l.b16 %v1774_v4  ;;  %v2442_v16 = vpack.c.b16 %v2422_v2, %v2421_v55  ;;  %v2021_v5 = vrot.slane %v6590_v48, 5  ;;  %v4489_v2 = vld [vmem:[%s5347_s10 + $0xa8] sm:$0xe] }
 0x20f   : > { %5192 = vst [vmem:[%s6554_s29 + $0x8] sm:$0xff] %v5120_v25   ;;  %v4184_v52 = vadd.f32 %v4183_v8, %v4153_v62  ;;  %v3801_v37 = vadd.f32 %v3800_v11, %v3712_v14  ;;  %v3889_v57 = vpop.f32.mrf.mxu3  ;;  %v2018_v8 = vsel %vm5494_vm5, %v2016_v27, %v2017_v13  ;;  %v6609_v25 = vrot.slane %v1785_v60, 5  ;;  %v6796_v14 = vld [vmem:[#allocation9_spill] sm:$0xff]  ;;  %v4473_v27 = vld [vmem:[%s5347_s10 + $0xb0] sm:$0x1] }
 0x210   : > { %v3713_v53 = vpop.f32.mrf.mxu1  ;;  %v1791_v56 = vrot.slane %v1789_v63, 4  ;;  %v2630_v62 = vunpack.c.l.b16 %v2018_v8  ;;  %v4409_v60 = vld [vmem:[%s5347_s10 + $0x9c] sm:$0xe]  ;;  %v1782_v63 = vor.u32 %v1781_v7, %v1778_v54  ;;  %v2023_v48 = vrot.slane %v2021_v5, 4 }
 0x211   : > { %v3890_v3 = vadd.f32 %v3889_v57, %v3801_v37  ;;  %v3714_v11 = vadd.f32 %v3713_v53, %v6796_v14  ;;  %v5035_v57 = vld [vmem:[%s5347_s10 + $0x9c] sm:$0xff]  ;;  %v1795_v53 = vshll.u32 %v4473_v27, 16  ;;  %v4425_v14 = vrot.slane %v4409_v60, 9 }
 0x212   : > { %v3980_v22 = vpop.f32.mrf.mxu0  ;;  %v1792_v51 = vor.u32 %v1791_v56, %v6609_v25  ;;  %v2650_v4 = vpack.c.b16 %v2630_v62, %v2629_v59  ;;  %v1783_v54 = vrot.slane %v1782_v63, 4  ;;  %v4455_v56 = vld [vmem:[%s5347_s10 + $0xb4] sm:$0xf]  ;;  %v2024_v59 = vrot.slane %v4473_v27, 5  ;;  %v6622_v62 = vld [vmem:[%s5347_s10 + $0xb8] sm:$0xf] }
 0x213   : > { %v3979_v19 = vadd.f32 %v3978_v23, %v3890_v3  ;;  %v1412_v23 = vrot.slane %v5264_v12, 5  ;;  %v1800_v63 = vshrl.u32 %v4455_v56, 16 }
 0x214   : > { %v1793_v7 = vrot.slane %v1792_v51, 4  ;;  %v1803_v51 = vshll.u32 %v4455_v56, 16 }
 0x215   : > { %v4115_v0 = vadd.f32 %v4114_v50, %v3979_v19  ;;  %v4154_v41 = vmul.f32 %v3979_v19, %v3979_v19  ;;  %v2586_v50 = vpack.c.b16 %v2566_v30, %v2565_v31  ;;  %v1797_v31 = vrot.slane %v1795_v53, 5 }
 0x216   : > { %v3802_v13 = vpop.f32.mrf.mxu2  ;;  %v4505_v30 = vrot.slane %v4489_v2, 9  ;;  %v1809_v53 = vshll.u32 %v6622_v62, 16 }
 0x217   : > { %v4185_v1 = vadd.f32 %v4184_v52, %v4154_v41  ;;  %v3803_v32 = vadd.f32 %v3802_v13, %v3714_v11  ;;  %v3891_v37 = vpop.f32.mrf.mxu3  ;;  %v1414_v52 = vrot.slane %v1412_v23, 4  ;;  %v5265_v41 = vld [vmem:[%s5347_s10 + $0xa4] sm:$0x1] }
 0x218   : > { %v3716_v3 = vpop.f32.mrf.mxu1  ;;  %v1415_v11 = vrot.slane %v5265_v41, 5  ;;  %v2022_v2 = vsel %vm5494_vm5, %v4505_v30, %v2021_v5  ;;  %v1802_v41 = vrot.slane %v1800_v63, 4  ;;  %v6641_v56 = vrot.slane %v1809_v53, 5 }
 0x219   : > { %v3892_v8 = vadd.f32 %v3891_v37, %v3803_v32  ;;  %v3717_v60 = vadd.f32 %v3716_v3, %v6081_v18  ;;  %v1788_v18 = vsel %vm5490_vm4, %v1783_v54, %v6609_v25 }
 0x21a   : > { %v3983_v55 = vpop.f32.mrf.mxu0  ;;  %v2567_v54 = vunpack.c.l.b16 %v1788_v18 }
 0x21b   : > { %v3981_v13 = vadd.f32 %v3980_v22, %v3892_v8  ;;  %3755 = vmatmul.bf16.gmra.mxu1 %v2442_v16  ;;  %3844 = vmatmul.bf16.gmra.mxu2 %v5035_v57  ;;  %v1413_v16 = vsel %vm5494_vm5, %v4425_v14, %v1412_v23  ;;  %v1416_v57 = vsel %vm5494_vm5, %v1414_v52, %v1415_v11 }
 0x21c   : > { %3933 = vmatmul.bf16.gmra.mxu3 %v2586_v50  ;;  %v1798_v8 = vsel %vm5490_vm4, %v1793_v7, %v1797_v31  ;;  %v2423_v14 = vunpack.c.l.b16 %v1413_v16  ;;  %v2424_v52 = vunpack.c.l.b16 %v1416_v57  ;;  %v2631_v31 = vunpack.c.l.b16 %v2022_v2  ;;  %v4490_v2 = vld [vmem:[%s5347_s10 + $0xb4] sm:$0xe] }
 0x21d   : > { %4022 = vmatmul.bf16.gmra.mxu0 %v2650_v4  ;;  %v5125_v12 = vpack.c.bf16 %v3981_v13, %v3979_v19  ;;  %v4116_v32 = vadd.f32 %v4115_v0, %v3981_v13  ;;  %v4155_v37 = vmul.f32 %v3981_v13, %v3981_v13  ;;  %v1813_v19 = vshrl.u32 %v6622_v62, 16 }
 0x21e   : > { %v3805_v22 = vpop.f32.mrf.mxu2  ;;  %v1805_v13 = vrot.slane %v1803_v51, 5  ;;  %v2568_v7 = vunpack.c.l.b16 %v1798_v8  ;;  %v5036_v51 = vld [vmem:[%s5347_s10 + $0xa8] sm:$0xff] }
 0x21f   : > { %5193 = vst [vmem:[%s6554_s29 + $0x10] sm:$0xff] %v5125_v12   ;;  %v4186_v50 = vadd.f32 %v4185_v1, %v4155_v37  ;;  %v3806_v4 = vadd.f32 %v3805_v22, %v3717_v60  ;;  %v3894_v27 = vpop.f32.mrf.mxu3  ;;  %v2025_v1 = vsel %vm5494_vm5, %v2023_v48, %v2024_v59  ;;  %v1815_v25 = vrot.slane %v1813_v19, 4  ;;  %v4474_v48 = vld [vmem:[%s5347_s10 + $0xbc] sm:$0x1]  ;;  %v5266_v22 = vld [vmem:[%s5347_s10 + $0xac] sm:$0xf] }
 0x220   : > { %v3718_v0 = vpop.f32.mrf.mxu1  ;;  %v2632_v12 = vunpack.c.l.b16 %v2025_v1  ;;  %v2443_v60 = vpack.c.b16 %v2424_v52, %v2423_v14  ;;  %v5267_v14 = vld [vmem:[%s5347_s10 + $0xb0] sm:$0x1] }
 0x221   : > { %v3895_v3 = vadd.f32 %v3894_v27, %v3806_v4  ;;  %v3719_v37 = vadd.f32 %v3718_v0, %v6083_v26  ;;  %v4410_v4 = vld [vmem:[%s5347_s10 + $0xa8] sm:$0xe]  ;;  %v1806_v27 = vor.u32 %v1805_v13, %v1802_v41  ;;  %v1816_v53 = vor.u32 %v1815_v25, %v6641_v56  ;;  %v4457_v25 = vld [vmem:[%s5347_s10 + $0xc0] sm:$0xf] }
 0x222   : > { %v3985_v23 = vpop.f32.mrf.mxu0  ;;  %v2651_v18 = vpack.c.b16 %v2632_v12, %v2631_v31  ;;  %v1819_v26 = vshll.u32 %v4474_v48, 16  ;;  %v2028_v0 = vrot.slane %v6622_v62, 5  ;;  %v4426_v1 = vrot.slane %v4410_v4, 9  ;;  %v6654_v12 = vld [vmem:[%s5347_s10 + $0xc4] sm:$0xf] }
 0x223   : > { %v3984_v11 = vadd.f32 %v3983_v55, %v3895_v3  ;;  %v1419_v55 = vrot.slane %v5266_v22, 5  ;;  %v1422_v52 = vrot.slane %v5267_v14, 5  ;;  %v1807_v41 = vrot.slane %v1806_v27, 4 }
 0x224   : > { %v1817_v13 = vrot.slane %v1816_v53, 4  ;;  %v2030_v62 = vrot.slane %v2028_v0, 4  ;;  %v2031_v31 = vrot.slane %v4474_v48, 5  ;;  %v1827_v4 = vshll.u32 %v4457_v25, 16 }
 0x225   : > { %v4117_v5 = vadd.f32 %v4116_v32, %v3984_v11  ;;  %v4156_v30 = vmul.f32 %v3984_v11, %v3984_v11  ;;  %v2587_v32 = vpack.c.b16 %v2568_v7, %v2567_v54  ;;  %v1821_v54 = vrot.slane %v1819_v26, 5 }
 0x226   : > { %v3807_v59 = vpop.f32.mrf.mxu2  ;;  %v4506_v7 = vrot.slane %v4490_v2, 9  ;;  %v1829_v14 = vrot.slane %v1827_v4, 5 }
 0x227   : > { %v4187_v16 = vadd.f32 %v4186_v50, %v4156_v30  ;;  %v3808_v57 = vadd.f32 %v3807_v59, %v3719_v37  ;;  %v3896_v63 = vpop.f32.mrf.mxu3  ;;  %v1421_v50 = vrot.slane %v1419_v55, 4 }
 0x228   : > { %v3721_v19 = vpop.f32.mrf.mxu1  ;;  %v2029_v26 = vsel %vm5494_vm5, %v4506_v7, %v2028_v0 }
 0x229   : > { %v3897_v3 = vadd.f32 %v3896_v63, %v3808_v57  ;;  %v3722_v57 = vadd.f32 %v3721_v19, %v6146_v49  ;;  %v1423_v63 = vsel %vm5494_vm5, %v1421_v50, %v1422_v52  ;;  %v1812_v49 = vsel %vm5490_vm4, %v1807_v41, %v6641_v56 }
 0x22a   : > { %v3988_v8 = vpop.f32.mrf.mxu0  ;;  %v2426_v2 = vunpack.c.l.b16 %v1423_v63  ;;  %v5037_v63 = vld [vmem:[%s5347_s10 + $0xb4] sm:$0xff] }
 0x22b   : > { %v3986_v30 = vadd.f32 %v3985_v23, %v3897_v3  ;;  %3760 = vmatmul.bf16.gmra.mxu1 %v2443_v60  ;;  %3849 = vmatmul.bf16.gmra.mxu2 %v5036_v51  ;;  %v1420_v60 = vsel %vm5494_vm5, %v4426_v1, %v1419_v55  ;;  %v1824_v51 = vshrl.u32 %v4457_v25, 16 }
 0x22c   : > { %3938 = vmatmul.bf16.gmra.mxu3 %v2587_v32  ;;  %v1833_v32 = vshll.u32 %v6654_v12, 16  ;;  %v2425_v3 = vunpack.c.l.b16 %v1420_v60 }
 0x22d   : > { %4027 = vmatmul.bf16.gmra.mxu0 %v2651_v18  ;;  %v5130_v37 = vpack.c.bf16 %v3986_v30, %v3984_v11  ;;  %v4118_v59 = vadd.f32 %v4117_v5, %v3986_v30  ;;  %v4157_v22 = vmul.f32 %v3986_v30, %v3986_v30  ;;  %v1837_v11 = vshrl.u32 %v6654_v12, 16 }
 0x22e   : > { %v3810_v23 = vpop.f32.mrf.mxu2  ;;  %v1822_v18 = vsel %vm5490_vm4, %v1817_v13, %v1821_v54  ;;  %v1826_v1 = vrot.slane %v1824_v51, 4  ;;  %v6673_v52 = vrot.slane %v1833_v32, 5  ;;  %v2569_v30 = vunpack.c.l.b16 %v1812_v49  ;;  %v4411_v51 = vld [vmem:[%s5347_s10 + $0xb4] sm:$0xe] }
 0x22f   : > { %5194 = vst [vmem:[%s6554_s29 + $0x18] sm:$0xff] %v5130_v37   ;;  %v4188_v27 = vadd.f32 %v4187_v16, %v4157_v22  ;;  %v3811_v53 = vadd.f32 %v3810_v23, %v3722_v57  ;;  %v3899_v48 = vpop.f32.mrf.mxu3  ;;  %v2032_v16 = vsel %vm5494_vm5, %v2030_v62, %v2031_v31  ;;  %v1839_v56 = vrot.slane %v1837_v11, 4  ;;  %v4475_v62 = vld [vmem:[%s5347_s10 + $0xc8] sm:$0x1]  ;;  %v5268_v22 = vld [vmem:[%s5347_s10 + $0xb8] sm:$0xf] }
 0x230   : > { %v3723_v5 = vpop.f32.mrf.mxu1  ;;  %v2570_v41 = vunpack.c.l.b16 %v1822_v18  ;;  %v2633_v13 = vunpack.c.l.b16 %v2029_v26  ;;  %v2634_v25 = vunpack.c.l.b16 %v2032_v16  ;;  %v2444_v37 = vpack.c.b16 %v2426_v2, %v2425_v3  ;;  %v5269_v26 = vld [vmem:[%s5347_s10 + $0xbc] sm:$0x1] }
 0x231   : > { %v3900_v19 = vadd.f32 %v3899_v48, %v3811_v53  ;;  %v3724_v7 = vadd.f32 %v3723_v5, %v6148_v45  ;;  %v1830_v4 = vor.u32 %v1829_v14, %v1826_v1  ;;  %v1840_v53 = vor.u32 %v1839_v56, %v6673_v52  ;;  %v4459_v14 = vld [vmem:[%s5347_s10 + $0xcc] sm:$0xf] }
 0x232   : > { %v3990_v55 = vpop.f32.mrf.mxu0  ;;  %v2652_v32 = vpack.c.b16 %v2634_v25, %v2633_v13  ;;  %v1843_v45 = vshll.u32 %v4475_v62, 16  ;;  %v2035_v11 = vrot.slane %v6654_v12, 5  ;;  %v4427_v18 = vrot.slane %v4411_v51, 9  ;;  %v6686_v13 = vld [vmem:[%s5347_s10 + $0xd0] sm:$0xf] }
 0x233   : > { %v3989_v50 = vadd.f32 %v3988_v8, %v3900_v19  ;;  %v1426_v8 = vrot.slane %v5268_v22, 5  ;;  %v4491_v19 = vld [vmem:[%s5347_s10 + $0xc0] sm:$0xe]  ;;  %v1429_v16 = vrot.slane %v5269_v26, 5  ;;  %v1831_v2 = vrot.slane %v1830_v4, 4 }
 0x234   : > { %v1841_v1 = vrot.slane %v1840_v53, 4  ;;  %v1845_v56 = vrot.slane %v1843_v45, 5  ;;  %v2037_v12 = vrot.slane %v2035_v11, 4  ;;  %v1857_v4 = vshll.u32 %v6686_v13, 16 }
 0x235   : > { %v4119_v0 = vadd.f32 %v4118_v59, %v3989_v50  ;;  %v4158_v54 = vmul.f32 %v3989_v50, %v3989_v50  ;;  %v2588_v59 = vpack.c.b16 %v2570_v41, %v2569_v30  ;;  %v4507_v30 = vrot.slane %v4491_v19, 9 }
 0x236   : > { %v3812_v31 = vpop.f32.mrf.mxu2  ;;  %v2038_v41 = vrot.slane %v4475_v62, 5 }
 0x237   : > { %v4189_v57 = vadd.f32 %v4188_v27, %v4158_v54  ;;  %v3813_v23 = vadd.f32 %v3812_v31, %v3724_v7  ;;  %v3901_v60 = vpop.f32.mrf.mxu3  ;;  %v1428_v27 = vrot.slane %v1426_v8, 4 }
 0x238   : > { %v3726_v48 = vpop.f32.mrf.mxu1 }
 0x239   : > { %v3902_v5 = vadd.f32 %v3901_v60, %v3813_v23  ;;  %v3727_v31 = vadd.f32 %v3726_v48, %v6166_v38  ;;  %v1430_v22 = vsel %vm5494_vm5, %v1428_v27, %v1429_v16  ;;  %v1848_v23 = vshrl.u32 %v4459_v14, 16 }
 0x23a   : > { %v3993_v49 = vpop.f32.mrf.mxu0  ;;  %v1851_v60 = vshll.u32 %v4459_v14, 16  ;;  %v1836_v38 = vsel %vm5490_vm4, %v1831_v2, %v6673_v52  ;;  %v1846_v48 = vsel %vm5490_vm4, %v1841_v1, %v1845_v56  ;;  %v2428_v45 = vunpack.c.l.b16 %v1430_v22  ;;  %v4476_v56 = vld [vmem:[%s5347_s10 + $0xd4] sm:$0x1] }
 0x23b   : > { %v3991_v3 = vadd.f32 %v3990_v55, %v3902_v5  ;;  %3765 = vmatmul.bf16.gmra.mxu1 %v2444_v37  ;;  %3854 = vmatmul.bf16.gmra.mxu2 %v5037_v63  ;;  %v1427_v37 = vsel %vm5494_vm5, %v4427_v18, %v1426_v8  ;;  %v1850_v5 = vrot.slane %v1848_v23, 4  ;;  %v6705_v27 = vrot.slane %v1857_v4, 5 }
 0x23c   : > { %3943 = vmatmul.bf16.gmra.mxu3 %v2588_v59  ;;  %v2036_v59 = vsel %vm5494_vm5, %v4507_v30, %v2035_v11  ;;  %v1853_v18 = vrot.slane %v1851_v60, 5  ;;  %v2571_v26 = vunpack.c.l.b16 %v1836_v38  ;;  %v2572_v16 = vunpack.c.l.b16 %v1846_v48  ;;  %v5271_v48 = vld [vmem:[%s5347_s10 + $0xc8] sm:$0x1] }
 0x23d   : > { %4032 = vmatmul.bf16.gmra.mxu0 %v2652_v32  ;;  %v5135_v25 = vpack.c.bf16 %v3991_v3, %v3989_v50  ;;  %v4120_v54 = vadd.f32 %v4119_v0, %v3991_v3  ;;  %v4159_v7 = vmul.f32 %v3991_v3, %v3991_v3  ;;  %v1861_v50 = vshrl.u32 %v6686_v13, 16 }
 0x23e   : > { %v3815_v55 = vpop.f32.mrf.mxu2  ;;  %v2427_v32 = vunpack.c.l.b16 %v1427_v37  ;;  %v2635_v3 = vunpack.c.l.b16 %v2036_v59  ;;  %v4412_v37 = vld [vmem:[%s5347_s10 + $0xc0] sm:$0xe]  ;;  %v1854_v22 = vor.u32 %v1853_v18, %v1850_v5  ;;  %v1436_v59 = vrot.slane %v5271_v48, 5 }
 0x23f   : > { %5195 = vst [vmem:[%s6554_s29 + $0x20] sm:$0xff] %v5135_v25   ;;  %v4190_v63 = vadd.f32 %v4189_v57, %v4159_v7  ;;  %v3816_v51 = vadd.f32 %v3815_v55, %v3727_v31  ;;  %v3904_v62 = vpop.f32.mrf.mxu3  ;;  %v2039_v57 = vsel %vm5494_vm5, %v2037_v12, %v2038_v41  ;;  %v1863_v52 = vrot.slane %v1861_v50, 4  ;;  %v5270_v41 = vld [vmem:[%s5347_s10 + $0xc4] sm:$0xf] }
 0x240   : > { %v3728_v0 = vpop.f32.mrf.mxu1  ;;  %v2636_v2 = vunpack.c.l.b16 %v2039_v57  ;;  %v2445_v12 = vpack.c.b16 %v2428_v45, %v2427_v32  ;;  %v5038_v55 = vld [vmem:[%s5347_s10 + $0xc0] sm:$0xff]  ;;  %v4428_v38 = vrot.slane %v4412_v37, 9  ;;  %v1855_v57 = vrot.slane %v1854_v22, 4 }
 0x241   : > { %v3905_v53 = vadd.f32 %v3904_v62, %v3816_v51  ;;  %v3729_v14 = vadd.f32 %v3728_v0, %v6184_v61  ;;  %v1864_v23 = vor.u32 %v1863_v52, %v6705_v27  ;;  %v1867_v62 = vshll.u32 %v4476_v56, 16  ;;  %v4492_v0 = vld [vmem:[%s5347_s10 + $0xcc] sm:$0xe] }
 0x242   : > { %v3995_v8 = vpop.f32.mrf.mxu0  ;;  %v2653_v51 = vpack.c.b16 %v2636_v2, %v2635_v3  ;;  %v2042_v61 = vrot.slane %v6686_v13, 5  ;;  %v4508_v5 = vrot.slane %v4492_v0, 9  ;;  %v2045_v52 = vrot.slane %v4476_v56, 5 }
 0x243   : > { %v3994_v19 = vadd.f32 %v3993_v49, %v3905_v53  ;;  %v1433_v49 = vrot.slane %v5270_v41, 5  ;;  %v1865_v32 = vrot.slane %v1864_v23, 4  ;;  %v1869_v45 = vrot.slane %v1867_v62, 5 }
 0x244   : > { %v2044_v18 = vrot.slane %v2042_v61, 4 }
 0x245   : > { %v4121_v11 = vadd.f32 %v4120_v54, %v3994_v19  ;;  %v4160_v1 = vmul.f32 %v3994_v19, %v3994_v19  ;;  %v2589_v54 = vpack.c.b16 %v2572_v16, %v2571_v26  ;;  %v1435_v53 = vrot.slane %v1433_v49, 4 }
 0x246   : > { %v3817_v30 = vpop.f32.mrf.mxu2 }
 0x247   : > { %v4191_v25 = vadd.f32 %v4190_v63, %v4160_v1  ;;  %v3818_v7 = vadd.f32 %v3817_v30, %v3729_v14  ;;  %v3906_v31 = vpop.f32.mrf.mxu3  ;;  %v1437_v41 = vsel %vm5494_vm5, %v1435_v53, %v1436_v59 }
 0x248   : > { %v3731_v60 = vpop.f32.mrf.mxu1 }
 0x249   : > { %v3907_v4 = vadd.f32 %v3906_v31, %v3818_v7  ;;  %v3732_v3 = vadd.f32 %v3731_v60, %v6207_v35  ;;  %v1870_v35 = vsel %vm5490_vm4, %v1865_v32, %v1869_v45  ;;  %v2046_v7 = vsel %vm5494_vm5, %v2044_v18, %v2045_v52 }
 0x24a   : > { %v3998_v50 = vpop.f32.mrf.mxu0  ;;  %v2574_v22 = vunpack.c.l.b16 %v1870_v35  ;;  %v2638_v60 = vunpack.c.l.b16 %v2046_v7 }
 0x24b   : > { %v3996_v63 = vadd.f32 %v3995_v8, %v3907_v4  ;;  %3770 = vmatmul.bf16.gmra.mxu1 %v2445_v12  ;;  %3859 = vmatmul.bf16.gmra.mxu2 %v5038_v55  ;;  %v1434_v12 = vsel %vm5494_vm5, %v4428_v38, %v1433_v49  ;;  %v2430_v55 = vunpack.c.l.b16 %v1437_v41  ;;  %v5039_v38 = vld [vmem:[%s5347_s10 + $0xcc] sm:$0xff] }
 0x24c   : > { %3948 = vmatmul.bf16.gmra.mxu3 %v2589_v54  ;;  %v2429_v31 = vunpack.c.l.b16 %v1434_v12 }
 0x24d   : > { %4037 = vmatmul.bf16.gmra.mxu0 %v2653_v51  ;;  %v5140_v13 = vpack.c.bf16 %v3996_v63, %v3994_v19  ;;  %v4122_v26 = vadd.f32 %v4121_v11, %v3996_v63  ;;  %v4161_v16 = vmul.f32 %v3996_v63, %v3996_v63  ;;  %v1860_v19 = vsel %vm5490_vm4, %v1855_v57, %v6705_v27 }
 0x24e   : > { %v3820_v2 = vpop.f32.mrf.mxu2  ;;  %v2573_v37 = vunpack.c.l.b16 %v1860_v19 }
 0x24f   : > { %5196 = vst [vmem:[%s6554_s29 + $0x28] sm:$0xff] %v5140_v13   ;;  %v4192_v8 = vadd.f32 %v4191_v25, %v4161_v16  ;;  %v3821_v1 = vadd.f32 %v3820_v2, %v3732_v3  ;;  %v3909_v14 = vpop.f32.mrf.mxu3  ;;  %v2043_v25 = vsel %vm5494_vm5, %v4508_v5, %v2042_v61  ;;  %v2446_v61 = vpack.c.b16 %v2430_v55, %v2429_v31 }
 0x250   : > { %v3733_v30 = vpop.f32.mrf.mxu1  ;;  %v2637_v23 = vunpack.c.l.b16 %v2043_v25  ;;  %v2590_v53 = vpack.c.b16 %v2574_v22, %v2573_v37 }
 0x251   : > { %v3910_v11 = vadd.f32 %v3909_v14, %v3821_v1  ;;  %v3734_v51 = vadd.f32 %v3733_v30, %v6218_v33 }
 0x252   : > { %v4000_v56 = vpop.f32.mrf.mxu0 }
 0x253   : > { %v3999_v49 = vadd.f32 %v3998_v50, %v3910_v11  ;;  %v2654_v50 = vpack.c.b16 %v2638_v60, %v2637_v23 }
 0x255   : > { %v4123_v27 = vadd.f32 %v4122_v26, %v3999_v49  ;;  %v4162_v54 = vmul.f32 %v3999_v49, %v3999_v49 }
 0x256   : > { %v3822_v29 = vpop.f32.mrf.mxu2 }
 0x257   : > { %v4193_v62 = vadd.f32 %v4192_v8, %v4162_v54  ;;  %v3823_v4 = vadd.f32 %v3822_v29, %v3734_v51  ;;  %v3911_v0 = vpop.f32.mrf.mxu3 }
 0x258   : > { %v3736_v34 = vpop.f32.mrf.mxu1 }
 0x259   : > { %v3912_v63 = vadd.f32 %v3911_v0, %v3823_v4  ;;  %v3737_v45 = vadd.f32 %v3736_v34, %v6232_v20 }
 0x25a   : > { %v4003_v48 = vpop.f32.mrf.mxu0 }
 0x25b   : > { %v4001_v59 = vadd.f32 %v4000_v56, %v3912_v63  ;;  %3775 = vmatmul.bf16.gmra.mxu1 %v2446_v61  ;;  %3864 = vmatmul.bf16.gmra.mxu2 %v5039_v38 }
 0x25c   : > { %3953 = vmatmul.bf16.gmra.mxu3 %v2590_v53 }
 0x25d   : > { %4042 = vmatmul.bf16.gmra.mxu0 %v2654_v50  ;;  %v5145_v57 = vpack.c.bf16 %v4001_v59, %v3999_v49  ;;  %v4124_v32 = vadd.f32 %v4123_v27, %v4001_v59  ;;  %v4163_v33 = vmul.f32 %v4001_v59, %v4001_v59 }
 0x25e   : > { %v3825_v5 = vpop.f32.mrf.mxu2 }
 0x25f   : > { %5197 = vst [vmem:[%s6554_s29 + $0x30] sm:$0xff] %v5145_v57   ;;  %v4194_v18 = vadd.f32 %v4193_v62, %v4163_v33  ;;  %v3826_v52 = vadd.f32 %v3825_v5, %v3737_v45  ;;  %v3914_v13 = vpop.f32.mrf.mxu3 }
 0x260   : > { %v3738_v26 = vpop.f32.mrf.mxu1 }
 0x261   : > { %v3915_v16 = vadd.f32 %v3914_v13, %v3826_v52  ;;  %v3739_v14 = vadd.f32 %v3738_v26, %v6242_v9 }
 0x262   : > { %v4005_v3 = vpop.f32.mrf.mxu0 }
 0x263   : > { %v4004_v2 = vadd.f32 %v4003_v48, %v3915_v16 }
 0x265   : > { %v4125_v8 = vadd.f32 %v4124_v32, %v4004_v2  ;;  %v4164_v1 = vmul.f32 %v4004_v2, %v4004_v2 }
 0x266   : > { %v3827_v30 = vpop.f32.mrf.mxu2 }
 0x267   : > { %v4195_v12 = vadd.f32 %v4194_v18, %v4164_v1  ;;  %v3828_v41 = vadd.f32 %v3827_v30, %v3739_v14  ;;  %v3916_v19 = vpop.f32.mrf.mxu3 }
 0x268   : > { %v3741_v11 = vpop.f32.mrf.mxu1 }
 0x269   : > { %v3917_v20 = vadd.f32 %v3916_v19, %v3828_v41  ;;  %v3742_v31 = vadd.f32 %v3741_v11, %v6263_v28 }
 0x26a   : > { %v4008_v56 = vpop.f32.mrf.mxu0 }
 0x26b   : > { %v4006_v35 = vadd.f32 %v4005_v3, %v3917_v20 }
 0x26d   : > { %v5150_v25 = vpack.c.bf16 %v4006_v35, %v4004_v2  ;;  %v4126_v7 = vadd.f32 %v4125_v8, %v4006_v35  ;;  %v4165_v49 = vmul.f32 %v4006_v35, %v4006_v35 }
 0x26e   : > { %v3830_v55 = vpop.f32.mrf.mxu2 }
 0x26f   : > { %5198 = vst [vmem:[%s6554_s29 + $0x38] sm:$0xff] %v5150_v25   ;;  %v4196_v37 = vadd.f32 %v4195_v12, %v4165_v49  ;;  %v3831_v22 = vadd.f32 %v3830_v55, %v3742_v31  ;;  %v3919_v23 = vpop.f32.mrf.mxu3 }
 0x270   : > { %v3743_v60 = vpop.f32.mrf.mxu1 }
 0x271   : > { %v3920_v9 = vadd.f32 %v3919_v23, %v3831_v22  ;;  %v3744_v62 = vadd.f32 %v3743_v60, %v6279_v6 }
 0x272   : > { %v4010_v27 = vpop.f32.mrf.mxu0 }
 0x273   : > { %v4009_v54 = vadd.f32 %v4008_v56, %v3920_v9 }
 0x275   : > { %v4127_v51 = vadd.f32 %v4126_v7, %v4009_v54  ;;  %v4166_v29 = vmul.f32 %v4009_v54, %v4009_v54 }
 0x276   : > { %v3832_v4 = vpop.f32.mrf.mxu2 }
 0x277   : > { %v4197_v0 = vadd.f32 %v4196_v37, %v4166_v29  ;;  %v3833_v61 = vadd.f32 %v3832_v4, %v3744_v62  ;;  %v3921_v38 = vpop.f32.mrf.mxu3 }
 0x278   : > { %v3746_v34 = vpop.f32.mrf.mxu1 }
 0x279   : > { %v3922_v28 = vadd.f32 %v3921_v38, %v3833_v61  ;;  %v3747_v57 = vadd.f32 %v3746_v34, %v6301_v21 }
 0x27a   : > { %v4013_v53 = vpop.f32.mrf.mxu0 }
 0x27b   : > { %v4011_v50 = vadd.f32 %v4010_v27, %v3922_v28 }
 0x27d   : > { %v5155_v63 = vpack.c.bf16 %v4011_v50, %v4009_v54  ;;  %v4128_v48 = vadd.f32 %v4127_v51, %v4011_v50  ;;  %v4167_v59 = vmul.f32 %v4011_v50, %v4011_v50 }
 0x27e   : > { %v3835_v32 = vpop.f32.mrf.mxu2 }
 0x27f   : > { %5199 = vst [vmem:[%s6554_s29 + $0x40] sm:$0xff] %v5155_v63   ;;  %v4198_v33 = vadd.f32 %v4197_v0, %v4167_v59  ;;  %v3836_v45 = vadd.f32 %v3835_v32, %v3747_v57  ;;  %v3924_v5 = vpop.f32.mrf.mxu3 }
 0x280   : > { %v3748_v18 = vpop.f32.mrf.mxu1 }
 0x281   : > { %v3925_v6 = vadd.f32 %v3924_v5, %v3836_v45  ;;  %v3749_v3 = vadd.f32 %v3748_v18, %v6311_v36 }
 0x282   : > { %v4015_v52 = vpop.f32.mrf.mxu0 }
 0x283   : > { %v4014_v13 = vadd.f32 %v4013_v53, %v3925_v6 }
 0x285   : > { %v4129_v26 = vadd.f32 %v4128_v48, %v4014_v13  ;;  %v4168_v16 = vmul.f32 %v4014_v13, %v4014_v13 }
 0x286   : > { %v3837_v2 = vpop.f32.mrf.mxu2 }
 0x287   : > { %v4199_v8 = vadd.f32 %v4198_v33, %v4168_v16  ;;  %v3838_v1 = vadd.f32 %v3837_v2, %v3749_v3  ;;  %v3926_v14 = vpop.f32.mrf.mxu3 }
 0x288   : > { %v3751_v30 = vpop.f32.mrf.mxu1 }
 0x289   : > { %v3927_v21 = vadd.f32 %v3926_v14, %v3838_v1  ;;  %v3752_v56 = vadd.f32 %v3751_v30, %v6333_v58 }
 0x28a   : > { %v4018_v12 = vpop.f32.mrf.mxu0 }
 0x28b   : > { %v4016_v41 = vadd.f32 %v4015_v52, %v3927_v21 }
 0x28d   : > { %v5160_v19 = vpack.c.bf16 %v4016_v41, %v4014_v13  ;;  %v4130_v11 = vadd.f32 %v4129_v26, %v4016_v41  ;;  %v4169_v20 = vmul.f32 %v4016_v41, %v4016_v41 }
 0x28e   : > { %v3840_v35 = vpop.f32.mrf.mxu2 }
 0x28f   : > { %5200 = vst [vmem:[%s6554_s29 + $0x48] sm:$0xff] %v5160_v19   ;;  %v4200_v25 = vadd.f32 %v4199_v8, %v4169_v20  ;;  %v3841_v7 = vadd.f32 %v3840_v35, %v3752_v56  ;;  %v3929_v49 = vpop.f32.mrf.mxu3 }
 0x290   : > { %v3753_v31 = vpop.f32.mrf.mxu1 }
 0x291   : > { %v3930_v36 = vadd.f32 %v3929_v49, %v3841_v7  ;;  %v3754_v60 = vadd.f32 %v3753_v31, %v6349_v17 }
 0x292   : > { %v4020_v55 = vpop.f32.mrf.mxu0 }
 0x293   : > { %v4019_v37 = vadd.f32 %v4018_v12, %v3930_v36 }
 0x295   : > { %v4131_v22 = vadd.f32 %v4130_v11, %v4019_v37  ;;  %v4170_v23 = vmul.f32 %v4019_v37, %v4019_v37 }
 0x296   : > { %v3842_v9 = vpop.f32.mrf.mxu2 }
 0x297   : > { %v4201_v27 = vadd.f32 %v4200_v25, %v4170_v23  ;;  %v3843_v54 = vadd.f32 %v3842_v9, %v3754_v60  ;;  %v3931_v51 = vpop.f32.mrf.mxu3 }
 0x298   : > { %v3756_v29 = vpop.f32.mrf.mxu1 }
 0x299   : > { %v3932_v58 = vadd.f32 %v3931_v51, %v3843_v54  ;;  %v3757_v34 = vadd.f32 %v3756_v29, %v6371_v43 }
 0x29a   : > { %v4023_v62 = vpop.f32.mrf.mxu0 }
 0x29b   : > { %v4021_v4 = vadd.f32 %v4020_v55, %v3932_v58 }
 0x29d   : > { %v5165_v0 = vpack.c.bf16 %v4021_v4, %v4019_v37  ;;  %v4132_v61 = vadd.f32 %v4131_v22, %v4021_v4  ;;  %v4171_v38 = vmul.f32 %v4021_v4, %v4021_v4 }
 0x29e   : > { %v3845_v28 = vpop.f32.mrf.mxu2 }
 0x29f   : > { %5201 = vst [vmem:[%s6554_s29 + $0x50] sm:$0xff] %v5165_v0   ;;  %v4202_v53 = vadd.f32 %v4201_v27, %v4171_v38  ;;  %v3846_v50 = vadd.f32 %v3845_v28, %v3757_v34  ;;  %v3934_v63 = vpop.f32.mrf.mxu3 }
 0x2a0   : > { %v3758_v48 = vpop.f32.mrf.mxu1 }
 0x2a1   : > { %v3935_v17 = vadd.f32 %v3934_v63, %v3846_v50  ;;  %v3759_v45 = vadd.f32 %v3758_v48, %v6381_v10 }
 0x2a2   : > { %v4025_v59 = vpop.f32.mrf.mxu0 }
 0x2a3   : > { %v4024_v57 = vadd.f32 %v4023_v62, %v3935_v17 }
 0x2a5   : > { %v4133_v32 = vadd.f32 %v4132_v61, %v4024_v57  ;;  %v4172_v33 = vmul.f32 %v4024_v57, %v4024_v57 }
 0x2a6   : > { %v3847_v5 = vpop.f32.mrf.mxu2 }
 0x2a7   : > { %v4203_v18 = vadd.f32 %v4202_v53, %v4172_v33  ;;  %v3848_v6 = vadd.f32 %v3847_v5, %v3759_v45  ;;  %v3936_v52 = vpop.f32.mrf.mxu3 }
 0x2a8   : > { %v3761_v13 = vpop.f32.mrf.mxu1 }
 0x2a9   : > { %v3937_v43 = vadd.f32 %v3936_v52, %v3848_v6  ;;  %v3762_v1 = vadd.f32 %v3761_v13, %v6403_v44 }
 0x2aa   : > { %v4028_v26 = vpop.f32.mrf.mxu0 }
 0x2ab   : > { %v4026_v16 = vadd.f32 %v4025_v59, %v3937_v43 }
 0x2ad   : > { %v5170_v3 = vpack.c.bf16 %v4026_v16, %v4024_v57  ;;  %v4134_v2 = vadd.f32 %v4133_v32, %v4026_v16  ;;  %v4173_v8 = vmul.f32 %v4026_v16, %v4026_v16 }
 0x2ae   : > { %v3850_v14 = vpop.f32.mrf.mxu2 }
 0x2af   : > { %5202 = vst [vmem:[%s6554_s29 + $0x58] sm:$0xff] %v5170_v3   ;;  %v4204_v30 = vadd.f32 %v4203_v18, %v4173_v8  ;;  %v3851_v21 = vadd.f32 %v3850_v14, %v3762_v1  ;;  %v3939_v12 = vpop.f32.mrf.mxu3 }
 0x2b0   : > { %v3763_v41 = vpop.f32.mrf.mxu1 }
 0x2b1   : > { %v3940_v10 = vadd.f32 %v3939_v12, %v3851_v21  ;;  %v3764_v35 = vadd.f32 %v3763_v41, %v6419_v42 }
 0x2b2   : > { %v4030_v19 = vpop.f32.mrf.mxu0 }
 0x2b3   : > { %v4029_v11 = vadd.f32 %v4028_v26, %v3940_v10 }
 0x2b5   : > { %v4135_v20 = vadd.f32 %v4134_v2, %v4029_v11  ;;  %v4174_v56 = vmul.f32 %v4029_v11, %v4029_v11 }
 0x2b6   : > { %v3852_v25 = vpop.f32.mrf.mxu2 }
 0x2b7   : > { %v4205_v7 = vadd.f32 %v4204_v30, %v4174_v56  ;;  %v3853_v49 = vadd.f32 %v3852_v25, %v3764_v35  ;;  %v3941_v31 = vpop.f32.mrf.mxu3 }
 0x2b8   : > { %v3766_v36 = vpop.f32.mrf.mxu1 }
 0x2b9   : > { %v3942_v44 = vadd.f32 %v3941_v31, %v3853_v49  ;;  %v3767_v9 = vadd.f32 %v3766_v36, %v6441_v40 }
 0x2ba   : > { %v4033_v55 = vpop.f32.mrf.mxu0 }
 0x2bb   : > { %v4031_v37 = vadd.f32 %v4030_v19, %v3942_v44 }
 0x2bd   : > { %v5175_v22 = vpack.c.bf16 %v4031_v37, %v4029_v11  ;;  %v4136_v23 = vadd.f32 %v4135_v20, %v4031_v37  ;;  %v4175_v60 = vmul.f32 %v4031_v37, %v4031_v37 }
 0x2be   : > { %v3855_v27 = vpop.f32.mrf.mxu2 }
 0x2bf   : > { %5203 = vst [vmem:[%s6554_s29 + $0x60] sm:$0xff] %v5175_v22   ;;  %v4206_v54 = vadd.f32 %v4205_v7, %v4175_v60  ;;  %v3856_v51 = vadd.f32 %v3855_v27, %v3767_v9  ;;  %v3944_v29 = vpop.f32.mrf.mxu3 }
 0x2c0   : > { %v3768_v58 = vpop.f32.mrf.mxu1 }
 0x2c1   : > { %v3945_v42 = vadd.f32 %v3944_v29, %v3856_v51  ;;  %v3769_v38 = vadd.f32 %v3768_v58, %v6451_v24 }
 0x2c2   : > { %v4035_v62 = vpop.f32.mrf.mxu0 }
 0x2c3   : > { %v4034_v4 = vadd.f32 %v4033_v55, %v3945_v42 }
 0x2c5   : > { %v4137_v0 = vadd.f32 %v4136_v23, %v4034_v4  ;;  %v4176_v61 = vmul.f32 %v4034_v4, %v4034_v4 }
 0x2c6   : > { %v3857_v34 = vpop.f32.mrf.mxu2 }
 0x2c7   : > { %v4207_v28 = vadd.f32 %v4206_v54, %v4176_v61  ;;  %v3858_v53 = vadd.f32 %v3857_v34, %v3769_v38  ;;  %v3946_v50 = vpop.f32.mrf.mxu3 }
 0x2c8   : > { %v3771_v63 = vpop.f32.mrf.mxu1 }
 0x2c9   : > { %v3947_v40 = vadd.f32 %v3946_v50, %v3858_v53  ;;  %v3772_v33 = vadd.f32 %v3771_v63, %v6473_v15 }
 0x2ca   : > { %v4038_v17 = vpop.f32.mrf.mxu0 }
 0x2cb   : > { %v4036_v48 = vadd.f32 %v4035_v62, %v3947_v40 }
 0x2cd   : > { %v5180_v59 = vpack.c.bf16 %v4036_v48, %v4034_v4  ;;  %v4138_v57 = vadd.f32 %v4137_v0, %v4036_v48  ;;  %v4177_v32 = vmul.f32 %v4036_v48, %v4036_v48 }
 0x2ce   : > { %v3860_v45 = vpop.f32.mrf.mxu2 }
 0x2cf   : > { %5204 = vst [vmem:[%s6554_s29 + $0x68] sm:$0xff] %v5180_v59   ;;  %v4208_v5 = vadd.f32 %v4207_v28, %v4177_v32  ;;  %v3861_v18 = vadd.f32 %v3860_v45, %v3772_v33  ;;  %v3949_v6 = vpop.f32.mrf.mxu3 }
 0x2d0   : > { %v3773_v52 = vpop.f32.mrf.mxu1 }
 0x2d1   : > { %v3950_v24 = vadd.f32 %v3949_v6, %v3861_v18  ;;  %v3774_v16 = vadd.f32 %v3773_v52, %v6484_v46 }
 0x2d2   : > { %v4040_v3 = vpop.f32.mrf.mxu0 }
 0x2d3   : > { %v4039_v13 = vadd.f32 %v4038_v17, %v3950_v24 }
 0x2d5   : > { %v4139_v43 = vadd.f32 %v4138_v57, %v4039_v13  ;;  %v4178_v26 = vmul.f32 %v4039_v13, %v4039_v13 }
 0x2d6   : > { %v3862_v2 = vpop.f32.mrf.mxu2 }
 0x2d7   : > { %v4209_v8 = vadd.f32 %v4208_v5, %v4178_v26  ;;  %v3863_v1 = vadd.f32 %v3862_v2, %v3774_v16  ;;  %v3951_v14 = vpop.f32.mrf.mxu3 }
 0x2d8   : > { %v3776_v30 = vpop.f32.mrf.mxu1 }
 0x2d9   : > { %v3952_v15 = vadd.f32 %v3951_v14, %v3863_v1  ;;  %v3777_v19 = vadd.f32 %v3776_v30, %v6504_v47 }
 0x2da   : > { %v4043_v25 = vpop.f32.mrf.mxu0 }
 0x2db   : > { %v4041_v21 = vadd.f32 %v4040_v3, %v3952_v15 }
 0x2dd   : > { %v5185_v12 = vpack.c.bf16 %v4041_v21, %v4039_v13  ;;  %v4140_v41 = vadd.f32 %v4139_v43, %v4041_v21  ;;  %v4179_v10 = vmul.f32 %v4041_v21, %v4041_v21 }
 0x2de   : > { %v3865_v11 = vpop.f32.mrf.mxu2 }
 0x2df   : > { %5205 = vst [vmem:[%s6554_s29 + $0x70] sm:$0xff] %v5185_v12   ;;  %v4210_v20 = vadd.f32 %v4209_v8, %v4179_v10  ;;  %v3866_v56 = vadd.f32 %v3865_v11, %v3777_v19  ;;  %v3954_v35 = vpop.f32.mrf.mxu3 }
 0x2e0   : > { %v3778_v7 = vpop.f32.mrf.mxu1 }
 0x2e1   : > { %v3955_v46 = vadd.f32 %v3954_v35, %v3866_v56  ;;  %v3779_v44 = vadd.f32 %v3778_v7, %v6514_v39 }
 0x2e2   : > { %v4045_v47 = vpop.f32.mrf.mxu0 }
 0x2e3   : > { %v4044_v49 = vadd.f32 %v4043_v25, %v3955_v46 }
 0x2e5   : > { %v4141_v31 = vadd.f32 %v4140_v41, %v4044_v49  ;;  %v4180_v36 = vmul.f32 %v4044_v49, %v4044_v49 }
 0x2e6   : > { %v3867_v55 = vpop.f32.mrf.mxu2 }
 0x2e7   : > { %v4211_v37 = vadd.f32 %v4210_v20, %v4180_v36  ;;  %v3868_v22 = vadd.f32 %v3867_v55, %v3779_v44  ;;  %v3956_v23 = vpop.f32.mrf.mxu3 }
 0x2e9   : > { %v3957_v60 = vadd.f32 %v3956_v23, %v3868_v22 }
 0x2eb   : > { %v4046_v9 = vadd.f32 %v4045_v47, %v3957_v60 }
 0x2ed   : > { %v5190_v27 = vpack.c.bf16 %v4046_v9, %v4044_v49  ;;  %v4142_v54 = vadd.f32 %v4141_v31, %v4046_v9  ;;  %v4181_v51 = vmul.f32 %v4046_v9, %v4046_v9 }
 0x2ef   : > { %5206 = vst [vmem:[%s6554_s29 + $0x78] sm:$0xff] %v5190_v27   ;;  %v4143_v29 = vrot.slane %v4142_v54, 4  ;;  %v4212_v58 = vadd.f32 %v4211_v37, %v4181_v51 }
 0x2f1   : > { %v4144_v42 = vadd.f32 %v4143_v29, %v4142_v54  ;;  %v4213_v62 = vrot.slane %v4212_v58, 4 }
 0x2f3   : > { %v4145_v4 = vrot.slane %v4144_v42, 2  ;;  %v4214_v0 = vadd.f32 %v4213_v62, %v4212_v58 }
 0x2f5   : > { %v4146_v39 = vadd.f32 %v4145_v4, %v4144_v42  ;;  %v4215_v61 = vrot.slane %v4214_v0, 2 }
 0x2f7   : > { %v4147_v38 = vrot.slane %v4146_v39, 1  ;;  %v4216_v34 = vadd.f32 %v4215_v61, %v4214_v0 }
 0x2f9   : > { %v4148_v28 = vadd.f32 %v4147_v38, %v4146_v39  ;;  %v4217_v53 = vrot.slane %v4216_v34, 1 }
 0x2fb   : > { %4149 = vst [vmem:[%s211_s5] sm:$0x1] %v4148_v28  ;;  %v4218_v50 = vadd.f32 %v4217_v53, %v4216_v34 }
 0x2fd   : > { %4219 = vst [vmem:[%s214_s8] sm:$0x1] %v4218_v50 }
 0x2fe PF: > { %s15_s15 = sadd.s32 1, %s5278_s15  }
 0x2ff   : > { %p12_p4 = scmp.ge.s32.totalorder %s15_s15, 4  }
 0x301   :  { %14 = sbr.rel (!%p12_p4) target bundleno = 1 (0x1), region = 84 }

// kernel: residual_block.4
= control target key start
LH: loop header
LB: loop body
LE: loop exit
PB: predicated region body
PF: predicated region fallthrough
CT: control target
= control target key end

     0   :  { %s6763_s21 = smov 0   ;;  %s9178_s0 = inlined_call_operand.vmem [shape: bf16[2,18,18,128], index: 0, kind: input, shape index: {}]   ;;  %s9179_s1 = inlined_call_operand.vmem [shape: f32[1,128], index: 1, kind: input, shape index: {}]   ;;  %s9180_s2 = inlined_call_operand.vmem [shape: f32[1,128], index: 2, kind: input, shape index: {}]   ;;  %s9181_s3 = inlined_call_operand.vmem [shape: bf16[1152,128], index: 3, kind: input, shape index: {}]   ;;  %s9182_s4 = inlined_call_operand.vmem [shape: bf16[2,256,128], index: 4, kind: output, shape index: {0}]   ;;  %s9183_s5 = inlined_call_operand.vmem [shape: f32[2,1,128], index: 5, kind: output, shape index: {1}]   ;;  %s9184_s6 = inlined_call_operand.vmem [shape: f32[2,1,128], index: 6, kind: output, shape index: {2}]  }
   0x1 LB: > { %s5960_s22 = sadd.s32 4294967295, %s6724_s21   ;;  %p5964_p0 = scmp.ge.s32.totalorder %s6724_s21, 1  ;;  %s6724_s21 = sphi %s6763_s21, %s17_s21  }
   0x2   : > { %p217_p1 = scmp.lt.s32.totalorder %s6724_s21, 3 }
   0x4   : > { %p218_p2 = pnand %p5964_p0, %p217_p1 }
   0x6   : > { %221 = sbr.rel (%p218_p2) target bundleno = 869 (0x365), region = 36 }
   0xb   : > { %v6394_v0 = vld [vmem:[%s9181_s3 + $0x38] sm:$0xff]  ;;  %p253_p3 = scmp.lt.s32.totalorder %s5960_s22, 1  ;;  %v6393_v1 = vld [vmem:[%s9181_s3 + $0x30] sm:$0xff]  ;;  %v271_v2 = vlaneseq  ;;  %v6392_v3 = vld [vmem:[%s9181_s3 + $0x28] sm:$0xff]  ;;  %v6726_v50 = vmov 0.0|0.0   ;;  %vm1223_vm4 = vcmask 1045504  }
   0xc   : > { %6669 = vmatpush.bf16.msra.mxu1 %v6394_v0  ;;  %6670 = vmatpush.bf16.msra.mxu2 %v6394_v0  ;;  %v6791_v4 = vld [vmem:[%s9179_s1] ss:$0 sm:$0xff]  ;;  %v6390_v28 = vld [vmem:[%s9181_s3 + $0x18] sm:$0xff]  ;;  %v6389_v41 = vld [vmem:[%s9181_s3 + $0x10] sm:$0xff]  ;;  %v3570_v51 = vunpack.c.l.b16 %v6726_v50  ;;  %vm694_vm1 = vsmask.f32 3328 }
   0xd   : > { %s9525_s22 = smov (!%p253_p3, %s5960_s22), 1  ;;  %6671 = vmatpush.bf16.msra.mxu3 %v6394_v0  ;;  %4882 = vmatpush.bf16.msra.mxu0 %v6394_v0  ;;  %v6799_v10 = vld [vmem:[%s9180_s2] ss:$0 sm:$0xff]  ;;  %v6801_v13 = vshrl.u32 %v271_v2, 7  ;;  %v6388_v56 = vld [vmem:[%s9181_s3 + $0x8] sm:$0xff] }
   0xe   : > { %s6693_s27 = smul.u32 216, %s9525_s22  ;;  %v6391_v16 = vld [vmem:[%s9181_s3 + $0x20] sm:$0xff]  ;;  %vm695_vm2 = vsmask.f32 7440  ;;  %s6386_s20 = sshll.u32 %s9525_s22, 7 }
   0xf   : > { %vm440_vm0 = vcmp.ge.s32.totalorder %v6801_v13, 1  ;;  %vm7267_vm3 = vmor %vm694_vm1, %vm695_vm2  ;;  %s265_s12 = scalar_lea.vmem %s9183_s5, %s9525_s22  ;;  %s268_s15 = scalar_lea.vmem %s9184_s6, %s9525_s22 }
  0x10   : > { %6672 = vmatpush.bf16.msra.mxu1 %v6393_v1  ;;  %6673 = vmatpush.bf16.msra.mxu2 %v6393_v1  ;;  %s6786_s8 = scalar_lea.vmem %s9178_s0, %s6693_s27  ;;  %s8756_s27 = scalar_lea.vmem %s9182_s4, %s6386_s20 }
  0x11   : > { %6674 = vmatpush.bf16.msra.mxu3 %v6393_v1  ;;  %4883 = vmatpush.bf16.msra.mxu0 %v6393_v1  ;;  %v6632_v5 = vld [vmem:[%s6786_s8 + $0x30] sm:$0xff]   ;;  %v6634_v6 = vld [vmem:[%s6786_s8 + $0x60] sm:$0xff]   ;;  %v6861_v1 = vpack.c.b16 %v3570_v51, %v3570_v51 }
  0x12   : > { %v6636_v7 = vld [vmem:[%s6786_s8 + $0x90] sm:$0xff]   ;;  %v6465_v8 = vunpack.c.l.bf16 %v6632_v5  ;;  %v6466_v9 = vunpack.c.h.bf16 %v6632_v5  ;;  %v6473_v11 = vunpack.c.l.bf16 %v6634_v6  ;;  %v6474_v12 = vunpack.c.h.bf16 %v6634_v6  ;;  %v284_v32 = vld [vmem:[%s6786_s8 + $0x3c] sm:$0xff]  }
  0x13   : > { %v6481_v14 = vunpack.c.l.bf16 %v6636_v7  ;;  %v6482_v15 = vunpack.c.h.bf16 %v6636_v7  ;;  %v292_v35 = vld [vmem:[%s6786_s8 + $0x6c] sm:$0xff]   ;;  %v316_v39 = vunpack.c.l.bf16 %v284_v32  ;;  %v317_v40 = vunpack.c.h.bf16 %v284_v32  ;;  %9236 = vst [vmem:[#allocation4_spill] sm:$0xff] %v6861_v1  ;;  %v300_v7 = vld [vmem:[%s6786_s8 + $0x9c] sm:$0xff]  }
  0x14   : > { %6675 = vmatpush.bf16.msra.mxu1 %v6392_v3  ;;  %6676 = vmatpush.bf16.msra.mxu2 %v6392_v3  ;;  %v349_v17 = vmul.f32 %v6791_v4, %v6465_v8  ;;  %v350_v18 = vmul.f32 %v6791_v4, %v6466_v9  ;;  %v357_v19 = vmul.f32 %v6791_v4, %v6473_v11  ;;  %v324_v43 = vunpack.c.l.bf16 %v292_v35  ;;  %v6387_v8 = vld [vmem:[%s9181_s3] sm:$0xff] }
  0x15   : > { %6677 = vmatpush.bf16.msra.mxu3 %v6392_v3  ;;  %4884 = vmatpush.bf16.msra.mxu0 %v6392_v3  ;;  %v358_v20 = vmul.f32 %v6791_v4, %v6474_v12  ;;  %v365_v21 = vmul.f32 %v6791_v4, %v6481_v14  ;;  %v366_v22 = vmul.f32 %v6791_v4, %v6482_v15  ;;  %v325_v55 = vunpack.c.h.bf16 %v292_v35  ;;  %v276_v15 = vld [vmem:[%s6786_s8 + $0xc] sm:$0xff]  }
  0x16   : > { %v384_v23 = vadd.f32 %v6799_v10, %v349_v17  ;;  %v385_v24 = vadd.f32 %v6799_v10, %v350_v18  ;;  %v392_v25 = vadd.f32 %v6799_v10, %v357_v19  ;;  %v351_v53 = vmul.f32 %v6791_v4, %v316_v39  ;;  %v6402_v39 = vld [vmem:[%s9181_s3 + $0x78] sm:$0xff] }
  0x17   : > { %v393_v26 = vadd.f32 %v6799_v10, %v358_v20  ;;  %v400_v27 = vadd.f32 %v6799_v10, %v365_v21  ;;  %v401_v31 = vadd.f32 %v6799_v10, %v366_v22  ;;  %v352_v54 = vmul.f32 %v6791_v4, %v317_v40  ;;  %v6410_v22 = vld [vmem:[%s9181_s3 + $0xb8] sm:$0xff] }
  0x18   : > { %6678 = vmatpush.bf16.msra.mxu1 %v6391_v16  ;;  %6679 = vmatpush.bf16.msra.mxu2 %v6391_v16  ;;  %v416_v29 = vmax.f32 %v384_v23, 0.0  ;;  %v424_v30 = vmax.f32 %v392_v25, 0.0  ;;  %v6823_v33 = vmax.f32 %v385_v24, 0.0  ;;  %v359_v62 = vmul.f32 %v6791_v4, %v324_v43  ;;  %v6418_v23 = vld [vmem:[%s9181_s3 + $0xf8] sm:$0xff] }
  0x19   : > { %6680 = vmatpush.bf16.msra.mxu3 %v6391_v16  ;;  %4885 = vmatpush.bf16.msra.mxu0 %v6391_v16  ;;  %v432_v34 = vmax.f32 %v400_v27, 0.0  ;;  %v6828_v37 = vmax.f32 %v393_v26, 0.0  ;;  %v6835_v42 = vmax.f32 %v401_v31, 0.0  ;;  %v386_v3 = vadd.f32 %v6799_v10, %v351_v53  ;;  %v6426_v40 = vld [vmem:[%s9181_s3 + $0x138] sm:$0xff] }
  0x1a   : > { %v462_v36 = vsel %vm440_vm0, %v416_v29, 0.0  ;;  %v470_v38 = vsel %vm440_vm0, %v424_v30, 0.0  ;;  %v6839_v45 = vpack.c.bf16 %v6823_v33, %v6823_v33  ;;  %v670_v46 = vpack.c.bf16 %v424_v30, %v424_v30  ;;  %v6889_v30 = vld [vmem:[%s6786_s8 + $0x48] sm:$0xff]  }
  0x1b   : > { %9234 = vst [vmem:[#allocation2_spill] sm:$0xff] %v6835_v42  ;;  %v494_v44 = vpack.c.bf16 %v462_v36, %v462_v36  ;;  %v478_v47 = vsel %vm440_vm0, %v432_v34, 0.0  ;;  %v502_v48 = vpack.c.bf16 %v470_v38, %v470_v38  ;;  %v6845_v49 = vpack.c.bf16 %v6828_v37, %v6828_v37 }
  0x1c   : > { %6681 = vmatpush.bf16.msra.mxu1 %v6390_v28  ;;  %6682 = vmatpush.bf16.msra.mxu2 %v6390_v28  ;;  %v6847_v52 = vpack.c.bf16 %v416_v29, %v416_v29  ;;  %v510_v57 = vpack.c.bf16 %v478_v47, %v478_v47  ;;  %v6856_v58 = vpack.c.bf16 %v6835_v42, %v6835_v42  ;;  %v3579_v60 = vunpack.c.l.b16 %v6839_v45  ;;  %v6417_v47 = vld [vmem:[%s9181_s3 + $0xf0] sm:$0xff] }
  0x1d   : > { %6683 = vmatpush.bf16.msra.mxu3 %v6390_v28  ;;  %4886 = vmatpush.bf16.msra.mxu0 %v6390_v28  ;;  %v3578_v59 = vunpack.c.l.b16 %v494_v44  ;;  %v890_v61 = vshrl.u32 %v670_v46, 16  ;;  %v3586_v63 = vunpack.c.l.b16 %v502_v48  ;;  %v3587_v0 = vunpack.c.l.b16 %v6845_v49 }
  0x1e   : > { %9235 = vst [vmem:[#allocation3_spill] sm:$0xff] %v6856_v58  ;;  %v387_v5 = vadd.f32 %v6799_v10, %v352_v54  ;;  %v360_v6 = vmul.f32 %v6791_v4, %v325_v55  ;;  %v3594_v11 = vunpack.c.l.b16 %v510_v57  ;;  %v3595_v12 = vunpack.c.l.b16 %v6856_v58 }
  0x1f   : > { %v394_v14 = vadd.f32 %v6799_v10, %v359_v62  ;;  %v3606_v16 = vpack.c.b16 %v3579_v60, %v3578_v59  ;;  %v6875_v17 = vrot.slane %v890_v61, 4  ;;  %v893_v18 = vshll.u32 %v670_v46, 16  ;;  %v6409_v46 = vld [vmem:[%s9181_s3 + $0xb0] sm:$0xff] }
  0x20   : > { %6684 = vmatpush.bf16.msra.mxu1 %v6389_v41  ;;  %6685 = vmatpush.bf16.msra.mxu2 %v6389_v41  ;;  %v903_v19 = vshrl.u32 %v6845_v49, 16  ;;  %v3610_v20 = vpack.c.b16 %v3587_v0, %v3586_v63  ;;  %v6878_v21 = vpack.c.bf16 %v432_v34, %v432_v34  ;;  %v332_v24 = vunpack.c.l.bf16 %v300_v7  ;;  %v6401_v62 = vld [vmem:[%s9181_s3 + $0x70] sm:$0xff] }
  0x21   : > { %6686 = vmatpush.bf16.msra.mxu3 %v6389_v41  ;;  %4887 = vmatpush.bf16.msra.mxu0 %v6389_v41  ;;  %v333_v25 = vunpack.c.h.bf16 %v300_v7  ;;  %v999_v26 = vshrl.u32 %v6856_v58, 16  ;;  %v418_v27 = vmax.f32 %v386_v3, 0.0  ;;  %v395_v28 = vadd.f32 %v6799_v10, %v360_v6 }
  0x22   : > { %v308_v29 = vunpack.c.l.bf16 %v276_v15  ;;  %v3614_v31 = vpack.c.b16 %v3595_v12, %v3594_v11  ;;  %v6891_v32 = vmax.f32 %v394_v14, 0.0  ;;  %v367_v34 = vmul.f32 %v6791_v4, %v332_v24  ;;  %v6408_v11 = vld [vmem:[%s9181_s3 + $0xa8] sm:$0xff] }
  0x23   : > { %v309_v35 = vunpack.c.h.bf16 %v276_v15  ;;  %v6894_v36 = vrot.slane %v893_v18, 5  ;;  %v6896_v38 = vrot.slane %v903_v19, 4  ;;  %v6904_v41 = vmax.f32 %v387_v5, 0.0  ;;  %v6425_v5 = vld [vmem:[%s9181_s3 + $0x130] sm:$0xff]  ;;  %v6416_v14 = vld [vmem:[%s9181_s3 + $0xe8] sm:$0xff] }
  0x24   : > { %6687 = vmatpush.bf16.msra.mxu1 %v6388_v56  ;;  %6688 = vmatpush.bf16.msra.mxu2 %v6388_v56  ;;  %v368_v43 = vmul.f32 %v6791_v4, %v333_v25  ;;  %v986_v44 = vshrl.u32 %v6878_v21, 16  ;;  %v402_v48 = vadd.f32 %v6799_v10, %v367_v34  ;;  %v343_v50 = vmul.f32 %v6791_v4, %v308_v29 }
  0x25   : > { %6689 = vmatpush.bf16.msra.mxu3 %v6388_v56  ;;  %4888 = vmatpush.bf16.msra.mxu0 %v6388_v56  ;;  %v6469_v51 = vunpack.c.l.bf16 %v6889_v30  ;;  %v989_v53 = vshll.u32 %v6878_v21, 16  ;;  %v464_v54 = vsel %vm440_vm0, %v418_v27, 0.0  ;;  %v6920_v55 = vmax.f32 %v395_v28, 0.0  ;;  %v6400_v28 = vld [vmem:[%s9181_s3 + $0x68] sm:$0xff] }
  0x26   : > { %v403_v56 = vadd.f32 %v6799_v10, %v368_v43  ;;  %v6923_v57 = vrot.slane %v999_v26, 4  ;;  %v472_v59 = vsel %vm440_vm0, %v6891_v32, 0.0  ;;  %v6929_v60 = vmax.f32 %v402_v48, 0.0  ;;  %v6407_v43 = vld [vmem:[%s9181_s3 + $0xa0] sm:$0xff] }
  0x27   : > { %9237 = vst [vmem:[#allocation5_spill] sm:$0xff] %v6920_v55  ;;  %v344_v61 = vmul.f32 %v6791_v4, %v309_v35  ;;  %v6937_v63 = vpack.c.bf16 %v6904_v41, %v6904_v41  ;;  %v378_v3 = vadd.f32 %v6799_v10, %v343_v50  ;;  %v6470_v6 = vunpack.c.h.bf16 %v6889_v30 }
  0x28   : > { %6690 = vmatpush.bf16.msra.mxu1 %v6387_v8  ;;  %6691 = vmatpush.bf16.msra.mxu2 %v6387_v8  ;;  %9238 = vst [vmem:[#allocation6_spill] sm:$0xff] %v6923_v57  ;;  %v6939_v0 = vmax.f32 %v403_v56, 0.0  ;;  %v496_v7 = vpack.c.bf16 %v464_v54, %v464_v54  ;;  %v353_v15 = vmul.f32 %v6791_v4, %v6469_v51  ;;  %v6963_v21 = vrot.slane %v986_v44, 4  ;;  %v6415_v44 = vld [vmem:[%s9181_s3 + $0xe0] sm:$0xff] }
  0x29   : > { %6692 = vmatpush.bf16.msra.mxu3 %v6387_v8  ;;  %4889 = vmatpush.bf16.msra.mxu0 %v6387_v8  ;;  %v480_v8 = vsel %vm440_vm0, %v6929_v60, 0.0  ;;  %v379_v12 = vadd.f32 %v6799_v10, %v344_v61  ;;  %v6959_v18 = vpack.c.bf16 %v6920_v55, %v6920_v55  ;;  %v3581_v25 = vunpack.c.l.b16 %v6937_v63 }
  0x2a   : > { %9239 = vst [vmem:[#allocation7_spill] sm:$0xff] %v6939_v0  ;;  %v512_v19 = vpack.c.bf16 %v480_v8, %v480_v8  ;;  %v354_v29 = vmul.f32 %v6791_v4, %v6470_v6  ;;  %v388_v30 = vadd.f32 %v6799_v10, %v353_v15  ;;  %v3580_v34 = vunpack.c.l.b16 %v496_v7  ;;  %v6423_v6 = vld [vmem:[%s9181_s3 + $0x120] sm:$0xff]  ;;  %v6414_v15 = vld [vmem:[%s9181_s3 + $0xd8] sm:$0xff] }
  0x2b   : > { %4910 = vmatmul.bf16.vlgmr.msra.gmra.mxu1 %v3606_v16  ;;  %4930 = vmatmul.bf16.vlgmr.msra.gmra.mxu2 %v3610_v20  ;;  %v504_v16 = vpack.c.bf16 %v472_v59, %v472_v59  ;;  %v6961_v20 = vmax.f32 %v378_v3, 0.0  ;;  %9240 = vst [vmem:[#allocation8_spill] sm:$0xff] %v6963_v21  ;;  %v6971_v24 = vmax.f32 %v379_v12, 0.0  ;;  %v6988_v35 = vpack.c.bf16 %v6891_v32, %v6891_v32  ;;  %v6637_v59 = vld [vmem:[%s6786_s8 + $0xa8] sm:$0xff]  }
  0x2c   : > { %5060 = vmatpush.bf16.msrb.mxu2 %v6410_v22  ;;  %4950 = vmatmul.bf16.vlgmr.msra.gmra.mxu3 %v3614_v31  ;;  %v6965_v22 = vpack.c.bf16 %v418_v27, %v418_v27  ;;  %v6424_v27 = vld [vmem:[%s9181_s3 + $0x128] sm:$0xff]  ;;  %v6635_v31 = vld [vmem:[%s6786_s8 + $0x78] sm:$0xff]   ;;  %v3589_v32 = vunpack.c.l.b16 %v6959_v18  ;;  %v3596_v48 = vunpack.c.l.b16 %v512_v19  ;;  %v7011_v3 = vmax.f32 %v388_v30, 0.0 }
  0x2d   : > { %5149 = vmatpush.bf16.msrb.mxu3 %v6418_v23  ;;  %4890 = vmatmul.bf16.vlgmr.msra.gmra.mxu0 %v6861_v1  ;;  %v6969_v23 = vpack.c.bf16 %v6939_v0, %v6939_v0  ;;  %v456_v26 = vsel %vm440_vm0, %v6961_v20, 0.0  ;;  %v6477_v56 = vunpack.c.l.bf16 %v6635_v31  ;;  %v3607_v8 = vpack.c.b16 %v3581_v25, %v3580_v34  ;;  %v5968_v21 = vld [vmem:[%s6786_s8 + $0xc] sm:$0xff]  }
  0x2e   : > { %4971 = vmatpush.bf16.msrb.mxu1 %v6402_v39  ;;  %5238 = vmatpush.bf16.msrb.mxu0 %v6426_v40  ;;  %v488_v39 = vpack.c.bf16 %v456_v26, %v456_v26  ;;  %v6992_v40 = vpack.c.bf16 %v6971_v24, %v6971_v24  ;;  %v6485_v25 = vunpack.c.l.bf16 %v6637_v59 }
  0x2f   : > { %9241 = vst [vmem:[#allocation9_spill] sm:$0xff] %v6969_v23  ;;  %v3597_v50 = vunpack.c.l.b16 %v6969_v23  ;;  %v361_v12 = vmul.f32 %v6791_v4, %v6477_v56  ;;  %v6413_v56 = vld [vmem:[%s9181_s3 + $0xd0] sm:$0xff] }
  0x30   : > { %5061 = vmatpush.bf16.msrb.mxu2 %v6409_v46  ;;  %v7000_v46 = vrot.slane %v989_v53, 5  ;;  %v3572_v51 = vunpack.c.l.b16 %v488_v39  ;;  %v3573_v54 = vunpack.c.l.b16 %v6992_v40  ;;  %v6399_v53 = vld [vmem:[%s9181_s3 + $0x60] sm:$0xff]  ;;  %v466_v39 = vsel %vm440_vm0, %v7011_v3, 0.0 }
  0x31   : > { %5150 = vmatpush.bf16.msrb.mxu3 %v6417_v47  ;;  %v3588_v47 = vunpack.c.l.b16 %v504_v16  ;;  %v917_v16 = vshll.u32 %v6988_v35, 16  ;;  %v396_v30 = vadd.f32 %v6799_v10, %v361_v12  ;;  %v735_v55 = vshrl.u32 %v6992_v40, 16 }
  0x32   : > { %4972 = vmatpush.bf16.msrb.mxu1 %v6401_v62  ;;  %5239 = vmatpush.bf16.msrb.mxu0 %v6425_v5  ;;  %9242 = vst [vmem:[#allocation10_spill] sm:$0xff] %v7000_v46  ;;  %v389_v62 = vadd.f32 %v6799_v10, %v354_v29  ;;  %v6478_v5 = vunpack.c.h.bf16 %v6635_v31  ;;  %v3603_v29 = vpack.c.b16 %v3573_v54, %v3572_v51  ;;  %v6486_v31 = vunpack.c.h.bf16 %v6637_v59  ;;  %v6405_v54 = vld [vmem:[%s9181_s3 + $0x90] sm:$0xff] }
  0x33   : > { %v3611_v19 = vpack.c.b16 %v3589_v32, %v3588_v47  ;;  %v6422_v47 = vld [vmem:[%s9181_s3 + $0x118] sm:$0xff]  ;;  %v7042_v32 = vmax.f32 %v396_v30, 0.0  ;;  %v927_v59 = vshrl.u32 %v6959_v18, 16 }
  0x34   : > { %5062 = vmatpush.bf16.msrb.mxu2 %v6408_v11  ;;  %v914_v11 = vshrl.u32 %v6988_v35, 16  ;;  %v362_v26 = vmul.f32 %v6791_v4, %v6478_v5  ;;  %v7029_v34 = vmax.f32 %v389_v62, 0.0  ;;  %v369_v35 = vmul.f32 %v6791_v4, %v6485_v25  ;;  %v6397_v25 = vld [vmem:[%s9181_s3 + $0x50] sm:$0xff] }
  0x35   : > { %5151 = vmatpush.bf16.msrb.mxu3 %v6416_v14  ;;  %v6406_v14 = vld [vmem:[%s9181_s3 + $0x98] sm:$0xff]  ;;  %v474_v12 = vsel %vm440_vm0, %v7042_v32, 0.0 }
  0x36   : > { %4973 = vmatpush.bf16.msrb.mxu1 %v6400_v28  ;;  %5240 = vmatpush.bf16.msrb.mxu0 %v6424_v27  ;;  %v6631_v28 = vld [vmem:[%s6786_s8 + $0x18] sm:$0xff]   ;;  %v3615_v27 = vpack.c.b16 %v3597_v50, %v3596_v48  ;;  %v370_v48 = vmul.f32 %v6791_v4, %v6486_v31  ;;  %v404_v5 = vadd.f32 %v6799_v10, %v369_v35 }
  0x37   : > { %v6461_v50 = vunpack.c.l.bf16 %v6631_v28  ;;  %v6462_v51 = vunpack.c.h.bf16 %v6631_v28  ;;  %v7072_v28 = vrot.slane %v914_v11, 4  ;;  %v288_v31 = vld [vmem:[%s6786_s8 + $0x54] sm:$0xff]  }
  0x38   : > { %5063 = vmatpush.bf16.msrb.mxu2 %v6407_v43  ;;  %v397_v43 = vadd.f32 %v6799_v10, %v362_v26  ;;  %v321_v9 = vunpack.c.h.bf16 %v288_v31 }
  0x39   : > { %5152 = vmatpush.bf16.msrb.mxu3 %v6415_v44  ;;  %v6398_v44 = vld [vmem:[%s9181_s3 + $0x58] sm:$0xff]  ;;  %v346_v26 = vmul.f32 %v6791_v4, %v6462_v51 }
  0x3a   : > { %4974 = vmatpush.bf16.msrb.mxu1 %v6399_v53  ;;  %5241 = vmatpush.bf16.msrb.mxu0 %v6423_v6  ;;  %v685_v53 = vpack.c.bf16 %v6929_v60, %v6929_v60  ;;  %v7054_v62 = vmax.f32 %v397_v43, 0.0  ;;  %v498_v6 = vpack.c.bf16 %v466_v39, %v466_v39  ;;  %v506_v60 = vpack.c.bf16 %v474_v12, %v474_v12  ;;  %v6404_v39 = vld [vmem:[%s9181_s3 + $0x88] sm:$0xff] }
  0x3b   : > { %4915 = vmatmul.bf16.gmra.mxu1 %v3607_v8  ;;  %4935 = vmatmul.bf16.gmra.mxu2 %v3611_v19  ;;  %v405_v8 = vadd.f32 %v6799_v10, %v370_v48  ;;  %v7066_v19 = vmax.f32 %v404_v5, 0.0  ;;  %v7085_v43 = vrot.slane %v917_v16, 5  ;;  %v381_v16 = vadd.f32 %v6799_v10, %v346_v26  ;;  %v6396_v12 = vld [vmem:[%s9181_s3 + $0x48] sm:$0xff] }
  0x3c   : > { %5064 = vmatpush.bf16.msrb.mxu2 %v6406_v14  ;;  %9243 = vst [vmem:[#allocation11_spill] sm:$0xff] %v7054_v62  ;;  %4955 = vmatmul.bf16.gmra.mxu3 %v3615_v27  ;;  %v345_v14 = vmul.f32 %v6791_v4, %v6461_v50  ;;  %v7076_v27 = vpack.c.bf16 %v7054_v62, %v7054_v62  ;;  %v1010_v35 = vshrl.u32 %v685_v53, 16  ;;  %v1013_v11 = vshll.u32 %v685_v53, 16  ;;  %v6412_v53 = vld [vmem:[%s9181_s3 + $0xc8] sm:$0xff] }
  0x3d   : > { %5153 = vmatpush.bf16.msrb.mxu3 %v6414_v15  ;;  %4895 = vmatmul.bf16.gmra.mxu0 %v3603_v29  ;;  %v7064_v15 = vpack.c.bf16 %v7029_v34, %v7029_v34  ;;  %v7078_v29 = vmax.f32 %v405_v8, 0.0  ;;  %v3582_v48 = vunpack.c.l.b16 %v498_v6  ;;  %v320_v5 = vunpack.c.l.bf16 %v288_v31  ;;  %v6421_v6 = vld [vmem:[%s9181_s3 + $0x110] sm:$0xff] }
  0x3e   : > { %4975 = vmatpush.bf16.msrb.mxu1 %v6398_v44  ;;  %5242 = vmatpush.bf16.msrb.mxu0 %v6422_v47  ;;  %9244 = vst [vmem:[#allocation12_spill] sm:$0xff] %v7076_v27  ;;  %v380_v30 = vadd.f32 %v6799_v10, %v345_v14  ;;  %v482_v44 = vsel %vm440_vm0, %v7066_v19, 0.0  ;;  %v1023_v47 = vshrl.u32 %v6969_v23, 16  ;;  %v3591_v8 = vunpack.c.l.b16 %v7076_v27 }
  0x3f   : > { %9245 = vst [vmem:[#allocation13_spill] sm:$0xff] %v7078_v29  ;;  %v514_v50 = vpack.c.bf16 %v482_v44, %v482_v44  ;;  %v7093_v51 = vpack.c.bf16 %v7078_v29, %v7078_v29  ;;  %v7113_v44 = vrot.slane %v927_v59, 4  ;;  %v7115_v7 = vrot.slane %v1010_v35, 4 }
  0x40   : > { %5065 = vmatpush.bf16.msrb.mxu2 %v6405_v54  ;;  %v3583_v54 = vunpack.c.l.b16 %v7064_v15  ;;  %v7108_v26 = vmax.f32 %v380_v30, 0.0  ;;  %v7117_v61 = vmax.f32 %v381_v16, 0.0  ;;  %v6411_v30 = vld [vmem:[%s9181_s3 + $0xc0] sm:$0xff]  ;;  %v7127_v59 = vrot.slane %v1023_v47, 4  ;;  %v304_v47 = vld [vmem:[%s6786_s8 + $0xb4] sm:$0xff]  }
  0x41   : > { %5154 = vmatpush.bf16.msrb.mxu3 %v6413_v56  ;;  %9246 = vst [vmem:[#allocation14_spill] sm:$0xff] %v7093_v51  ;;  %v3590_v56 = vunpack.c.l.b16 %v506_v60  ;;  %v3598_v14 = vunpack.c.l.b16 %v514_v50  ;;  %v3599_v60 = vunpack.c.l.b16 %v7093_v51  ;;  %v7125_v50 = vrot.slane %v1013_v11, 5  ;;  %v296_v16 = vld [vmem:[%s6786_s8 + $0x84] sm:$0xff]  }
  0x42   : > { %4976 = vmatpush.bf16.msrb.mxu1 %v6397_v25  ;;  %v6403_v25 = vld [vmem:[%s9181_s3 + $0x80] sm:$0xff]  ;;  %9247 = vst [vmem:[#allocation15_spill] sm:$0xff] %v7113_v44  ;;  %5243 = vmatpush.bf16.msrb.mxu0 %v6421_v6  ;;  %v7131_v35 = vpack.c.bf16 %v6961_v20, %v6961_v20  ;;  %v458_v31 = vsel %vm440_vm0, %v7108_v26, 0.0  ;;  %v3608_v6 = vpack.c.b16 %v3583_v54, %v3582_v48  ;;  %v328_v54 = vunpack.c.l.bf16 %v296_v16 }
  0x43   : > { %9248 = vst [vmem:[#allocation16_spill] sm:$0xff] %v7115_v7  ;;  %v490_v2 = vpack.c.bf16 %v458_v31, %v458_v31  ;;  %v7143_v11 = vpack.c.bf16 %v7117_v61, %v7117_v61  ;;  %v6395_v20 = vld [vmem:[%s9181_s3 + $0x40] sm:$0xff]  ;;  %v3612_v29 = vpack.c.b16 %v3591_v8, %v3590_v56  ;;  %v355_v0 = vmul.f32 %v6791_v4, %v320_v5 }
  0x44   : > { %5066 = vmatpush.bf16.msrb.mxu2 %v6404_v39  ;;  %v6420_v39 = vld [vmem:[%s9181_s3 + $0x108] sm:$0xff]  ;;  %9249 = vst [vmem:[#allocation17_spill] sm:$0xff] %v7125_v50  ;;  %v356_v23 = vmul.f32 %v6791_v4, %v321_v9  ;;  %v329_v31 = vunpack.c.h.bf16 %v296_v16  ;;  %v336_v7 = vunpack.c.l.bf16 %v304_v47  ;;  %v337_v56 = vunpack.c.h.bf16 %v304_v47 }
  0x45   : > { %5155 = vmatpush.bf16.msrb.mxu3 %v6412_v53  ;;  %9250 = vst [vmem:[#allocation18_spill] sm:$0xff] %v7127_v59  ;;  %v7139_v53 = vpack.c.bf16 %v7011_v3, %v7011_v3  ;;  %v3616_v59 = vpack.c.b16 %v3599_v60, %v3598_v14  ;;  %v3574_v3 = vunpack.c.l.b16 %v490_v2  ;;  %v3575_v48 = vunpack.c.l.b16 %v7143_v11  ;;  %v7161_v14 = vld [vmem:[%s6786_s8 + $0x24] sm:$0xff]  }
  0x46   : > { %4977 = vmatpush.bf16.msrb.mxu1 %v6396_v12  ;;  %5244 = vmatpush.bf16.msrb.mxu0 %v6420_v39  ;;  %v390_v12 = vadd.f32 %v6799_v10, %v355_v0  ;;  %v391_v50 = vadd.f32 %v6799_v10, %v356_v23  ;;  %v676_v5 = vpack.c.bf16 %v7042_v32, %v7042_v32  ;;  %v6419_v0 = vld [vmem:[%s9181_s3 + $0x100] sm:$0xff]  ;;  %v6450_v39 = vld [vmem:[%s9181_s3 + $0x1f8] sm:$0xff] }
  0x47   : > { %v7156_v8 = vpack.c.b16 %v3575_v48, %v3574_v3  ;;  %v363_v9 = vmul.f32 %v6791_v4, %v328_v54  ;;  %v364_v2 = vmul.f32 %v6791_v4, %v329_v31  ;;  %v372_v32 = vmul.f32 %v6791_v4, %v337_v56 }
  0x48   : > { %5067 = vmatpush.bf16.msrb.mxu2 %v6403_v25  ;;  %v422_v60 = vmax.f32 %v390_v12, 0.0  ;;  %v7166_v23 = vmax.f32 %v391_v50, 0.0  ;;  %v371_v25 = vmul.f32 %v6791_v4, %v336_v7  ;;  %v312_v3 = vunpack.c.l.bf16 %v7161_v14 }
  0x49   : > { %5156 = vmatpush.bf16.msrb.mxu3 %v6411_v30  ;;  %v398_v16 = vadd.f32 %v6799_v10, %v363_v9  ;;  %v399_v47 = vadd.f32 %v6799_v10, %v364_v2  ;;  %v407_v54 = vadd.f32 %v6799_v10, %v372_v32  ;;  %v938_v56 = vshrl.u32 %v676_v5, 16 }
  0x4a   : > { %4978 = vmatpush.bf16.msrb.mxu1 %v6395_v20  ;;  %v468_v50 = vsel %vm440_vm0, %v422_v60, 0.0  ;;  %v7179_v7 = vpack.c.bf16 %v7166_v23, %v7166_v23  ;;  %v406_v20 = vadd.f32 %v6799_v10, %v371_v25  ;;  %5245 = vmatpush.bf16.msrb.mxu0 %v6419_v0  ;;  %v941_v2 = vshll.u32 %v676_v5, 16 }
  0x4b   : > { %4920 = vmatmul.bf16.gmra.mxu1 %v3608_v6  ;;  %4940 = vmatmul.bf16.gmra.mxu2 %v3612_v29  ;;  %v6442_v29 = vld [vmem:[%s9181_s3 + $0x1b8] sm:$0xff]  ;;  %v500_v6 = vpack.c.bf16 %v468_v50, %v468_v50  ;;  %v7186_v48 = vmax.f32 %v398_v16, 0.0  ;;  %v951_v25 = vshrl.u32 %v7076_v27, 16  ;;  %v7205_v0 = vpack.c.bf16 %v7108_v26, %v7108_v26 }
  0x4c   : > { %4960 = vmatmul.bf16.gmra.mxu3 %v3616_v59  ;;  %v7188_v59 = vmax.f32 %v399_v47, 0.0  ;;  %v7193_v9 = vmax.f32 %v406_v20, 0.0  ;;  %5416 = vmatpush.bf16.msra.mxu2 %v6442_v29  ;;  %v7207_v50 = vmax.f32 %v407_v54, 0.0  ;;  %v3585_v29 = vunpack.c.l.b16 %v7179_v7  ;;  %v6434_v26 = vld [vmem:[%s9181_s3 + $0x178] sm:$0xff] }
  0x4d   : > { %4900 = vmatmul.bf16.gmra.mxu0 %v7156_v8  ;;  %v476_v16 = vsel %vm440_vm0, %v7186_v48, 0.0  ;;  %v3584_v20 = vunpack.c.l.b16 %v500_v6  ;;  %v313_v12 = vunpack.c.h.bf16 %v7161_v14  ;;  %v347_v31 = vmul.f32 %v6791_v4, %v312_v3  ;;  %v6458_v54 = vld [vmem:[%s9181_s3 + $0x238] sm:$0xff]  ;;  %5505 = vmatpush.bf16.msra.mxu3 %v6450_v39 }
  0x4e   : > { %9251 = vst [vmem:[#allocation19_spill] sm:$0xff] %v7188_v59  ;;  %v7201_v47 = vpack.c.bf16 %v7188_v59, %v7188_v59  ;;  %v508_v32 = vpack.c.bf16 %v476_v16, %v476_v16  ;;  %v484_v5 = vsel %vm440_vm0, %v7193_v9, 0.0  ;;  %v7227_v14 = vpack.c.bf16 %v7207_v50, %v7207_v50  ;;  %5327 = vmatpush.bf16.msra.mxu1 %v6434_v26  ;;  %v6000_v26 = vld [vmem:[%s6786_s8 + $0x14] sm:$0x1] }
  0x4f   : > { %9252 = vst [vmem:[#allocation20_spill] sm:$0xff] %v7193_v9  ;;  %v516_v30 = vpack.c.bf16 %v484_v5, %v484_v5  ;;  %v7229_v3 = vrot.slane %v938_v56, 4  ;;  %v7231_v42 = vrot.slane %v941_v2, 5  ;;  %v7233_v57 = vrot.slane %v951_v25, 4  ;;  %5594 = vmatpush.bf16.msra.mxu0 %v6458_v54 }
  0x50   : > { %9253 = vst [vmem:[#allocation21_spill] sm:$0xff] %v7201_v47  ;;  %v3592_v16 = vunpack.c.l.b16 %v508_v32  ;;  %v3593_v6 = vunpack.c.l.b16 %v7201_v47  ;;  %v7237_v58 = vpack.c.bf16 %v7066_v19, %v7066_v19  ;;  %v7242_v56 = vpack.c.bf16 %v422_v60, %v422_v60 }
  0x51   : > { %9254 = vst [vmem:[#allocation22_spill] sm:$0xff] %v7207_v50  ;;  %v3600_v46 = vunpack.c.l.b16 %v516_v30  ;;  %v3601_v2 = vunpack.c.l.b16 %v7227_v14  ;;  %v348_v25 = vmul.f32 %v6791_v4, %v313_v12  ;;  %v382_v19 = vadd.f32 %v6799_v10, %v347_v31 }
  0x52   : > { %9255 = vst [vmem:[#allocation23_spill] sm:$0xff] %v7227_v14  ;;  %v3609_v39 = vpack.c.b16 %v3585_v29, %v3584_v20  ;;  %v3613_v9 = vpack.c.b16 %v3593_v6, %v3592_v16  ;;  %v6727_v54 = vmov 0   ;;  %v1433_v59 = vunpack.c.l.bf16 %v5968_v21 }
  0x53   : > { %9256 = vst [vmem:[#allocation24_spill] sm:$0xff] %v7229_v3  ;;  %v3617_v32 = vpack.c.b16 %v3601_v2, %v3600_v46  ;;  %v383_v50 = vadd.f32 %v6799_v10, %v348_v25  ;;  %v414_v30 = vmax.f32 %v382_v19, 0.0  ;;  %v700_v60 = vrot.slane %v6727_v54, 4  ;;  %v519_v2 = vld [vmem:[%s6786_s8 + $0x14] sm:$0x1] }
  0x54   : > { %9257 = vst [vmem:[#allocation25_spill] sm:$0xff] %v7231_v42  ;;  %v703_v5 = vrot.slane %v6727_v54, 5  ;;  %v1434_v14 = vunpack.c.h.bf16 %v5968_v21  ;;  %v1645_v20 = vunpack.c.l.bf16 %v6000_v26  ;;  %v1465_v46 = vmul.f32 %v6791_v4, %v1433_v59  ;;  %v1082_v42 = vld [vmem:[%s6786_s8 + $0xc] sm:$0xe] }
  0x55   : > { %9258 = vst [vmem:[#allocation26_spill] sm:$0xff] %v7233_v57  ;;  %v7250_v51 = vmax.f32 %v383_v50, 0.0  ;;  %v460_v31 = vsel %vm440_vm0, %v414_v30, 0.0  ;;  %v7254_v12 = vpack.c.bf16 %v414_v30, %v414_v30 }
  0x56   : > { %v492_v29 = vpack.c.bf16 %v460_v31, %v460_v31  ;;  %v704_v16 = vor.u32 %v703_v5, %v700_v60  ;;  %v1466_v6 = vmul.f32 %v6791_v4, %v1434_v14  ;;  %v1661_v59 = vmul.f32 %v6791_v4, %v1645_v20 }
  0x57   : > { %v7263_v21 = vpack.c.bf16 %v7250_v51, %v7250_v51  ;;  %v1497_v30 = vadd.f32 %v6799_v10, %v1465_v46  ;;  %v535_v31 = vunpack.c.l.bf16 %v519_v2 }
  0x58   : > { %v3576_v14 = vunpack.c.l.b16 %v492_v29  ;;  %v705_v26 = vrot.slane %v704_v16, 4  ;;  %v1677_v60 = vadd.f32 %v6799_v10, %v1661_v59 }
  0x59   : > { %v3577_v54 = vunpack.c.l.b16 %v7263_v21  ;;  %v1529_v25 = vmax.f32 %v1497_v30, 0.0 }
  0x5a   : > { %v710_v19 = vsel %vm7267_vm3, %v705_v26, %v703_v5  ;;  %v7283_v46 = vmax.f32 %v1677_v60, 0.0  ;;  %v9264_v5 = vshll.u32 %v7131_v35, 16 }
  0x5b   : > { %4925 = vmatmul.bf16.gmra.mxu1 %v3609_v39  ;;  %4945 = vmatmul.bf16.gmra.mxu2 %v3613_v9  ;;  %v1498_v39 = vadd.f32 %v6799_v10, %v1466_v6  ;;  %v3605_v29 = vpack.c.b16 %v3577_v54, %v3576_v14  ;;  %v3634_v16 = vunpack.c.l.b16 %v710_v19  ;;  %v551_v6 = vmul.f32 %v6791_v4, %v535_v31 }
  0x5c   : > { %4965 = vmatmul.bf16.gmra.mxu3 %v3617_v32  ;;  %v9262_v32 = vshrl.u32 %v7131_v35, 16  ;;  %9263 = vst [vmem:[#allocation28_spill] sm:$0xff] %v7283_v46  ;;  %v1565_v9 = vsel %vm440_vm0, %v1529_v25, 0.0  ;;  %v1709_v59 = vpack.c.bf16 %v1529_v25, %v1529_v25  ;;  %v727_v26 = vrot.slane %v9264_v5, 5 }
  0x5d   : > { %v7279_v57 = vmax.f32 %v1498_v39, 0.0  ;;  %4905 = vmatmul.bf16.gmra.mxu0 %v3605_v29  ;;  %v7293_v14 = vpack.c.b16 %v3634_v16, %v3634_v16  ;;  %v1597_v19 = vpack.c.bf16 %v1565_v9, %v1565_v9  ;;  %v1711_v39 = vpack.c.bf16 %v7283_v46, %v7283_v46 }
  0x5e   : > { %v724_v20 = vrot.slane %v9262_v32, 4  ;;  %v1758_v54 = vshrl.u32 %v1709_v59, 16  ;;  %v1761_v60 = vshll.u32 %v1709_v59, 16  ;;  %v567_v35 = vadd.f32 %v6799_v10, %v551_v6 }
  0x5f   : > { %9261 = vst [vmem:[#allocation27_spill] sm:$0xff] %v7279_v57  ;;  %v1598_v2 = vpack.c.bf16 %v7279_v57, %v7279_v57  ;;  %v3826_v62 = vunpack.c.l.b16 %v1597_v19  ;;  %v1777_v25 = vshll.u32 %v1711_v39, 16  ;;  %v731_v59 = vshll.u32 %v6992_v40, 16 }
  0x60   : > { %9265 = vst [vmem:[#allocation29_spill] sm:$0xff] %v7293_v14  ;;  %v1760_v5 = vrot.slane %v1758_v54, 4  ;;  %v1763_v27 = vrot.slane %v1761_v60, 5  ;;  %v728_v29 = vor.u32 %v727_v26, %v724_v20  ;;  %v583_v47 = vmax.f32 %v567_v35, 0.0 }
  0x61   : > { %v3827_v31 = vunpack.c.l.b16 %v1598_v2  ;;  %v1767_v32 = vshll.u32 %v1598_v2, 16  ;;  %v1771_v57 = vshrl.u32 %v1598_v2, 16  ;;  %v1779_v9 = vrot.slane %v1777_v25, 5 }
  0x62   : > { %v1764_v44 = vor.u32 %v1763_v27, %v1760_v5  ;;  %v729_v46 = vrot.slane %v728_v29, 4  ;;  %v651_v2 = vpack.c.bf16 %v583_v47, %v583_v47  ;;  %v7302_v6 = vadd.s32 8, %v6801_v13 }
  0x63   : > { %v1769_v30 = vrot.slane %v1767_v32, 5  ;;  %v3858_v16 = vpack.c.b16 %v3827_v31, %v3826_v62  ;;  %v1773_v3 = vrot.slane %v1771_v57, 4  ;;  %v1098_v39 = vunpack.c.l.bf16 %v1082_v42  ;;  %v6001_v42 = vld [vmem:[%s6786_s8 + $0x20] sm:$0x1] }
  0x64   : > { %v1765_v20 = vrot.slane %v1764_v44, 4  ;;  %v733_v26 = vrot.slane %v731_v59, 5  ;;  %v737_v62 = vrot.slane %v735_v55, 4  ;;  %v741_v54 = vshll.u32 %v651_v2, 16  ;;  %v520_v44 = vld [vmem:[%s6786_s8 + $0x20] sm:$0x1] }
  0x65   : > { %v1774_v19 = vor.u32 %v1773_v3, %v1769_v30  ;;  %v1114_v27 = vmul.f32 %v6791_v4, %v1098_v39  ;;  %vm1162_vm5 = vcmp.le.s32.totalorder %v7302_v6, 14  ;;  %v1230_v31 = vrot.slane %v6971_v24, 2 }
  0x66   : > { %v1770_v40 = vsel %vm7267_vm3, %v1765_v20, %v1769_v30  ;;  %v734_v3 = vsel %vm7267_vm3, %v729_v46, %v733_v26  ;;  %v738_v60 = vor.u32 %v737_v62, %v733_v26  ;;  %v743_v25 = vrot.slane %v741_v54, 5 }
  0x67   : > { %v1775_v57 = vrot.slane %v1774_v19, 4  ;;  %v3890_v32 = vunpack.c.l.b16 %v1770_v40  ;;  %v3636_v35 = vunpack.c.l.b16 %v734_v3  ;;  %v1130_v46 = vadd.f32 %v6799_v10, %v1114_v27  ;;  %v6441_v19 = vld [vmem:[%s9181_s3 + $0x1b0] sm:$0xff]  ;;  %v7332_v3 = vld [vmem:[%s9180_s2] ss:$0 sm:$0xff] }
  0x68   : > { %v739_v5 = vrot.slane %v738_v60, 4  ;;  %v1232_v29 = vrot.slane %v583_v47, 2  ;;  %v1646_v59 = vunpack.c.l.bf16 %v6001_v42  ;;  %v536_v24 = vunpack.c.l.bf16 %v520_v44  ;;  %5417 = vmatpush.bf16.msra.mxu2 %v6441_v19 }
  0x69   : > { %v1780_v55 = vsel %vm7267_vm3, %v1775_v57, %v1779_v9  ;;  %v1146_v9 = vmax.f32 %v1130_v46, 0.0 }
  0x6a   : > { %v3891_v30 = vunpack.c.l.b16 %v1780_v55  ;;  %v744_v39 = vsel %vm7267_vm3, %v739_v5, %v743_v25  ;;  %v1233_v20 = vsel %vm1223_vm4, %v1230_v31, %v1232_v29  ;;  %v1662_v62 = vmul.f32 %v6791_v4, %v1646_v59 }
  0x6b   : > { %4979 = vmatmul.bf16.vlgmr.msrb.gmra.mxu1 %v7293_v14  ;;  %5068 = vmatmul.bf16.vlgmr.msrb.gmra.mxu2 %v6861_v1  ;;  %v3637_v26 = vunpack.c.l.b16 %v744_v39  ;;  %v1229_v10 = vrot.slane %v1146_v9, 2  ;;  %v552_v57 = vmul.f32 %v6791_v4, %v536_v24  ;;  %v1791_v55 = vshll.u32 %v7143_v11, 16  ;;  %v1083_v24 = vld [vmem:[%s6786_s8 + $0x18] sm:$0xe]  ;;  %v6457_v9 = vld [vmem:[%s9181_s3 + $0x230] sm:$0xff]  ;;  %v6640_v14 = vld [vmem:[%s6786_s8 + $0x48] sm:$0xff]  }
  0x6c   : > { %5157 = vmatmul.bf16.vlgmr.msrb.gmra.mxu3 %v3858_v16  ;;  %v3922_v2 = vpack.c.b16 %v3891_v30, %v3890_v32  ;;  %v1339_v16 = vsel %vm1162_vm5, %v1233_v20, 0.0  ;;  %v1678_v60 = vadd.f32 %v7332_v3, %v1662_v62  ;;  %v1795_v4 = vshrl.u32 %v7143_v11, 16  ;;  %v6449_v11 = vld [vmem:[%s9181_s3 + $0x1f0] sm:$0xff]  ;;  %5595 = vmatpush.bf16.msra.mxu0 %v6457_v9 }
  0x6d   : > { %v1371_v47 = vpack.c.bf16 %v1339_v16, %v1339_v16  ;;  %v3667_v54 = vpack.c.b16 %v3637_v26, %v3636_v35  ;;  %v1231_v27 = vsel %vm1223_vm4, %v1229_v10, %v1230_v31  ;;  %v9266_v25 = vshrl.u32 %v7205_v0, 16  ;;  %5506 = vmatpush.bf16.msra.mxu3 %v6449_v11 }
  0x6e   : > { %5246 = vmatmul.bf16.vlgmr.msrb.gmra.mxu0 %v3922_v2  ;;  %v1370_v42 = vpack.c.bf16 %v1231_v27, %v1231_v27  ;;  %v7335_v44 = vmax.f32 %v1678_v60, 0.0  ;;  %v9267_v31 = vshll.u32 %v7205_v0, 16  ;;  %v568_v5 = vadd.f32 %v7332_v3, %v552_v57  ;;  %v6433_v0 = vld [vmem:[%s9181_s3 + $0x170] sm:$0xff]  ;;  %v7361_v60 = vld [vmem:[%s9179_s1] ss:$0 sm:$0xff] }
  0x6f   : > { %v3733_v40 = vunpack.c.l.b16 %v1371_v47  ;;  %v1784_v35 = vrot.slane %v9266_v25, 4  ;;  %v1793_v29 = vrot.slane %v1791_v55, 5  ;;  %v1797_v59 = vrot.slane %v1795_v4, 4  ;;  %5328 = vmatpush.bf16.msra.mxu1 %v6433_v0  ;;  %v5972_v55 = vld [vmem:[%s6786_s8 + $0x24] sm:$0xff]  }
  0x70   : > { %v3732_v32 = vunpack.c.l.b16 %v1370_v42  ;;  %v1787_v30 = vrot.slane %v9267_v31, 5  ;;  %v1714_v46 = vpack.c.bf16 %v7335_v44, %v7335_v44  ;;  %v584_v39 = vmax.f32 %v568_v5, 0.0 }
  0x71   : > { %v1798_v20 = vor.u32 %v1797_v59, %v1793_v29  ;;  %v1099_v47 = vunpack.c.l.bf16 %v1083_v24  ;;  %v521_v59 = vld [vmem:[%s6786_s8 + $0x2c] sm:$0x1] }
  0x72   : > { %v3763_v19 = vpack.c.b16 %v3733_v40, %v3732_v32  ;;  %v1788_v2 = vor.u32 %v1787_v30, %v1784_v35  ;;  %v1801_v26 = vshll.u32 %v1714_v46, 16  ;;  %v654_v10 = vpack.c.bf16 %v584_v39, %v584_v39  ;;  %v6002_v30 = vld [vmem:[%s6786_s8 + $0x2c] sm:$0x1] }
  0x73   : > { %v1799_v62 = vrot.slane %v1798_v20, 4  ;;  %v1115_v42 = vmul.f32 %v7361_v60, %v1099_v47  ;;  %v7369_v32 = vrot.slane %v7117_v61, 2  ;;  %v1237_v5 = vrot.slane %v584_v39, 2 }
  0x74   : > { %v1789_v16 = vrot.slane %v1788_v2, 4  ;;  %v1803_v57 = vrot.slane %v1801_v26, 5  ;;  %v765_v40 = vshll.u32 %v654_v10, 16  ;;  %v1437_v46 = vunpack.c.l.bf16 %v5972_v55 }
  0x75   : > { %v1131_v31 = vadd.f32 %v7332_v3, %v1115_v42  ;;  %v1647_v61 = vunpack.c.l.bf16 %v6002_v30  ;;  %v537_v20 = vunpack.c.l.bf16 %v521_v59 }
  0x76   : > { %v1794_v27 = vsel %vm7267_vm3, %v1789_v16, %v1793_v29  ;;  %v1804_v4 = vsel %vm7267_vm3, %v1799_v62, %v1803_v57  ;;  %v767_v35 = vrot.slane %v765_v40, 5  ;;  %v1438_v29 = vunpack.c.h.bf16 %v5972_v55 }
  0x77   : > { %v3893_v25 = vunpack.c.l.b16 %v1804_v4  ;;  %v1469_v2 = vmul.f32 %v7361_v60, %v1437_v46  ;;  %v553_v40 = vmul.f32 %v7361_v60, %v537_v20  ;;  %v9269_v46 = vshll.u32 %v7254_v12, 16 }
  0x78   : > { %v1470_v11 = vmul.f32 %v7361_v60, %v1438_v29  ;;  %v768_v0 = vsel %vm7267_vm3, %v1799_v62, %v767_v35  ;;  %v9268_v62 = vshrl.u32 %v7254_v12, 16 }
  0x79   : > { %v3639_v26 = vunpack.c.l.b16 %v768_v0  ;;  %v1501_v10 = vadd.f32 %v7332_v3, %v1469_v2  ;;  %v775_v29 = vrot.slane %v9269_v46, 5 }
  0x7a   : > { %v1502_v47 = vadd.f32 %v7332_v3, %v1470_v11  ;;  %v772_v42 = vrot.slane %v9268_v62, 4  ;;  %v1084_v62 = vld [vmem:[%s6786_s8 + $0x24] sm:$0xe] }
  0x7b   : > { %4984 = vmatmul.bf16.gmra.mxu1 %v3667_v54  ;;  %5073 = vmatmul.bf16.gmra.mxu2 %v3763_v19  ;;  %v3892_v54 = vunpack.c.l.b16 %v1794_v27  ;;  %v1147_v19 = vmax.f32 %v1131_v31, 0.0  ;;  %v1663_v27 = vmul.f32 %v7361_v60, %v1647_v61  ;;  %v1533_v35 = vmax.f32 %v1501_v10, 0.0 }
  0x7c   : > { %5162 = vmatmul.bf16.gmra.mxu3 %v7156_v8  ;;  %v1238_v8 = vsel %vm1223_vm4, %v7369_v32, %v1237_v5  ;;  %v7390_v31 = vmax.f32 %v1502_v47, 0.0  ;;  %v569_v5 = vadd.f32 %v7332_v3, %v553_v40  ;;  %v776_v12 = vor.u32 %v775_v29, %v772_v42 }
  0x7d   : > { %v3923_v24 = vpack.c.b16 %v3893_v25, %v3892_v54  ;;  %v1234_v9 = vrot.slane %v1147_v19, 2  ;;  %v1341_v39 = vsel %vm1162_vm5, %v1238_v8, 0.0  ;;  %v3668_v55 = vpack.c.b16 %v3639_v26, %v3892_v54 }
  0x7e   : > { %v1373_v16 = vpack.c.bf16 %v1341_v39, %v1341_v39  ;;  %v1679_v30 = vadd.f32 %v7332_v3, %v1663_v27  ;;  %v1715_v19 = vpack.c.bf16 %v1533_v35, %v1533_v35  ;;  %v779_v8 = vshll.u32 %v7263_v21, 16 }
  0x7f   : > { %5251 = vmatmul.bf16.gmra.mxu0 %v3923_v24  ;;  %v1236_v57 = vsel %vm1223_vm4, %v1234_v9, %v7369_v32  ;;  %v1569_v24 = vsel %vm440_vm0, %v1533_v35, 0.0  ;;  %v1602_v2 = vpack.c.bf16 %v7390_v31, %v7390_v31  ;;  %v585_v61 = vmax.f32 %v569_v5, 0.0 }
  0x80   : > { %v1372_v4 = vpack.c.bf16 %v1236_v57, %v1236_v57  ;;  %v3735_v25 = vunpack.c.l.b16 %v1373_v16  ;;  %v1601_v54 = vpack.c.bf16 %v1569_v24, %v1569_v24  ;;  %v7401_v11 = vmax.f32 %v1679_v30, 0.0 }
  0x81   : > { %v1806_v9 = vshrl.u32 %v1715_v19, 16  ;;  %v1809_v39 = vshll.u32 %v1715_v19, 16  ;;  %v3831_v26 = vunpack.c.l.b16 %v1602_v2  ;;  %v1815_v10 = vshll.u32 %v1602_v2, 16 }
  0x82   : > { %v3734_v59 = vunpack.c.l.b16 %v1372_v4  ;;  %v3830_v20 = vunpack.c.l.b16 %v1601_v54  ;;  %v1717_v16 = vpack.c.bf16 %v7401_v11, %v7401_v11  ;;  %v1819_v27 = vshrl.u32 %v1602_v2, 16  ;;  %v6639_v2 = vld [vmem:[%s6786_s8 + $0x30] sm:$0xff]  }
  0x83   : > { %v1808_v47 = vrot.slane %v1806_v9, 4  ;;  %v1811_v57 = vrot.slane %v1809_v39, 5  ;;  %v657_v40 = vpack.c.bf16 %v585_v61, %v585_v61  ;;  %v1817_v35 = vrot.slane %v1815_v10, 5 }
  0x84   : > { %v3764_v0 = vpack.c.b16 %v3735_v25, %v3734_v59  ;;  %v3860_v4 = vpack.c.b16 %v3831_v26, %v3830_v20  ;;  %v1825_v25 = vshll.u32 %v1717_v16, 16  ;;  %v777_v30 = vrot.slane %v776_v12, 4 }
  0x85   : > { %v1812_v5 = vor.u32 %v1811_v57, %v1808_v47  ;;  %v1821_v42 = vrot.slane %v1819_v27, 4  ;;  %v781_v46 = vrot.slane %v779_v8, 5  ;;  %v783_v29 = vshrl.u32 %v7263_v21, 16 }
  0x86   : > { %v1827_v59 = vrot.slane %v1825_v25, 5  ;;  %v789_v24 = vshll.u32 %v657_v40, 16  ;;  %v1100_v19 = vunpack.c.l.bf16 %v1084_v62  ;;  %v1240_v54 = vrot.slane %v7250_v51, 2  ;;  %v6003_v62 = vld [vmem:[%s6786_s8 + $0x38] sm:$0x1] }
  0x87   : > { %v1813_v9 = vrot.slane %v1812_v5, 4  ;;  %v785_v39 = vrot.slane %v783_v29, 4  ;;  %v1242_v21 = vrot.slane %v585_v61, 2  ;;  %v6493_v51 = vunpack.c.l.bf16 %v6639_v2 }
  0x88   : > { %v791_v12 = vrot.slane %v789_v24, 5  ;;  %v1116_v8 = vmul.f32 %v7361_v60, %v1100_v19  ;;  %v6494_v40 = vunpack.c.h.bf16 %v6639_v2  ;;  %v1648_v2 = vunpack.c.l.bf16 %v6003_v62 }
  0x89   : > { %v1818_v26 = vsel %vm7267_vm3, %v1813_v9, %v1817_v35  ;;  %v786_v10 = vor.u32 %v785_v39, %v781_v46  ;;  %v1243_v27 = vsel %vm1223_vm4, %v1240_v54, %v1242_v21 }
  0x8a   : > { %v3894_v47 = vunpack.c.l.b16 %v1818_v26  ;;  %v1132_v57 = vadd.f32 %v7332_v3, %v1116_v8  ;;  %v1343_v61 = vsel %vm1162_vm5, %v1243_v27, 0.0  ;;  %v1472_v29 = vmul.f32 %v7361_v60, %v6494_v40 }
  0x8b   : > { %4989 = vmatmul.bf16.gmra.mxu1 %v3668_v55  ;;  %5078 = vmatmul.bf16.gmra.mxu2 %v3764_v0  ;;  %v1822_v55 = vor.u32 %v1821_v42, %v1817_v35  ;;  %v782_v0 = vsel %vm7267_vm3, %v777_v30, %v781_v46  ;;  %v787_v30 = vrot.slane %v786_v10, 4  ;;  %v1471_v35 = vmul.f32 %v7361_v60, %v6493_v51 }
  0x8c   : > { %5167 = vmatmul.bf16.gmra.mxu3 %v3860_v4  ;;  %v3640_v20 = vunpack.c.l.b16 %v782_v0  ;;  %v522_v4 = vld [vmem:[%s6786_s8 + $0x38] sm:$0x1]  ;;  %v1148_v42 = vmax.f32 %v1132_v57, 0.0  ;;  %v1375_v46 = vpack.c.bf16 %v1343_v61, %v1343_v61  ;;  %v1504_v21 = vadd.f32 %v7332_v3, %v1472_v29 }
  0x8d   : > { %v1823_v16 = vrot.slane %v1822_v55, 4  ;;  %v792_v24 = vsel %vm7267_vm3, %v787_v30, %v791_v12  ;;  %v1503_v19 = vadd.f32 %v7332_v3, %v1471_v35  ;;  %v538_v9 = vunpack.c.l.bf16 %v522_v4 }
  0x8e   : > { %v3641_v0 = vunpack.c.l.b16 %v792_v24  ;;  %v1239_v39 = vrot.slane %v1148_v42, 2  ;;  %v3737_v8 = vunpack.c.l.b16 %v1375_v46  ;;  %v9270_v57 = vshrl.u32 %v6847_v52, 16 }
  0x8f   : > { %v1828_v25 = vsel %vm7267_vm3, %v1823_v16, %v1827_v59  ;;  %v6440_v59 = vld [vmem:[%s9181_s3 + $0x1a8] sm:$0xff]  ;;  %v1535_v26 = vmax.f32 %v1503_v19, 0.0  ;;  %v1664_v16 = vmul.f32 %v7361_v60, %v1648_v2  ;;  %v554_v10 = vmul.f32 %v7361_v60, %v538_v9 }
  0x90   : > { %v3895_v5 = vunpack.c.l.b16 %v1828_v25  ;;  %5418 = vmatpush.bf16.msra.mxu2 %v6440_v59  ;;  %v3669_v12 = vpack.c.b16 %v3641_v0, %v3640_v20  ;;  %v1241_v51 = vsel %vm1223_vm4, %v1239_v39, %v1240_v54  ;;  %v796_v27 = vrot.slane %v9270_v57, 4  ;;  %v1085_v39 = vld [vmem:[%s6786_s8 + $0x30] sm:$0xe] }
  0x91   : > { %v1374_v62 = vpack.c.bf16 %v1241_v51, %v1241_v51  ;;  %v7438_v4 = vmax.f32 %v1504_v21, 0.0  ;;  %v1571_v25 = vsel %vm440_vm0, %v1535_v26, 0.0  ;;  %v1718_v30 = vpack.c.bf16 %v1535_v26, %v1535_v26  ;;  %v6432_v51 = vld [vmem:[%s9181_s3 + $0x168] sm:$0xff] }
  0x92   : > { %v3924_v55 = vpack.c.b16 %v3895_v5, %v3894_v47  ;;  %v9271_v47 = vshll.u32 %v6847_v52, 16  ;;  %v1603_v61 = vpack.c.bf16 %v1571_v25, %v1571_v25  ;;  %v1680_v35 = vadd.f32 %v7332_v3, %v1664_v16  ;;  %5329 = vmatpush.bf16.msra.mxu1 %v6432_v51 }
  0x93   : > { %9272 = vst [vmem:[#allocation30_spill] sm:$0xff] %v7438_v4  ;;  %v570_v20 = vadd.f32 %v7332_v3, %v554_v10  ;;  %v3736_v5 = vunpack.c.l.b16 %v1374_v62  ;;  %v1604_v42 = vpack.c.bf16 %v7438_v4, %v7438_v4  ;;  %v1830_v52 = vshrl.u32 %v1718_v30, 16 }
  0x94   : > { %5256 = vmatmul.bf16.gmra.mxu0 %v3924_v55  ;;  %v799_v40 = vrot.slane %v9271_v47, 5  ;;  %v1833_v46 = vshll.u32 %v1718_v30, 16  ;;  %v3832_v29 = vunpack.c.l.b16 %v1603_v61  ;;  %v7446_v24 = vmax.f32 %v1680_v35, 0.0 }
  0x95   : > { %v586_v19 = vmax.f32 %v570_v20, 0.0  ;;  %v3765_v9 = vpack.c.b16 %v3737_v8, %v3736_v5  ;;  %v3833_v59 = vunpack.c.l.b16 %v1604_v42  ;;  %v1832_v55 = vrot.slane %v1830_v52, 4  ;;  %v6456_v8 = vld [vmem:[%s9181_s3 + $0x228] sm:$0xff] }
  0x96   : > { %v800_v54 = vor.u32 %v799_v40, %v796_v27  ;;  %9273 = vst [vmem:[#allocation31_spill] sm:$0xff] %v7446_v24  ;;  %v1835_v0 = vrot.slane %v1833_v46, 5  ;;  %v1720_v21 = vpack.c.bf16 %v7446_v24, %v7446_v24  ;;  %v1839_v26 = vshll.u32 %v1604_v42, 16  ;;  %5596 = vmatpush.bf16.msra.mxu0 %v6456_v8  ;;  %v9331_v24 = vld [vmem:[#allocation14_spill] sm:$0xff] }
  0x97   : > { %v1843_v16 = vshrl.u32 %v1604_v42, 16  ;;  %v660_v10 = vpack.c.bf16 %v586_v19, %v586_v19  ;;  %v3861_v57 = vpack.c.b16 %v3833_v59, %v3832_v29  ;;  %v803_v47 = vshll.u32 %v6839_v45, 16  ;;  %v5976_v29 = vld [vmem:[%s6786_s8 + $0x3c] sm:$0xff]  }
  0x98   : > { %v801_v2 = vrot.slane %v800_v54, 4  ;;  %v1836_v27 = vor.u32 %v1835_v0, %v1832_v55  ;;  %v807_v40 = vshrl.u32 %v6839_v45, 16  ;;  %v1841_v62 = vrot.slane %v1839_v26, 5  ;;  %v523_v26 = vld [vmem:[%s6786_s8 + $0x44] sm:$0x1] }
  0x99   : > { %v1845_v25 = vrot.slane %v1843_v16, 4  ;;  %v1849_v30 = vshll.u32 %v1720_v21, 16  ;;  %v813_v61 = vshll.u32 %v660_v10, 16  ;;  %v805_v20 = vrot.slane %v803_v47, 5  ;;  %v6004_v21 = vld [vmem:[%s6786_s8 + $0x44] sm:$0x1] }
  0x9a   : > { %v1837_v35 = vrot.slane %v1836_v27, 4  ;;  %v809_v54 = vrot.slane %v807_v40, 4  ;;  %v1101_v5 = vunpack.c.l.bf16 %v1085_v39  ;;  %v1245_v45 = vrot.slane %v6823_v33, 2 }
  0x9b   : > { %4994 = vmatmul.bf16.gmra.mxu1 %v3669_v12  ;;  %v6448_v12 = vld [vmem:[%s9181_s3 + $0x1e8] sm:$0xff]  ;;  %5083 = vmatmul.bf16.gmra.mxu2 %v3765_v9  ;;  %v1846_v42 = vor.u32 %v1845_v25, %v1841_v62  ;;  %v1851_v52 = vrot.slane %v1849_v30, 5  ;;  %v815_v46 = vrot.slane %v813_v61, 5  ;;  %v806_v59 = vsel %vm7267_vm3, %v801_v2, %v805_v20 }
  0x9c   : > { %5507 = vmatpush.bf16.msra.mxu3 %v6448_v12  ;;  %v1842_v9 = vsel %vm7267_vm3, %v1837_v35, %v1841_v62  ;;  %v810_v55 = vor.u32 %v809_v54, %v805_v20  ;;  %v1117_v0 = vmul.f32 %v7361_v60, %v1101_v5  ;;  %v3642_v10 = vunpack.c.l.b16 %v806_v59 }
  0x9d   : > { %5172 = vmatmul.bf16.gmra.mxu3 %v3861_v57  ;;  %v1847_v16 = vrot.slane %v1846_v42, 4  ;;  %v3896_v39 = vunpack.c.l.b16 %v1842_v9  ;;  %v1247_v12 = vrot.slane %v586_v19, 2  ;;  %v1441_v33 = vunpack.c.l.bf16 %v5976_v29 }
  0x9e   : > { %v811_v51 = vrot.slane %v810_v55, 4  ;;  %v1133_v8 = vadd.f32 %v7332_v3, %v1117_v0  ;;  %v1442_v57 = vunpack.c.h.bf16 %v5976_v29  ;;  %v1649_v2 = vunpack.c.l.bf16 %v6004_v21 }
  0x9f   : > { %v1852_v27 = vsel %vm7267_vm3, %v1847_v16, %v1851_v52  ;;  %v1248_v47 = vsel %vm1223_vm4, %v1245_v45, %v1247_v12  ;;  %v539_v40 = vunpack.c.l.bf16 %v523_v26  ;;  %v1473_v20 = vmul.f32 %v7361_v60, %v1441_v33 }
  0xa0   : > { %v3897_v62 = vunpack.c.l.b16 %v1852_v27  ;;  %v816_v25 = vsel %vm7267_vm3, %v811_v51, %v815_v46  ;;  %v1149_v30 = vmax.f32 %v1133_v8, 0.0  ;;  %v1345_v19 = vsel %vm1162_vm5, %v1248_v47, 0.0 }
  0xa1   : > { %v3643_v61 = vunpack.c.l.b16 %v816_v25  ;;  %v1377_v35 = vpack.c.bf16 %v1345_v19, %v1345_v19  ;;  %v1474_v54 = vmul.f32 %v7361_v60, %v1442_v57  ;;  %v1665_v29 = vmul.f32 %v7361_v60, %v1649_v2 }
  0xa2   : > { %v3925_v5 = vpack.c.b16 %v3897_v62, %v3896_v39  ;;  %v1244_v52 = vrot.slane %v1149_v30, 2  ;;  %v555_v9 = vmul.f32 %v7361_v60, %v539_v40  ;;  %v1505_v0 = vadd.f32 %v7332_v3, %v1473_v20 }
  0xa3   : > { %v3670_v46 = vpack.c.b16 %v3643_v61, %v3642_v10  ;;  %v3739_v55 = vunpack.c.l.b16 %v1377_v35  ;;  %v1506_v21 = vadd.f32 %v7332_v3, %v1474_v54  ;;  %v1681_v16 = vadd.f32 %v7332_v3, %v1665_v29 }
  0xa4   : > { %5261 = vmatmul.bf16.gmra.mxu0 %v3925_v5  ;;  %v1246_v26 = vsel %vm1223_vm4, %v1244_v52, %v1245_v45  ;;  %v571_v39 = vadd.f32 %v7332_v3, %v555_v9  ;;  %v9274_v12 = vshrl.u32 %v6965_v22, 16  ;;  %v1537_v33 = vmax.f32 %v1505_v0, 0.0 }
  0xa5   : > { %v1376_v8 = vpack.c.bf16 %v1246_v26, %v1246_v26  ;;  %v7494_v57 = vmax.f32 %v1506_v21, 0.0  ;;  %v9276_v10 = vshll.u32 %v6965_v22, 16  ;;  %v7498_v47 = vmax.f32 %v1681_v16, 0.0 }
  0xa6   : > { %v820_v51 = vrot.slane %v9274_v12, 4  ;;  %v587_v2 = vmax.f32 %v571_v39, 0.0  ;;  %v827_v45 = vshll.u32 %v6937_v63, 16  ;;  %v831_v40 = vshrl.u32 %v6937_v63, 16 }
  0xa7   : > { %9275 = vst [vmem:[#allocation32_spill] sm:$0xff] %v7494_v57  ;;  %v823_v27 = vrot.slane %v9276_v10, 5  ;;  %v3738_v62 = vunpack.c.l.b16 %v1376_v8  ;;  %v1573_v25 = vsel %vm440_vm0, %v1537_v33, 0.0  ;;  %v1606_v30 = vpack.c.bf16 %v7494_v57, %v7494_v57 }
  0xa8   : > { %v7481_v42 = vpop.f32.mrf.mxu1  ;;  %9277 = vst [vmem:[#allocation33_spill] sm:$0xff] %v7498_v47  ;;  %v1721_v19 = vpack.c.bf16 %v1537_v33, %v1537_v33  ;;  %v1605_v61 = vpack.c.bf16 %v1573_v25, %v1573_v25  ;;  %v1723_v22 = vpack.c.bf16 %v7498_v47, %v7498_v47  ;;  %v663_v20 = vpack.c.bf16 %v587_v2, %v587_v2  ;;  %v1086_v33 = vld [vmem:[%s6786_s8 + $0x3c] sm:$0xe] }
  0xa9   : > { %v824_v54 = vor.u32 %v823_v27, %v820_v51  ;;  %v3766_v5 = vpack.c.b16 %v3739_v55, %v3738_v62  ;;  %v3835_v29 = vunpack.c.l.b16 %v1606_v30  ;;  %v1863_v0 = vshll.u32 %v1606_v30, 16 }
  0xaa   : > { %v7485_v59 = vpop.f32.mrf.mxu0  ;;  %v1854_v52 = vshrl.u32 %v1721_v19, 16  ;;  %v1857_v63 = vshll.u32 %v1721_v19, 16  ;;  %v1867_v21 = vshrl.u32 %v1606_v30, 16  ;;  %v1873_v26 = vshll.u32 %v1723_v22, 16 }
  0xab   : > { %4999 = vmatmul.bf16.gmra.mxu1 %v3670_v46  ;;  %v3834_v46 = vunpack.c.l.b16 %v1605_v61  ;;  %5088 = vmatmul.bf16.gmra.mxu2 %v3766_v5  ;;  %v825_v51 = vrot.slane %v824_v54, 4  ;;  %v829_v55 = vrot.slane %v827_v45, 5  ;;  %v1865_v27 = vrot.slane %v1863_v0, 5  ;;  %v6005_v45 = vld [vmem:[%s6786_s8 + $0x50] sm:$0x1] }
  0xac   : > { %v1856_v39 = vrot.slane %v1854_v52, 4  ;;  %v1859_v12 = vrot.slane %v1857_v63, 5  ;;  %v1869_v62 = vrot.slane %v1867_v21, 4  ;;  %v1875_v25 = vrot.slane %v1873_v26, 5 }
  0xad   : > { %v3862_v10 = vpack.c.b16 %v3835_v29, %v3834_v46  ;;  %v830_v30 = vsel %vm7267_vm3, %v825_v51, %v829_v55  ;;  %v833_v61 = vrot.slane %v831_v40, 4  ;;  %v837_v22 = vshll.u32 %v663_v20, 16 }
  0xae   : > { %v7508_v35 = vpop.f32.mrf.mxu2  ;;  %v1860_v19 = vor.u32 %v1859_v12, %v1856_v39  ;;  %v1870_v5 = vor.u32 %v1869_v62, %v1865_v27  ;;  %v3644_v52 = vunpack.c.l.b16 %v830_v30  ;;  %v1102_v63 = vunpack.c.l.bf16 %v1086_v33 }
  0xaf   : > { %v7510_v9 = vpop.f32.mrf.mxu3  ;;  %5177 = vmatmul.bf16.gmra.mxu3 %v3862_v10  ;;  %v1250_v54 = vrot.slane %v6904_v41, 2  ;;  %v834_v47 = vor.u32 %v833_v61, %v829_v55  ;;  %v839_v29 = vrot.slane %v837_v22, 5  ;;  %v1252_v46 = vrot.slane %v587_v2, 2 }
  0xb0   : > { %9278 = vst [vmem:[#allocation34_spill] sm:$0xff] %v7510_v9  ;;  %v7512_v16 = vpop.f32.mrf.mxu1  ;;  %v1861_v1 = vrot.slane %v1860_v19, 4  ;;  %v1871_v0 = vrot.slane %v1870_v5, 4  ;;  %v1118_v26 = vmul.f32 %v7361_v60, %v1102_v63  ;;  %v6497_v40 = vunpack.c.l.bf16 %v6640_v14  ;;  %v524_v19 = vld [vmem:[%s6786_s8 + $0x50] sm:$0x1] }
  0xb1   : > { %9279 = vst [vmem:[#allocation35_spill] sm:$0xff] %v7512_v16  ;;  %v6498_v20 = vunpack.c.h.bf16 %v6640_v14  ;;  %v835_v51 = vrot.slane %v834_v47, 4  ;;  %v1253_v41 = vsel %vm1223_vm4, %v1250_v54, %v1252_v46  ;;  %v1650_v33 = vunpack.c.l.bf16 %v6005_v45 }
  0xb2   : > { %v7514_v8 = vpop.f32.mrf.mxu0  ;;  %v1866_v39 = vsel %vm7267_vm3, %v1861_v1, %v1865_v27  ;;  %v1876_v2 = vsel %vm7267_vm3, %v1871_v0, %v1875_v25  ;;  %v1134_v62 = vadd.f32 %v7332_v3, %v1118_v26  ;;  %v1347_v14 = vsel %vm1162_vm5, %v1253_v41, 0.0  ;;  %v6439_v25 = vld [vmem:[%s9181_s3 + $0x1a0] sm:$0xff] }
  0xb3   : > { %v3898_v55 = vunpack.c.l.b16 %v1866_v39  ;;  %v3899_v30 = vunpack.c.l.b16 %v1876_v2  ;;  %v840_v47 = vsel %vm7267_vm3, %v835_v51, %v839_v29  ;;  %v1379_v27 = vpack.c.bf16 %v1347_v14, %v1347_v14  ;;  %5419 = vmatpush.bf16.msra.mxu2 %v6439_v25 }
  0xb4   : > { %v1475_v61 = vmul.f32 %v7361_v60, %v6497_v40  ;;  %v3645_v22 = vunpack.c.l.b16 %v840_v47  ;;  %v1150_v5 = vmax.f32 %v1134_v62, 0.0  ;;  %v1476_v63 = vmul.f32 %v7361_v60, %v6498_v20 }
  0xb5   : > { %v1666_v45 = vmul.f32 %v7361_v60, %v1650_v33  ;;  %v3926_v46 = vpack.c.b16 %v3899_v30, %v3898_v55  ;;  %v3741_v0 = vunpack.c.l.b16 %v1379_v27  ;;  %v540_v39 = vunpack.c.l.bf16 %v524_v19 }
  0xb6   : > { %v7522_v21 = vpop.f32.mrf.mxu2  ;;  %v1507_v26 = vadd.f32 %v7332_v3, %v1475_v61  ;;  %v3671_v29 = vpack.c.b16 %v3645_v22, %v3644_v52  ;;  %v1249_v51 = vrot.slane %v1150_v5, 2  ;;  %v1508_v40 = vadd.f32 %v7332_v3, %v1476_v63 }
  0xb7   : > { %9280 = vst [vmem:[#allocation36_spill] sm:$0xff] %v7522_v21  ;;  %v7527_v12 = vpop.f32.mrf.mxu3  ;;  %v1682_v41 = vadd.f32 %v7332_v3, %v1666_v45  ;;  %5266 = vmatmul.bf16.gmra.mxu0 %v3926_v46  ;;  %v556_v62 = vmul.f32 %v7361_v60, %v540_v39  ;;  %v9282_v20 = vshrl.u32 %v7139_v53, 16  ;;  %v9283_v33 = vshll.u32 %v7139_v53, 16 }
  0xb8   : > { %9281 = vst [vmem:[#allocation37_spill] sm:$0xff] %v7527_v12  ;;  %v7532_v10 = vpop.f32.mrf.mxu1  ;;  %v1539_v2 = vmax.f32 %v1507_v26, 0.0  ;;  %v1251_v19 = vsel %vm1223_vm4, %v1249_v51, %v1250_v54  ;;  %v7557_v30 = vmax.f32 %v1508_v40, 0.0  ;;  %v851_v27 = vshll.u32 %v7064_v15, 16 }
  0xb9   : > { %v844_v14 = vrot.slane %v9282_v20, 4  ;;  %v847_v55 = vrot.slane %v9283_v33, 5  ;;  %v7559_v52 = vmax.f32 %v1682_v41, 0.0  ;;  %v1378_v61 = vpack.c.bf16 %v1251_v19, %v1251_v19  ;;  %v6447_v19 = vld [vmem:[%s9181_s3 + $0x1e0] sm:$0xff] }
  0xba   : > { %v7538_v1 = vpop.f32.mrf.mxu0  ;;  %9284 = vst [vmem:[#allocation38_spill] sm:$0xff] %v7557_v30  ;;  %v1575_v25 = vsel %vm440_vm0, %v1539_v2, 0.0  ;;  %v1724_v22 = vpack.c.bf16 %v1539_v2, %v1539_v2  ;;  %v572_v53 = vadd.f32 %v7332_v3, %v556_v62  ;;  %v1608_v54 = vpack.c.bf16 %v7557_v30, %v7557_v30  ;;  %5508 = vmatpush.bf16.msra.mxu3 %v6447_v19 }
  0xbb   : > { %5004 = vmatmul.bf16.gmra.mxu1 %v3671_v29  ;;  %9285 = vst [vmem:[#allocation39_spill] sm:$0xff] %v7559_v52  ;;  %v1607_v63 = vpack.c.bf16 %v1575_v25, %v1575_v25  ;;  %v1726_v45 = vpack.c.bf16 %v7559_v52, %v7559_v52  ;;  %v848_v26 = vor.u32 %v847_v55, %v844_v14  ;;  %v3740_v39 = vunpack.c.l.b16 %v1378_v61  ;;  %v6431_v25 = vld [vmem:[%s9181_s3 + $0x160] sm:$0xff] }
  0xbc   : > { %v1878_v29 = vshrl.u32 %v1724_v22, 16  ;;  %v1881_v51 = vshll.u32 %v1724_v22, 16  ;;  %v588_v41 = vmax.f32 %v572_v53, 0.0  ;;  %v3837_v20 = vunpack.c.l.b16 %v1608_v54  ;;  %v6455_v14 = vld [vmem:[%s9181_s3 + $0x220] sm:$0xff]  ;;  %5330 = vmatpush.bf16.msra.mxu1 %v6431_v25 }
  0xbd   : > { %v3836_v2 = vunpack.c.l.b16 %v1607_v63  ;;  %v1887_v62 = vshll.u32 %v1608_v54, 16  ;;  %v1891_v33 = vshrl.u32 %v1608_v54, 16  ;;  %v3767_v55 = vpack.c.b16 %v3741_v0, %v3740_v39  ;;  %v1087_v63 = vld [vmem:[%s6786_s8 + $0x48] sm:$0xe]  ;;  %5597 = vmatpush.bf16.msra.mxu0 %v6455_v14 }
  0xbe   : > { %v7561_v47 = vpop.f32.mrf.mxu2  ;;  %v1880_v61 = vrot.slane %v1878_v29, 4  ;;  %v1883_v22 = vrot.slane %v1881_v51, 5  ;;  %v1897_v53 = vshll.u32 %v1726_v45, 16  ;;  %v666_v52 = vpack.c.bf16 %v588_v41, %v588_v41  ;;  %v5980_v51 = vld [vmem:[%s6786_s8 + $0x54] sm:$0xff]  }
  0xbf   : > { %v7566_v5 = vpop.f32.mrf.mxu3  ;;  %v3863_v12 = vpack.c.b16 %v3837_v20, %v3836_v2  ;;  %v1889_v21 = vrot.slane %v1887_v62, 5  ;;  %v1893_v54 = vrot.slane %v1891_v33, 4  ;;  %5093 = vmatmul.bf16.gmra.mxu2 %v3767_v55  ;;  %v853_v57 = vrot.slane %v851_v27, 5 }
  0xc0   : > { %9286 = vst [vmem:[#allocation40_spill] sm:$0xff] %v7566_v5  ;;  %v7573_v46 = vpop.f32.mrf.mxu1  ;;  %v1884_v30 = vor.u32 %v1883_v22, %v1880_v61  ;;  %v1899_v5 = vrot.slane %v1897_v53, 5  ;;  %v855_v45 = vshrl.u32 %v7064_v15, 16  ;;  %v861_v39 = vshll.u32 %v666_v52, 16  ;;  %v6006_v61 = vld [vmem:[%s6786_s8 + $0x5c] sm:$0x1] }
  0xc1   : > { %9287 = vst [vmem:[#allocation41_spill] sm:$0xff] %v7573_v46  ;;  %v849_v46 = vrot.slane %v848_v26, 4  ;;  %5182 = vmatmul.bf16.gmra.mxu3 %v3863_v12  ;;  %v1894_v9 = vor.u32 %v1893_v54, %v1889_v21  ;;  %v1103_v29 = vunpack.c.l.bf16 %v1087_v63  ;;  %v1255_v27 = vrot.slane %v7029_v34, 2  ;;  %v525_v22 = vld [vmem:[%s6786_s8 + $0x5c] sm:$0x1] }
  0xc2   : > { %v7575_v40 = vpop.f32.mrf.mxu0  ;;  %v1885_v2 = vrot.slane %v1884_v30, 4  ;;  %v1257_v26 = vrot.slane %v588_v41, 2  ;;  %v857_v19 = vrot.slane %v855_v45, 4  ;;  %v863_v25 = vrot.slane %v861_v39, 5 }
  0xc3   : > { %v854_v62 = vsel %vm7267_vm3, %v849_v46, %v853_v57  ;;  %v1895_v12 = vrot.slane %v1894_v9, 4  ;;  %v1119_v14 = vmul.f32 %v7361_v60, %v1103_v29  ;;  %v1445_v55 = vunpack.c.l.bf16 %v5980_v51 }
  0xc4   : > { %v3646_v15 = vunpack.c.l.b16 %v854_v62  ;;  %v1890_v52 = vsel %vm7267_vm3, %v1885_v2, %v1889_v21  ;;  %v1258_v30 = vsel %vm1223_vm4, %v1255_v27, %v1257_v26  ;;  %v858_v41 = vor.u32 %v857_v19, %v853_v57 }
  0xc5   : > { %v1900_v34 = vsel %vm7267_vm3, %v1895_v12, %v1899_v5  ;;  %v3900_v46 = vunpack.c.l.b16 %v1890_v52  ;;  %v1349_v53 = vsel %vm1162_vm5, %v1258_v30, 0.0  ;;  %v1135_v21 = vadd.f32 %v7332_v3, %v1119_v14 }
  0xc6   : > { %v7587_v0 = vpop.f32.mrf.mxu2  ;;  %v3901_v63 = vunpack.c.l.b16 %v1900_v34  ;;  %v1381_v54 = vpack.c.bf16 %v1349_v53, %v1349_v53  ;;  %v1446_v45 = vunpack.c.h.bf16 %v5980_v51  ;;  %v859_v39 = vrot.slane %v858_v41, 4 }
  0xc7   : > { %9288 = vst [vmem:[#allocation42_spill] sm:$0xff] %v7587_v0  ;;  %v7591_v20 = vpop.f32.mrf.mxu3  ;;  %v1477_v29 = vmul.f32 %v7361_v60, %v1445_v55  ;;  %v1651_v2 = vunpack.c.l.bf16 %v6006_v61  ;;  %v541_v62 = vunpack.c.l.bf16 %v525_v22  ;;  %v9291_v34 = vshrl.u32 %v7242_v56, 16 }
  0xc8   : > { %9289 = vst [vmem:[#allocation43_spill] sm:$0xff] %v7591_v20  ;;  %v7596_v33 = vpop.f32.mrf.mxu1  ;;  %v3927_v26 = vpack.c.b16 %v3901_v63, %v3900_v46  ;;  %v1151_v20 = vmax.f32 %v1135_v21, 0.0  ;;  %v3743_v5 = vunpack.c.l.b16 %v1381_v54  ;;  %v1478_v12 = vmul.f32 %v7361_v60, %v1446_v45 }
  0xc9   : > { %v864_v57 = vsel %vm7267_vm3, %v859_v39, %v863_v25  ;;  %v1509_v19 = vadd.f32 %v7332_v3, %v1477_v29  ;;  %v1667_v52 = vmul.f32 %v7361_v60, %v1651_v2  ;;  %v557_v51 = vmul.f32 %v7361_v60, %v541_v62 }
  0xca   : > { %v7606_v9 = vpop.f32.mrf.mxu0  ;;  %5271 = vmatmul.bf16.gmra.mxu0 %v3927_v26  ;;  %v3647_v30 = vunpack.c.l.b16 %v864_v57  ;;  %v1254_v55 = vrot.slane %v1151_v20, 2  ;;  %v1510_v61 = vadd.f32 %v7332_v3, %v1478_v12  ;;  %v868_v46 = vrot.slane %v9291_v34, 4 }
  0xcb   : > { %v1541_v41 = vmax.f32 %v1509_v19, 0.0  ;;  %v1683_v25 = vadd.f32 %v7332_v3, %v1667_v52  ;;  %v573_v63 = vadd.f32 %v7332_v3, %v557_v51  ;;  %v9293_v21 = vshll.u32 %v7242_v56, 16 }
  0xcc   : > { %v3672_v45 = vpack.c.b16 %v3647_v30, %v3646_v15  ;;  %v1256_v20 = vsel %vm1223_vm4, %v1254_v55, %v1255_v27  ;;  %v7632_v39 = vmax.f32 %v1510_v61, 0.0  ;;  %v875_v29 = vshll.u32 %v7179_v7, 16 }
  0xcd   : > { %v871_v54 = vrot.slane %v9293_v21, 5  ;;  %v1380_v2 = vpack.c.bf16 %v1256_v20, %v1256_v20  ;;  %v1577_v62 = vsel %vm440_vm0, %v1541_v41, 0.0  ;;  %v1727_v26 = vpack.c.bf16 %v1541_v41, %v1541_v41 }
  0xce   : > { %v7617_v14 = vpop.f32.mrf.mxu2  ;;  %9294 = vst [vmem:[#allocation46_spill] sm:$0xff] %v7632_v39  ;;  %v7637_v12 = vmax.f32 %v1683_v25, 0.0  ;;  %5009 = vmatmul.bf16.gmra.mxu1 %v3672_v45  ;;  %v1609_v57 = vpack.c.bf16 %v1577_v62, %v1577_v62  ;;  %v1610_v56 = vpack.c.bf16 %v7632_v39, %v7632_v39  ;;  %v589_v3 = vmax.f32 %v573_v63, 0.0  ;;  %v1088_v63 = vld [vmem:[%s6786_s8 + $0x54] sm:$0xe] }
  0xcf   : > { %v7621_v22 = vpop.f32.mrf.mxu3  ;;  %v872_v15 = vor.u32 %v871_v54, %v868_v46  ;;  %v3742_v27 = vunpack.c.l.b16 %v1380_v2  ;;  %v1902_v19 = vshrl.u32 %v1727_v26, 16  ;;  %v1905_v52 = vshll.u32 %v1727_v26, 16 }
  0xd0   : > { %9290 = vst [vmem:[#allocation44_spill] sm:$0xff] %v7621_v22  ;;  %v7626_v53 = vpop.f32.mrf.mxu1  ;;  %v1729_v51 = vpack.c.bf16 %v7637_v12, %v7637_v12  ;;  %v3838_v55 = vunpack.c.l.b16 %v1609_v57  ;;  %v3839_v61 = vunpack.c.l.b16 %v1610_v56  ;;  %v1911_v34 = vshll.u32 %v1610_v56, 16 }
  0xd1   : > { %9292 = vst [vmem:[#allocation45_spill] sm:$0xff] %v7626_v53  ;;  %v1915_v41 = vshrl.u32 %v1610_v56, 16  ;;  %v3768_v25 = vpack.c.b16 %v3743_v5, %v3742_v27  ;;  %v1904_v21 = vrot.slane %v1902_v19, 4  ;;  %v1907_v45 = vrot.slane %v1905_v52, 5 }
  0xd2   : > { %9295 = vst [vmem:[#allocation47_spill] sm:$0xff] %v7637_v12  ;;  %v7643_v30 = vpop.f32.mrf.mxu0  ;;  %v1921_v20 = vshll.u32 %v1729_v51, 16  ;;  %v3864_v46 = vpack.c.b16 %v3839_v61, %v3838_v55  ;;  %v1913_v54 = vrot.slane %v1911_v34, 5  ;;  %v669_v0 = vpack.c.bf16 %v589_v3, %v589_v3  ;;  %v6641_v55 = vld [vmem:[%s6786_s8 + $0x60] sm:$0xff]  }
  0xd3   : > { %v1917_v2 = vrot.slane %v1915_v41, 4  ;;  %5098 = vmatmul.bf16.gmra.mxu2 %v3768_v25  ;;  %v1908_v12 = vor.u32 %v1907_v45, %v1904_v21  ;;  %v873_v56 = vrot.slane %v872_v15, 4  ;;  %v877_v5 = vrot.slane %v875_v29, 5 }
  0xd4   : > { %v1923_v57 = vrot.slane %v1921_v20, 5  ;;  %5187 = vmatmul.bf16.gmra.mxu3 %v3864_v46  ;;  %v879_v19 = vshrl.u32 %v7179_v7, 16  ;;  %v885_v52 = vshll.u32 %v669_v0, 16  ;;  %v1104_v51 = vunpack.c.l.bf16 %v1088_v63  ;;  %v6007_v46 = vld [vmem:[%s6786_s8 + $0x68] sm:$0x1] }
  0xd5   : > { %v1918_v27 = vor.u32 %v1917_v2, %v1913_v54  ;;  %v1909_v61 = vrot.slane %v1908_v12, 4  ;;  %v878_v34 = vsel %vm7267_vm3, %v873_v56, %v877_v5  ;;  %v1260_v41 = vrot.slane %v7166_v23, 2  ;;  %v526_v12 = vld [vmem:[%s6786_s8 + $0x68] sm:$0x1] }
  0xd6   : > { %v7645_v62 = vpop.f32.mrf.mxu2  ;;  %v1262_v25 = vrot.slane %v589_v3, 2  ;;  %v881_v45 = vrot.slane %v879_v19, 4  ;;  %v887_v15 = vrot.slane %v885_v52, 5  ;;  %v3648_v29 = vunpack.c.l.b16 %v878_v34 }
  0xd7   : > { %9296 = vst [vmem:[#allocation48_spill] sm:$0xff] %v7645_v62  ;;  %v7648_v26 = vpop.f32.mrf.mxu3  ;;  %v1919_v21 = vrot.slane %v1918_v27, 4  ;;  %v1914_v20 = vsel %vm7267_vm3, %v1909_v61, %v1913_v54  ;;  %v1120_v7 = vmul.f32 %v7361_v60, %v1104_v51  ;;  %v6501_v63 = vunpack.c.l.bf16 %v6641_v55  ;;  %v7672_v54 = vld [vmem:[%s9180_s2] ss:$0 sm:$0xff] }
  0xd8   : > { %9297 = vst [vmem:[#allocation49_spill] sm:$0xff] %v7648_v26  ;;  %v7650_v39 = vpop.f32.mrf.mxu1  ;;  %v1263_v0 = vsel %vm1223_vm4, %v1260_v41, %v1262_v25  ;;  %v3902_v56 = vunpack.c.l.b16 %v1914_v20  ;;  %v882_v23 = vor.u32 %v881_v45, %v877_v5  ;;  %v6502_v61 = vunpack.c.h.bf16 %v6641_v55 }
  0xd9   : > { %v1924_v2 = vsel %vm7267_vm3, %v1919_v21, %v1923_v57  ;;  %v1351_v3 = vsel %vm1162_vm5, %v1263_v0, 0.0  ;;  %v1136_v52 = vadd.f32 %v7672_v54, %v1120_v7  ;;  %v6438_v57 = vld [vmem:[%s9181_s3 + $0x198] sm:$0xff]  ;;  %v1479_v25 = vmul.f32 %v7361_v60, %v6501_v63 }
  0xda   : > { %v3903_v27 = vunpack.c.l.b16 %v1924_v2  ;;  %v7667_v19 = vpop.f32.mrf.mxu0  ;;  %v1383_v51 = vpack.c.bf16 %v1351_v3, %v1351_v3  ;;  %v883_v5 = vrot.slane %v882_v23, 4  ;;  %v1652_v21 = vunpack.c.l.bf16 %v6007_v46  ;;  %5420 = vmatpush.bf16.msra.mxu2 %v6438_v57 }
  0xdb   : > { %v542_v20 = vunpack.c.l.bf16 %v526_v12  ;;  %v1152_v2 = vmax.f32 %v1136_v52, 0.0  ;;  %v1480_v7 = vmul.f32 %v7361_v60, %v6502_v61  ;;  %v1511_v62 = vadd.f32 %v7672_v54, %v1479_v25 }
  0xdc   : > { %v3928_v0 = vpack.c.b16 %v3903_v27, %v3902_v56  ;;  %v3745_v26 = vunpack.c.l.b16 %v1383_v51  ;;  %v888_v55 = vsel %vm7267_vm3, %v883_v5, %v887_v15  ;;  %v1668_v23 = vmul.f32 %v7361_v60, %v1652_v21 }
  0xdd   : > { %v558_v63 = vmul.f32 %v7361_v60, %v542_v20  ;;  %v3649_v46 = vunpack.c.l.b16 %v888_v55  ;;  %v1259_v12 = vrot.slane %v1152_v2, 2  ;;  %v1512_v56 = vadd.f32 %v7672_v54, %v1480_v7 }
  0xde   : > { %v7675_v34 = vpop.f32.mrf.mxu2  ;;  %5276 = vmatmul.bf16.gmra.mxu0 %v3928_v0  ;;  %v896_v27 = vor.u32 %v6894_v36, %v6875_v17  ;;  %v1543_v52 = vmax.f32 %v1511_v62, 0.0  ;;  %v1684_v51 = vadd.f32 %v7672_v54, %v1668_v23  ;;  %v899_v15 = vshll.u32 %v6845_v49, 16 }
  0xdf   : > { %9298 = vst [vmem:[#allocation50_spill] sm:$0xff] %v7675_v34  ;;  %v7681_v45 = vpop.f32.mrf.mxu3  ;;  %v574_v61 = vadd.f32 %v7672_v54, %v558_v63  ;;  %v3673_v57 = vpack.c.b16 %v3649_v46, %v3648_v29  ;;  %v1261_v5 = vsel %vm1223_vm4, %v1259_v12, %v1260_v41  ;;  %v7698_v25 = vmax.f32 %v1512_v56, 0.0 }
  0xe0   : > { %9299 = vst [vmem:[#allocation51_spill] sm:$0xff] %v7681_v45  ;;  %v7684_v3 = vpop.f32.mrf.mxu1  ;;  %v897_v60 = vrot.slane %v896_v27, 4  ;;  %v1382_v21 = vpack.c.bf16 %v1261_v5, %v1261_v5  ;;  %v1579_v20 = vsel %vm440_vm0, %v1543_v52, 0.0  ;;  %v1730_v0 = vpack.c.bf16 %v1543_v52, %v1543_v52 }
  0xe1   : > { %9300 = vst [vmem:[#allocation52_spill] sm:$0xff] %v7684_v3  ;;  %v7702_v2 = vmax.f32 %v1684_v51, 0.0  ;;  %5014 = vmatmul.bf16.gmra.mxu1 %v3673_v57  ;;  %v1611_v17 = vpack.c.bf16 %v1579_v20, %v1579_v20  ;;  %v1612_v36 = vpack.c.bf16 %v7698_v25, %v7698_v25  ;;  %v590_v41 = vmax.f32 %v574_v61, 0.0  ;;  %v6446_v57 = vld [vmem:[%s9181_s3 + $0x1d8] sm:$0xff] }
  0xe2   : > { %9301 = vst [vmem:[#allocation53_spill] sm:$0xff] %v7698_v25  ;;  %v7706_v62 = vpop.f32.mrf.mxu0  ;;  %v901_v29 = vrot.slane %v899_v15, 5  ;;  %v3744_v7 = vunpack.c.l.b16 %v1382_v21  ;;  %v1926_v55 = vshrl.u32 %v1730_v0, 16  ;;  %v1929_v23 = vshll.u32 %v1730_v0, 16  ;;  %v6430_v61 = vld [vmem:[%s9181_s3 + $0x158] sm:$0xff]  ;;  %5509 = vmatpush.bf16.msra.mxu3 %v6446_v57 }
  0xe3   : > { %9302 = vst [vmem:[#allocation54_spill] sm:$0xff] %v7702_v2  ;;  %v1732_v63 = vpack.c.bf16 %v7702_v2, %v7702_v2  ;;  %v3840_v12 = vunpack.c.l.b16 %v1611_v17  ;;  %v3841_v56 = vunpack.c.l.b16 %v1612_v36  ;;  %v1935_v27 = vshll.u32 %v1612_v36, 16  ;;  %v6454_v15 = vld [vmem:[%s9181_s3 + $0x218] sm:$0xff]  ;;  %v1089_v17 = vld [vmem:[%s6786_s8 + $0x60] sm:$0xe]  ;;  %5331 = vmatpush.bf16.msra.mxu1 %v6430_v61 }
  0xe4   : > { %v1939_v52 = vshrl.u32 %v1612_v36, 16  ;;  %v3769_v5 = vpack.c.b16 %v3745_v26, %v3744_v7  ;;  %v1928_v21 = vrot.slane %v1926_v55, 4  ;;  %v1931_v20 = vrot.slane %v1929_v23, 5  ;;  %v5984_v26 = vld [vmem:[%s6786_s8 + $0x6c] sm:$0xff]   ;;  %5598 = vmatpush.bf16.msra.mxu0 %v6454_v15 }
  0xe5   : > { %v1945_v0 = vshll.u32 %v1732_v63, 16  ;;  %v3865_v36 = vpack.c.b16 %v3841_v56, %v3840_v12  ;;  %v672_v3 = vpack.c.bf16 %v590_v41, %v590_v41  ;;  %v902_v22 = vsel %vm7267_vm3, %v897_v60, %v901_v29  ;;  %v7735_v60 = vld [vmem:[%s9179_s1] ss:$0 sm:$0xff] }
  0xe6   : > { %v7708_v49 = vpop.f32.mrf.mxu2  ;;  %5103 = vmatmul.bf16.gmra.mxu2 %v3769_v5  ;;  %v1932_v25 = vor.u32 %v1931_v20, %v1928_v21  ;;  %v906_v55 = vor.u32 %v6896_v38, %v901_v29  ;;  %v3650_v23 = vunpack.c.l.b16 %v902_v22  ;;  %v1105_v63 = vunpack.c.l.bf16 %v1089_v17  ;;  %v6008_v29 = vld [vmem:[%s6786_s8 + $0x74] sm:$0x1] }
  0xe7   : > { %9303 = vst [vmem:[#allocation55_spill] sm:$0xff] %v7708_v49  ;;  %v7712_v46 = vpop.f32.mrf.mxu3  ;;  %v1941_v49 = vrot.slane %v1939_v52, 4  ;;  %v1947_v45 = vrot.slane %v1945_v0, 5  ;;  %5192 = vmatmul.bf16.gmra.mxu3 %v3865_v36  ;;  %v1265_v56 = vrot.slane %v6828_v37, 2  ;;  %v1449_v38 = vunpack.c.l.bf16 %v5984_v26 }
  0xe8   : > { %9304 = vst [vmem:[#allocation56_spill] sm:$0xff] %v7712_v46  ;;  %v4980_v51 = vpop.f32.mrf.mxu1  ;;  %v1937_v46 = vrot.slane %v1935_v27, 5  ;;  %v1933_v12 = vrot.slane %v1932_v25, 4  ;;  %v1267_v27 = vrot.slane %v590_v41, 2  ;;  %v907_v57 = vrot.slane %v906_v55, 4 }
  0xe9   : > { %v4981_v2 = vadd.f32 %v4980_v51, %v7485_v59  ;;  %v909_v59 = vshll.u32 %v672_v3, 16  ;;  %v1450_v41 = vunpack.c.h.bf16 %v5984_v26  ;;  %v1481_v26 = vmul.f32 %v7735_v60, %v1449_v38 }
  0xea   : > { %v1942_v7 = vor.u32 %v1941_v49, %v1937_v46  ;;  %v1121_v49 = vmul.f32 %v7735_v60, %v1105_v63  ;;  %v1938_v25 = vsel %vm7267_vm3, %v1933_v12, %v1937_v46  ;;  %v1268_v37 = vsel %vm1223_vm4, %v1265_v56, %v1267_v27  ;;  %v527_v12 = vld [vmem:[%s6786_s8 + $0x74] sm:$0x1] }
  0xeb   : > { %v7730_v51 = vpop.f32.mrf.mxu0  ;;  %v911_v3 = vrot.slane %v909_v59, 5  ;;  %v3904_v5 = vunpack.c.l.b16 %v1938_v25  ;;  %v1353_v20 = vsel %vm1162_vm5, %v1268_v37, 0.0  ;;  %v1653_v63 = vunpack.c.l.bf16 %v6008_v29 }
  0xec   : > { %v1943_v52 = vrot.slane %v1942_v7, 4  ;;  %9305 = vst [vmem:[#allocation57_spill] sm:$0xff] %v7730_v51  ;;  %v1137_v21 = vadd.f32 %v7672_v54, %v1121_v49  ;;  %v1385_v27 = vpack.c.bf16 %v1353_v20, %v1353_v20  ;;  %v7763_v29 = vpack.c.bf16 %v7186_v48, %v7186_v48 }
  0xed   : > { %v912_v36 = vsel %vm7267_vm3, %v907_v57, %v911_v3  ;;  %v1669_v46 = vmul.f32 %v7735_v60, %v1653_v63 }
  0xee   : > { %v5069_v22 = vpop.f32.mrf.mxu2  ;;  %v1948_v15 = vsel %vm7267_vm3, %v1943_v52, %v1947_v45  ;;  %v3651_v7 = vunpack.c.l.b16 %v912_v36  ;;  %v1153_v55 = vmax.f32 %v1137_v21, 0.0  ;;  %v1482_v45 = vmul.f32 %v7735_v60, %v1450_v41 }
  0xef   : > { %v5158_v61 = vpop.f32.mrf.mxu3  ;;  %v3905_v17 = vunpack.c.l.b16 %v1948_v15  ;;  %v1513_v52 = vadd.f32 %v7672_v54, %v1481_v26  ;;  %v5070_v49 = vadd.f32 %v5069_v22, %v4981_v2  ;;  %v543_v41 = vunpack.c.l.bf16 %v527_v12 }
  0xf0   : > { %v7747_v0 = vpop.f32.mrf.mxu1  ;;  %v3674_v25 = vpack.c.b16 %v3651_v7, %v3650_v23  ;;  %v1264_v37 = vrot.slane %v1153_v55, 2  ;;  %v1514_v15 = vadd.f32 %v7672_v54, %v1482_v45  ;;  %v1685_v22 = vadd.f32 %v7672_v54, %v1669_v46 }
  0xf1   : > { %v3929_v59 = vpack.c.b16 %v3905_v17, %v3904_v5  ;;  %v1545_v38 = vmax.f32 %v1513_v52, 0.0  ;;  %v7759_v3 = vadd.f32 %v5158_v61, %v5070_v49  ;;  %v3747_v17 = vunpack.c.l.b16 %v1385_v27 }
  0xf2   : > { %5019 = vmatmul.bf16.gmra.mxu1 %v3674_v25  ;;  %v1266_v2 = vsel %vm1223_vm4, %v1264_v37, %v1265_v56  ;;  %v7766_v23 = vmax.f32 %v1514_v15, 0.0  ;;  %v7779_v7 = vmax.f32 %v1685_v22, 0.0  ;;  %v920_v55 = vor.u32 %v7085_v43, %v7072_v28  ;;  %v1090_v22 = vld [vmem:[%s6786_s8 + $0x6c] sm:$0xe] }
  0xf3   : > { %5281 = vmatmul.bf16.gmra.mxu0 %v3929_v59  ;;  %9306 = vst [vmem:[#allocation58_spill] sm:$0xff] %v7759_v3  ;;  %v7769_v5 = vpop.f32.mrf.mxu0  ;;  %v1384_v20 = vpack.c.bf16 %v1266_v2, %v1266_v2  ;;  %v1581_v61 = vsel %vm440_vm0, %v1545_v38, 0.0  ;;  %v1733_v36 = vpack.c.bf16 %v1545_v38, %v1545_v38  ;;  %v559_v59 = vmul.f32 %v7735_v60, %v543_v41  ;;  %v9318_v3 = vld [vmem:[#allocation24_spill] sm:$0xff] }
  0xf4   : > { %9307 = vst [vmem:[#allocation59_spill] sm:$0xff] %v7766_v23  ;;  %v1613_v48 = vpack.c.bf16 %v1581_v61, %v1581_v61  ;;  %v1614_v56 = vpack.c.bf16 %v7766_v23, %v7766_v23  ;;  %v1735_v49 = vpack.c.bf16 %v7779_v7, %v7779_v7 }
  0xf5   : > { %9308 = vst [vmem:[#allocation60_spill] sm:$0xff] %v7769_v5  ;;  %v3746_v45 = vunpack.c.l.b16 %v1384_v20  ;;  %v1950_v63 = vshrl.u32 %v1733_v36, 16  ;;  %v1953_v12 = vshll.u32 %v1733_v36, 16  ;;  %v6642_v36 = vld [vmem:[%s6786_s8 + $0x78] sm:$0xff]   ;;  %v575_v57 = vadd.f32 %v7672_v54, %v559_v59 }
  0xf6   : > { %v7771_v21 = vpop.f32.mrf.mxu2  ;;  %9309 = vst [vmem:[#allocation61_spill] sm:$0xff] %v7779_v7  ;;  %v3842_v27 = vunpack.c.l.b16 %v1613_v48  ;;  %v3843_v52 = vunpack.c.l.b16 %v1614_v56  ;;  %v1959_v25 = vshll.u32 %v1614_v56, 16  ;;  %v1963_v2 = vshrl.u32 %v1614_v56, 16  ;;  %v6009_v7 = vld [vmem:[%s6786_s8 + $0x80] sm:$0x1]  ;;  %v9310_v56 = vld [vmem:[#allocation5_spill] sm:$0xff] }
  0xf7   : > { %v7775_v26 = vpop.f32.mrf.mxu3  ;;  %v3770_v37 = vpack.c.b16 %v3747_v17, %v3746_v45  ;;  %v1952_v15 = vrot.slane %v1950_v63, 4  ;;  %v1955_v38 = vrot.slane %v1953_v12, 5  ;;  %v1969_v43 = vshll.u32 %v1735_v49, 16 }
  0xf8   : > { %v4985_v46 = vpop.f32.mrf.mxu1  ;;  %v3866_v61 = vpack.c.b16 %v3843_v52, %v3842_v27  ;;  %v1961_v28 = vrot.slane %v1959_v25, 5  ;;  %v1965_v48 = vrot.slane %v1963_v2, 4  ;;  %v921_v5 = vrot.slane %v920_v55, 4 }
  0xf9   : > { %v4986_v20 = vadd.f32 %v4985_v46, %v7538_v1  ;;  %5108 = vmatmul.bf16.gmra.mxu2 %v3770_v37  ;;  %v1956_v41 = vor.u32 %v1955_v38, %v1952_v15  ;;  %v1971_v23 = vrot.slane %v1969_v43, 5  ;;  %v923_v17 = vshll.u32 %v6959_v18, 16 }
  0xfa   : > { %5197 = vmatmul.bf16.gmra.mxu3 %v3866_v61  ;;  %v1106_v45 = vunpack.c.l.bf16 %v1090_v22  ;;  %v1270_v63 = vrot.slane %v9310_v56, 2  ;;  %v1966_v52 = vor.u32 %v1965_v48, %v1961_v28  ;;  %v591_v49 = vmax.f32 %v575_v57, 0.0 }
  0xfb   : > { %v1957_v27 = vrot.slane %v1956_v41, 4  ;;  %v6505_v1 = vunpack.c.l.bf16 %v6642_v36  ;;  %v925_v37 = vrot.slane %v923_v17, 5  ;;  %v6506_v55 = vunpack.c.h.bf16 %v6642_v36  ;;  %v9312_v41 = vld [vmem:[#allocation15_spill] sm:$0xff] }
  0xfc   : > { %v7793_v25 = vpop.f32.mrf.mxu0  ;;  %v1122_v59 = vmul.f32 %v7735_v60, %v1106_v45  ;;  %v1654_v15 = vunpack.c.l.bf16 %v6009_v7  ;;  %v1967_v2 = vrot.slane %v1966_v52, 4  ;;  %v675_v22 = vpack.c.bf16 %v591_v49, %v591_v49 }
  0xfd   : > { %9311 = vst [vmem:[#allocation5_spill] sm:$0xff] %v7793_v25  ;;  %v1962_v18 = vsel %vm7267_vm3, %v1957_v27, %v1961_v28  ;;  %v1272_v61 = vrot.slane %v591_v49, 2  ;;  %v926_v57 = vsel %vm7267_vm3, %v921_v5, %v925_v37  ;;  %v930_v48 = vor.u32 %v9312_v41, %v925_v37 }
  0xfe   : > { %v5074_v12 = vpop.f32.mrf.mxu2  ;;  %v3906_v43 = vunpack.c.l.b16 %v1962_v18  ;;  %v1138_v17 = vadd.f32 %v7672_v54, %v1122_v59  ;;  %v1972_v36 = vsel %vm7267_vm3, %v1967_v2, %v1971_v23  ;;  %v933_v7 = vshll.u32 %v675_v22, 16  ;;  %v6437_v23 = vld [vmem:[%s9181_s3 + $0x190] sm:$0xff] }
  0xff   : > { %v5163_v46 = vpop.f32.mrf.mxu3  ;;  %v3652_v45 = vunpack.c.l.b16 %v926_v57  ;;  %v1273_v56 = vsel %vm1223_vm4, %v1270_v63, %v1272_v61  ;;  %v3907_v25 = vunpack.c.l.b16 %v1972_v36  ;;  %v931_v28 = vrot.slane %v930_v48, 4  ;;  %v528_v36 = vld [vmem:[%s6786_s8 + $0x80] sm:$0x1]  ;;  %5421 = vmatpush.bf16.msra.mxu2 %v6437_v23 }
 0x100   : > { %v7796_v38 = vpop.f32.mrf.mxu1  ;;  %v1154_v27 = vmax.f32 %v1138_v17, 0.0  ;;  %v1355_v52 = vsel %vm1162_vm5, %v1273_v56, 0.0  ;;  %v935_v49 = vrot.slane %v933_v7, 5  ;;  %v1483_v37 = vmul.f32 %v7735_v60, %v6505_v1 }
 0x101   : > { %v1387_v5 = vpack.c.bf16 %v1355_v52, %v1355_v52  ;;  %v1484_v59 = vmul.f32 %v7735_v60, %v6506_v55  ;;  %v3930_v18 = vpack.c.b16 %v3907_v25, %v3906_v43  ;;  %v1670_v22 = vmul.f32 %v7735_v60, %v1654_v15 }
 0x102   : > { %v1269_v2 = vrot.slane %v1154_v27, 2  ;;  %v5075_v61 = vadd.f32 %v5074_v12, %v4986_v20  ;;  %v936_v48 = vsel %vm7267_vm3, %v931_v28, %v935_v49  ;;  %v1515_v1 = vadd.f32 %v7672_v54, %v1483_v37 }
 0x103   : > { %v1516_v55 = vadd.f32 %v7672_v54, %v1484_v59  ;;  %5286 = vmatmul.bf16.gmra.mxu0 %v3930_v18  ;;  %v3653_v25 = vunpack.c.l.b16 %v936_v48  ;;  %v1686_v20 = vadd.f32 %v7672_v54, %v1670_v22  ;;  %v3749_v56 = vunpack.c.l.b16 %v1387_v5 }
 0x104   : > { %v1271_v15 = vsel %vm1223_vm4, %v1269_v2, %v1270_v63  ;;  %v7827_v12 = vadd.f32 %v5163_v46, %v5075_v61  ;;  %v1547_v28 = vmax.f32 %v1515_v1, 0.0  ;;  %v7833_v37 = vpop.f32.mrf.mxu0  ;;  %v544_v23 = vunpack.c.l.bf16 %v528_v36 }
 0x105   : > { %v1386_v7 = vpack.c.bf16 %v1271_v15, %v1271_v15  ;;  %v7829_v27 = vmax.f32 %v1516_v55, 0.0  ;;  %v3675_v52 = vpack.c.b16 %v3653_v25, %v3652_v45  ;;  %v7831_v49 = vmax.f32 %v1686_v20, 0.0  ;;  %9316 = vst [vmem:[#allocation64_spill] sm:$0xff] %v7833_v37 }
 0x106   : > { %v7815_v57 = vpop.f32.mrf.mxu2  ;;  %9313 = vst [vmem:[#allocation15_spill] sm:$0xff] %v7827_v12  ;;  %v1583_v46 = vsel %vm440_vm0, %v1547_v28, 0.0  ;;  %v1736_v5 = vpack.c.bf16 %v1547_v28, %v1547_v28  ;;  %v560_v61 = vmul.f32 %v7735_v60, %v544_v23  ;;  %v6429_v28 = vld [vmem:[%s9181_s3 + $0x150] sm:$0xff]  ;;  %v9319_v23 = vld [vmem:[#allocation25_spill] sm:$0xff] }
 0x107   : > { %v7822_v17 = vpop.f32.mrf.mxu3  ;;  %9314 = vst [vmem:[#allocation62_spill] sm:$0xff] %v7829_v27  ;;  %v3748_v63 = vunpack.c.l.b16 %v1386_v7  ;;  %v1616_v18 = vpack.c.bf16 %v7829_v27, %v7829_v27  ;;  %5024 = vmatmul.bf16.gmra.mxu1 %v3675_v52  ;;  %v1615_v45 = vpack.c.bf16 %v1583_v46, %v1583_v46  ;;  %v1738_v22 = vpack.c.bf16 %v7831_v49, %v7831_v49  ;;  %v9317_v52 = vld [vmem:[#allocation21_spill] sm:$0xff] }
 0x108   : > { %v4990_v43 = vpop.f32.mrf.mxu1  ;;  %9315 = vst [vmem:[#allocation63_spill] sm:$0xff] %v7831_v49  ;;  %v1974_v48 = vshrl.u32 %v1736_v5, 16  ;;  %v1977_v1 = vshll.u32 %v1736_v5, 16  ;;  %v1091_v5 = vld [vmem:[%s6786_s8 + $0x78] sm:$0xe]  ;;  %5332 = vmatpush.bf16.msra.mxu1 %v6429_v28 }
 0x109   : > { %v7836_v59 = vadd.f32 %v4990_v43, %v7606_v9  ;;  %v3771_v9 = vpack.c.b16 %v3749_v56, %v3748_v63  ;;  %v3845_v55 = vunpack.c.l.b16 %v1616_v18  ;;  %v3844_v36 = vunpack.c.l.b16 %v1615_v45  ;;  %v6445_v43 = vld [vmem:[%s9181_s3 + $0x1d0] sm:$0xff]  ;;  %v5988_v45 = vld [vmem:[%s6786_s8 + $0x84] sm:$0xff]  }
 0x10a   : > { %v1983_v25 = vshll.u32 %v1616_v18, 16  ;;  %v1987_v15 = vshrl.u32 %v1616_v18, 16  ;;  %v1993_v20 = vshll.u32 %v1738_v22, 16  ;;  %v6453_v56 = vld [vmem:[%s9181_s3 + $0x210] sm:$0xff]  ;;  %v1976_v63 = vrot.slane %v1974_v48, 4  ;;  %5510 = vmatpush.bf16.msra.mxu3 %v6445_v43 }
 0x10b   : > { %5113 = vmatmul.bf16.gmra.mxu2 %v3771_v9  ;;  %v1979_v46 = vrot.slane %v1977_v1, 5  ;;  %v576_v18 = vadd.f32 %v7672_v54, %v560_v61  ;;  %v3867_v22 = vpack.c.b16 %v3845_v55, %v3844_v36  ;;  %v944_v9 = vor.u32 %v9319_v23, %v9318_v3  ;;  %v9320_v48 = vld [vmem:[#allocation12_spill] sm:$0xff]  ;;  %5599 = vmatpush.bf16.msra.mxu0 %v6453_v56  ;;  %v9321_v55 = vld [vmem:[#allocation11_spill] sm:$0xff] }
 0x10c   : > { %v1985_v2 = vrot.slane %v1983_v25, 5  ;;  %v1989_v41 = vrot.slane %v1987_v15, 4  ;;  %v1995_v37 = vrot.slane %v1993_v20, 5  ;;  %v947_v1 = vshll.u32 %v9320_v48, 16 }
 0x10d   : > { %v1980_v12 = vor.u32 %v1979_v46, %v1976_v63  ;;  %v592_v51 = vmax.f32 %v576_v18, 0.0  ;;  %5202 = vmatmul.bf16.gmra.mxu3 %v3867_v22  ;;  %v1107_v53 = vunpack.c.l.bf16 %v1091_v5  ;;  %v1275_v36 = vrot.slane %v9321_v55, 2  ;;  %v9323_v18 = vld [vmem:[#allocation26_spill] sm:$0xff] }
 0x10e   : > { %v7849_v7 = vpop.f32.mrf.mxu2  ;;  %v1990_v61 = vor.u32 %v1989_v41, %v1985_v2  ;;  %v1453_v25 = vunpack.c.l.bf16 %v5988_v45  ;;  %v945_v43 = vrot.slane %v944_v9, 4  ;;  %v949_v28 = vrot.slane %v947_v1, 5 }
 0x10f   : > { %v5168_v49 = vpop.f32.mrf.mxu3  ;;  %v1981_v15 = vrot.slane %v1980_v12, 4  ;;  %v678_v20 = vpack.c.bf16 %v592_v51, %v592_v51  ;;  %v1123_v46 = vmul.f32 %v7735_v60, %v1107_v53  ;;  %v1277_v3 = vrot.slane %v592_v51, 2 }
 0x110   : > { %v7861_v27 = vpop.f32.mrf.mxu1  ;;  %v1991_v16 = vrot.slane %v1990_v61, 4  ;;  %v1454_v23 = vunpack.c.h.bf16 %v5988_v45  ;;  %v950_v41 = vsel %vm7267_vm3, %v945_v43, %v949_v28  ;;  %v954_v5 = vor.u32 %v9323_v18, %v949_v28  ;;  %v6010_v61 = vld [vmem:[%s6786_s8 + $0x8c] sm:$0x1] }
 0x111   : > { %v7867_v63 = vpop.f32.mrf.mxu0  ;;  %v1986_v56 = vsel %vm7267_vm3, %v1981_v15, %v1985_v2  ;;  %v957_v12 = vshll.u32 %v678_v20, 16  ;;  %v3654_v48 = vunpack.c.l.b16 %v950_v41  ;;  %v1139_v1 = vadd.f32 %v7672_v54, %v1123_v46 }
 0x112   : > { %9322 = vst [vmem:[#allocation21_spill] sm:$0xff] %v7867_v63  ;;  %v1996_v22 = vsel %vm7267_vm3, %v1991_v16, %v1995_v37  ;;  %v3908_v9 = vunpack.c.l.b16 %v1986_v56  ;;  %v955_v51 = vrot.slane %v954_v5, 4  ;;  %v1278_v55 = vsel %vm1223_vm4, %v1275_v36, %v1277_v3 }
 0x113   : > { %v3909_v53 = vunpack.c.l.b16 %v1996_v22  ;;  %v959_v45 = vrot.slane %v957_v12, 5  ;;  %v1155_v15 = vmax.f32 %v1139_v1, 0.0  ;;  %v1357_v43 = vsel %vm1162_vm5, %v1278_v55, 0.0 }
 0x114   : > { %v1485_v20 = vmul.f32 %v7735_v60, %v1453_v25  ;;  %v1486_v16 = vmul.f32 %v7735_v60, %v1454_v23  ;;  %v1389_v56 = vpack.c.bf16 %v1357_v43, %v1357_v43  ;;  %v1655_v41 = vunpack.c.l.bf16 %v6010_v61 }
 0x115   : > { %v3931_v28 = vpack.c.b16 %v3909_v53, %v3908_v9  ;;  %v960_v46 = vsel %vm7267_vm3, %v955_v51, %v959_v45  ;;  %v1274_v5 = vrot.slane %v1155_v15, 2  ;;  %v9324_v1 = vshrl.u32 %v7763_v29, 16 }
 0x116   : > { %v7880_v2 = vpop.f32.mrf.mxu2  ;;  %v3655_v3 = vunpack.c.l.b16 %v960_v46  ;;  %v1517_v12 = vadd.f32 %v7672_v54, %v1485_v20  ;;  %v1518_v22 = vadd.f32 %v7672_v54, %v1486_v16  ;;  %v9325_v23 = vshll.u32 %v7763_v29, 16 }
 0x117   : > { %v7888_v18 = vpop.f32.mrf.mxu3  ;;  %v964_v25 = vrot.slane %v9324_v1, 4  ;;  %5291 = vmatmul.bf16.gmra.mxu0 %v3931_v28  ;;  %v1671_v9 = vmul.f32 %v7735_v60, %v1655_v41  ;;  %v5080_v61 = vadd.f32 %v7849_v7, %v7836_v59  ;;  %v1276_v51 = vsel %vm1223_vm4, %v1274_v5, %v1275_v36  ;;  %v529_v5 = vld [vmem:[%s6786_s8 + $0x8c] sm:$0x1] }
 0x118   : > { %v4995_v37 = vpop.f32.mrf.mxu1  ;;  %v967_v55 = vrot.slane %v9325_v23, 5  ;;  %v3676_v53 = vpack.c.b16 %v3655_v3, %v3654_v48  ;;  %v1549_v45 = vmax.f32 %v1517_v12, 0.0  ;;  %v7900_v15 = vmax.f32 %v1518_v22, 0.0 }
 0x119   : > { %v1388_v43 = vpack.c.bf16 %v1276_v51, %v1276_v51  ;;  %v3751_v20 = vunpack.c.l.b16 %v1389_v56  ;;  %v1687_v16 = vadd.f32 %v7672_v54, %v1671_v9  ;;  %v7903_v46 = vadd.f32 %v5168_v49, %v5080_v61  ;;  %v7905_v29 = vpop.f32.mrf.mxu0 }
 0x11a   : > { %9326 = vst [vmem:[#allocation24_spill] sm:$0xff] %v7900_v15  ;;  %5029 = vmatmul.bf16.gmra.mxu1 %v3676_v53  ;;  %v1585_v28 = vsel %vm440_vm0, %v1549_v45, 0.0  ;;  %v1618_v59 = vpack.c.bf16 %v7900_v15, %v7900_v15  ;;  %v1739_v7 = vpack.c.bf16 %v1549_v45, %v1549_v45  ;;  %v7912_v36 = vadd.f32 %v4995_v37, %v7667_v19  ;;  %v1092_v19 = vld [vmem:[%s6786_s8 + $0x84] sm:$0xe] }
 0x11b   : > { %9327 = vst [vmem:[#allocation25_spill] sm:$0xff] %v7903_v46  ;;  %v9329_v48 = vshrl.u32 %v9317_v52, 16  ;;  %v3750_v41 = vunpack.c.l.b16 %v1388_v43  ;;  %v1617_v49 = vpack.c.bf16 %v1585_v28, %v1585_v28  ;;  %v7916_v3 = vmax.f32 %v1687_v16, 0.0  ;;  %v6643_v46 = vld [vmem:[%s6786_s8 + $0x90] sm:$0xff]  }
 0x11c   : > { %9328 = vst [vmem:[#allocation12_spill] sm:$0xff] %v7905_v29  ;;  %v1998_v12 = vshrl.u32 %v1739_v7, 16  ;;  %v2001_v22 = vshll.u32 %v1739_v7, 16  ;;  %v3847_v1 = vunpack.c.l.b16 %v1618_v59  ;;  %v2007_v23 = vshll.u32 %v1618_v59, 16 }
 0x11d   : > { %v977_v56 = vrot.slane %v9329_v48, 4  ;;  %9330 = vst [vmem:[#allocation11_spill] sm:$0xff] %v7916_v3  ;;  %v3772_v9 = vpack.c.b16 %v3751_v20, %v3750_v41  ;;  %v3846_v61 = vunpack.c.l.b16 %v1617_v49  ;;  %v1741_v53 = vpack.c.bf16 %v7916_v3, %v7916_v3 }
 0x11e   : > { %v2011_v51 = vshrl.u32 %v1618_v59, 16  ;;  %v5084_v37 = vpop.f32.mrf.mxu2  ;;  %v2000_v45 = vrot.slane %v1998_v12, 4  ;;  %v2003_v43 = vrot.slane %v2001_v22, 5  ;;  %v2009_v28 = vrot.slane %v2007_v23, 5  ;;  %v6011_v12 = vld [vmem:[%s6786_s8 + $0x98] sm:$0x1] }
 0x11f   : > { %v545_v16 = vunpack.c.l.bf16 %v529_v5  ;;  %5118 = vmatmul.bf16.gmra.mxu2 %v3772_v9  ;;  %v3868_v7 = vpack.c.b16 %v3847_v1, %v3846_v61  ;;  %v2017_v15 = vshll.u32 %v1741_v53, 16  ;;  %v968_v20 = vor.u32 %v967_v55, %v964_v25 }
 0x120   : > { %v7922_v48 = vpop.f32.mrf.mxu1  ;;  %v2013_v29 = vrot.slane %v2011_v51, 4  ;;  %v5173_v41 = vpop.f32.mrf.mxu3  ;;  %v2004_v49 = vor.u32 %v2003_v43, %v2000_v45  ;;  %v971_v59 = vshll.u32 %v9317_v52, 16  ;;  %v1108_v63 = vunpack.c.l.bf16 %v1092_v19 }
 0x121   : > { %v561_v3 = vmul.f32 %v7735_v60, %v545_v16  ;;  %v9332_v22 = vshrl.u32 %v9331_v24, 16  ;;  %5207 = vmatmul.bf16.gmra.mxu3 %v3868_v7  ;;  %v2019_v9 = vrot.slane %v2017_v15, 5  ;;  %v969_v1 = vrot.slane %v968_v20, 4  ;;  %v7934_v45 = vpop.f32.mrf.mxu0 }
 0x122   : > { %v2014_v5 = vor.u32 %v2013_v29, %v2009_v28  ;;  %v2005_v61 = vrot.slane %v2004_v49, 4  ;;  %v973_v55 = vrot.slane %v971_v59, 5  ;;  %v1124_v53 = vmul.f32 %v7735_v60, %v1108_v63  ;;  %9333 = vst [vmem:[#allocation26_spill] sm:$0xff] %v7934_v45  ;;  %v9334_v29 = vld [vmem:[#allocation19_spill] sm:$0xff] }
 0x123   : > { %v7930_v23 = vrot.slane %v9332_v22, 4  ;;  %v577_v25 = vadd.f32 %v7672_v54, %v561_v3  ;;  %v6509_v52 = vunpack.c.l.bf16 %v6643_v46  ;;  %v6510_v19 = vunpack.c.h.bf16 %v6643_v46 }
 0x124   : > { %v2015_v51 = vrot.slane %v2014_v5, 4  ;;  %v1656_v43 = vunpack.c.l.bf16 %v6011_v12  ;;  %v2010_v16 = vsel %vm7267_vm3, %v2005_v61, %v2009_v28  ;;  %v978_v7 = vor.u32 %v977_v56, %v973_v55 }
 0x125   : > { %v593_v22 = vmax.f32 %v577_v25, 0.0  ;;  %v1280_v15 = vrot.slane %v9334_v29, 2  ;;  %v3910_v3 = vunpack.c.l.b16 %v2010_v16  ;;  %v974_v63 = vsel %vm7267_vm3, %v969_v1, %v973_v55 }
 0x126   : > { %v2020_v20 = vsel %vm7267_vm3, %v2015_v51, %v2019_v9  ;;  %v1140_v49 = vadd.f32 %v7672_v54, %v1124_v53  ;;  %v979_v46 = vrot.slane %v978_v7, 4  ;;  %v1487_v28 = vmul.f32 %v7735_v60, %v6509_v52  ;;  %v7947_v25 = vpop.f32.mrf.mxu2  ;;  %v6436_v9 = vld [vmem:[%s9181_s3 + $0x188] sm:$0xff] }
 0x127   : > { %v3911_v59 = vunpack.c.l.b16 %v2020_v20  ;;  %v681_v5 = vpack.c.bf16 %v593_v22, %v593_v22  ;;  %v1282_v12 = vrot.slane %v593_v22, 2  ;;  %v1488_v56 = vmul.f32 %v7735_v60, %v6510_v19  ;;  %5422 = vmatpush.bf16.msra.mxu2 %v6436_v9 }
 0x128   : > { %v1156_v45 = vmax.f32 %v1140_v49, 0.0  ;;  %v1672_v61 = vmul.f32 %v7735_v60, %v1656_v43  ;;  %v5085_v51 = vadd.f32 %v5084_v37, %v7912_v36  ;;  %v5000_v16 = vpop.f32.mrf.mxu1  ;;  %v1519_v19 = vadd.f32 %v7672_v54, %v1487_v28  ;;  %v7958_v7 = vpop.f32.mrf.mxu3 }
 0x129   : > { %v3932_v1 = vpack.c.b16 %v3911_v59, %v3910_v3  ;;  %v981_v55 = vshll.u32 %v681_v5, 16  ;;  %v1283_v53 = vsel %vm1223_vm4, %v1280_v15, %v1282_v12  ;;  %v1520_v43 = vadd.f32 %v7672_v54, %v1488_v56  ;;  %9335 = vst [vmem:[#allocation14_spill] sm:$0xff] %v7958_v7  ;;  %v7970_v9 = vpop.f32.mrf.mxu0  ;;  %v5992_v7 = vld [vmem:[%s6786_s8 + $0x9c] sm:$0xff]  }
 0x12a   : > { %v1279_v22 = vrot.slane %v1156_v45, 2  ;;  %v1359_v52 = vsel %vm1162_vm5, %v1283_v53, 0.0  ;;  %v1688_v3 = vadd.f32 %v7672_v54, %v1672_v61  ;;  %v7961_v49 = vadd.f32 %v5173_v41, %v5085_v51  ;;  %9339 = vst [vmem:[#allocation67_spill] sm:$0xff] %v7970_v9 }
 0x12b   : > { %5296 = vmatmul.bf16.gmra.mxu0 %v3932_v1  ;;  %v983_v29 = vrot.slane %v981_v55, 5  ;;  %v1391_v20 = vpack.c.bf16 %v1359_v52, %v1359_v52  ;;  %v3656_v36 = vunpack.c.l.b16 %v974_v63  ;;  %v1551_v45 = vmax.f32 %v1519_v19, 0.0 }
 0x12c   : > { %9336 = vst [vmem:[#allocation19_spill] sm:$0xff] %v7961_v49  ;;  %v1281_v37 = vsel %vm1223_vm4, %v1279_v22, %v1280_v15  ;;  %v7964_v59 = vmax.f32 %v1520_v43, 0.0  ;;  %v7968_v56 = vmax.f32 %v1688_v3, 0.0  ;;  %v9340_v61 = vshrl.u32 %v7237_v58, 16 }
 0x12d   : > { %v984_v5 = vsel %vm7267_vm3, %v979_v46, %v983_v29  ;;  %v1390_v12 = vpack.c.bf16 %v1281_v37, %v1281_v37  ;;  %v3753_v28 = vunpack.c.l.b16 %v1391_v20  ;;  %v1587_v41 = vsel %vm440_vm0, %v1551_v45, 0.0  ;;  %v530_v29 = vld [vmem:[%s6786_s8 + $0x98] sm:$0x1] }
 0x12e   : > { %9337 = vst [vmem:[#allocation65_spill] sm:$0xff] %v7964_v59  ;;  %v3657_v1 = vunpack.c.l.b16 %v984_v5  ;;  %v1620_v15 = vpack.c.bf16 %v7964_v59, %v7964_v59  ;;  %v1742_v63 = vpack.c.bf16 %v1551_v45, %v1551_v45  ;;  %v7978_v55 = vrot.slane %v9340_v61, 4  ;;  %v6444_v45 = vld [vmem:[%s9181_s3 + $0x1c8] sm:$0xff]  ;;  %v1093_v61 = vld [vmem:[%s6786_s8 + $0x90] sm:$0xe] }
 0x12f   : > { %9338 = vst [vmem:[#allocation66_spill] sm:$0xff] %v7968_v56  ;;  %v3752_v46 = vunpack.c.l.b16 %v1390_v12  ;;  %v1619_v53 = vpack.c.bf16 %v1587_v41, %v1587_v41  ;;  %v1744_v51 = vpack.c.bf16 %v7968_v56, %v7968_v56  ;;  %v6428_v12 = vld [vmem:[%s9181_s3 + $0x148] sm:$0xff]  ;;  %5511 = vmatpush.bf16.msra.mxu3 %v6444_v45  ;;  %v6012_v45 = vld [vmem:[%s6786_s8 + $0xa4] sm:$0x1] }
 0x130   : > { %v3677_v22 = vpack.c.b16 %v3657_v1, %v3656_v36  ;;  %v2022_v52 = vshrl.u32 %v1742_v63, 16  ;;  %v2025_v19 = vshll.u32 %v1742_v63, 16  ;;  %v3849_v43 = vunpack.c.l.b16 %v1620_v15  ;;  %v6452_v36 = vld [vmem:[%s9181_s3 + $0x208] sm:$0xff]  ;;  %5333 = vmatpush.bf16.msra.mxu1 %v6428_v12 }
 0x131   : > { %v3773_v20 = vpack.c.b16 %v3753_v28, %v3752_v46  ;;  %v3848_v3 = vunpack.c.l.b16 %v1619_v53  ;;  %v2031_v37 = vshll.u32 %v1620_v15, 16  ;;  %v2035_v5 = vshrl.u32 %v1620_v15, 16  ;;  %v5089_v46 = vpop.f32.mrf.mxu2  ;;  %v9342_v53 = vld [vmem:[#allocation20_spill] sm:$0xff]  ;;  %5600 = vmatpush.bf16.msra.mxu0 %v6452_v36 }
 0x132   : > { %v9341_v1 = vshll.u32 %v7237_v58, 16  ;;  %5034 = vmatmul.bf16.gmra.mxu1 %v3677_v22  ;;  %v2024_v28 = vrot.slane %v2022_v52, 4  ;;  %v2027_v15 = vrot.slane %v2025_v19, 5  ;;  %v2041_v63 = vshll.u32 %v1744_v51, 16  ;;  %v8002_v58 = vpop.f32.mrf.mxu1  ;;  %v9344_v51 = vld [vmem:[#allocation8_spill] sm:$0xff]  ;;  %v9345_v19 = vld [vmem:[#allocation10_spill] sm:$0xff]  ;;  %v8007_v34 = vpop.f32.mrf.mxu3 }
 0x133   : > { %v7999_v9 = vpack.c.bf16 %v9342_v53, %v9342_v53  ;;  %5123 = vmatmul.bf16.gmra.mxu2 %v3773_v20  ;;  %v3869_v56 = vpack.c.b16 %v3849_v43, %v3848_v3  ;;  %v2033_v59 = vrot.slane %v2031_v37, 5  ;;  %v2037_v49 = vrot.slane %v2035_v5, 4  ;;  %9343 = vst [vmem:[#allocation20_spill] sm:$0xff] %v8002_v58  ;;  %v9346_v3 = vld [vmem:[#allocation3_spill] sm:$0xff] }
 0x134   : > { %v7994_v41 = vrot.slane %v9341_v1, 5  ;;  %v2028_v1 = vor.u32 %v2027_v15, %v2024_v28  ;;  %v5001_v22 = vadd.f32 %v5000_v16, %v7481_v42  ;;  %v546_v52 = vunpack.c.l.bf16 %v530_v29  ;;  %v8012_v29 = vpop.f32.mrf.mxu0 }
 0x135   : > { %v992_v4 = vor.u32 %v9345_v19, %v9344_v51  ;;  %5212 = vmatmul.bf16.gmra.mxu3 %v3869_v56  ;;  %v2038_v43 = vor.u32 %v2037_v49, %v2033_v59  ;;  %v2043_v20 = vrot.slane %v2041_v63, 5  ;;  %v995_v37 = vshll.u32 %v9346_v3, 16  ;;  %9347 = vst [vmem:[#allocation8_spill] sm:$0xff] %v8012_v29 }
 0x136   : > { %v1109_v5 = vunpack.c.l.bf16 %v1093_v61  ;;  %v2029_v53 = vrot.slane %v2028_v1, 4  ;;  %v562_v28 = vmul.f32 %v7735_v60, %v546_v52  ;;  %v1457_v42 = vunpack.c.l.bf16 %v5992_v7  ;;  %v9348_v52 = vld [vmem:[#allocation6_spill] sm:$0xff] }
 0x137   : > { %v993_v15 = vrot.slane %v992_v4, 4  ;;  %v2039_v16 = vrot.slane %v2038_v43, 4  ;;  %v997_v51 = vrot.slane %v995_v37, 5  ;;  %v1458_v12 = vunpack.c.h.bf16 %v5992_v7 }
 0x138   : > { %v1125_v19 = vmul.f32 %v7735_v60, %v1109_v5  ;;  %v2034_v49 = vsel %vm7267_vm3, %v2029_v53, %v2033_v59  ;;  %v578_v56 = vadd.f32 %v7672_v54, %v562_v28  ;;  %v1489_v36 = vmul.f32 %v7735_v60, %v1457_v42  ;;  %v9349_v5 = vld [vmem:[#allocation2_spill] sm:$0xff] }
 0x139   : > { %v1657_v63 = vunpack.c.l.bf16 %v6012_v45  ;;  %v2044_v61 = vsel %vm7267_vm3, %v2039_v16, %v2043_v20  ;;  %v3912_v4 = vunpack.c.l.b16 %v2034_v49  ;;  %v998_v1 = vsel %vm7267_vm3, %v993_v15, %v997_v51  ;;  %v8029_v15 = vpop.f32.mrf.mxu2 }
 0x13a   : > { %v1002_v43 = vor.u32 %v9348_v52, %v997_v51  ;;  %v3913_v3 = vunpack.c.l.b16 %v2044_v61  ;;  %v594_v37 = vmax.f32 %v578_v56, 0.0  ;;  %v1141_v7 = vadd.f32 %v7672_v54, %v1125_v19  ;;  %9350 = vst [vmem:[#allocation10_spill] sm:$0xff] %v8029_v15  ;;  %v8031_v51 = vpop.f32.mrf.mxu3 }
 0x13b   : > { %v1285_v59 = vrot.slane %v9349_v5, 2  ;;  %v3658_v53 = vunpack.c.l.b16 %v998_v1  ;;  %v1490_v28 = vmul.f32 %v7735_v60, %v1458_v12  ;;  %v1521_v45 = vadd.f32 %v7672_v54, %v1489_v36  ;;  %9351 = vst [vmem:[#allocation3_spill] sm:$0xff] %v8031_v51  ;;  %v8034_v1 = vpop.f32.mrf.mxu1 }
 0x13c   : > { %v1673_v42 = vmul.f32 %v7735_v60, %v1657_v63  ;;  %v3933_v20 = vpack.c.b16 %v3913_v3, %v3912_v4  ;;  %v684_v16 = vpack.c.bf16 %v594_v37, %v594_v37  ;;  %v1157_v49 = vmax.f32 %v1141_v7, 0.0  ;;  %v8044_v5 = vpop.f32.mrf.mxu0 }
 0x13d   : > { %v1287_v29 = vrot.slane %v594_v37, 2  ;;  %v1003_v56 = vrot.slane %v1002_v43, 4  ;;  %v1522_v19 = vadd.f32 %v7672_v54, %v1490_v28  ;;  %v1553_v61 = vmax.f32 %v1521_v45, 0.0  ;;  %9353 = vst [vmem:[#allocation2_spill] sm:$0xff] %v8044_v5 }
 0x13e   : > { %v5090_v52 = vadd.f32 %v5089_v46, %v5001_v22  ;;  %5301 = vmatmul.bf16.gmra.mxu0 %v3933_v20  ;;  %v1005_v12 = vshll.u32 %v684_v16, 16  ;;  %v1284_v36 = vrot.slane %v1157_v49, 2  ;;  %v1689_v4 = vadd.f32 %v7672_v54, %v1673_v42 }
 0x13f   : > { %v1288_v63 = vsel %vm1223_vm4, %v1285_v59, %v1287_v29  ;;  %v8040_v37 = vmax.f32 %v1522_v19, 0.0  ;;  %v1589_v43 = vsel %vm440_vm0, %v1553_v61, 0.0  ;;  %v1745_v7 = vpack.c.bf16 %v1553_v61, %v1553_v61 }
 0x140   : > { %v1361_v3 = vsel %vm1162_vm5, %v1288_v63, 0.0  ;;  %v1007_v46 = vrot.slane %v1005_v12, 5  ;;  %v1286_v22 = vsel %vm1223_vm4, %v1284_v36, %v1285_v59  ;;  %v1621_v45 = vpack.c.bf16 %v1589_v43, %v1589_v43 }
 0x141   : > { %9352 = vst [vmem:[#allocation6_spill] sm:$0xff] %v8040_v37  ;;  %v1393_v28 = vpack.c.bf16 %v1361_v3, %v1361_v3  ;;  %v1392_v20 = vpack.c.bf16 %v1286_v22, %v1286_v22  ;;  %v1622_v54 = vpack.c.bf16 %v8040_v37, %v8040_v37  ;;  %v2046_v29 = vshrl.u32 %v1745_v7, 16  ;;  %v531_v37 = vld [vmem:[%s6786_s8 + $0xa4] sm:$0x1] }
 0x142   : > { %v2049_v42 = vshll.u32 %v1745_v7, 16  ;;  %v1008_v16 = vsel %vm7267_vm3, %v1003_v56, %v1007_v46  ;;  %v3850_v19 = vunpack.c.l.b16 %v1621_v45  ;;  %v8051_v61 = vmax.f32 %v1689_v4, 0.0 }
 0x143   : > { %v3755_v49 = vunpack.c.l.b16 %v1393_v28  ;;  %v3659_v63 = vunpack.c.l.b16 %v1008_v16  ;;  %v3754_v12 = vunpack.c.l.b16 %v1392_v20  ;;  %v3851_v59 = vunpack.c.l.b16 %v1622_v54  ;;  %v1094_v20 = vld [vmem:[%s6786_s8 + $0x9c] sm:$0xe] }
 0x144   : > { %9354 = vst [vmem:[#allocation68_spill] sm:$0xff] %v8051_v61  ;;  %v2048_v36 = vrot.slane %v2046_v29, 4  ;;  %v1747_v3 = vpack.c.bf16 %v8051_v61, %v8051_v61  ;;  %v2051_v43 = vrot.slane %v2049_v42, 5  ;;  %v2055_v22 = vshll.u32 %v1622_v54, 16  ;;  %v5094_v29 = vpop.f32.mrf.mxu2  ;;  %v8060_v16 = vpop.f32.mrf.mxu3 }
 0x145   : > { %v2059_v5 = vshrl.u32 %v1622_v54, 16  ;;  %v3678_v7 = vpack.c.b16 %v3659_v63, %v3658_v53  ;;  %v3774_v51 = vpack.c.b16 %v3755_v49, %v3754_v12  ;;  %v3870_v15 = vpack.c.b16 %v3851_v59, %v3850_v19  ;;  %v9356_v49 = vld [vmem:[#allocation16_spill] sm:$0xff]  ;;  %v9357_v19 = vld [vmem:[#allocation17_spill] sm:$0xff] }
 0x146   : > { %v8057_v56 = vadd.f32 %v8007_v34, %v5090_v52  ;;  %v2052_v4 = vor.u32 %v2051_v43, %v2048_v36  ;;  %v2057_v46 = vrot.slane %v2055_v22, 5  ;;  %v2065_v45 = vshll.u32 %v1747_v3, 16  ;;  %v8066_v52 = vpop.f32.mrf.mxu1  ;;  %v9359_v59 = vld [vmem:[#allocation9_spill] sm:$0xff]  ;;  %v6644_v3 = vld [vmem:[%s6786_s8 + $0xa8] sm:$0xff]   ;;  %v9363_v22 = vld [vmem:[#allocation18_spill] sm:$0xff] }
 0x147   : > { %v2061_v28 = vrot.slane %v2059_v5, 4  ;;  %5039 = vmatmul.bf16.gmra.mxu1 %v3678_v7  ;;  %5128 = vmatmul.bf16.gmra.mxu2 %v3774_v51  ;;  %v547_v53 = vunpack.c.l.bf16 %v531_v37  ;;  %v1016_v34 = vor.u32 %v9357_v19, %v9356_v49  ;;  %9358 = vst [vmem:[#allocation16_spill] sm:$0xff] %v8066_v52  ;;  %v1019_v36 = vshll.u32 %v9359_v59, 16  ;;  %v9360_v43 = vld [vmem:[#allocation23_spill] sm:$0xff]  ;;  %v8071_v42 = vpop.f32.mrf.mxu0 }
 0x148   : > { %9355 = vst [vmem:[#allocation69_spill] sm:$0xff] %v8057_v56  ;;  %5217 = vmatmul.bf16.gmra.mxu3 %v3870_v15  ;;  %v2053_v5 = vrot.slane %v2052_v4, 4  ;;  %v2067_v12 = vrot.slane %v2065_v45, 5  ;;  %v1110_v7 = vunpack.c.l.bf16 %v1094_v20  ;;  %v5006_v15 = vadd.f32 %v8034_v1, %v7532_v10  ;;  %v8081_v45 = vld [vmem:[%s9180_s2] ss:$0 sm:$0xff]  ;;  %v9362_v10 = vld [vmem:[#allocation7_spill] sm:$0xff] }
 0x149   : > { %v2062_v63 = vor.u32 %v2061_v28, %v2057_v46  ;;  %9361 = vst [vmem:[#allocation17_spill] sm:$0xff] %v8071_v42  ;;  %v563_v51 = vmul.f32 %v7735_v60, %v547_v53  ;;  %v1017_v37 = vrot.slane %v1016_v34, 4  ;;  %v1021_v4 = vrot.slane %v1019_v36, 5  ;;  %v6013_v20 = vld [vmem:[%s6786_s8 + $0xb0] sm:$0x1] }
 0x14a   : > { %v2058_v49 = vsel %vm7267_vm3, %v2053_v5, %v2057_v46  ;;  %v1126_v53 = vmul.f32 %v7735_v60, %v1110_v7  ;;  %v6513_v34 = vunpack.c.l.bf16 %v6644_v3  ;;  %v1290_v1 = vrot.slane %v9362_v10, 2 }
 0x14b   : > { %v2063_v19 = vrot.slane %v2062_v63, 4  ;;  %v3914_v28 = vunpack.c.l.b16 %v2058_v49  ;;  %v579_v59 = vadd.f32 %v8081_v45, %v563_v51  ;;  %v1022_v5 = vsel %vm7267_vm3, %v1017_v37, %v1021_v4 }
 0x14c   : > { %v6514_v63 = vunpack.c.h.bf16 %v6644_v3  ;;  %v1026_v54 = vor.u32 %v9363_v22, %v1021_v4  ;;  %v1142_v42 = vadd.f32 %v8081_v45, %v1126_v53  ;;  %v3660_v51 = vunpack.c.l.b16 %v1022_v5  ;;  %v8095_v37 = vpop.f32.mrf.mxu2  ;;  %v8097_v10 = vpop.f32.mrf.mxu3  ;;  %v6435_v3 = vld [vmem:[%s9181_s3 + $0x180] sm:$0xff] }
 0x14d   : > { %v2068_v46 = vsel %vm7267_vm3, %v2063_v19, %v2067_v12  ;;  %v595_v49 = vmax.f32 %v579_v59, 0.0  ;;  %v1491_v7 = vmul.f32 %v7735_v60, %v6513_v34  ;;  %v1658_v56 = vunpack.c.l.bf16 %v6013_v20  ;;  %5423 = vmatpush.bf16.msra.mxu2 %v6435_v3 }
 0x14e   : > { %v3915_v36 = vunpack.c.l.b16 %v2068_v46  ;;  %v1492_v61 = vmul.f32 %v7735_v60, %v6514_v63  ;;  %v1158_v19 = vmax.f32 %v1142_v42, 0.0  ;;  %v5095_v53 = vadd.f32 %v5094_v29, %v5006_v15  ;;  %v5010_v34 = vpop.f32.mrf.mxu1 }
 0x14f   : > { %v687_v12 = vpack.c.bf16 %v595_v49, %v595_v49  ;;  %v1292_v58 = vrot.slane %v595_v49, 2  ;;  %v1523_v22 = vadd.f32 %v8081_v45, %v1491_v7  ;;  %v1674_v59 = vmul.f32 %v7735_v60, %v1658_v56 }
 0x150   : > { %v3934_v52 = vpack.c.b16 %v3915_v36, %v3914_v28  ;;  %v1524_v4 = vadd.f32 %v8081_v45, %v1492_v61  ;;  %v1027_v28 = vrot.slane %v1026_v54, 4  ;;  %v1289_v20 = vrot.slane %v1158_v19, 2  ;;  %v8111_v61 = vpop.f32.mrf.mxu0 }
 0x151   : > { %v1029_v42 = vshll.u32 %v687_v12, 16  ;;  %v1293_v46 = vsel %vm1223_vm4, %v1290_v1, %v1292_v58  ;;  %v1555_v63 = vmax.f32 %v1523_v22, 0.0  ;;  %v1690_v49 = vadd.f32 %v8081_v45, %v1674_v59  ;;  %9365 = vst [vmem:[#allocation23_spill] sm:$0xff] %v8111_v61 }
 0x152   : > { %5306 = vmatmul.bf16.gmra.mxu0 %v3934_v52  ;;  %v1363_v5 = vsel %vm1162_vm5, %v1293_v46, 0.0  ;;  %v8108_v36 = vmax.f32 %v1524_v4, 0.0  ;;  %v1291_v56 = vsel %vm1223_vm4, %v1289_v20, %v1290_v1  ;;  %v8115_v54 = vadd.f32 %v8060_v16, %v5095_v53 }
 0x153   : > { %v1031_v60 = vrot.slane %v1029_v42, 5  ;;  %v1395_v29 = vpack.c.bf16 %v1363_v5, %v1363_v5  ;;  %v1394_v52 = vpack.c.bf16 %v1291_v56, %v1291_v56  ;;  %v1591_v58 = vsel %vm440_vm0, %v1555_v63, 0.0  ;;  %v532_v5 = vld [vmem:[%s6786_s8 + $0xb0] sm:$0x1] }
 0x154   : > { %9364 = vst [vmem:[#allocation9_spill] sm:$0xff] %v8108_v36  ;;  %v1624_v15 = vpack.c.bf16 %v8108_v36, %v8108_v36  ;;  %v1748_v7 = vpack.c.bf16 %v1555_v63, %v1555_v63  ;;  %v1623_v3 = vpack.c.bf16 %v1591_v58, %v1591_v58  ;;  %v8123_v1 = vmax.f32 %v1690_v49, 0.0 }
 0x155   : > { %9366 = vst [vmem:[#allocation7_spill] sm:$0xff] %v8115_v54  ;;  %v1032_v12 = vsel %vm7267_vm3, %v1027_v28, %v1031_v60  ;;  %v3757_v19 = vunpack.c.l.b16 %v1395_v29  ;;  %v3756_v16 = vunpack.c.l.b16 %v1394_v52  ;;  %v1095_v60 = vld [vmem:[%s6786_s8 + $0xa8] sm:$0xe]  ;;  %v6443_v52 = vld [vmem:[%s9181_s3 + $0x1c0] sm:$0xff] }
 0x156   : > { %9367 = vst [vmem:[#allocation18_spill] sm:$0xff] %v8123_v1  ;;  %v3661_v22 = vunpack.c.l.b16 %v1032_v12  ;;  %v2070_v4 = vshrl.u32 %v1748_v7, 16  ;;  %v2073_v59 = vshll.u32 %v1748_v7, 16  ;;  %v3852_v53 = vunpack.c.l.b16 %v1623_v3  ;;  %v5099_v7 = vpop.f32.mrf.mxu2  ;;  %5512 = vmatpush.bf16.msra.mxu3 %v6443_v52 }
 0x157   : > { %v3853_v42 = vunpack.c.l.b16 %v1624_v15  ;;  %v1750_v20 = vpack.c.bf16 %v8123_v1, %v8123_v1  ;;  %v2079_v46 = vshll.u32 %v1624_v15, 16  ;;  %v3775_v56 = vpack.c.b16 %v3757_v19, %v3756_v16  ;;  %v8132_v12 = vpop.f32.mrf.mxu3  ;;  %v6451_v19 = vld [vmem:[%s9181_s3 + $0x200] sm:$0xff]  ;;  %v5996_v1 = vld [vmem:[%s6786_s8 + $0xb4] sm:$0xff]  }
 0x158   : > { %v3679_v63 = vpack.c.b16 %v3661_v22, %v3660_v51  ;;  %v2072_v61 = vrot.slane %v2070_v4, 4  ;;  %v2075_v28 = vrot.slane %v2073_v59, 5  ;;  %v2083_v49 = vshrl.u32 %v1624_v15, 16  ;;  %v6427_v51 = vld [vmem:[%s9181_s3 + $0x140] sm:$0xff]  ;;  %5601 = vmatpush.bf16.msra.mxu0 %v6451_v19 }
 0x159   : > { %v3871_v29 = vpack.c.b16 %v3853_v42, %v3852_v53  ;;  %v2081_v58 = vrot.slane %v2079_v46, 5  ;;  %v2089_v36 = vshll.u32 %v1750_v20, 16  ;;  %v9368_v3 = vshrl.u32 %v7999_v9, 16  ;;  %5133 = vmatmul.bf16.gmra.mxu2 %v3775_v56  ;;  %v8148_v53 = vpop.f32.mrf.mxu1  ;;  %5334 = vmatpush.bf16.msra.mxu1 %v6427_v51  ;;  %v6014_v51 = vld [vmem:[%s6786_s8 + $0xbc] sm:$0x1] }
 0x15a   : > { %v9369_v22 = vshll.u32 %v7999_v9, 16  ;;  %5044 = vmatmul.bf16.gmra.mxu1 %v3679_v63  ;;  %v2076_v4 = vor.u32 %v2075_v28, %v2072_v61  ;;  %v548_v59 = vunpack.c.l.bf16 %v532_v5  ;;  %v2085_v42 = vrot.slane %v2083_v49, 4  ;;  %v8160_v61 = vld [vmem:[%s9179_s1] ss:$0 sm:$0xff] }
 0x15b   : > { %v8142_v15 = vrot.slane %v9368_v3, 4  ;;  %5222 = vmatmul.bf16.gmra.mxu3 %v3871_v29  ;;  %v5011_v20 = vadd.f32 %v5010_v34, %v7596_v33  ;;  %v1040_v46 = vor.u32 %v7994_v41, %v7978_v55  ;;  %v1043_v3 = vshll.u32 %v9331_v24, 16  ;;  %v8155_v63 = vpop.f32.mrf.mxu0  ;;  %v9371_v34 = vld [vmem:[#allocation13_spill] sm:$0xff] }
 0x15c   : > { %v8146_v16 = vrot.slane %v9369_v22, 5  ;;  %v2077_v9 = vrot.slane %v2076_v4, 4  ;;  %v2091_v22 = vrot.slane %v2089_v36, 5  ;;  %9370 = vst [vmem:[#allocation70_spill] sm:$0xff] %v8155_v63  ;;  %v564_v5 = vmul.f32 %v8160_v61, %v548_v59 }
 0x15d   : > { %v1111_v33 = vunpack.c.l.bf16 %v1095_v60  ;;  %v2086_v55 = vor.u32 %v2085_v42, %v2081_v58  ;;  %v1041_v41 = vrot.slane %v1040_v46, 4  ;;  %v1045_v24 = vrot.slane %v1043_v3, 5 }
 0x15e   : > { %v1295_v56 = vrot.slane %v9371_v34, 2  ;;  %v2082_v36 = vsel %vm7267_vm3, %v2077_v9, %v2081_v58  ;;  %v580_v28 = vadd.f32 %v8081_v45, %v564_v5  ;;  %v1461_v49 = vunpack.c.l.bf16 %v5996_v1  ;;  %v8176_v54 = vpop.f32.mrf.mxu2 }
 0x15f   : > { %v1127_v29 = vmul.f32 %v8160_v61, %v1111_v33  ;;  %v2087_v4 = vrot.slane %v2086_v55, 4  ;;  %v3916_v63 = vunpack.c.l.b16 %v2082_v36  ;;  %v1046_v60 = vsel %vm7267_vm3, %v1041_v41, %v1045_v24  ;;  %v8178_v41 = vpop.f32.mrf.mxu3 }
 0x160   : > { %v1050_v52 = vor.u32 %v7930_v23, %v1045_v24  ;;  %v596_v19 = vmax.f32 %v580_v28, 0.0  ;;  %v3662_v59 = vunpack.c.l.b16 %v1046_v60  ;;  %v1462_v46 = vunpack.c.h.bf16 %v5996_v1  ;;  %9372 = vst [vmem:[#allocation13_spill] sm:$0xff] %v8178_v41 }
 0x161   : > { %v1143_v42 = vadd.f32 %v8081_v45, %v1127_v29  ;;  %v2092_v58 = vsel %vm7267_vm3, %v2087_v4, %v2091_v22  ;;  %v1493_v9 = vmul.f32 %v8160_v61, %v1461_v49  ;;  %v1659_v5 = vunpack.c.l.bf16 %v6014_v51  ;;  %v5015_v22 = vpop.f32.mrf.mxu1 }
 0x162   : > { %v1051_v3 = vrot.slane %v1050_v52, 4  ;;  %v3917_v33 = vunpack.c.l.b16 %v2092_v58  ;;  %v690_v55 = vpack.c.bf16 %v596_v19, %v596_v19  ;;  %v1297_v36 = vrot.slane %v596_v19, 2 }
 0x163   : > { %v1159_v34 = vmax.f32 %v1143_v42, 0.0  ;;  %v1494_v23 = vmul.f32 %v8160_v61, %v1462_v46  ;;  %v1525_v24 = vadd.f32 %v8081_v45, %v1493_v9  ;;  %v1675_v1 = vmul.f32 %v8160_v61, %v1659_v5  ;;  %v8188_v46 = vpop.f32.mrf.mxu0 }
 0x164   : > { %v5100_v28 = vadd.f32 %v5099_v7, %v5011_v20  ;;  %v3935_v29 = vpack.c.b16 %v3917_v33, %v3916_v63  ;;  %v1053_v4 = vshll.u32 %v690_v55, 16  ;;  %v1298_v51 = vsel %vm1223_vm4, %v1295_v56, %v1297_v36  ;;  %9373 = vst [vmem:[#allocation71_spill] sm:$0xff] %v8188_v46 }
 0x165   : > { %v1294_v49 = vrot.slane %v1159_v34, 2  ;;  %v1365_v60 = vsel %vm1162_vm5, %v1298_v51, 0.0  ;;  %v1526_v52 = vadd.f32 %v8081_v45, %v1494_v23  ;;  %v1557_v19 = vmax.f32 %v1525_v24, 0.0 }
 0x166   : > { %v1691_v42 = vadd.f32 %v8081_v45, %v1675_v1  ;;  %5311 = vmatmul.bf16.gmra.mxu0 %v3935_v29  ;;  %v1055_v58 = vrot.slane %v1053_v4, 5  ;;  %v1397_v20 = vpack.c.bf16 %v1365_v60, %v1365_v60  ;;  %v8192_v63 = vadd.f32 %v8132_v12, %v5100_v28 }
 0x167   : > { %v1296_v7 = vsel %vm1223_vm4, %v1294_v49, %v1295_v56  ;;  %v8194_v5 = vmax.f32 %v1526_v52, 0.0  ;;  %v1593_v33 = vsel %vm440_vm0, %v1557_v19, 0.0  ;;  %v1751_v55 = vpack.c.bf16 %v1557_v19, %v1557_v19  ;;  %v533_v52 = vld [vmem:[%s6786_s8 + $0xbc] sm:$0x1] }
 0x168   : > { %9374 = vst [vmem:[#allocation72_spill] sm:$0xff] %v8192_v63  ;;  %v1396_v9 = vpack.c.bf16 %v1296_v7, %v1296_v7  ;;  %v1056_v34 = vsel %vm7267_vm3, %v1051_v3, %v1055_v58  ;;  %v3759_v36 = vunpack.c.l.b16 %v1397_v20  ;;  %v1625_v23 = vpack.c.bf16 %v1593_v33, %v1593_v33 }
 0x169   : > { %9375 = vst [vmem:[#allocation73_spill] sm:$0xff] %v8194_v5  ;;  %v8200_v24 = vmax.f32 %v1691_v42, 0.0  ;;  %v3663_v56 = vunpack.c.l.b16 %v1056_v34  ;;  %v1626_v12 = vpack.c.bf16 %v8194_v5, %v8194_v5  ;;  %v2094_v28 = vshrl.u32 %v1751_v55, 16  ;;  %v5104_v34 = vpop.f32.mrf.mxu2 }
 0x16a   : > { %v3758_v1 = vunpack.c.l.b16 %v1396_v9  ;;  %v9377_v29 = vshrl.u32 %v9360_v43, 16  ;;  %v2097_v49 = vshll.u32 %v1751_v55, 16  ;;  %v3854_v51 = vunpack.c.l.b16 %v1625_v23  ;;  %v8209_v46 = vpop.f32.mrf.mxu3  ;;  %v9379_v23 = vld [vmem:[#allocation28_spill] sm:$0xff] }
 0x16b   : > { %9376 = vst [vmem:[#allocation74_spill] sm:$0xff] %v8200_v24  ;;  %v1753_v60 = vpack.c.bf16 %v8200_v24, %v8200_v24  ;;  %v3680_v3 = vpack.c.b16 %v3663_v56, %v3662_v59  ;;  %v3855_v42 = vunpack.c.l.b16 %v1626_v12  ;;  %v2096_v58 = vrot.slane %v2094_v28, 4  ;;  %v1096_v56 = vld [vmem:[%s6786_s8 + $0xb4] sm:$0xe] }
 0x16c   : > { %v1073_v4 = vrot.slane %v9377_v29, 4  ;;  %v3776_v19 = vpack.c.b16 %v3759_v36, %v3758_v1  ;;  %v2099_v7 = vrot.slane %v2097_v49, 5  ;;  %v2103_v20 = vshll.u32 %v1626_v12, 16  ;;  %v9378_v29 = vld [vmem:[#allocation27_spill] sm:$0xff]  ;;  %v8214_v36 = vpop.f32.mrf.mxu1 }
 0x16d   : > { %v2107_v9 = vshrl.u32 %v1626_v12, 16  ;;  %v2113_v33 = vshll.u32 %v1753_v60, 16  ;;  %5049 = vmatmul.bf16.gmra.mxu1 %v3680_v3  ;;  %v3872_v24 = vpack.c.b16 %v3855_v42, %v3854_v51  ;;  %v549_v59 = vunpack.c.l.bf16 %v533_v52  ;;  %v6645_v60 = vld [vmem:[%s6786_s8 + $0xc0] sm:$0xff]  }
 0x16e   : > { %5138 = vmatmul.bf16.gmra.mxu2 %v3776_v19  ;;  %v2100_v1 = vor.u32 %v2099_v7, %v2096_v58  ;;  %v2105_v28 = vrot.slane %v2103_v20, 5  ;;  %v5016_v12 = vadd.f32 %v5015_v22, %v7650_v39  ;;  %v1064_v3 = vor.u32 %v8146_v16, %v8142_v15  ;;  %v9381_v58 = vld [vmem:[#allocation22_spill] sm:$0xff] }
 0x16f   : > { %v2109_v49 = vrot.slane %v2107_v9, 4  ;;  %5227 = vmatmul.bf16.gmra.mxu3 %v3872_v24  ;;  %v2115_v63 = vrot.slane %v2113_v33, 5  ;;  %v565_v55 = vmul.f32 %v8160_v61, %v549_v59  ;;  %v1067_v51 = vshll.u32 %v9360_v43, 16 }
 0x170   : > { %v8218_v41 = vpop.f32.mrf.mxu0  ;;  %v2101_v52 = vrot.slane %v2100_v1, 4  ;;  %v1112_v42 = vunpack.c.l.bf16 %v1096_v56  ;;  %v1300_v7 = vrot.slane %v9381_v58, 2  ;;  %v1065_v22 = vrot.slane %v1064_v3, 4 }
 0x171   : > { %9380 = vst [vmem:[#allocation27_spill] sm:$0xff] %v8218_v41  ;;  %v2110_v19 = vor.u32 %v2109_v49, %v2105_v28  ;;  %v581_v39 = vadd.f32 %v8081_v45, %v565_v55  ;;  %v1069_v24 = vrot.slane %v1067_v51, 5  ;;  %v6517_v20 = vunpack.c.l.bf16 %v6645_v60  ;;  %v6015_v49 = vld [vmem:[%s6786_s8 + $0xc8] sm:$0x1] }
 0x172   : > { %v2106_v9 = vsel %vm7267_vm3, %v2101_v52, %v2105_v28  ;;  %v1128_v59 = vmul.f32 %v8160_v61, %v1112_v42  ;;  %v6518_v15 = vunpack.c.h.bf16 %v6645_v60  ;;  %v8236_v28 = vpop.f32.mrf.mxu2 }
 0x173   : > { %v2111_v33 = vrot.slane %v2110_v19, 4  ;;  %v3918_v16 = vunpack.c.l.b16 %v2106_v9  ;;  %v597_v43 = vmax.f32 %v581_v39, 0.0  ;;  %v1070_v1 = vsel %vm7267_vm3, %v1065_v22, %v1069_v24  ;;  %v8238_v39 = vpop.f32.mrf.mxu3 }
 0x174   : > { %v1074_v56 = vor.u32 %v1073_v4, %v1069_v24  ;;  %v3664_v3 = vunpack.c.l.b16 %v1070_v1  ;;  %v1144_v51 = vadd.f32 %v8081_v45, %v1128_v59  ;;  %v1495_v58 = vmul.f32 %v8160_v61, %v6517_v20  ;;  %v8240_v9 = vpop.f32.mrf.mxu1 }
 0x175   : > { %v2116_v55 = vsel %vm7267_vm3, %v2111_v33, %v2115_v63  ;;  %v693_v19 = vpack.c.bf16 %v597_v43, %v597_v43  ;;  %v1302_v42 = vrot.slane %v597_v43, 2  ;;  %v1496_v22 = vmul.f32 %v8160_v61, %v6518_v15 }
 0x176   : > { %v3919_v52 = vunpack.c.l.b16 %v2116_v55  ;;  %v1075_v60 = vrot.slane %v1074_v56, 4  ;;  %v1160_v4 = vmax.f32 %v1144_v51, 0.0  ;;  %v1527_v63 = vadd.f32 %v8081_v45, %v1495_v58 }
 0x177   : > { %v1660_v24 = vunpack.c.l.bf16 %v6015_v49  ;;  %v1077_v59 = vshll.u32 %v693_v19, 16  ;;  %v1303_v20 = vsel %vm1223_vm4, %v1300_v7, %v1302_v42  ;;  %v5105_v1 = vadd.f32 %v5104_v34, %v5016_v12 }
 0x178   : > { %v3936_v33 = vpack.c.b16 %v3919_v52, %v3918_v16  ;;  %v1299_v5 = vrot.slane %v1160_v4, 2  ;;  %v1367_v56 = vsel %vm1162_vm5, %v1303_v20, 0.0  ;;  %v1528_v43 = vadd.f32 %v8081_v45, %v1496_v22  ;;  %v8248_v41 = vpop.f32.mrf.mxu0 }
 0x179   : > { %v1559_v55 = vmax.f32 %v1527_v63, 0.0  ;;  %9382 = vst [vmem:[#allocation28_spill] sm:$0xff] %v8248_v41  ;;  %v1079_v51 = vrot.slane %v1077_v59, 5  ;;  %v1399_v15 = vpack.c.bf16 %v1367_v56, %v1367_v56  ;;  %v1676_v58 = vmul.f32 %v8160_v61, %v1660_v24  ;;  %v6646_v41 = vld [vmem:[%s6786_s8 + $0x18] sm:$0xff]  }
 0x17a   : > { %5316 = vmatmul.bf16.gmra.mxu0 %v3936_v33  ;;  %v8252_v16 = vadd.f32 %v8209_v46, %v5105_v1  ;;  %v1301_v49 = vsel %vm1223_vm4, %v1299_v5, %v1300_v7  ;;  %v8255_v34 = vmax.f32 %v1528_v43, 0.0  ;;  %v4983_v5 = vadd.f32 %v7747_v0, %v7514_v8 }
 0x17b   : > { %v1595_v12 = vsel %vm440_vm0, %v1559_v55, 0.0  ;;  %v1754_v52 = vpack.c.bf16 %v1559_v55, %v1559_v55  ;;  %v1080_v19 = vsel %vm7267_vm3, %v1075_v60, %v1079_v51  ;;  %v1398_v42 = vpack.c.bf16 %v1301_v49, %v1301_v49  ;;  %v6016_v51 = vld [vmem:[%s6786_s8 + $0xc] sm:$0xe] }
 0x17c   : > { %9383 = vst [vmem:[#allocation22_spill] sm:$0xff] %v8255_v34  ;;  %v3761_v4 = vunpack.c.l.b16 %v1399_v15  ;;  %v1627_v22 = vpack.c.bf16 %v1595_v12, %v1595_v12  ;;  %v3665_v63 = vunpack.c.l.b16 %v1080_v19  ;;  %v1628_v46 = vpack.c.bf16 %v8255_v34, %v8255_v34  ;;  %v5109_v1 = vpop.f32.mrf.mxu2  ;;  %v8267_v15 = vpop.f32.mrf.mxu1 }
 0x17d   : > { %v2118_v24 = vshrl.u32 %v1754_v52, 16  ;;  %v2121_v33 = vshll.u32 %v1754_v52, 16  ;;  %v3760_v7 = vunpack.c.l.b16 %v1398_v42  ;;  %v1692_v20 = vadd.f32 %v8081_v45, %v1676_v58  ;;  %v5198_v34 = vpop.f32.mrf.mxu3 }
 0x17e   : > { %v3856_v59 = vunpack.c.l.b16 %v1627_v22  ;;  %v3681_v60 = vpack.c.b16 %v3665_v63, %v3664_v3  ;;  %v3857_v56 = vunpack.c.l.b16 %v1628_v46  ;;  %v2127_v52 = vshll.u32 %v1628_v46, 16 }
 0x17f   : > { %v2120_v43 = vrot.slane %v2118_v24, 4  ;;  %v2123_v55 = vrot.slane %v2121_v33, 5  ;;  %v3777_v49 = vpack.c.b16 %v3761_v4, %v3760_v7  ;;  %v8269_v12 = vmax.f32 %v1692_v20, 0.0 }
 0x180   : > { %v2131_v19 = vshrl.u32 %v1628_v46, 16  ;;  %v8273_v8 = vadd.f32 %v7771_v21, %v4983_v5  ;;  %5054 = vmatmul.bf16.gmra.mxu1 %v3681_v60  ;;  %v3873_v0 = vpack.c.b16 %v3857_v56, %v3856_v59  ;;  %v2129_v42 = vrot.slane %v2127_v52, 5  ;;  %v8281_v21 = vpop.f32.mrf.mxu0 }
 0x181   : > { %v2124_v58 = vor.u32 %v2123_v55, %v2120_v43  ;;  %5143 = vmatmul.bf16.gmra.mxu2 %v3777_v49  ;;  %v1756_v3 = vpack.c.bf16 %v8269_v12, %v8269_v12  ;;  %v2157_v4 = vunpack.c.l.bf16 %v6016_v51  ;;  %v8279_v63 = vadd.f32 %v7796_v38, %v7575_v40  ;;  %9384 = vst [vmem:[#allocation75_spill] sm:$0xff] %v8281_v21  ;;  %v6064_v40 = vld [vmem:[%s6786_s8 + $0x20] sm:$0x1]  ;;  %v6080_v51 = vld [vmem:[%s6786_s8 + $0x18] sm:$0xe] }
 0x182   : > { %v2133_v22 = vrot.slane %v2131_v19, 4  ;;  %5232 = vmatmul.bf16.gmra.mxu3 %v3873_v0  ;;  %v9385_v24 = vrot.slane %v9379_v23, 2  ;;  %v9386_v33 = vrot.slane %v9378_v29, 2  ;;  %v6521_v7 = vunpack.c.l.bf16 %v6646_v41 }
 0x183   : > { %v2125_v46 = vrot.slane %v2124_v58, 4  ;;  %v2137_v20 = vshll.u32 %v1756_v3, 16  ;;  %v2173_v60 = vmul.f32 %v8160_v61, %v2157_v4  ;;  %v5021_v43 = vadd.f32 %v8240_v9, %v7508_v35 }
 0x184   : > { %v2277_v5 = vsel %vm1223_vm4, %v9386_v33, %v9385_v24  ;;  %v2134_v59 = vor.u32 %v2133_v22, %v2129_v42  ;;  %v6522_v23 = vunpack.c.h.bf16 %v6646_v41  ;;  %v2514_v55 = vmul.f32 %v8160_v61, %v6521_v7  ;;  %v8299_v58 = vpop.f32.mrf.mxu2 }
 0x185   : > { %v2386_v56 = vsel %vm1162_vm5, %v2277_v5, 0.0  ;;  %v2130_v38 = vsel %vm7267_vm3, %v2125_v46, %v2129_v42  ;;  %v2139_v52 = vrot.slane %v2137_v20, 5  ;;  %v2189_v19 = vadd.f32 %v8081_v45, %v2173_v60 }
 0x186   : > { %v2135_v49 = vrot.slane %v2134_v59, 4  ;;  %v2418_v0 = vpack.c.bf16 %v2386_v56, %v2386_v56  ;;  %v3920_v3 = vunpack.c.l.b16 %v2130_v38  ;;  %v2515_v22 = vmul.f32 %v8160_v61, %v6522_v23  ;;  %v5025_v59 = vpop.f32.mrf.mxu1 }
 0x187   : > { %v2546_v4 = vadd.f32 %v8081_v45, %v2514_v55  ;;  %v2690_v42 = vunpack.c.l.bf16 %v6064_v40  ;;  %v2205_v41 = vmax.f32 %v2189_v19, 0.0  ;;  %v3250_v9 = vunpack.c.l.bf16 %v6080_v51  ;;  %v8310_v40 = vpop.f32.mrf.mxu3 }
 0x188   : > { %v2140_v35 = vsel %vm7267_vm3, %v2135_v49, %v2139_v52  ;;  %v5110_v46 = vadd.f32 %v5109_v1, %v5021_v43  ;;  %v2547_v33 = vadd.f32 %v8081_v45, %v2515_v22  ;;  %v3987_v60 = vunpack.c.l.b16 %v2418_v0  ;;  %v8319_v22 = vpop.f32.mrf.mxu0 }
 0x189   : > { %v3921_v24 = vunpack.c.l.b16 %v2140_v35  ;;  %v2578_v5 = vmax.f32 %v2546_v4, 0.0  ;;  %v2706_v7 = vmul.f32 %v8160_v61, %v2690_v42  ;;  %v2273_v20 = vrot.slane %v2205_v41, 2  ;;  %9389 = vst [vmem:[#allocation77_spill] sm:$0xff] %v8319_v22 }
 0x18a   : > { %v3266_v56 = vmul.f32 %v8160_v61, %v3250_v9  ;;  %v8308_v38 = vadd.f32 %v5198_v34, %v5110_v46  ;;  %v2579_v55 = vmax.f32 %v2547_v33, 0.0  ;;  %v9388_v51 = vrot.slane %v9378_v29, 2 }
 0x18b   : > { %v3937_v23 = vpack.c.b16 %v3921_v24, %v3920_v3  ;;  %v2610_v1 = vsel %vm440_vm0, %v2578_v5, 0.0  ;;  %v2802_v43 = vpack.c.bf16 %v2578_v5, %v2578_v5  ;;  %v2722_v19 = vadd.f32 %v8081_v45, %v2706_v7 }
 0x18c   : > { %9387 = vst [vmem:[#allocation76_spill] sm:$0xff] %v8308_v38  ;;  %v2275_v49 = vsel %vm1223_vm4, %v2273_v20, %v9388_v51  ;;  %v2642_v52 = vpack.c.bf16 %v2610_v1, %v2610_v1  ;;  %v3282_v0 = vadd.f32 %v8081_v45, %v3266_v56  ;;  %v2643_v4 = vpack.c.bf16 %v2579_v55, %v2579_v55 }
 0x18d   : > { %5321 = vmatmul.bf16.gmra.mxu0 %v3937_v23  ;;  %v2417_v34 = vpack.c.bf16 %v2275_v49, %v2275_v49  ;;  %v2851_v3 = vshrl.u32 %v2802_v43, 16  ;;  %v2854_v42 = vshll.u32 %v2802_v43, 16  ;;  %v2738_v41 = vmax.f32 %v2722_v19, 0.0 }
 0x18e   : > { %v4082_v35 = vunpack.c.l.b16 %v2642_v52  ;;  %v3298_v9 = vmax.f32 %v3282_v0, 0.0  ;;  %v3363_v46 = vrot.slane %v2579_v55, 2  ;;  %v4083_v29 = vunpack.c.l.b16 %v2643_v4  ;;  %v5114_v56 = vpop.f32.mrf.mxu2 }
 0x18f   : > { %v3986_v24 = vunpack.c.l.b16 %v2417_v34  ;;  %v2853_v33 = vrot.slane %v2851_v3, 4  ;;  %v2856_v5 = vrot.slane %v2854_v42, 5  ;;  %v2804_v20 = vpack.c.bf16 %v2738_v41, %v2738_v41  ;;  %v8328_v3 = vpop.f32.mrf.mxu1 }
 0x190   : > { %v2860_v1 = vshll.u32 %v2643_v4, 16  ;;  %v2864_v7 = vshrl.u32 %v2643_v4, 16  ;;  %v3362_v51 = vrot.slane %v3298_v9, 2  ;;  %v4114_v23 = vpack.c.b16 %v4083_v29, %v4082_v35  ;;  %v6017_v4 = vld [vmem:[%s6786_s8 + $0x18] sm:$0xe] }
 0x191   : > { %v4018_v22 = vpack.c.b16 %v3987_v60, %v3986_v24  ;;  %v2857_v49 = vor.u32 %v2856_v5, %v2853_v33  ;;  %v3365_v21 = vrot.slane %v2738_v41, 2  ;;  %v2870_v52 = vshll.u32 %v2804_v20, 16  ;;  %v6081_v33 = vld [vmem:[%s6786_s8 + $0x24] sm:$0xe] }
 0x192   : > { %v2862_v38 = vrot.slane %v2860_v1, 5  ;;  %v2866_v43 = vrot.slane %v2864_v7, 4  ;;  %v3364_v55 = vsel %vm1223_vm4, %v3362_v51, %v3363_v46  ;;  %v8324_v19 = vadd.f32 %v7775_v26, %v8273_v8  ;;  %5424 = vmatmul.bf16.vlgmr.msra.gmra.mxu2 %v4114_v23  ;;  %v6034_v8 = vld [vmem:[%s6786_s8 + $0x24] sm:$0xff]  }
 0x193   : > { %5335 = vmatmul.bf16.vlgmr.msra.gmra.mxu1 %v4018_v22  ;;  %v2858_v0 = vrot.slane %v2857_v49, 4  ;;  %v3366_v60 = vsel %vm1223_vm4, %v3363_v46, %v3365_v21  ;;  %v3506_v34 = vpack.c.bf16 %v3364_v55, %v3364_v55  ;;  %v5077_v42 = vadd.f32 %v7815_v57, %v8279_v63  ;;  %v5203_v22 = vpop.f32.mrf.mxu3  ;;  %v6065_v46 = vld [vmem:[%s6786_s8 + $0x2c] sm:$0x1] }
 0x194   : > { %v2867_v35 = vor.u32 %v2866_v43, %v2862_v38  ;;  %v2872_v41 = vrot.slane %v2870_v52, 5  ;;  %v3475_v26 = vsel %vm1162_vm5, %v3366_v60, 0.0  ;;  %v5026_v21 = vadd.f32 %v5025_v59, %v7561_v47  ;;  %v8340_v1 = vpop.f32.mrf.mxu0 }
 0x195   : > { %v2863_v9 = vsel %vm7267_vm3, %v2858_v0, %v2862_v38  ;;  %v3507_v24 = vpack.c.bf16 %v3475_v26, %v3475_v26  ;;  %v4242_v29 = vunpack.c.l.b16 %v3506_v34  ;;  %v2158_v57 = vunpack.c.l.bf16 %v6017_v4 }
 0x196   : > { %v2868_v5 = vrot.slane %v2867_v35, 4  ;;  %v4146_v20 = vunpack.c.l.b16 %v2863_v9  ;;  %v2281_v7 = vrot.slane %v7335_v44, 2  ;;  %v2484_v51 = vunpack.c.l.bf16 %v6034_v8  ;;  %v8354_v35 = vpop.f32.mrf.mxu2 }
 0x197   : > { %v4243_v63 = vunpack.c.l.b16 %v3507_v24  ;;  %v2485_v23 = vunpack.c.h.bf16 %v6034_v8  ;;  %v2174_v38 = vmul.f32 %v8160_v61, %v2158_v57  ;;  %v2691_v43 = vunpack.c.l.bf16 %v6065_v46 }
 0x198   : > { %v2873_v49 = vsel %vm7267_vm3, %v2868_v5, %v2872_v41  ;;  %v3251_v52 = vunpack.c.l.bf16 %v6081_v33  ;;  %v2282_v55 = vsel %vm1223_vm4, %v7369_v32, %v2281_v7  ;;  %v2516_v0 = vmul.f32 %v8160_v61, %v2484_v51  ;;  %v5030_v7 = vpop.f32.mrf.mxu1 }
 0x199   : > { %v4147_v47 = vunpack.c.l.b16 %v2873_v49  ;;  %v4274_v59 = vpack.c.b16 %v4243_v63, %v4242_v29  ;;  %v2190_v60 = vadd.f32 %v8081_v45, %v2174_v38  ;;  %v2388_v44 = vsel %vm1162_vm5, %v2282_v55, 0.0 }
 0x19a   : > { %v2517_v34 = vmul.f32 %v8160_v61, %v2485_v23  ;;  %v2707_v4 = vmul.f32 %v8160_v61, %v2691_v43  ;;  %v2420_v26 = vpack.c.bf16 %v2388_v44, %v2388_v44  ;;  %v2548_v8 = vadd.f32 %v8081_v45, %v2516_v0 }
 0x19b   : > { %v4178_v41 = vpack.c.b16 %v4147_v47, %v4146_v20  ;;  %v3267_v9 = vmul.f32 %v8160_v61, %v3251_v52  ;;  %v2206_v24 = vmax.f32 %v2190_v60, 0.0  ;;  %v5115_v33 = vadd.f32 %v5114_v56, %v5026_v21  ;;  %v8368_v43 = vpop.f32.mrf.mxu3 }
 0x19c   : > { %v2549_v29 = vadd.f32 %v8081_v45, %v2517_v34  ;;  %v2723_v46 = vadd.f32 %v8081_v45, %v2707_v4  ;;  %v8361_v5 = vadd.f32 %v7822_v17, %v5077_v42  ;;  %v4993_v57 = vadd.f32 %v7861_v27, %v7643_v30  ;;  %v8372_v30 = vpop.f32.mrf.mxu0 }
 0x19d   : > { %5513 = vmatmul.bf16.vlgmr.msra.gmra.mxu3 %v4178_v41  ;;  %5602 = vmatmul.bf16.vlgmr.msra.gmra.mxu0 %v4274_v59  ;;  %v2580_v20 = vmax.f32 %v2548_v8, 0.0  ;;  %v3283_v63 = vadd.f32 %v8081_v45, %v3267_v9  ;;  %v2278_v51 = vrot.slane %v2206_v24, 2  ;;  %v8366_v38 = vadd.f32 %v5203_v22, %v5115_v33 }
 0x19e   : > { %v2581_v23 = vmax.f32 %v2549_v29, 0.0  ;;  %v2739_v49 = vmax.f32 %v2723_v46, 0.0  ;;  %v3989_v56 = vunpack.c.l.b16 %v2420_v26 }
 0x19f   : > { %v2612_v17 = vsel %vm440_vm0, %v2580_v20, 0.0  ;;  %v2805_v42 = vpack.c.bf16 %v2580_v20, %v2580_v20  ;;  %v3299_v21 = vmax.f32 %v3283_v63, 0.0  ;;  %v2280_v27 = vsel %vm1223_vm4, %v2278_v51, %v7369_v32  ;;  %v6018_v20 = vld [vmem:[%s6786_s8 + $0x24] sm:$0xe] }
 0x1a0   : > { %v2644_v52 = vpack.c.bf16 %v2612_v17, %v2612_v17  ;;  %v2645_v47 = vpack.c.bf16 %v2581_v23, %v2581_v23  ;;  %v2807_v59 = vpack.c.bf16 %v2739_v49, %v2739_v49  ;;  %v2419_v55 = vpack.c.bf16 %v2280_v27, %v2280_v27 }
 0x1a1   : > { %v2875_v22 = vshrl.u32 %v2805_v42, 16  ;;  %v2878_v0 = vshll.u32 %v2805_v42, 16  ;;  %v3367_v60 = vrot.slane %v3299_v21, 2  ;;  %v3368_v32 = vrot.slane %v2581_v23, 2 }
 0x1a2   : > { %v4084_v44 = vunpack.c.l.b16 %v2644_v52  ;;  %v4085_v34 = vunpack.c.l.b16 %v2645_v47  ;;  %v2884_v4 = vshll.u32 %v2645_v47, 16  ;;  %v2888_v41 = vshrl.u32 %v2645_v47, 16  ;;  %v5119_v63 = vpop.f32.mrf.mxu2 }
 0x1a3   : > { %v3988_v26 = vunpack.c.l.b16 %v2419_v55  ;;  %v2877_v8 = vrot.slane %v2875_v22, 4  ;;  %v2880_v9 = vrot.slane %v2878_v0, 5  ;;  %v2894_v24 = vshll.u32 %v2807_v59, 16 }
 0x1a4   : > { %v4115_v29 = vpack.c.b16 %v4085_v34, %v4084_v44  ;;  %v2886_v46 = vrot.slane %v2884_v4, 5  ;;  %v2890_v33 = vrot.slane %v2888_v41, 4  ;;  %v5082_v51 = vadd.f32 %v7880_v2, %v4993_v57  ;;  %v6647_v44 = vld [vmem:[%s6786_s8 + $0x30] sm:$0xff]   ;;  %v8382_v34 = vpop.f32.mrf.mxu1 }
 0x1a5   : > { %v4019_v17 = vpack.c.b16 %v3989_v56, %v3988_v26  ;;  %v2881_v42 = vor.u32 %v2880_v9, %v2877_v8  ;;  %v3370_v21 = vrot.slane %v2739_v49, 2  ;;  %v2896_v52 = vrot.slane %v2894_v24, 5  ;;  %v6066_v8 = vld [vmem:[%s6786_s8 + $0x38] sm:$0x1] }
 0x1a6   : > { %5429 = vmatmul.bf16.gmra.mxu2 %v4115_v29  ;;  %v2891_v27 = vor.u32 %v2890_v33, %v2886_v46  ;;  %v3369_v47 = vsel %vm1223_vm4, %v3367_v60, %v3368_v32  ;;  %v5031_v55 = vadd.f32 %v5030_v7, %v7617_v14  ;;  %v2159_v0 = vunpack.c.l.bf16 %v6018_v20  ;;  %v5208_v14 = vpop.f32.mrf.mxu3  ;;  %v6082_v33 = vld [vmem:[%s6786_s8 + $0x30] sm:$0xe] }
 0x1a7   : > { %5340 = vmatmul.bf16.gmra.mxu1 %v4019_v17  ;;  %v2882_v59 = vrot.slane %v2881_v42, 4  ;;  %v3371_v23 = vsel %vm1223_vm4, %v3368_v32, %v3370_v21  ;;  %v3508_v22 = vpack.c.bf16 %v3369_v47, %v3369_v47  ;;  %v2284_v49 = vrot.slane %v7390_v31, 2 }
 0x1a8   : > { %v2892_v2 = vrot.slane %v2891_v27, 4  ;;  %v3477_v57 = vsel %vm1162_vm5, %v3371_v23, 0.0  ;;  %v2286_v56 = vrot.slane %v7401_v11, 2  ;;  %v8390_v41 = vpop.f32.mrf.mxu0  ;;  %v2175_v26 = vmul.f32 %v8160_v61, %v2159_v0 }
 0x1a9   : > { %v2887_v7 = vsel %vm7267_vm3, %v2882_v59, %v2886_v46  ;;  %v3509_v60 = vpack.c.bf16 %v3477_v57, %v3477_v57  ;;  %v4244_v4 = vunpack.c.l.b16 %v3508_v22  ;;  %v6525_v31 = vunpack.c.l.bf16 %v6647_v44 }
 0x1aa   : > { %v2897_v9 = vsel %vm7267_vm3, %v2892_v2, %v2896_v52  ;;  %v4148_v24 = vunpack.c.l.b16 %v2887_v7  ;;  %v2287_v29 = vsel %vm1223_vm4, %v2284_v49, %v2286_v56  ;;  %v2191_v20 = vadd.f32 %v8081_v45, %v2175_v26  ;;  %v8407_v56 = vpop.f32.mrf.mxu2 }
 0x1ab   : > { %v4149_v11 = vunpack.c.l.b16 %v2897_v9  ;;  %v4245_v32 = vunpack.c.l.b16 %v3509_v60  ;;  %v2390_v46 = vsel %vm1162_vm5, %v2287_v29, 0.0  ;;  %v6526_v42 = vunpack.c.h.bf16 %v6647_v44  ;;  %v6019_v9 = vld [vmem:[%s6786_s8 + $0x30] sm:$0xe] }
 0x1ac   : > { %v2422_v17 = vpack.c.bf16 %v2390_v46, %v2390_v46  ;;  %v2518_v21 = vmul.f32 %v8160_v61, %v6525_v31  ;;  %v2692_v27 = vunpack.c.l.bf16 %v6066_v8  ;;  %v2207_v52 = vmax.f32 %v2191_v20, 0.0 }
 0x1ad   : > { %v4179_v47 = vpack.c.b16 %v4149_v11, %v4148_v24  ;;  %v4275_v59 = vpack.c.b16 %v4245_v32, %v4244_v4  ;;  %v3252_v23 = vunpack.c.l.bf16 %v6082_v33  ;;  %v4998_v22 = vadd.f32 %v7922_v48, %v7706_v62 }
 0x1ae   : > { %v2519_v0 = vmul.f32 %v8160_v61, %v6526_v42  ;;  %v2550_v2 = vadd.f32 %v8081_v45, %v2518_v21  ;;  %v2708_v57 = vmul.f32 %v8160_v61, %v2692_v27  ;;  %v8410_v44 = vadd.f32 %v7888_v18, %v5082_v51  ;;  %v8427_v32 = vpop.f32.mrf.mxu3 }
 0x1af   : > { %5518 = vmatmul.bf16.gmra.mxu3 %v4179_v47  ;;  %5607 = vmatmul.bf16.gmra.mxu0 %v4275_v59  ;;  %v2283_v7 = vrot.slane %v2207_v52, 2  ;;  %v3268_v60 = vmul.f32 %v8160_v61, %v3252_v23  ;;  %v5120_v4 = vadd.f32 %v5119_v63, %v5031_v55  ;;  %v8414_v26 = vadd.f32 %v7947_v25, %v4998_v22  ;;  %v5035_v31 = vpop.f32.mrf.mxu1 }
 0x1b0   : > { %v2551_v62 = vadd.f32 %v8081_v45, %v2519_v0  ;;  %v2582_v48 = vmax.f32 %v2550_v2, 0.0  ;;  %v2724_v8 = vadd.f32 %v8081_v45, %v2708_v57  ;;  %v3991_v29 = vunpack.c.l.b16 %v2422_v17  ;;  %v8425_v55 = vpop.f32.mrf.mxu0 }
 0x1b1   : > { %v2285_v24 = vsel %vm1223_vm4, %v2283_v7, %v2284_v49  ;;  %v3284_v18 = vadd.f32 %v8081_v45, %v3268_v60  ;;  %v8421_v51 = vadd.f32 %v5208_v14, %v5120_v4  ;;  %v2160_v49 = vunpack.c.l.bf16 %v6019_v9 }
 0x1b2   : > { %v2421_v33 = vpack.c.bf16 %v2285_v24, %v2285_v24  ;;  %v2583_v11 = vmax.f32 %v2551_v62, 0.0  ;;  %v2614_v25 = vsel %vm440_vm0, %v2582_v48, 0.0  ;;  %v2808_v63 = vpack.c.bf16 %v2582_v48, %v2582_v48 }
 0x1b3   : > { %v2646_v20 = vpack.c.bf16 %v2614_v25, %v2614_v25  ;;  %v2740_v46 = vmax.f32 %v2724_v8, 0.0  ;;  %v3300_v42 = vmax.f32 %v3284_v18, 0.0 }
 0x1b4   : > { %v3990_v17 = vunpack.c.l.b16 %v2421_v33  ;;  %v2647_v21 = vpack.c.bf16 %v2583_v11, %v2583_v11  ;;  %v2899_v45 = vshrl.u32 %v2808_v63, 16  ;;  %v2902_v14 = vshll.u32 %v2808_v63, 16  ;;  %v6038_v63 = vld [vmem:[%s6786_s8 + $0x3c] sm:$0xff]  }
 0x1b5   : > { %v4086_v27 = vunpack.c.l.b16 %v2646_v20  ;;  %v2810_v47 = vpack.c.bf16 %v2740_v46, %v2740_v46  ;;  %v3372_v59 = vrot.slane %v3300_v42, 2  ;;  %v3373_v52 = vrot.slane %v2583_v11, 2  ;;  %v9390_v11 = vld [vmem:[#allocation50_spill] sm:$0xff] }
 0x1b6   : > { %v4020_v23 = vpack.c.b16 %v3991_v29, %v3990_v17  ;;  %v4087_v22 = vunpack.c.l.b16 %v2647_v21  ;;  %v2901_v0 = vrot.slane %v2899_v45, 4  ;;  %v2904_v2 = vrot.slane %v2902_v14, 5  ;;  %v5124_v24 = vpop.f32.mrf.mxu2  ;;  %v9391_v14 = vld [vmem:[#allocation30_spill] sm:$0xff] }
 0x1b7   : > { %v2908_v57 = vshll.u32 %v2647_v21, 16  ;;  %v2912_v7 = vshrl.u32 %v2647_v21, 16  ;;  %v2918_v60 = vshll.u32 %v2810_v47, 16  ;;  %v3374_v4 = vsel %vm1223_vm4, %v3372_v59, %v3373_v52  ;;  %v9392_v47 = vld [vmem:[#allocation31_spill] sm:$0xff] }
 0x1b8   : > { %5345 = vmatmul.bf16.gmra.mxu1 %v4020_v23  ;;  %v4116_v62 = vpack.c.b16 %v4087_v22, %v4086_v27  ;;  %v2905_v48 = vor.u32 %v2904_v2, %v2901_v0  ;;  %v3375_v8 = vrot.slane %v2740_v46, 2  ;;  %v3510_v9 = vpack.c.bf16 %v3374_v4, %v3374_v4  ;;  %v8438_v23 = vpop.f32.mrf.mxu1 }
 0x1b9   : > { %v2910_v18 = vrot.slane %v2908_v57, 5  ;;  %v2914_v33 = vrot.slane %v2912_v7, 4  ;;  %v2920_v25 = vrot.slane %v2918_v60, 5  ;;  %v5036_v29 = vadd.f32 %v5035_v31, %v9390_v11  ;;  %9393 = vst [vmem:[#allocation50_spill] sm:$0xff] %v8438_v23  ;;  %v6067_v57 = vld [vmem:[%s6786_s8 + $0x44] sm:$0x1]  ;;  %v5213_v7 = vpop.f32.mrf.mxu3 }
 0x1ba   : > { %5434 = vmatmul.bf16.gmra.mxu2 %v4116_v62  ;;  %v2906_v20 = vrot.slane %v2905_v48, 4  ;;  %v3376_v42 = vsel %vm1223_vm4, %v3373_v52, %v3375_v8  ;;  %v4246_v17 = vunpack.c.l.b16 %v3510_v9  ;;  %v2176_v21 = vmul.f32 %v8160_v61, %v2160_v49  ;;  %v8447_v49 = vld [vmem:[%s9180_s2] ss:$0 sm:$0xff]  ;;  %v6083_v11 = vld [vmem:[%s6786_s8 + $0x3c] sm:$0xe] }
 0x1bb   : > { %v2915_v45 = vor.u32 %v2914_v33, %v2910_v18  ;;  %v3479_v46 = vsel %vm1162_vm5, %v3376_v42, 0.0  ;;  %v2289_v27 = vrot.slane %v9391_v14, 2  ;;  %v2291_v59 = vrot.slane %v9392_v47, 2  ;;  %v8442_v0 = vpop.f32.mrf.mxu0 }
 0x1bc   : > { %v2911_v31 = vsel %vm7267_vm3, %v2906_v20, %v2910_v18  ;;  %v3511_v22 = vpack.c.bf16 %v3479_v46, %v3479_v46  ;;  %9394 = vst [vmem:[#allocation30_spill] sm:$0xff] %v8442_v0  ;;  %v2192_v52 = vadd.f32 %v8447_v49, %v2176_v21  ;;  %v2488_v2 = vunpack.c.l.bf16 %v6038_v63  ;;  %v6021_v0 = vld [vmem:[%s6786_s8 + $0x48] sm:$0xe] }
 0x1bd   : > { %v2916_v60 = vrot.slane %v2915_v45, 4  ;;  %v4150_v4 = vunpack.c.l.b16 %v2911_v31  ;;  %v2292_v62 = vsel %vm1223_vm4, %v2289_v27, %v2291_v59  ;;  %v2489_v48 = vunpack.c.h.bf16 %v6038_v63 }
 0x1be   : > { %v4247_v8 = vunpack.c.l.b16 %v3511_v22  ;;  %v2208_v9 = vmax.f32 %v2192_v52, 0.0  ;;  %v2392_v18 = vsel %vm1162_vm5, %v2292_v62, 0.0  ;;  %v2520_v33 = vmul.f32 %v8160_v61, %v2488_v2 }
 0x1bf   : > { %v2921_v20 = vsel %vm7267_vm3, %v2916_v60, %v2920_v25  ;;  %v2424_v42 = vpack.c.bf16 %v2392_v18, %v2392_v18  ;;  %v2521_v21 = vmul.f32 %v8160_v61, %v2489_v48  ;;  %v2693_v46 = vunpack.c.l.bf16 %v6067_v57  ;;  %v8463_v18 = vpop.f32.mrf.mxu2 }
 0x1c0   : > { %v4151_v45 = vunpack.c.l.b16 %v2921_v20  ;;  %v4276_v14 = vpack.c.b16 %v4247_v8, %v4246_v17  ;;  %v2288_v47 = vrot.slane %v2208_v9, 2  ;;  %v2552_v63 = vadd.f32 %v8447_v49, %v2520_v33  ;;  %9395 = vst [vmem:[#allocation31_spill] sm:$0xff] %v8463_v18  ;;  %v9396_v9 = vld [vmem:[#allocation35_spill] sm:$0xff]  ;;  %v9397_v33 = vld [vmem:[#allocation20_spill] sm:$0xff] }
 0x1c1   : > { %v3993_v59 = vunpack.c.l.b16 %v2424_v42  ;;  %v2553_v31 = vadd.f32 %v8447_v49, %v2521_v21  ;;  %v2709_v22 = vmul.f32 %v8160_v61, %v2693_v46  ;;  %v3253_v52 = vunpack.c.l.bf16 %v6083_v11 }
 0x1c2   : > { %v4180_v2 = vpack.c.b16 %v4151_v45, %v4150_v4  ;;  %5612 = vmatmul.bf16.gmra.mxu0 %v4276_v14  ;;  %v2290_v62 = vsel %vm1223_vm4, %v2288_v47, %v2289_v27  ;;  %v2584_v25 = vmax.f32 %v2552_v63, 0.0  ;;  %v5125_v60 = vadd.f32 %v5124_v24, %v5036_v29 }
 0x1c3   : > { %v2423_v57 = vpack.c.bf16 %v2290_v62, %v2290_v62  ;;  %v2585_v48 = vmax.f32 %v2553_v31, 0.0  ;;  %v2725_v17 = vadd.f32 %v8447_v49, %v2709_v22  ;;  %v3269_v8 = vmul.f32 %v8160_v61, %v3253_v52  ;;  %v8474_v63 = vpop.f32.mrf.mxu0  ;;  %v8476_v31 = vpop.f32.mrf.mxu3 }
 0x1c4   : > { %v5003_v20 = vadd.f32 %v9397_v33, %v9396_v9  ;;  %5523 = vmatmul.bf16.gmra.mxu3 %v4180_v2  ;;  %v2616_v4 = vsel %vm440_vm0, %v2584_v25, 0.0  ;;  %v2811_v11 = vpack.c.bf16 %v2584_v25, %v2584_v25  ;;  %v8471_v42 = vadd.f32 %v5213_v7, %v5125_v60  ;;  %v5040_v46 = vpop.f32.mrf.mxu1  ;;  %9399 = vst [vmem:[#allocation20_spill] sm:$0xff] %v8474_v63  ;;  %v9402_v63 = vld [vmem:[#allocation10_spill] sm:$0xff] }
 0x1c5   : > { %v3992_v27 = vunpack.c.l.b16 %v2423_v57  ;;  %v2648_v24 = vpack.c.bf16 %v2616_v4, %v2616_v4  ;;  %v2649_v29 = vpack.c.bf16 %v2585_v48, %v2585_v48  ;;  %v2741_v21 = vmax.f32 %v2725_v17, 0.0  ;;  %9400 = vst [vmem:[#allocation78_spill] sm:$0xff] %v8476_v31 }
 0x1c6   : > { %9398 = vst [vmem:[#allocation35_spill] sm:$0xff] %v8471_v42  ;;  %v2923_v45 = vshrl.u32 %v2811_v11, 16  ;;  %v2926_v14 = vshll.u32 %v2811_v11, 16  ;;  %v3285_v47 = vadd.f32 %v8447_v49, %v3269_v8  ;;  %v3378_v61 = vrot.slane %v2585_v48, 2  ;;  %v9401_v48 = vld [vmem:[#allocation14_spill] sm:$0xff]  ;;  %v9408_v42 = vld [vmem:[#allocation41_spill] sm:$0xff] }
 0x1c7   : > { %v4021_v22 = vpack.c.b16 %v3993_v59, %v3992_v27  ;;  %v4088_v52 = vunpack.c.l.b16 %v2648_v24  ;;  %v4089_v2 = vunpack.c.l.b16 %v2649_v29  ;;  %v2813_v7 = vpack.c.bf16 %v2741_v21, %v2741_v21  ;;  %v6020_v24 = vld [vmem:[%s6786_s8 + $0x3c] sm:$0xe] }
 0x1c8   : > { %v2925_v62 = vrot.slane %v2923_v45, 4  ;;  %v2928_v25 = vrot.slane %v2926_v14, 5  ;;  %v2932_v60 = vshll.u32 %v2649_v29, 16  ;;  %v2936_v57 = vshrl.u32 %v2649_v29, 16 }
 0x1c9   : > { %5350 = vmatmul.bf16.gmra.mxu1 %v4021_v22  ;;  %v4117_v17 = vpack.c.b16 %v4089_v2, %v4088_v52  ;;  %v2942_v9 = vshll.u32 %v2813_v7, 16  ;;  %v3301_v33 = vmax.f32 %v3285_v47, 0.0  ;;  %v3380_v8 = vrot.slane %v2741_v21, 2  ;;  %v9403_v52 = vld [vmem:[#allocation34_spill] sm:$0xff]  ;;  %v6648_v2 = vld [vmem:[%s6786_s8 + $0x48] sm:$0xff]  }
 0x1ca   : > { %v8480_v4 = vadd.f32 %v9401_v48, %v8414_v26  ;;  %v2929_v11 = vor.u32 %v2928_v25, %v2925_v62  ;;  %v2934_v59 = vrot.slane %v2932_v60, 5  ;;  %v2938_v27 = vrot.slane %v2936_v57, 4  ;;  %v5129_v7 = vpop.f32.mrf.mxu2 }
 0x1cb   : > { %v8484_v31 = vadd.f32 %v9402_v63, %v5003_v20  ;;  %5439 = vmatmul.bf16.gmra.mxu2 %v4117_v17  ;;  %v2944_v45 = vrot.slane %v2942_v9, 5  ;;  %v3377_v29 = vrot.slane %v3301_v33, 2  ;;  %v3381_v14 = vsel %vm1223_vm4, %v3378_v61, %v3380_v8  ;;  %v9404_v63 = vld [vmem:[#allocation32_spill] sm:$0xff]  ;;  %v9405_v33 = vld [vmem:[#allocation33_spill] sm:$0xff] }
 0x1cc   : > { %v2930_v22 = vrot.slane %v2929_v11, 4  ;;  %v2939_v47 = vor.u32 %v2938_v27, %v2934_v59  ;;  %v3481_v21 = vsel %vm1162_vm5, %v3381_v14, 0.0  ;;  %v5041_v26 = vadd.f32 %v5040_v46, %v9403_v52  ;;  %v8496_v48 = vpop.f32.mrf.mxu1  ;;  %v6084_v52 = vld [vmem:[%s6786_s8 + $0x48] sm:$0xe] }
 0x1cd   : > { %v3379_v62 = vsel %vm1223_vm4, %v3377_v29, %v3378_v61  ;;  %v3513_v25 = vpack.c.bf16 %v3481_v21, %v3481_v21  ;;  %v2161_v20 = vunpack.c.l.bf16 %v6020_v24  ;;  %v2294_v60 = vrot.slane %v9404_v63, 2  ;;  %9406 = vst [vmem:[#allocation14_spill] sm:$0xff] %v8496_v48  ;;  %v8501_v61 = vld [vmem:[%s9179_s1] ss:$0 sm:$0xff]  ;;  %v6068_v29 = vld [vmem:[%s6786_s8 + $0x50] sm:$0x1] }
 0x1ce   : > { %v2935_v57 = vsel %vm7267_vm3, %v2930_v22, %v2934_v59  ;;  %v2940_v17 = vrot.slane %v2939_v47, 4  ;;  %v3512_v9 = vpack.c.bf16 %v3379_v62, %v3379_v62  ;;  %v2296_v8 = vrot.slane %v9405_v33, 2  ;;  %v5218_v62 = vpop.f32.mrf.mxu3 }
 0x1cf   : > { %v4152_v46 = vunpack.c.l.b16 %v2935_v57  ;;  %v4249_v11 = vunpack.c.l.b16 %v3513_v25  ;;  %v2177_v27 = vmul.f32 %v8501_v61, %v2161_v20  ;;  %v6529_v24 = vunpack.c.l.bf16 %v6648_v2  ;;  %v8507_v22 = vpop.f32.mrf.mxu0 }
 0x1d0   : > { %v2945_v59 = vsel %vm7267_vm3, %v2940_v17, %v2944_v45  ;;  %v4248_v14 = vunpack.c.l.b16 %v3512_v9  ;;  %9407 = vst [vmem:[#allocation10_spill] sm:$0xff] %v8507_v22  ;;  %v2297_v47 = vsel %vm1223_vm4, %v2294_v60, %v2296_v8  ;;  %v6530_v21 = vunpack.c.h.bf16 %v6648_v2 }
 0x1d1   : > { %v4153_v25 = vunpack.c.l.b16 %v2945_v59  ;;  %v2193_v63 = vadd.f32 %v8447_v49, %v2177_v27  ;;  %v2394_v20 = vsel %vm1162_vm5, %v2297_v47, 0.0  ;;  %v2522_v57 = vmul.f32 %v8501_v61, %v6529_v24  ;;  %v9409_v59 = vld [vmem:[#allocation16_spill] sm:$0xff] }
 0x1d2   : > { %v4277_v33 = vpack.c.b16 %v4249_v11, %v4248_v14  ;;  %v2426_v48 = vpack.c.bf16 %v2394_v20, %v2394_v20  ;;  %v2523_v45 = vmul.f32 %v8501_v61, %v6530_v21  ;;  %v2694_v17 = vunpack.c.l.bf16 %v6068_v29 }
 0x1d3   : > { %v4181_v9 = vpack.c.b16 %v4153_v25, %v4152_v46  ;;  %v2209_v22 = vmax.f32 %v2193_v63, 0.0  ;;  %v2554_v8 = vadd.f32 %v8447_v49, %v2522_v57  ;;  %v3254_v2 = vunpack.c.l.bf16 %v6084_v52  ;;  %v8526_v63 = vpop.f32.mrf.mxu2 }
 0x1d4   : > { %v5008_v18 = vadd.f32 %v9409_v59, %v9408_v42  ;;  %5617 = vmatmul.bf16.gmra.mxu0 %v4277_v33  ;;  %v2555_v27 = vadd.f32 %v8447_v49, %v2523_v45  ;;  %v2710_v47 = vmul.f32 %v8501_v61, %v2694_v17  ;;  %v5130_v24 = vadd.f32 %v5129_v7, %v5041_v26 }
 0x1d5   : > { %5528 = vmatmul.bf16.gmra.mxu3 %v4181_v9  ;;  %v2293_v11 = vrot.slane %v2209_v22, 2  ;;  %v3995_v14 = vunpack.c.l.b16 %v2426_v48  ;;  %v2586_v21 = vmax.f32 %v2554_v8, 0.0  ;;  %v3270_v46 = vmul.f32 %v8501_v61, %v3254_v2  ;;  %9411 = vst [vmem:[#allocation32_spill] sm:$0xff] %v8526_v63 }
 0x1d6   : > { %v2587_v29 = vmax.f32 %v2555_v27, 0.0  ;;  %v2726_v25 = vadd.f32 %v8447_v49, %v2710_v47  ;;  %v8524_v52 = vadd.f32 %v5218_v62, %v5130_v24  ;;  %v2162_v42 = vunpack.c.l.bf16 %v6021_v0  ;;  %v8534_v24 = vpop.f32.mrf.mxu3 }
 0x1d7   : > { %v2295_v20 = vsel %vm1223_vm4, %v2293_v11, %v2294_v60  ;;  %v2618_v57 = vsel %vm440_vm0, %v2586_v21, 0.0  ;;  %v2814_v26 = vpack.c.bf16 %v2586_v21, %v2586_v21  ;;  %v3286_v7 = vadd.f32 %v8447_v49, %v3270_v46  ;;  %v5045_v17 = vpop.f32.mrf.mxu1  ;;  %v8532_v60 = vpop.f32.mrf.mxu0 }
 0x1d8   : > { %9410 = vst [vmem:[#allocation34_spill] sm:$0xff] %v8524_v52  ;;  %v2425_v48 = vpack.c.bf16 %v2295_v20, %v2295_v20  ;;  %v2650_v22 = vpack.c.bf16 %v2618_v57, %v2618_v57  ;;  %v2651_v33 = vpack.c.bf16 %v2587_v29, %v2587_v29  ;;  %v2742_v45 = vmax.f32 %v2726_v25, 0.0 }
 0x1d9   : > { %v2947_v9 = vshrl.u32 %v2814_v26, 16  ;;  %v2950_v8 = vshll.u32 %v2814_v26, 16  ;;  %v3302_v62 = vmax.f32 %v3286_v7, 0.0  ;;  %v3383_v2 = vrot.slane %v2587_v29, 2  ;;  %9412 = vst [vmem:[#allocation33_spill] sm:$0xff] %v8532_v60 }
 0x1da   : > { %v3994_v59 = vunpack.c.l.b16 %v2425_v48  ;;  %v4090_v27 = vunpack.c.l.b16 %v2650_v22  ;;  %v4091_v0 = vunpack.c.l.b16 %v2651_v33  ;;  %v2816_v47 = vpack.c.bf16 %v2742_v45, %v2742_v45  ;;  %v9413_v22 = vld [vmem:[#allocation3_spill] sm:$0xff] }
 0x1db   : > { %v2949_v11 = vrot.slane %v2947_v9, 4  ;;  %v2952_v21 = vrot.slane %v2950_v8, 5  ;;  %v2956_v46 = vshll.u32 %v2651_v33, 16  ;;  %v2960_v20 = vshrl.u32 %v2651_v33, 16 }
 0x1dc   : > { %v4022_v57 = vpack.c.b16 %v3995_v14, %v3994_v59  ;;  %v4118_v52 = vpack.c.b16 %v4091_v0, %v4090_v27  ;;  %v2966_v25 = vshll.u32 %v2816_v47, 16  ;;  %v3382_v63 = vrot.slane %v3302_v62, 2  ;;  %v6042_v27 = vld [vmem:[%s6786_s8 + $0x54] sm:$0xff]  }
 0x1dd   : > { %v2953_v26 = vor.u32 %v2952_v21, %v2949_v11  ;;  %v2958_v7 = vrot.slane %v2956_v46, 5  ;;  %v2962_v29 = vrot.slane %v2960_v20, 4  ;;  %v3385_v48 = vrot.slane %v2742_v45, 2  ;;  %v9414_v0 = vld [vmem:[#allocation40_spill] sm:$0xff]  ;;  %v9415_v11 = vld [vmem:[#allocation38_spill] sm:$0xff] }
 0x1de   : > { %v8538_v23 = vadd.f32 %v9413_v22, %v8484_v31  ;;  %v5097_v60 = vadd.f32 %v8095_v37, %v5008_v18  ;;  %5355 = vmatmul.bf16.gmra.mxu1 %v4022_v57  ;;  %5444 = vmatmul.bf16.gmra.mxu2 %v4118_v52  ;;  %v2968_v9 = vrot.slane %v2966_v25, 5  ;;  %v3384_v14 = vsel %vm1223_vm4, %v3382_v63, %v3383_v2  ;;  %v6069_v18 = vld [vmem:[%s6786_s8 + $0x5c] sm:$0x1]  ;;  %v5134_v52 = vpop.f32.mrf.mxu2 }
 0x1df   : > { %v2954_v33 = vrot.slane %v2953_v26, 4  ;;  %v2963_v8 = vor.u32 %v2962_v29, %v2958_v7  ;;  %v3386_v62 = vsel %vm1223_vm4, %v3383_v2, %v3385_v48  ;;  %v3514_v59 = vpack.c.bf16 %v3384_v14, %v3384_v14  ;;  %v8552_v20 = vpop.f32.mrf.mxu1  ;;  %v9417_v26 = vld [vmem:[#allocation39_spill] sm:$0xff] }
 0x1e0   : > { %v3483_v45 = vsel %vm1162_vm5, %v3386_v62, 0.0  ;;  %v5046_v47 = vadd.f32 %v5045_v17, %v9414_v0  ;;  %v2178_v31 = vmul.f32 %v8501_v61, %v2162_v42  ;;  %v2299_v37 = vrot.slane %v9415_v11, 2  ;;  %9416 = vst [vmem:[#allocation41_spill] sm:$0xff] %v8552_v20  ;;  %v5223_v0 = vpop.f32.mrf.mxu3 }
 0x1e1   : > { %v2959_v63 = vsel %vm7267_vm3, %v2954_v33, %v2958_v7  ;;  %v2964_v21 = vrot.slane %v2963_v8, 4  ;;  %v3515_v46 = vpack.c.bf16 %v3483_v45, %v3483_v45  ;;  %v4250_v2 = vunpack.c.l.b16 %v3514_v59  ;;  %v6085_v45 = vld [vmem:[%s6786_s8 + $0x54] sm:$0xe] }
 0x1e2   : > { %v4154_v57 = vunpack.c.l.b16 %v2959_v63  ;;  %v2194_v25 = vadd.f32 %v8447_v49, %v2178_v31  ;;  %v2301_v17 = vrot.slane %v9417_v26, 2  ;;  %v2492_v29 = vunpack.c.l.bf16 %v6042_v27 }
 0x1e3   : > { %v2969_v42 = vsel %vm7267_vm3, %v2964_v21, %v2968_v9  ;;  %v4251_v48 = vunpack.c.l.b16 %v3515_v46  ;;  %v2493_v22 = vunpack.c.h.bf16 %v6042_v27  ;;  %v2695_v14 = vunpack.c.l.bf16 %v6069_v18  ;;  %v8558_v7 = vpop.f32.mrf.mxu0 }
 0x1e4   : > { %v4155_v62 = vunpack.c.l.b16 %v2969_v42  ;;  %9418 = vst [vmem:[#allocation16_spill] sm:$0xff] %v8558_v7  ;;  %v2210_v33 = vmax.f32 %v2194_v25, 0.0  ;;  %v2302_v8 = vsel %vm1223_vm4, %v2299_v37, %v2301_v17  ;;  %v2524_v59 = vmul.f32 %v8501_v61, %v2492_v29 }
 0x1e5   : > { %v4278_v31 = vpack.c.b16 %v4251_v48, %v4250_v2  ;;  %v2396_v11 = vsel %vm1162_vm5, %v2302_v8, 0.0  ;;  %v2525_v63 = vmul.f32 %v8501_v61, %v2493_v22  ;;  %v2711_v9 = vmul.f32 %v8501_v61, %v2695_v14  ;;  %v9419_v8 = vld [vmem:[#allocation45_spill] sm:$0xff] }
 0x1e6   : > { %v4182_v27 = vpack.c.b16 %v4155_v62, %v4154_v57  ;;  %v2298_v18 = vrot.slane %v2210_v33, 2  ;;  %v2428_v21 = vpack.c.bf16 %v2396_v11, %v2396_v11  ;;  %v2556_v46 = vadd.f32 %v8447_v49, %v2524_v59 }
 0x1e7   : > { %5622 = vmatmul.bf16.gmra.mxu0 %v4278_v31  ;;  %v2557_v25 = vadd.f32 %v8447_v49, %v2525_v63  ;;  %v2727_v26 = vadd.f32 %v8447_v49, %v2711_v9  ;;  %v3255_v17 = vunpack.c.l.bf16 %v6085_v45  ;;  %v5135_v29 = vadd.f32 %v5134_v52, %v5046_v47 }
 0x1e8   : > { %v8571_v2 = vadd.f32 %v8097_v10, %v5097_v60  ;;  %5533 = vmatmul.bf16.gmra.mxu3 %v4182_v27  ;;  %v2300_v42 = vsel %vm1223_vm4, %v2298_v18, %v2299_v37  ;;  %v3997_v48 = vunpack.c.l.b16 %v2428_v21  ;;  %v2588_v22 = vmax.f32 %v2556_v46, 0.0  ;;  %v8581_v10 = vpop.f32.mrf.mxu2 }
 0x1e9   : > { %v2427_v57 = vpack.c.bf16 %v2300_v42, %v2300_v42  ;;  %v2589_v14 = vmax.f32 %v2557_v25, 0.0  ;;  %v2743_v62 = vmax.f32 %v2727_v26, 0.0  ;;  %v3271_v33 = vmul.f32 %v8501_v61, %v3255_v17  ;;  %9421 = vst [vmem:[#allocation40_spill] sm:$0xff] %v8581_v10 }
 0x1ea   : > { %v5013_v59 = vadd.f32 %v8148_v53, %v9419_v8  ;;  %v2620_v45 = vsel %vm440_vm0, %v2588_v22, 0.0  ;;  %v2817_v47 = vpack.c.bf16 %v2588_v22, %v2588_v22  ;;  %v8579_v52 = vadd.f32 %v5223_v0, %v5135_v29  ;;  %v5050_v63 = vpop.f32.mrf.mxu1  ;;  %v6022_v8 = vld [vmem:[%s6786_s8 + $0x54] sm:$0xe] }
 0x1eb   : > { %v3996_v60 = vunpack.c.l.b16 %v2427_v57  ;;  %v2652_v37 = vpack.c.bf16 %v2620_v45, %v2620_v45  ;;  %v2653_v31 = vpack.c.bf16 %v2589_v14, %v2589_v14  ;;  %v2819_v11 = vpack.c.bf16 %v2743_v62, %v2743_v62  ;;  %v8584_v17 = vpop.f32.mrf.mxu0  ;;  %v8586_v57 = vpop.f32.mrf.mxu3 }
 0x1ec   : > { %9420 = vst [vmem:[#allocation3_spill] sm:$0xff] %v8579_v52  ;;  %v2971_v9 = vshrl.u32 %v2817_v47, 16  ;;  %v2974_v27 = vshll.u32 %v2817_v47, 16  ;;  %v3287_v18 = vadd.f32 %v8447_v49, %v3271_v33  ;;  %v3388_v21 = vrot.slane %v2589_v14, 2 }
 0x1ed   : > { %v4023_v53 = vpack.c.b16 %v3997_v48, %v3996_v60  ;;  %v4092_v46 = vunpack.c.l.b16 %v2652_v37  ;;  %v4093_v25 = vunpack.c.l.b16 %v2653_v31  ;;  %v2980_v26 = vshll.u32 %v2653_v31, 16  ;;  %9422 = vst [vmem:[#allocation38_spill] sm:$0xff] %v8584_v17 }
 0x1ee   : > { %v2973_v0 = vrot.slane %v2971_v9, 4  ;;  %v2976_v29 = vrot.slane %v2974_v27, 5  ;;  %v2984_v42 = vshrl.u32 %v2653_v31, 16  ;;  %v2990_v22 = vshll.u32 %v2819_v11, 16  ;;  %9423 = vst [vmem:[#allocation39_spill] sm:$0xff] %v8586_v57  ;;  %v9424_v31 = vld [vmem:[#allocation44_spill] sm:$0xff] }
 0x1ef   : > { %5360 = vmatmul.bf16.gmra.mxu1 %v4023_v53  ;;  %v4119_v45 = vpack.c.b16 %v4093_v25, %v4092_v46  ;;  %v2982_v47 = vrot.slane %v2980_v26, 5  ;;  %v3303_v7 = vmax.f32 %v3287_v18, 0.0  ;;  %v3390_v33 = vrot.slane %v2743_v62, 2  ;;  %v6649_v57 = vld [vmem:[%s6786_s8 + $0x60] sm:$0xff]   ;;  %v9426_v46 = vld [vmem:[#allocation47_spill] sm:$0xff] }
 0x1f0   : > { %v5102_v48 = vadd.f32 %v8176_v54, %v5013_v59  ;;  %v2977_v14 = vor.u32 %v2976_v29, %v2973_v0  ;;  %v2986_v60 = vrot.slane %v2984_v42, 4  ;;  %v2992_v37 = vrot.slane %v2990_v22, 5  ;;  %v9425_v62 = vld [vmem:[#allocation46_spill] sm:$0xff] }
 0x1f1   : > { %5449 = vmatmul.bf16.gmra.mxu2 %v4119_v45  ;;  %v3387_v17 = vrot.slane %v3303_v7, 2  ;;  %v3391_v9 = vsel %vm1223_vm4, %v3388_v21, %v3390_v33  ;;  %v5051_v11 = vadd.f32 %v5050_v63, %v9424_v31  ;;  %v2163_v27 = vunpack.c.l.bf16 %v6022_v8  ;;  %v5139_v42 = vpop.f32.mrf.mxu2 }
 0x1f2   : > { %v2978_v52 = vrot.slane %v2977_v14, 4  ;;  %v2987_v10 = vor.u32 %v2986_v60, %v2982_v47  ;;  %v3485_v18 = vsel %vm1162_vm5, %v3391_v9, 0.0  ;;  %v2304_v54 = vrot.slane %v9425_v62, 2  ;;  %v6070_v14 = vld [vmem:[%s6786_s8 + $0x68] sm:$0x1] }
 0x1f3   : > { %v3389_v59 = vsel %vm1223_vm4, %v3387_v17, %v3388_v21  ;;  %v3517_v53 = vpack.c.bf16 %v3485_v18, %v3485_v18  ;;  %v2179_v7 = vmul.f32 %v8501_v61, %v2163_v27  ;;  %v2306_v25 = vrot.slane %v9426_v46, 2  ;;  %v6086_v21 = vld [vmem:[%s6786_s8 + $0x60] sm:$0xe]  ;;  %v8605_v17 = vpop.f32.mrf.mxu1 }
 0x1f4   : > { %v2983_v63 = vsel %vm7267_vm3, %v2978_v52, %v2982_v47  ;;  %v2988_v26 = vrot.slane %v2987_v10, 4  ;;  %v3516_v0 = vpack.c.bf16 %v3389_v59, %v3389_v59  ;;  %v6533_v29 = vunpack.c.l.bf16 %v6649_v57  ;;  %9427 = vst [vmem:[#allocation45_spill] sm:$0xff] %v8605_v17 }
 0x1f5   : > { %v4156_v22 = vunpack.c.l.b16 %v2983_v63  ;;  %v4253_v8 = vunpack.c.l.b16 %v3517_v53  ;;  %v2195_v45 = vadd.f32 %v8447_v49, %v2179_v7  ;;  %v2307_v33 = vsel %vm1223_vm4, %v2304_v54, %v2306_v25  ;;  %v5228_v25 = vpop.f32.mrf.mxu3 }
 0x1f6   : > { %v2993_v60 = vsel %vm7267_vm3, %v2988_v26, %v2992_v37  ;;  %v4252_v9 = vunpack.c.l.b16 %v3516_v0  ;;  %v2398_v52 = vsel %vm1162_vm5, %v2307_v33, 0.0  ;;  %v6534_v10 = vunpack.c.h.bf16 %v6649_v57  ;;  %v9429_v37 = vld [vmem:[#allocation13_spill] sm:$0xff] }
 0x1f7   : > { %v4157_v47 = vunpack.c.l.b16 %v2993_v60  ;;  %v8611_v31 = vpop.f32.mrf.mxu0  ;;  %v2211_v27 = vmax.f32 %v2195_v45, 0.0  ;;  %v2430_v18 = vpack.c.bf16 %v2398_v52, %v2398_v52  ;;  %v2526_v62 = vmul.f32 %v8501_v61, %v6533_v29  ;;  %v6023_v60 = vld [vmem:[%s6786_s8 + $0x60] sm:$0xe] }
 0x1f8   : > { %9428 = vst [vmem:[#allocation44_spill] sm:$0xff] %v8611_v31  ;;  %v4279_v59 = vpack.c.b16 %v4253_v8, %v4252_v9  ;;  %v2527_v53 = vmul.f32 %v8501_v61, %v6534_v10  ;;  %v2696_v7 = vunpack.c.l.bf16 %v6070_v14  ;;  %v3256_v46 = vunpack.c.l.bf16 %v6086_v21  ;;  %v9430_v9 = vld [vmem:[#allocation52_spill] sm:$0xff] }
 0x1f9   : > { %v8616_v63 = vadd.f32 %v9429_v37, %v5102_v48  ;;  %v4183_v26 = vpack.c.b16 %v4157_v47, %v4156_v22  ;;  %v2303_v0 = vrot.slane %v2211_v27, 2  ;;  %v2558_v57 = vadd.f32 %v8447_v49, %v2526_v62 }
 0x1fa   : > { %5627 = vmatmul.bf16.gmra.mxu0 %v4279_v59  ;;  %v2559_v45 = vadd.f32 %v8447_v49, %v2527_v53  ;;  %v2712_v33 = vmul.f32 %v8501_v61, %v2696_v7  ;;  %v3272_v29 = vmul.f32 %v8501_v61, %v3256_v46  ;;  %v5140_v8 = vadd.f32 %v5139_v42, %v5051_v11 }
 0x1fb   : > { %v5018_v14 = vadd.f32 %v8214_v36, %v9430_v9  ;;  %5538 = vmatmul.bf16.gmra.mxu3 %v4183_v26  ;;  %v2305_v48 = vsel %vm1223_vm4, %v2303_v0, %v2304_v54  ;;  %v3999_v21 = vunpack.c.l.b16 %v2430_v18  ;;  %v2590_v22 = vmax.f32 %v2558_v57, 0.0  ;;  %v8632_v54 = vpop.f32.mrf.mxu2 }
 0x1fc   : > { %v2429_v52 = vpack.c.bf16 %v2305_v48, %v2305_v48  ;;  %v2591_v10 = vmax.f32 %v2559_v45, 0.0  ;;  %v2728_v47 = vadd.f32 %v8447_v49, %v2712_v33  ;;  %v3288_v27 = vadd.f32 %v8447_v49, %v3272_v29  ;;  %9432 = vst [vmem:[#allocation47_spill] sm:$0xff] %v8632_v54 }
 0x1fd   : > { %v2622_v62 = vsel %vm440_vm0, %v2590_v22, 0.0  ;;  %v2820_v59 = vpack.c.bf16 %v2590_v22, %v2590_v22  ;;  %v8630_v11 = vadd.f32 %v5228_v25, %v5140_v8  ;;  %v2164_v42 = vunpack.c.l.bf16 %v6023_v60  ;;  %v5055_v57 = vpop.f32.mrf.mxu1 }
 0x1fe   : > { %v3998_v53 = vunpack.c.l.b16 %v2429_v52  ;;  %v2654_v36 = vpack.c.bf16 %v2622_v62, %v2622_v62  ;;  %v2655_v7 = vpack.c.bf16 %v2591_v10, %v2591_v10  ;;  %v2744_v46 = vmax.f32 %v2728_v47, 0.0 }
 0x1ff   : > { %9431 = vst [vmem:[#allocation46_spill] sm:$0xff] %v8630_v11  ;;  %v2995_v18 = vshrl.u32 %v2820_v59, 16  ;;  %v2998_v37 = vshll.u32 %v2820_v59, 16  ;;  %v3304_v26 = vmax.f32 %v3288_v27, 0.0  ;;  %v3393_v0 = vrot.slane %v2591_v10, 2  ;;  %v8634_v48 = vpop.f32.mrf.mxu0  ;;  %v8636_v59 = vpop.f32.mrf.mxu3 }
 0x200   : > { %v4024_v45 = vpack.c.b16 %v3999_v21, %v3998_v53  ;;  %v4094_v33 = vunpack.c.l.b16 %v2654_v36  ;;  %v4095_v29 = vunpack.c.l.b16 %v2655_v7  ;;  %v2822_v9 = vpack.c.bf16 %v2744_v46, %v2744_v46  ;;  %9433 = vst [vmem:[#allocation13_spill] sm:$0xff] %v8634_v48 }
 0x201   : > { %v2997_v25 = vrot.slane %v2995_v18, 4  ;;  %v3000_v8 = vrot.slane %v2998_v37, 5  ;;  %v3004_v60 = vshll.u32 %v2655_v7, 16  ;;  %v3008_v22 = vshrl.u32 %v2655_v7, 16  ;;  %9434 = vst [vmem:[#allocation52_spill] sm:$0xff] %v8636_v59  ;;  %v9435_v7 = vld [vmem:[#allocation51_spill] sm:$0xff] }
 0x202   : > { %5365 = vmatmul.bf16.gmra.mxu1 %v4024_v45  ;;  %v4120_v52 = vpack.c.b16 %v4095_v29, %v4094_v33  ;;  %v3014_v47 = vshll.u32 %v2822_v9, 16  ;;  %v3392_v62 = vrot.slane %v3304_v26, 2  ;;  %v3395_v31 = vrot.slane %v2744_v46, 2  ;;  %v6046_v45 = vld [vmem:[%s6786_s8 + $0x6c] sm:$0xff]   ;;  %v9436_v9 = vld [vmem:[#allocation53_spill] sm:$0xff] }
 0x203   : > { %v5107_v10 = vadd.f32 %v8236_v28, %v5018_v14  ;;  %v3001_v21 = vor.u32 %v3000_v8, %v2997_v25  ;;  %v3006_v27 = vrot.slane %v3004_v60, 5  ;;  %v3010_v53 = vrot.slane %v3008_v22, 4  ;;  %v9437_v8 = vld [vmem:[#allocation54_spill] sm:$0xff] }
 0x204   : > { %5454 = vmatmul.bf16.gmra.mxu2 %v4120_v52  ;;  %v3016_v36 = vrot.slane %v3014_v47, 5  ;;  %v3394_v18 = vsel %vm1223_vm4, %v3392_v62, %v3393_v0  ;;  %v3396_v37 = vsel %vm1223_vm4, %v3393_v0, %v3395_v31  ;;  %v5056_v48 = vadd.f32 %v5055_v57, %v9435_v7 }
 0x205   : > { %v3002_v33 = vrot.slane %v3001_v21, 4  ;;  %v3011_v26 = vor.u32 %v3010_v53, %v3006_v27  ;;  %v3487_v46 = vsel %vm1162_vm5, %v3396_v37, 0.0  ;;  %v3518_v28 = vpack.c.bf16 %v3394_v18, %v3394_v18  ;;  %v6071_v53 = vld [vmem:[%s6786_s8 + $0x74] sm:$0x1]  ;;  %v6087_v18 = vld [vmem:[%s6786_s8 + $0x6c] sm:$0xe]  ;;  %v5144_v37 = vpop.f32.mrf.mxu2 }
 0x206   : > { %v3519_v14 = vpack.c.bf16 %v3487_v46, %v3487_v46  ;;  %v2180_v29 = vmul.f32 %v8501_v61, %v2164_v42  ;;  %v2309_v25 = vrot.slane %v9436_v9, 2  ;;  %v2311_v60 = vrot.slane %v9437_v8, 2 }
 0x207   : > { %v3007_v31 = vsel %vm7267_vm3, %v3002_v33, %v3006_v27  ;;  %v3012_v0 = vrot.slane %v3011_v26, 4  ;;  %v4254_v57 = vunpack.c.l.b16 %v3518_v28  ;;  %v2496_v22 = vunpack.c.l.bf16 %v6046_v45  ;;  %v8659_v33 = vpop.f32.mrf.mxu1 }
 0x208   : > { %v4158_v52 = vunpack.c.l.b16 %v3007_v31  ;;  %v4255_v47 = vunpack.c.l.b16 %v3519_v14  ;;  %v2196_v62 = vadd.f32 %v8447_v49, %v2180_v29  ;;  %v2312_v21 = vsel %vm1223_vm4, %v2309_v25, %v2311_v60  ;;  %9438 = vst [vmem:[#allocation51_spill] sm:$0xff] %v8659_v33  ;;  %v5233_v33 = vpop.f32.mrf.mxu3 }
 0x209   : > { %v3017_v42 = vsel %vm7267_vm3, %v3012_v0, %v3016_v36  ;;  %v2400_v7 = vsel %vm1162_vm5, %v2312_v21, 0.0  ;;  %v2497_v46 = vunpack.c.h.bf16 %v6046_v45  ;;  %v2528_v27 = vmul.f32 %v8501_v61, %v2496_v22 }
 0x20a   : > { %v4159_v26 = vunpack.c.l.b16 %v3017_v42  ;;  %v4280_v28 = vpack.c.b16 %v4255_v47, %v4254_v57  ;;  %v8661_v14 = vpop.f32.mrf.mxu0  ;;  %v2212_v29 = vmax.f32 %v2196_v62, 0.0  ;;  %v2432_v9 = vpack.c.bf16 %v2400_v7, %v2400_v7  ;;  %v9440_v7 = vld [vmem:[#allocation36_spill] sm:$0xff] }
 0x20b   : > { %9439 = vst [vmem:[#allocation53_spill] sm:$0xff] %v8661_v14  ;;  %v2529_v8 = vmul.f32 %v8501_v61, %v2497_v46  ;;  %v2560_v60 = vadd.f32 %v8447_v49, %v2528_v27  ;;  %v2697_v31 = vunpack.c.l.bf16 %v6071_v53  ;;  %v3257_v36 = vunpack.c.l.bf16 %v6087_v18 }
 0x20c   : > { %v8666_v0 = vadd.f32 %v8238_v39, %v5107_v10  ;;  %v4184_v45 = vpack.c.b16 %v4159_v26, %v4158_v52  ;;  %5632 = vmatmul.bf16.gmra.mxu0 %v4280_v28  ;;  %v2308_v22 = vrot.slane %v2212_v29, 2  ;;  %v5145_v21 = vadd.f32 %v5144_v37, %v5056_v48 }
 0x20d   : > { %v2561_v57 = vadd.f32 %v8447_v49, %v2529_v8  ;;  %v2592_v47 = vmax.f32 %v2560_v60, 0.0  ;;  %v2713_v62 = vmul.f32 %v8501_v61, %v2697_v31  ;;  %v3273_v42 = vmul.f32 %v8501_v61, %v3257_v36 }
 0x20e   : > { %v5023_v46 = vadd.f32 %v8267_v15, %v9440_v7  ;;  %5543 = vmatmul.bf16.gmra.mxu3 %v4184_v45  ;;  %v2310_v53 = vsel %vm1223_vm4, %v2308_v22, %v2309_v25  ;;  %v4001_v39 = vunpack.c.l.b16 %v2432_v9  ;;  %v8674_v10 = vadd.f32 %v5233_v33, %v5145_v21  ;;  %v8685_v22 = vpop.f32.mrf.mxu2 }
 0x20f   : > { %v2431_v52 = vpack.c.bf16 %v2310_v53, %v2310_v53  ;;  %v2593_v18 = vmax.f32 %v2561_v57, 0.0  ;;  %v2624_v48 = vsel %vm440_vm0, %v2592_v47, 0.0  ;;  %v2823_v37 = vpack.c.bf16 %v2592_v47, %v2592_v47  ;;  %9443 = vst [vmem:[#allocation79_spill] sm:$0xff] %v8685_v22 }
 0x210   : > { %9441 = vst [vmem:[#allocation54_spill] sm:$0xff] %v8674_v10  ;;  %v8679_v27 = vadd.f32 %v8299_v58, %v5023_v46  ;;  %v2656_v26 = vpack.c.bf16 %v2624_v48, %v2624_v48  ;;  %v2729_v28 = vadd.f32 %v8447_v49, %v2713_v62  ;;  %v3289_v15 = vadd.f32 %v8447_v49, %v3273_v42  ;;  %v5336_v62 = vpop.f32.mrf.mxu1 }
 0x211   : > { %v4000_v29 = vunpack.c.l.b16 %v2431_v52  ;;  %v2657_v8 = vpack.c.bf16 %v2593_v18, %v2593_v18  ;;  %v3019_v25 = vshrl.u32 %v2823_v37, 16  ;;  %v3022_v9 = vshll.u32 %v2823_v37, 16 }
 0x212   : > { %v4096_v33 = vunpack.c.l.b16 %v2656_v26  ;;  %v2745_v60 = vmax.f32 %v2729_v28, 0.0  ;;  %v3305_v31 = vmax.f32 %v3289_v15, 0.0  ;;  %v3398_v36 = vrot.slane %v2593_v18, 2  ;;  %v8683_v45 = vpop.f32.mrf.mxu0  ;;  %v9444_v26 = vld [vmem:[#allocation58_spill] sm:$0xff]  ;;  %v9445_v18 = vld [vmem:[#allocation57_spill] sm:$0xff] }
 0x213   : > { %9442 = vst [vmem:[#allocation36_spill] sm:$0xff] %v8683_v45  ;;  %v4025_v58 = vpack.c.b16 %v4001_v39, %v4000_v29  ;;  %v4097_v21 = vunpack.c.l.b16 %v2657_v8  ;;  %v3021_v57 = vrot.slane %v3019_v25, 4  ;;  %v3024_v47 = vrot.slane %v3022_v9, 5  ;;  %v6024_v15 = vld [vmem:[%s6786_s8 + $0x6c] sm:$0xe]  ;;  %v8691_v9 = vpop.f32.mrf.mxu3 }
 0x214   : > { %v2825_v7 = vpack.c.bf16 %v2745_v60, %v2745_v60  ;;  %v3028_v42 = vshll.u32 %v2657_v8, 16  ;;  %v3032_v46 = vshrl.u32 %v2657_v8, 16  ;;  %v3397_v53 = vrot.slane %v3305_v31, 2  ;;  %9446 = vst [vmem:[#allocation58_spill] sm:$0xff] %v8691_v9 }
 0x215   : > { %5370 = vmatmul.bf16.gmra.mxu1 %v4025_v58  ;;  %v4121_v52 = vpack.c.b16 %v4097_v21, %v4096_v33  ;;  %v3025_v48 = vor.u32 %v3024_v47, %v3021_v57  ;;  %v3400_v37 = vrot.slane %v2745_v60, 2  ;;  %v5248_v28 = vadd.f32 %v9445_v18, %v9444_v26  ;;  %v9447_v18 = vld [vmem:[#allocation59_spill] sm:$0xff] }
 0x216   : > { %v3030_v45 = vrot.slane %v3028_v42, 5  ;;  %v3034_v39 = vrot.slane %v3032_v46, 4  ;;  %v3038_v29 = vshll.u32 %v2825_v7, 16  ;;  %v3399_v25 = vsel %vm1223_vm4, %v3397_v53, %v3398_v36  ;;  %v6650_v42 = vld [vmem:[%s6786_s8 + $0x78] sm:$0xff]   ;;  %v6072_v46 = vld [vmem:[%s6786_s8 + $0x80] sm:$0x1] }
 0x217   : > { %5459 = vmatmul.bf16.gmra.mxu2 %v4121_v52  ;;  %v3026_v8 = vrot.slane %v3025_v48, 4  ;;  %v3401_v33 = vsel %vm1223_vm4, %v3398_v36, %v3400_v37  ;;  %v3520_v31 = vpack.c.bf16 %v3399_v25, %v3399_v25  ;;  %v5337_v60 = vadd.f32 %v5336_v62, %v5248_v28  ;;  %v6088_v48 = vld [vmem:[%s6786_s8 + $0x78] sm:$0xe] }
 0x218   : > { %v3035_v58 = vor.u32 %v3034_v39, %v3030_v45  ;;  %v3040_v21 = vrot.slane %v3038_v29, 5  ;;  %v3489_v57 = vsel %vm1162_vm5, %v3401_v33, 0.0  ;;  %v2165_v47 = vunpack.c.l.bf16 %v6024_v15  ;;  %v9448_v28 = vld [vmem:[#allocation61_spill] sm:$0xff] }
 0x219   : > { %v3031_v7 = vsel %vm7267_vm3, %v3026_v8, %v3030_v45  ;;  %v3521_v53 = vpack.c.bf16 %v3489_v57, %v3489_v57  ;;  %v4256_v26 = vunpack.c.l.b16 %v3520_v31  ;;  %v2314_v52 = vrot.slane %v9447_v18, 2 }
 0x21a   : > { %v3036_v9 = vrot.slane %v3035_v58, 4  ;;  %v4160_v36 = vunpack.c.l.b16 %v3031_v7  ;;  %v8702_v37 = vpop.f32.mrf.mxu0  ;;  %v2181_v62 = vmul.f32 %v8501_v61, %v2165_v47  ;;  %v2316_v39 = vrot.slane %v9448_v28, 2  ;;  %v5425_v58 = vpop.f32.mrf.mxu2 }
 0x21b   : > { %v4257_v29 = vunpack.c.l.b16 %v3521_v53  ;;  %v6537_v15 = vunpack.c.l.bf16 %v6650_v42  ;;  %v6538_v25 = vunpack.c.h.bf16 %v6650_v42  ;;  %v2698_v33 = vunpack.c.l.bf16 %v6072_v46  ;;  %v5338_v53 = vpop.f32.mrf.mxu1 }
 0x21c   : > { %v3041_v45 = vsel %vm7267_vm3, %v3036_v9, %v3040_v21  ;;  %v2197_v8 = vadd.f32 %v8447_v49, %v2181_v62  ;;  %v2317_v31 = vsel %vm1223_vm4, %v2314_v52, %v2316_v39  ;;  %v3258_v57 = vunpack.c.l.bf16 %v6088_v48 }
 0x21d   : > { %v4161_v7 = vunpack.c.l.b16 %v3041_v45  ;;  %v4281_v18 = vpack.c.b16 %v4257_v29, %v4256_v26  ;;  %v2402_v47 = vsel %vm1162_vm5, %v2317_v31, 0.0  ;;  %v2530_v28 = vmul.f32 %v8501_v61, %v6537_v15 }
 0x21e   : > { %v2213_v14 = vmax.f32 %v2197_v8, 0.0  ;;  %v2434_v42 = vpack.c.bf16 %v2402_v47, %v2402_v47  ;;  %v2531_v46 = vmul.f32 %v8501_v61, %v6538_v25  ;;  %v2714_v9 = vmul.f32 %v8501_v61, %v2698_v33 }
 0x21f   : > { %v4185_v21 = vpack.c.b16 %v4161_v7, %v4160_v36  ;;  %5637 = vmatmul.bf16.gmra.mxu0 %v4281_v18  ;;  %v2562_v62 = vadd.f32 %v8447_v49, %v2530_v28  ;;  %v3274_v48 = vmul.f32 %v8501_v61, %v3258_v57  ;;  %v5426_v39 = vadd.f32 %v5425_v58, %v5337_v60  ;;  %v9449_v36 = vld [vmem:[#allocation60_spill] sm:$0xff]  ;;  %v9451_v58 = vld [vmem:[#allocation5_spill] sm:$0xff] }
 0x220   : > { %v2313_v26 = vrot.slane %v2213_v14, 2  ;;  %v4003_v29 = vunpack.c.l.b16 %v2434_v42  ;;  %v2563_v45 = vadd.f32 %v8447_v49, %v2531_v46  ;;  %v2730_v15 = vadd.f32 %v8447_v49, %v2714_v9  ;;  %v5514_v31 = vpop.f32.mrf.mxu3  ;;  %v9450_v14 = vld [vmem:[#allocation15_spill] sm:$0xff] }
 0x221   : > { %5548 = vmatmul.bf16.gmra.mxu3 %v4185_v21  ;;  %v2594_v8 = vmax.f32 %v2562_v62, 0.0  ;;  %v3290_v25 = vadd.f32 %v8447_v49, %v3274_v48  ;;  %v5515_v47 = vadd.f32 %v5514_v31, %v5426_v39  ;;  %v5250_v33 = vadd.f32 %v9449_v36, %v8324_v19 }
 0x222   : > { %v2315_v7 = vsel %vm1223_vm4, %v2313_v26, %v2314_v52  ;;  %v2595_v18 = vmax.f32 %v2563_v45, 0.0  ;;  %v2746_v57 = vmax.f32 %v2730_v15, 0.0  ;;  %v8723_v60 = vpop.f32.mrf.mxu0  ;;  %v5253_v28 = vadd.f32 %v9451_v58, %v9450_v14  ;;  %v5427_v14 = vpop.f32.mrf.mxu2 }
 0x223   : > { %v2433_v42 = vpack.c.bf16 %v2315_v7, %v2315_v7  ;;  %v2626_v46 = vsel %vm440_vm0, %v2594_v8, 0.0  ;;  %v2826_v9 = vpack.c.bf16 %v2594_v8, %v2594_v8  ;;  %v3306_v21 = vmax.f32 %v3290_v25, 0.0 }
 0x224   : > { %v2658_v49 = vpack.c.bf16 %v2626_v46, %v2626_v46  ;;  %v2659_v62 = vpack.c.bf16 %v2595_v18, %v2595_v18  ;;  %v2828_v48 = vpack.c.bf16 %v2746_v57, %v2746_v57  ;;  %v3403_v39 = vrot.slane %v2595_v18, 2  ;;  %v5341_v8 = vpop.f32.mrf.mxu1 }
 0x225   : > { %v4002_v19 = vunpack.c.l.b16 %v2433_v42  ;;  %v3043_v31 = vshrl.u32 %v2826_v9, 16  ;;  %v3046_v52 = vshll.u32 %v2826_v9, 16  ;;  %v3402_v26 = vrot.slane %v3306_v21, 2  ;;  %v6025_v42 = vld [vmem:[%s6786_s8 + $0x78] sm:$0xe] }
 0x226   : > { %v4098_v45 = vunpack.c.l.b16 %v2658_v49  ;;  %v4099_v15 = vunpack.c.l.b16 %v2659_v62  ;;  %v3052_v36 = vshll.u32 %v2659_v62, 16  ;;  %v3056_v10 = vshrl.u32 %v2659_v62, 16 }
 0x227   : > { %v4026_v7 = vpack.c.b16 %v4003_v29, %v4002_v19  ;;  %v3045_v58 = vrot.slane %v3043_v31, 4  ;;  %v3048_v22 = vrot.slane %v3046_v52, 5  ;;  %v3062_v59 = vshll.u32 %v2828_v48, 16 }
 0x228   : > { %v4122_v25 = vpack.c.b16 %v4099_v15, %v4098_v45  ;;  %v3054_v46 = vrot.slane %v3052_v36, 5  ;;  %v3058_v11 = vrot.slane %v3056_v10, 4  ;;  %v3404_v18 = vsel %vm1223_vm4, %v3402_v26, %v3403_v39  ;;  %v5516_v17 = vpop.f32.mrf.mxu3  ;;  %v6050_v36 = vld [vmem:[%s6786_s8 + $0x84] sm:$0xff]  }
 0x229   : > { %5375 = vmatmul.bf16.gmra.mxu1 %v4026_v7  ;;  %v3049_v9 = vor.u32 %v3048_v22, %v3045_v58  ;;  %v3064_v54 = vrot.slane %v3062_v59, 5  ;;  %v3405_v21 = vrot.slane %v2746_v57, 2  ;;  %v3522_v49 = vpack.c.bf16 %v3404_v18, %v3404_v18 }
 0x22a   : > { %5464 = vmatmul.bf16.gmra.mxu2 %v4122_v25  ;;  %v3059_v62 = vor.u32 %v3058_v11, %v3054_v46  ;;  %v5604_v29 = vadd.f32 %v8702_v37, %v5515_v47  ;;  %v5339_v19 = vadd.f32 %v5338_v53, %v5250_v33  ;;  %v5342_v48 = vadd.f32 %v5341_v8, %v5253_v28  ;;  %v9452_v47 = vld [vmem:[#allocation62_spill] sm:$0xff]  ;;  %v6073_v28 = vld [vmem:[%s6786_s8 + $0x8c] sm:$0x1] }
 0x22b   : > { %v3050_v31 = vrot.slane %v3049_v9, 4  ;;  %v3406_v10 = vsel %vm1223_vm4, %v3403_v39, %v3405_v21  ;;  %v4258_v52 = vunpack.c.l.b16 %v3522_v49  ;;  %v2166_v26 = vunpack.c.l.bf16 %v6025_v42  ;;  %v9453_v8 = vld [vmem:[#allocation63_spill] sm:$0xff] }
 0x22c   : > { %v3060_v45 = vrot.slane %v3059_v62, 4  ;;  %v3491_v59 = vsel %vm1162_vm5, %v3406_v10, 0.0  ;;  %v5785_v22 = vmul.f32 %v5604_v29, %v5604_v29  ;;  %v5428_v57 = vadd.f32 %v5427_v14, %v5339_v19  ;;  %v5608_v15 = vpop.f32.mrf.mxu0 }
 0x22d   : > { %v3055_v11 = vsel %vm7267_vm3, %v3050_v31, %v3054_v46  ;;  %v3523_v37 = vpack.c.bf16 %v3491_v59, %v3491_v59  ;;  %v2182_v53 = vmul.f32 %v8501_v61, %v2166_v26  ;;  %v2319_v33 = vrot.slane %v9452_v47, 2  ;;  %v8748_v46 = vld [vmem:[%s9180_s2] ss:$0 sm:$0xff]  ;;  %v5343_v59 = vpop.f32.mrf.mxu1 }
 0x22e   : > { %v3065_v39 = vsel %vm7267_vm3, %v3060_v45, %v3064_v54  ;;  %v4162_v7 = vunpack.c.l.b16 %v3055_v11  ;;  %v5517_v58 = vadd.f32 %v5516_v17, %v5428_v57  ;;  %v2321_v25 = vrot.slane %v9453_v8, 2  ;;  %v5430_v17 = vpop.f32.mrf.mxu2  ;;  %v6089_v45 = vld [vmem:[%s6786_s8 + $0x84] sm:$0xe] }
 0x22f   : > { %v4163_v14 = vunpack.c.l.b16 %v3065_v39  ;;  %v4259_v18 = vunpack.c.l.b16 %v3523_v37  ;;  %v2198_v42 = vadd.f32 %v8748_v46, %v2182_v53  ;;  %v2500_v9 = vunpack.c.l.bf16 %v6050_v36 }
 0x230   : > { %v5606_v21 = vadd.f32 %v8723_v60, %v5517_v58  ;;  %v2322_v54 = vsel %vm1223_vm4, %v2319_v33, %v2321_v25  ;;  %v2501_v49 = vunpack.c.h.bf16 %v6050_v36  ;;  %v2699_v62 = vunpack.c.l.bf16 %v6073_v28 }
 0x231   : > { %v4186_v19 = vpack.c.b16 %v4163_v14, %v4162_v7  ;;  %v4282_v31 = vpack.c.b16 %v4259_v18, %v4258_v52  ;;  %v2214_v10 = vmax.f32 %v2198_v42, 0.0  ;;  %v2404_v26 = vsel %vm1162_vm5, %v2322_v54, 0.0 }
 0x232   : > { %v6554_v60 = vpack.c.bf16 %v5606_v21, %v5604_v29  ;;  %v8761_v57 = vadd.f32 %v5606_v21, %v5604_v29  ;;  %v5786_v36 = vmul.f32 %v5606_v21, %v5606_v21  ;;  %v2436_v11 = vpack.c.bf16 %v2404_v26, %v2404_v26  ;;  %v5519_v28 = vpop.f32.mrf.mxu3 }
 0x233   : > { %5553 = vmatmul.bf16.gmra.mxu3 %v4186_v19  ;;  %5642 = vmatmul.bf16.gmra.mxu0 %v4282_v31  ;;  %v2318_v52 = vrot.slane %v2214_v10, 2  ;;  %v2532_v37 = vmul.f32 %v8501_v61, %v2500_v9  ;;  %v2533_v53 = vmul.f32 %v8501_v61, %v2501_v49  ;;  %v2715_v47 = vmul.f32 %v8501_v61, %v2699_v62 }
 0x234   : > { %6555 = vst [vmem:[%s8756_s27] sm:$0xff] %v6554_v60   ;;  %v8767_v39 = vadd.f32 %v5786_v36, %v5785_v22  ;;  %v4005_v7 = vunpack.c.l.b16 %v2436_v11  ;;  %v3259_v58 = vunpack.c.l.bf16 %v6089_v45  ;;  %v5431_v8 = vadd.f32 %v5430_v17, %v5342_v48  ;;  %v8773_v42 = vpop.f32.mrf.mxu0  ;;  %v9454_v22 = vld [vmem:[#allocation64_spill] sm:$0xff]  ;;  %v9455_v17 = vld [vmem:[#allocation25_spill] sm:$0xff] }
 0x235   : > { %v2320_v29 = vsel %vm1223_vm4, %v2318_v52, %v2319_v33  ;;  %v2564_v25 = vadd.f32 %v8748_v46, %v2532_v37  ;;  %v2565_v14 = vadd.f32 %v8748_v46, %v2533_v53  ;;  %v2731_v18 = vadd.f32 %v8748_v46, %v2715_v47  ;;  %v9456_v33 = vld [vmem:[#allocation21_spill] sm:$0xff] }
 0x236   : > { %v2435_v9 = vpack.c.bf16 %v2320_v29, %v2320_v29  ;;  %v3275_v21 = vmul.f32 %v8501_v61, %v3259_v58  ;;  %v5520_v54 = vadd.f32 %v5519_v28, %v5431_v8  ;;  %v5255_v49 = vadd.f32 %v9454_v22, %v8361_v5  ;;  %v5432_v28 = vpop.f32.mrf.mxu2 }
 0x237   : > { %v2596_v62 = vmax.f32 %v2564_v25, 0.0  ;;  %v2597_v19 = vmax.f32 %v2565_v14, 0.0  ;;  %v2747_v48 = vmax.f32 %v2731_v18, 0.0  ;;  %v5258_v31 = vadd.f32 %v9456_v33, %v9455_v17  ;;  %v5346_v14 = vpop.f32.mrf.mxu1 }
 0x238   : > { %v4004_v10 = vunpack.c.l.b16 %v2435_v9  ;;  %v3291_v26 = vadd.f32 %v8748_v46, %v3275_v21  ;;  %v8781_v45 = vadd.f32 %v5608_v15, %v5520_v54  ;;  %v5344_v60 = vadd.f32 %v5343_v59, %v5255_v49 }
 0x239   : > { %v2628_v36 = vsel %vm440_vm0, %v2596_v62, 0.0  ;;  %v2661_v61 = vpack.c.bf16 %v2597_v19, %v2597_v19  ;;  %v2829_v11 = vpack.c.bf16 %v2596_v62, %v2596_v62  ;;  %v2831_v52 = vpack.c.bf16 %v2747_v48, %v2747_v48 }
 0x23a   : > { %v4027_v37 = vpack.c.b16 %v4005_v7, %v4004_v10  ;;  %v2660_v5 = vpack.c.bf16 %v2628_v36, %v2628_v36  ;;  %v3307_v53 = vmax.f32 %v3291_v26, 0.0  ;;  %v3408_v47 = vrot.slane %v2597_v19, 2  ;;  %v5521_v7 = vpop.f32.mrf.mxu3 }
 0x23b   : > { %v3067_v58 = vshrl.u32 %v2829_v11, 16  ;;  %v3070_v8 = vshll.u32 %v2829_v11, 16  ;;  %v4101_v29 = vunpack.c.l.b16 %v2661_v61  ;;  %v3076_v25 = vshll.u32 %v2661_v61, 16 }
 0x23c   : > { %5380 = vmatmul.bf16.gmra.mxu1 %v4027_v37  ;;  %v4100_v15 = vunpack.c.l.b16 %v2660_v5  ;;  %v3080_v18 = vshrl.u32 %v2661_v61, 16  ;;  %v3086_v59 = vshll.u32 %v2831_v52, 16  ;;  %v3407_v9 = vrot.slane %v3307_v53, 2  ;;  %v6026_v52 = vld [vmem:[%s6786_s8 + $0x84] sm:$0xe] }
 0x23d   : > { %v3069_v21 = vrot.slane %v3067_v58, 4  ;;  %v3072_v54 = vrot.slane %v3070_v8, 5  ;;  %v3078_v22 = vrot.slane %v3076_v25, 5  ;;  %v3410_v49 = vrot.slane %v2747_v48, 2 }
 0x23e   : > { %v4123_v62 = vpack.c.b16 %v4101_v29, %v4100_v15  ;;  %v3082_v17 = vrot.slane %v3080_v18, 4  ;;  %v3088_v19 = vrot.slane %v3086_v59, 5  ;;  %v3409_v33 = vsel %vm1223_vm4, %v3407_v9, %v3408_v47  ;;  %v6651_v59 = vld [vmem:[%s6786_s8 + $0x90] sm:$0xff]  }
 0x23f   : > { %v3073_v10 = vor.u32 %v3072_v54, %v3069_v21  ;;  %v3411_v26 = vsel %vm1223_vm4, %v3408_v47, %v3410_v49  ;;  %v3524_v36 = vpack.c.bf16 %v3409_v33, %v3409_v33  ;;  %v5748_v61 = vadd.f32 %v8761_v57, %v8781_v45  ;;  %v8789_v11 = vpop.f32.mrf.mxu0  ;;  %v9457_v54 = vld [vmem:[#allocation24_spill] sm:$0xff] }
 0x240   : > { %5469 = vmatmul.bf16.gmra.mxu2 %v4123_v62  ;;  %v3083_v37 = vor.u32 %v3082_v17, %v3078_v22  ;;  %v3493_v48 = vsel %vm1162_vm5, %v3411_v26, 0.0  ;;  %v5787_v5 = vmul.f32 %v8781_v45, %v8781_v45  ;;  %v5433_v53 = vadd.f32 %v5432_v28, %v5344_v60  ;;  %v9458_v62 = vld [vmem:[#allocation11_spill] sm:$0xff] }
 0x241   : > { %v3074_v58 = vrot.slane %v3073_v10, 4  ;;  %v3525_v8 = vpack.c.bf16 %v3493_v48, %v3493_v48  ;;  %v4260_v47 = vunpack.c.l.b16 %v3524_v36  ;;  %v5347_v29 = vadd.f32 %v5346_v14, %v5258_v31  ;;  %v6074_v36 = vld [vmem:[%s6786_s8 + $0x98] sm:$0x1] }
 0x242   : > { %v3084_v25 = vrot.slane %v3083_v37, 4  ;;  %v5818_v57 = vadd.f32 %v8767_v39, %v5787_v5  ;;  %v5522_v15 = vadd.f32 %v5521_v7, %v5433_v53  ;;  %v2167_v18 = vunpack.c.l.bf16 %v6026_v52  ;;  %v8808_v39 = vld [vmem:[%s9179_s1] ss:$0 sm:$0xff]  ;;  %v6090_v5 = vld [vmem:[%s6786_s8 + $0x90] sm:$0xe] }
 0x243   : > { %v3079_v9 = vsel %vm7267_vm3, %v3074_v58, %v3078_v22  ;;  %v4261_v21 = vunpack.c.l.b16 %v3525_v8  ;;  %v2324_v49 = vrot.slane %v9457_v54, 2  ;;  %v2326_v17 = vrot.slane %v9458_v62, 2  ;;  %v5435_v22 = vpop.f32.mrf.mxu2 }
 0x244   : > { %v3089_v60 = vsel %vm7267_vm3, %v3084_v25, %v3088_v19  ;;  %v4164_v31 = vunpack.c.l.b16 %v3079_v9  ;;  %v5611_v28 = vadd.f32 %v8773_v42, %v5522_v15  ;;  %v2183_v14 = vmul.f32 %v8808_v39, %v2167_v18  ;;  %v5348_v19 = vpop.f32.mrf.mxu1 }
 0x245   : > { %v4165_v7 = vunpack.c.l.b16 %v3089_v60  ;;  %v4283_v33 = vpack.c.b16 %v4261_v21, %v4260_v47  ;;  %v2327_v10 = vsel %vm1223_vm4, %v2324_v49, %v2326_v17  ;;  %v6541_v26 = vunpack.c.l.bf16 %v6651_v59 }
 0x246   : > { %v6559_v52 = vpack.c.bf16 %v5611_v28, %v8781_v45  ;;  %v8814_v37 = vadd.f32 %v5748_v61, %v5611_v28  ;;  %v5788_v42 = vmul.f32 %v5611_v28, %v5611_v28  ;;  %v2199_v48 = vadd.f32 %v8748_v46, %v2183_v14  ;;  %v9459_v28 = vld [vmem:[#allocation12_spill] sm:$0xff] }
 0x247   : > { %v4187_v53 = vpack.c.b16 %v4165_v7, %v4164_v31  ;;  %5647 = vmatmul.bf16.gmra.mxu0 %v4283_v33  ;;  %v2406_v58 = vsel %vm1162_vm5, %v2327_v10, 0.0  ;;  %v6542_v8 = vunpack.c.h.bf16 %v6651_v59  ;;  %v2534_v47 = vmul.f32 %v8808_v39, %v6541_v26  ;;  %v5524_v25 = vpop.f32.mrf.mxu3  ;;  %v8821_v15 = vpop.f32.mrf.mxu0 }
 0x248   : > { %6654 = vst [vmem:[%s8756_s27 + $0x8] sm:$0xff] %v6559_v52   ;;  %v8824_v18 = vadd.f32 %v5818_v57, %v5788_v42  ;;  %v2215_v45 = vmax.f32 %v2199_v48, 0.0  ;;  %v2438_v61 = vpack.c.bf16 %v2406_v58, %v2406_v58  ;;  %v2700_v9 = vunpack.c.l.bf16 %v6074_v36  ;;  %v9460_v42 = vld [vmem:[#allocation19_spill] sm:$0xff] }
 0x249   : > { %5558 = vmatmul.bf16.gmra.mxu3 %v4187_v53  ;;  %v2535_v21 = vmul.f32 %v8808_v39, %v6542_v8  ;;  %v2566_v54 = vadd.f32 %v8748_v46, %v2534_v47  ;;  %v3260_v62 = vunpack.c.l.bf16 %v6090_v5  ;;  %v5436_v17 = vadd.f32 %v5435_v22, %v5347_v29  ;;  %v9461_v29 = vld [vmem:[#allocation26_spill] sm:$0xff] }
 0x24a   : > { %v2323_v60 = vrot.slane %v2215_v45, 2  ;;  %v4007_v59 = vunpack.c.l.b16 %v2438_v61  ;;  %v2716_v31 = vmul.f32 %v8808_v39, %v2700_v9  ;;  %v5260_v14 = vadd.f32 %v9459_v28, %v8410_v44 }
 0x24b   : > { %v2567_v57 = vadd.f32 %v8748_v46, %v2535_v21  ;;  %v2598_v7 = vmax.f32 %v2566_v54, 0.0  ;;  %v3276_v33 = vmul.f32 %v8808_v39, %v3260_v62  ;;  %v5525_v10 = vadd.f32 %v5524_v25, %v5436_v17 }
 0x24c   : > { %v2325_v26 = vsel %vm1223_vm4, %v2323_v60, %v2324_v49  ;;  %v2732_v36 = vadd.f32 %v8748_v46, %v2716_v31  ;;  %v5349_v52 = vadd.f32 %v5348_v19, %v5260_v14  ;;  %v5263_v22 = vadd.f32 %v9461_v29, %v9460_v42  ;;  %v5437_v49 = vpop.f32.mrf.mxu2  ;;  %v5351_v54 = vpop.f32.mrf.mxu1 }
 0x24d   : > { %v2437_v48 = vpack.c.bf16 %v2325_v26, %v2325_v26  ;;  %v2599_v5 = vmax.f32 %v2567_v57, 0.0  ;;  %v2630_v53 = vsel %vm440_vm0, %v2598_v7, 0.0  ;;  %v2832_v44 = vpack.c.bf16 %v2598_v7, %v2598_v7 }
 0x24e   : > { %v2662_v58 = vpack.c.bf16 %v2630_v53, %v2630_v53  ;;  %v2748_v8 = vmax.f32 %v2732_v36, 0.0  ;;  %v3292_v47 = vadd.f32 %v8748_v46, %v3276_v33  ;;  %v8841_v25 = vadd.f32 %v8789_v11, %v5525_v10 }
 0x24f   : > { %v4006_v45 = vunpack.c.l.b16 %v2437_v48  ;;  %v2663_v61 = vpack.c.bf16 %v2599_v5, %v2599_v5  ;;  %v3091_v19 = vshrl.u32 %v2832_v44, 16  ;;  %v3094_v9 = vshll.u32 %v2832_v44, 16  ;;  %v5526_v21 = vpop.f32.mrf.mxu3 }
 0x250   : > { %v4102_v62 = vunpack.c.l.b16 %v2662_v58  ;;  %v2834_v17 = vpack.c.bf16 %v2748_v8, %v2748_v8  ;;  %v3308_v60 = vmax.f32 %v3292_v47, 0.0  ;;  %v3413_v31 = vrot.slane %v2599_v5, 2 }
 0x251   : > { %v4028_v28 = vpack.c.b16 %v4007_v59, %v4006_v45  ;;  %v4103_v14 = vunpack.c.l.b16 %v2663_v61  ;;  %v3093_v57 = vrot.slane %v3091_v19, 4  ;;  %v3096_v7 = vrot.slane %v3094_v9, 5  ;;  %v8843_v26 = vpop.f32.mrf.mxu0  ;;  %v6027_v9 = vld [vmem:[%s6786_s8 + $0x90] sm:$0xe] }
 0x252   : > { %v3100_v33 = vshll.u32 %v2663_v61, 16  ;;  %v3104_v11 = vshrl.u32 %v2663_v61, 16  ;;  %v3110_v10 = vshll.u32 %v2834_v17, 16  ;;  %v3412_v36 = vrot.slane %v3308_v60, 2  ;;  %v6054_v60 = vld [vmem:[%s6786_s8 + $0x9c] sm:$0xff]  }
 0x253   : > { %5385 = vmatmul.bf16.gmra.mxu1 %v4028_v28  ;;  %v4124_v42 = vpack.c.b16 %v4103_v14, %v4102_v62  ;;  %v3097_v29 = vor.u32 %v3096_v7, %v3093_v57  ;;  %v3415_v48 = vrot.slane %v2748_v8, 2  ;;  %v5750_v53 = vadd.f32 %v8814_v37, %v8841_v25 }
 0x254   : > { %v3102_v5 = vrot.slane %v3100_v33, 5  ;;  %v3106_v59 = vrot.slane %v3104_v11, 4  ;;  %v3112_v44 = vrot.slane %v3110_v10, 5  ;;  %v3414_v58 = vsel %vm1223_vm4, %v3412_v36, %v3413_v31  ;;  %v5440_v36 = vpop.f32.mrf.mxu2 }
 0x255   : > { %5474 = vmatmul.bf16.gmra.mxu2 %v4124_v42  ;;  %v3098_v47 = vrot.slane %v3097_v29, 4  ;;  %v3416_v45 = vsel %vm1223_vm4, %v3413_v31, %v3415_v48  ;;  %v3526_v61 = vpack.c.bf16 %v3414_v58, %v3414_v58  ;;  %v5789_v19 = vmul.f32 %v8841_v25, %v8841_v25  ;;  %v9462_v48 = vld [vmem:[#allocation65_spill] sm:$0xff] }
 0x256   : > { %v3107_v62 = vor.u32 %v3106_v59, %v3102_v5  ;;  %v3495_v8 = vsel %vm1162_vm5, %v3416_v45, 0.0  ;;  %v5438_v17 = vadd.f32 %v5437_v49, %v5349_v52  ;;  %v5352_v37 = vadd.f32 %v5351_v54, %v5263_v22  ;;  %v9463_v52 = vld [vmem:[#allocation66_spill] sm:$0xff]  ;;  %v8860_v54 = vpop.f32.mrf.mxu1 }
 0x257   : > { %v3103_v28 = vsel %vm7267_vm3, %v3098_v47, %v3102_v5  ;;  %v3527_v14 = vpack.c.bf16 %v3495_v8, %v3495_v8  ;;  %v4262_v57 = vunpack.c.l.b16 %v3526_v61  ;;  %v5820_v7 = vadd.f32 %v8824_v18, %v5789_v19 }
 0x258   : > { %v3108_v31 = vrot.slane %v3107_v62, 4  ;;  %v4166_v33 = vunpack.c.l.b16 %v3103_v28  ;;  %v5527_v11 = vadd.f32 %v5526_v21, %v5438_v17  ;;  %v2168_v10 = vunpack.c.l.bf16 %v6027_v9  ;;  %v5529_v42 = vpop.f32.mrf.mxu3  ;;  %v6075_v9 = vld [vmem:[%s6786_s8 + $0xa4] sm:$0x1]  ;;  %v6091_v28 = vld [vmem:[%s6786_s8 + $0x9c] sm:$0xe] }
 0x259   : > { %v4263_v29 = vunpack.c.l.b16 %v3527_v14  ;;  %v2329_v59 = vrot.slane %v9462_v48, 2  ;;  %v2331_v22 = vrot.slane %v9463_v52, 2  ;;  %v2504_v49 = vunpack.c.l.bf16 %v6054_v60  ;;  %v8869_v62 = vpop.f32.mrf.mxu0 }
 0x25a   : > { %v3113_v5 = vsel %vm7267_vm3, %v3108_v31, %v3112_v44  ;;  %v5616_v18 = vadd.f32 %v8821_v15, %v5527_v11  ;;  %v2184_v21 = vmul.f32 %v8808_v39, %v2168_v10  ;;  %v2505_v58 = vunpack.c.h.bf16 %v6054_v60 }
 0x25b   : > { %v4167_v47 = vunpack.c.l.b16 %v3113_v5  ;;  %v4284_v45 = vpack.c.b16 %v4263_v29, %v4262_v57  ;;  %v2332_v61 = vsel %vm1223_vm4, %v2329_v59, %v2331_v22  ;;  %v2536_v19 = vmul.f32 %v8808_v39, %v2504_v49 }
 0x25c   : > { %v6564_v8 = vpack.c.bf16 %v5616_v18, %v8841_v25  ;;  %v8872_v17 = vadd.f32 %v5750_v53, %v5616_v18  ;;  %v5790_v44 = vmul.f32 %v5616_v18, %v5616_v18  ;;  %v2200_v15 = vadd.f32 %v8748_v46, %v2184_v21  ;;  %v9464_v18 = vld [vmem:[#allocation67_spill] sm:$0xff] }
 0x25d   : > { %v4188_v14 = vpack.c.b16 %v4167_v47, %v4166_v33  ;;  %5652 = vmatmul.bf16.gmra.mxu0 %v4284_v45  ;;  %v2408_v60 = vsel %vm1162_vm5, %v2332_v61, 0.0  ;;  %v2537_v57 = vmul.f32 %v8808_v39, %v2505_v58  ;;  %v2568_v31 = vadd.f32 %v8748_v46, %v2536_v19 }
 0x25e   : > { %6655 = vst [vmem:[%s8756_s27 + $0x10] sm:$0xff] %v6564_v8   ;;  %v8881_v11 = vadd.f32 %v5820_v7, %v5790_v44  ;;  %v2216_v10 = vmax.f32 %v2200_v15, 0.0  ;;  %v2440_v25 = vpack.c.bf16 %v2408_v60, %v2408_v60  ;;  %v2701_v53 = vunpack.c.l.bf16 %v6075_v9 }
 0x25f   : > { %5563 = vmatmul.bf16.gmra.mxu3 %v4188_v14  ;;  %v2569_v29 = vadd.f32 %v8748_v46, %v2537_v57  ;;  %v2600_v48 = vmax.f32 %v2568_v31, 0.0  ;;  %v3261_v52 = vunpack.c.l.bf16 %v6091_v28  ;;  %v5441_v33 = vadd.f32 %v5440_v36, %v5352_v37  ;;  %v5442_v36 = vpop.f32.mrf.mxu2 }
 0x260   : > { %v2328_v22 = vrot.slane %v2216_v10, 2  ;;  %v4009_v49 = vunpack.c.l.b16 %v2440_v25  ;;  %v2717_v5 = vmul.f32 %v8808_v39, %v2701_v53  ;;  %v5265_v21 = vadd.f32 %v9464_v18, %v8480_v4  ;;  %v5531_v8 = vpop.f32.mrf.mxu3  ;;  %v5356_v4 = vpop.f32.mrf.mxu1 }
 0x261   : > { %v2601_v58 = vmax.f32 %v2569_v29, 0.0  ;;  %v2632_v7 = vsel %vm440_vm0, %v2600_v48, 0.0  ;;  %v2835_v47 = vpack.c.bf16 %v2600_v48, %v2600_v48  ;;  %v3277_v45 = vmul.f32 %v8808_v39, %v3261_v52 }
 0x262   : > { %v2330_v61 = vsel %vm1223_vm4, %v2328_v22, %v2329_v59  ;;  %v2664_v19 = vpack.c.bf16 %v2632_v7, %v2632_v7  ;;  %v2733_v9 = vadd.f32 %v8748_v46, %v2717_v5  ;;  %v5530_v37 = vadd.f32 %v5529_v42, %v5441_v33 }
 0x263   : > { %v2439_v44 = vpack.c.bf16 %v2330_v61, %v2330_v61  ;;  %v2665_v15 = vpack.c.bf16 %v2601_v58, %v2601_v58  ;;  %v3115_v28 = vshrl.u32 %v2835_v47, 16  ;;  %v3118_v14 = vshll.u32 %v2835_v47, 16 }
 0x264   : > { %v4104_v60 = vunpack.c.l.b16 %v2664_v19  ;;  %v2749_v57 = vmax.f32 %v2733_v9, 0.0  ;;  %v3293_v31 = vadd.f32 %v8748_v46, %v3277_v45  ;;  %v3418_v10 = vrot.slane %v2601_v58, 2  ;;  %v8893_v48 = vpop.f32.mrf.mxu0 }
 0x265   : > { %v4008_v25 = vunpack.c.l.b16 %v2439_v44  ;;  %v4105_v53 = vunpack.c.l.b16 %v2665_v15  ;;  %v3117_v29 = vrot.slane %v3115_v28, 4  ;;  %v3120_v59 = vrot.slane %v3118_v14, 5 }
 0x266   : > { %v2837_v52 = vpack.c.bf16 %v2749_v57, %v2749_v57  ;;  %v3124_v42 = vshll.u32 %v2665_v15, 16  ;;  %v3128_v33 = vshrl.u32 %v2665_v15, 16  ;;  %v3309_v22 = vmax.f32 %v3293_v31, 0.0 }
 0x267   : > { %v4029_v5 = vpack.c.b16 %v4009_v49, %v4008_v25  ;;  %v4125_v18 = vpack.c.b16 %v4105_v53, %v4104_v60  ;;  %v3121_v7 = vor.u32 %v3120_v59, %v3117_v29  ;;  %v3420_v47 = vrot.slane %v2749_v57, 2  ;;  %v6028_v57 = vld [vmem:[%s6786_s8 + $0x9c] sm:$0xe] }
 0x268   : > { %v3126_v61 = vrot.slane %v3124_v42, 5  ;;  %v3130_v19 = vrot.slane %v3128_v33, 4  ;;  %v3134_v9 = vshll.u32 %v2837_v52, 16  ;;  %v3417_v45 = vrot.slane %v3309_v22, 2  ;;  %v9465_v22 = vld [vmem:[#allocation69_spill] sm:$0xff] }
 0x269   : > { %5390 = vmatmul.bf16.gmra.mxu1 %v4029_v5  ;;  %5479 = vmatmul.bf16.gmra.mxu2 %v4125_v18  ;;  %v3122_v58 = vrot.slane %v3121_v7, 4  ;;  %v3421_v44 = vsel %vm1223_vm4, %v3418_v10, %v3420_v47  ;;  %v5619_v28 = vadd.f32 %v8843_v26, %v5530_v37  ;;  %v5354_v14 = vadd.f32 %v8860_v54, %v5265_v21  ;;  %v5445_v37 = vpop.f32.mrf.mxu2  ;;  %v9466_v5 = vld [vmem:[#allocation8_spill] sm:$0xff]  ;;  %v6652_v47 = vld [vmem:[%s6786_s8 + $0xa8] sm:$0xff]  }
 0x26a   : > { %v3131_v15 = vor.u32 %v3130_v19, %v3126_v61  ;;  %v3136_v31 = vrot.slane %v3134_v9, 5  ;;  %v3419_v49 = vsel %vm1223_vm4, %v3417_v45, %v3418_v10  ;;  %v3497_v60 = vsel %vm1162_vm5, %v3421_v44, 0.0  ;;  %v9467_v45 = vld [vmem:[#allocation6_spill] sm:$0xff]  ;;  %v6076_v44 = vld [vmem:[%s6786_s8 + $0xb0] sm:$0x1] }
 0x26b   : > { %v3127_v25 = vsel %vm7267_vm3, %v3122_v58, %v3126_v61  ;;  %v3528_v53 = vpack.c.bf16 %v3419_v49, %v3419_v49  ;;  %v3529_v29 = vpack.c.bf16 %v3497_v60, %v3497_v60  ;;  %v5752_v59 = vadd.f32 %v8872_v17, %v5619_v28  ;;  %v5534_v10 = vpop.f32.mrf.mxu3  ;;  %v5358_v61 = vpop.f32.mrf.mxu1 }
 0x26c   : > { %v3132_v52 = vrot.slane %v3131_v15, 4  ;;  %v4168_v26 = vunpack.c.l.b16 %v3127_v25  ;;  %v5791_v54 = vmul.f32 %v5619_v28, %v5619_v28  ;;  %v5443_v21 = vadd.f32 %v5442_v36, %v5354_v14  ;;  %v6092_v36 = vld [vmem:[%s6786_s8 + $0xa8] sm:$0xe]  ;;  %v8915_v25 = vpop.f32.mrf.mxu0 }
 0x26d   : > { %v4264_v42 = vunpack.c.l.b16 %v3528_v53  ;;  %v4265_v33 = vunpack.c.l.b16 %v3529_v29  ;;  %v5268_v18 = vadd.f32 %v9466_v5, %v9465_v22  ;;  %v2169_v7 = vunpack.c.l.bf16 %v6028_v57  ;;  %v9468_v53 = vld [vmem:[#allocation68_spill] sm:$0xff] }
 0x26e   : > { %v3137_v19 = vsel %vm7267_vm3, %v3132_v52, %v3136_v31  ;;  %v5822_v17 = vadd.f32 %v8881_v11, %v5791_v54  ;;  %v5532_v9 = vadd.f32 %v5531_v8, %v5443_v21  ;;  %v2334_v58 = vrot.slane %v9467_v45, 2 }
 0x26f   : > { %v4169_v14 = vunpack.c.l.b16 %v3137_v19  ;;  %v4285_v15 = vpack.c.b16 %v4265_v33, %v4264_v42  ;;  %v5357_v49 = vadd.f32 %v5356_v4, %v5268_v18  ;;  %v2185_v60 = vmul.f32 %v8808_v39, %v2169_v7 }
 0x270   : > { %v5621_v57 = vadd.f32 %v8869_v62, %v5532_v9  ;;  %v2336_v29 = vrot.slane %v9468_v53, 2  ;;  %v6545_v22 = vunpack.c.l.bf16 %v6652_v47  ;;  %v6546_v31 = vunpack.c.h.bf16 %v6652_v47 }
 0x271   : > { %v4189_v11 = vpack.c.b16 %v4169_v14, %v4168_v26  ;;  %5657 = vmatmul.bf16.gmra.mxu0 %v4285_v15  ;;  %v2201_v8 = vadd.f32 %v8748_v46, %v2185_v60  ;;  %v2702_v52 = vunpack.c.l.bf16 %v6076_v44  ;;  %v3262_v54 = vunpack.c.l.bf16 %v6092_v36  ;;  %v9469_v60 = vld [vmem:[#allocation2_spill] sm:$0xff] }
 0x272   : > { %v6569_v21 = vpack.c.bf16 %v5621_v57, %v5619_v28  ;;  %v8920_v42 = vadd.f32 %v5752_v59, %v5621_v57  ;;  %v5792_v4 = vmul.f32 %v5621_v57, %v5621_v57  ;;  %v2337_v33 = vsel %vm1223_vm4, %v2334_v58, %v2336_v29  ;;  %v5447_v57 = vpop.f32.mrf.mxu2 }
 0x273   : > { %5568 = vmatmul.bf16.gmra.mxu3 %v4189_v11  ;;  %v2217_v5 = vmax.f32 %v2201_v8, 0.0  ;;  %v2410_v62 = vsel %vm1162_vm5, %v2337_v33, 0.0  ;;  %v2538_v18 = vmul.f32 %v8808_v39, %v6545_v22  ;;  %v2539_v26 = vmul.f32 %v8808_v39, %v6546_v31  ;;  %v5536_v53 = vpop.f32.mrf.mxu3  ;;  %v5361_v8 = vpop.f32.mrf.mxu1 }
 0x274   : > { %6656 = vst [vmem:[%s8756_s27 + $0x18] sm:$0xff] %v6569_v21   ;;  %v8928_v7 = vadd.f32 %v5822_v17, %v5792_v4  ;;  %v2442_v47 = vpack.c.bf16 %v2410_v62, %v2410_v62  ;;  %v2718_v28 = vmul.f32 %v8808_v39, %v2702_v52  ;;  %v3278_v59 = vmul.f32 %v8808_v39, %v3262_v54 }
 0x275   : > { %v2333_v19 = vrot.slane %v2217_v5, 2  ;;  %v2570_v9 = vadd.f32 %v8748_v46, %v2538_v18  ;;  %v2571_v45 = vadd.f32 %v8748_v46, %v2539_v26  ;;  %v5446_v44 = vadd.f32 %v5445_v37, %v5357_v49 }
 0x276   : > { %v4011_v36 = vunpack.c.l.b16 %v2442_v47  ;;  %v2734_v14 = vadd.f32 %v8748_v46, %v2718_v28  ;;  %v3294_v15 = vadd.f32 %v8748_v46, %v3278_v59  ;;  %v5270_v17 = vadd.f32 %v9469_v60, %v8538_v23 }
 0x277   : > { %v2335_v29 = vsel %vm1223_vm4, %v2333_v19, %v2334_v58  ;;  %v2602_v22 = vmax.f32 %v2570_v9, 0.0  ;;  %v2603_v31 = vmax.f32 %v2571_v45, 0.0  ;;  %v5535_v11 = vadd.f32 %v5534_v10, %v5446_v44  ;;  %v8941_v62 = vpop.f32.mrf.mxu0 }
 0x278   : > { %v2441_v52 = vpack.c.bf16 %v2335_v29, %v2335_v29  ;;  %v2750_v54 = vmax.f32 %v2734_v14, 0.0  ;;  %v3310_v21 = vmax.f32 %v3294_v15, 0.0  ;;  %v5359_v37 = vadd.f32 %v5358_v61, %v5270_v17  ;;  %v6029_v17 = vld [vmem:[%s6786_s8 + $0xa8] sm:$0xe] }
 0x279   : > { %v2634_v49 = vsel %vm440_vm0, %v2602_v22, 0.0  ;;  %v2667_v4 = vpack.c.bf16 %v2603_v31, %v2603_v31  ;;  %v2838_v33 = vpack.c.bf16 %v2602_v22, %v2602_v22  ;;  %v3423_v5 = vrot.slane %v2603_v31, 2 }
 0x27a   : > { %v4010_v23 = vunpack.c.l.b16 %v2441_v52  ;;  %v2666_v18 = vpack.c.bf16 %v2634_v49, %v2634_v49  ;;  %v2840_v58 = vpack.c.bf16 %v2750_v54, %v2750_v54  ;;  %v3422_v26 = vrot.slane %v3310_v21, 2 }
 0x27b   : > { %v3139_v47 = vshrl.u32 %v2838_v33, 16  ;;  %v3142_v10 = vshll.u32 %v2838_v33, 16  ;;  %v4107_v28 = vunpack.c.l.b16 %v2667_v4  ;;  %v3148_v59 = vshll.u32 %v2667_v4, 16 }
 0x27c   : > { %v4030_v19 = vpack.c.b16 %v4011_v36, %v4010_v23  ;;  %v4106_v9 = vunpack.c.l.b16 %v2666_v18  ;;  %v3152_v61 = vshrl.u32 %v2667_v4, 16  ;;  %v3158_v45 = vshll.u32 %v2840_v58, 16  ;;  %v9470_v23 = vld [vmem:[#allocation7_spill] sm:$0xff]  ;;  %v9471_v18 = vld [vmem:[#allocation17_spill] sm:$0xff] }
 0x27d   : > { %v3141_v44 = vrot.slane %v3139_v47, 4  ;;  %v3144_v14 = vrot.slane %v3142_v10, 5  ;;  %v3150_v15 = vrot.slane %v3148_v59, 5  ;;  %v3424_v60 = vsel %vm1223_vm4, %v3422_v26, %v3423_v5  ;;  %v5450_v26 = vpop.f32.mrf.mxu2 }
 0x27e   : > { %5395 = vmatmul.bf16.gmra.mxu1 %v4030_v19  ;;  %v4126_v29 = vpack.c.b16 %v4107_v28, %v4106_v9  ;;  %v3154_v22 = vrot.slane %v3152_v61, 4  ;;  %v3160_v31 = vrot.slane %v3158_v45, 5  ;;  %v3425_v52 = vrot.slane %v2750_v54, 2  ;;  %v8949_v10 = vpop.f32.mrf.mxu3 }
 0x27f   : > { %v3145_v21 = vor.u32 %v3144_v14, %v3141_v44  ;;  %v3530_v49 = vpack.c.bf16 %v3424_v60, %v3424_v60  ;;  %v5624_v33 = vadd.f32 %v8893_v48, %v5535_v11  ;;  %v5448_v20 = vadd.f32 %v5447_v57, %v5359_v37  ;;  %v8954_v57 = vpop.f32.mrf.mxu1  ;;  %v9472_v44 = vld [vmem:[#allocation9_spill] sm:$0xff] }
 0x280   : > { %5484 = vmatmul.bf16.gmra.mxu2 %v4126_v29  ;;  %v3155_v36 = vor.u32 %v3154_v22, %v3150_v15  ;;  %v3426_v4 = vsel %vm1223_vm4, %v3423_v5, %v3425_v52  ;;  %v5273_v58 = vadd.f32 %v9471_v18, %v9470_v23  ;;  %v2170_v47 = vunpack.c.l.bf16 %v6029_v17  ;;  %v6058_v60 = vld [vmem:[%s6786_s8 + $0xb4] sm:$0xff]   ;;  %v6077_v17 = vld [vmem:[%s6786_s8 + $0xbc] sm:$0x1]  ;;  %v8962_v29 = vpop.f32.mrf.mxu0 }
 0x281   : > { %v3146_v28 = vrot.slane %v3145_v21, 4  ;;  %v3499_v54 = vsel %vm1162_vm5, %v3426_v4, 0.0  ;;  %v4266_v59 = vunpack.c.l.b16 %v3530_v49  ;;  %v5754_v48 = vadd.f32 %v8920_v42, %v5624_v33  ;;  %v9473_v21 = vld [vmem:[#allocation18_spill] sm:$0xff] }
 0x282   : > { %v3156_v11 = vrot.slane %v3155_v36, 4  ;;  %v3531_v37 = vpack.c.bf16 %v3499_v54, %v3499_v54  ;;  %v5793_v5 = vmul.f32 %v5624_v33, %v5624_v33  ;;  %v5537_v19 = vadd.f32 %v5536_v53, %v5448_v20 }
 0x283   : > { %v3151_v9 = vsel %vm7267_vm3, %v3146_v28, %v3150_v15  ;;  %v5362_v61 = vadd.f32 %v5361_v8, %v5273_v58  ;;  %v2186_v45 = vmul.f32 %v8808_v39, %v2170_v47  ;;  %v2339_v14 = vrot.slane %v9472_v44, 2  ;;  %v6093_v58 = vld [vmem:[%s6786_s8 + $0xb4] sm:$0xe] }
 0x284   : > { %v3161_v42 = vsel %vm7267_vm3, %v3156_v11, %v3160_v31  ;;  %v4170_v22 = vunpack.c.l.b16 %v3151_v9  ;;  %v4267_v52 = vunpack.c.l.b16 %v3531_v37  ;;  %v5824_v20 = vadd.f32 %v8928_v7, %v5793_v5 }
 0x285   : > { %v4171_v53 = vunpack.c.l.b16 %v3161_v42  ;;  %v5626_v15 = vadd.f32 %v8915_v25, %v5537_v19  ;;  %v2202_v8 = vadd.f32 %v8748_v46, %v2186_v45  ;;  %v2341_v49 = vrot.slane %v9473_v21, 2 }
 0x286   : > { %v4286_v36 = vpack.c.b16 %v4267_v52, %v4266_v59  ;;  %v2508_v4 = vunpack.c.l.bf16 %v6058_v60  ;;  %v2509_v23 = vunpack.c.h.bf16 %v6058_v60  ;;  %v2703_v18 = vunpack.c.l.bf16 %v6077_v17  ;;  %v5452_v60 = vpop.f32.mrf.mxu2  ;;  %v8984_v17 = vpop.f32.mrf.mxu3 }
 0x287   : > { %v4190_v47 = vpack.c.b16 %v4171_v53, %v4170_v22  ;;  %v6574_v28 = vpack.c.bf16 %v5626_v15, %v5624_v33  ;;  %v8971_v31 = vadd.f32 %v5754_v48, %v5626_v15  ;;  %v5794_v54 = vmul.f32 %v5626_v15, %v5626_v15  ;;  %v5366_v15 = vpop.f32.mrf.mxu1 }
 0x288   : > { %5662 = vmatmul.bf16.gmra.mxu0 %v4286_v36  ;;  %v2218_v7 = vmax.f32 %v2202_v8, 0.0  ;;  %v2342_v11 = vsel %vm1223_vm4, %v2339_v14, %v2341_v49  ;;  %v2540_v25 = vmul.f32 %v8808_v39, %v2508_v4  ;;  %v2541_v37 = vmul.f32 %v8808_v39, %v2509_v23 }
 0x289   : > { %5573 = vmatmul.bf16.gmra.mxu3 %v4190_v47  ;;  %6657 = vst [vmem:[%s8756_s27 + $0x20] sm:$0xff] %v6574_v28   ;;  %v8977_v59 = vadd.f32 %v5824_v20, %v5794_v54  ;;  %v2412_v5 = vsel %vm1162_vm5, %v2342_v11, 0.0  ;;  %v2719_v33 = vmul.f32 %v8808_v39, %v2703_v18  ;;  %v3263_v48 = vunpack.c.l.bf16 %v6093_v58  ;;  %v9474_v20 = vld [vmem:[#allocation23_spill] sm:$0xff]  ;;  %v8993_v47 = vpop.f32.mrf.mxu0 }
 0x28a   : > { %v2338_v19 = vrot.slane %v2218_v7, 2  ;;  %v2444_v9 = vpack.c.bf16 %v2412_v5, %v2412_v5  ;;  %v2572_v45 = vadd.f32 %v8748_v46, %v2540_v25  ;;  %v2573_v44 = vadd.f32 %v8748_v46, %v2541_v37 }
 0x28b   : > { %v2735_v42 = vadd.f32 %v8748_v46, %v2719_v33  ;;  %v3279_v22 = vmul.f32 %v8808_v39, %v3263_v48  ;;  %v5451_v52 = vadd.f32 %v5450_v26, %v5362_v61  ;;  %v5275_v53 = vadd.f32 %v9474_v20, %v8571_v2 }
 0x28c   : > { %v2340_v8 = vsel %vm1223_vm4, %v2338_v19, %v2339_v14  ;;  %v4013_v21 = vunpack.c.l.b16 %v2444_v9  ;;  %v2604_v49 = vmax.f32 %v2572_v45, 0.0  ;;  %v2605_v36 = vmax.f32 %v2573_v44, 0.0 }
 0x28d   : > { %v2443_v4 = vpack.c.bf16 %v2340_v8, %v2340_v8  ;;  %v2751_v23 = vmax.f32 %v2735_v42, 0.0  ;;  %v3295_v18 = vadd.f32 %v8748_v46, %v3279_v22  ;;  %v5540_v58 = vadd.f32 %v8949_v10, %v5451_v52 }
 0x28e   : > { %v2636_v26 = vsel %vm440_vm0, %v2604_v49, 0.0  ;;  %v2669_v61 = vpack.c.bf16 %v2605_v36, %v2605_v36  ;;  %v2841_v28 = vpack.c.bf16 %v2604_v49, %v2604_v49  ;;  %v3428_v2 = vrot.slane %v2605_v36, 2 }
 0x28f   : > { %v4012_v54 = vunpack.c.l.b16 %v2443_v4  ;;  %v2668_v7 = vpack.c.bf16 %v2636_v26, %v2636_v26  ;;  %v2843_v14 = vpack.c.bf16 %v2751_v23, %v2751_v23  ;;  %v3311_v11 = vmax.f32 %v3295_v18, 0.0  ;;  %v5455_v18 = vpop.f32.mrf.mxu2 }
 0x290   : > { %v3163_v25 = vshrl.u32 %v2841_v28, 16  ;;  %v3166_v37 = vshll.u32 %v2841_v28, 16  ;;  %v4109_v5 = vunpack.c.l.b16 %v2669_v61  ;;  %v3172_v33 = vshll.u32 %v2669_v61, 16 }
 0x291   : > { %v4031_v48 = vpack.c.b16 %v4013_v21, %v4012_v54  ;;  %v4108_v46 = vunpack.c.l.b16 %v2668_v7  ;;  %v3176_v19 = vshrl.u32 %v2669_v61, 16  ;;  %v3182_v10 = vshll.u32 %v2843_v14, 16  ;;  %v9000_v26 = vpop.f32.mrf.mxu3  ;;  %v9475_v7 = vld [vmem:[#allocation72_spill] sm:$0xff]  ;;  %v9476_v14 = vld [vmem:[#allocation70_spill] sm:$0xff] }
 0x292   : > { %v3165_v9 = vrot.slane %v3163_v25, 4  ;;  %v3168_v45 = vrot.slane %v3166_v37, 5  ;;  %v3174_v44 = vrot.slane %v3172_v33, 5  ;;  %v3427_v42 = vrot.slane %v3311_v11, 2  ;;  %v9006_v25 = vpop.f32.mrf.mxu1 }
 0x293   : > { %5400 = vmatmul.bf16.gmra.mxu1 %v4031_v48  ;;  %v4127_v22 = vpack.c.b16 %v4109_v5, %v4108_v46  ;;  %v3178_v52 = vrot.slane %v3176_v19, 4  ;;  %v3184_v20 = vrot.slane %v3182_v10, 5  ;;  %v3430_v8 = vrot.slane %v2751_v23, 2  ;;  %v6030_v23 = vld [vmem:[%s6786_s8 + $0xb4] sm:$0xe]  ;;  %v9011_v48 = vpop.f32.mrf.mxu0 }
 0x294   : > { %v3169_v49 = vor.u32 %v3168_v45, %v3165_v9  ;;  %v3429_v36 = vsel %vm1223_vm4, %v3427_v42, %v3428_v2  ;;  %v5629_v4 = vadd.f32 %v8941_v62, %v5540_v58  ;;  %v5364_v21 = vadd.f32 %v8954_v57, %v5275_v53  ;;  %v6653_v45 = vld [vmem:[%s6786_s8 + $0xc0] sm:$0xff]  }
 0x295   : > { %5489 = vmatmul.bf16.gmra.mxu2 %v4127_v22  ;;  %v3179_v61 = vor.u32 %v3178_v52, %v3174_v44  ;;  %v3431_v28 = vsel %vm1223_vm4, %v3428_v2, %v3430_v8  ;;  %v3532_v54 = vpack.c.bf16 %v3429_v36, %v3429_v36  ;;  %v5278_v11 = vadd.f32 %v9476_v14, %v9475_v7  ;;  %v6078_v8 = vld [vmem:[%s6786_s8 + $0xc8] sm:$0x1]  ;;  %v9477_v36 = vld [vmem:[#allocation73_spill] sm:$0xff] }
 0x296   : > { %v3170_v37 = vrot.slane %v3169_v49, 4  ;;  %v3501_v62 = vsel %vm1162_vm5, %v3431_v28, 0.0  ;;  %v5756_v57 = vadd.f32 %v8971_v31, %v5629_v4  ;;  %v5795_v53 = vmul.f32 %v5629_v4, %v5629_v4 }
 0x297   : > { %v3180_v58 = vrot.slane %v3179_v61, 4  ;;  %v3533_v5 = vpack.c.bf16 %v3501_v62, %v3501_v62  ;;  %v4268_v33 = vunpack.c.l.b16 %v3532_v54  ;;  %v5453_v2 = vadd.f32 %v5452_v60, %v5364_v21 }
 0x298   : > { %v3175_v46 = vsel %vm7267_vm3, %v3170_v37, %v3174_v44  ;;  %v5826_v19 = vadd.f32 %v8977_v59, %v5795_v53  ;;  %v5367_v10 = vadd.f32 %v5366_v15, %v5278_v11  ;;  %v2171_v9 = vunpack.c.l.bf16 %v6030_v23  ;;  %v9478_v44 = vld [vmem:[#allocation74_spill] sm:$0xff]  ;;  %v9033_v37 = vpop.f32.mrf.mxu2 }
 0x299   : > { %v3185_v42 = vsel %vm7267_vm3, %v3180_v58, %v3184_v20  ;;  %v4172_v31 = vunpack.c.l.b16 %v3175_v46  ;;  %v4269_v22 = vunpack.c.l.b16 %v3533_v5  ;;  %v5542_v52 = vadd.f32 %v8984_v17, %v5453_v2  ;;  %v9028_v20 = vld [vmem:[%s9180_s2] ss:$0 sm:$0xff]  ;;  %v6094_v23 = vld [vmem:[%s6786_s8 + $0xc0] sm:$0xe]  ;;  %v9035_v62 = vpop.f32.mrf.mxu3 }
 0x29a   : > { %v4173_v60 = vunpack.c.l.b16 %v3185_v42  ;;  %v2187_v49 = vmul.f32 %v8808_v39, %v2171_v9  ;;  %v2344_v21 = vrot.slane %v9477_v36, 2  ;;  %v2346_v61 = vrot.slane %v9478_v44, 2 }
 0x29b   : > { %v4287_v59 = vpack.c.b16 %v4269_v22, %v4268_v33  ;;  %v5631_v15 = vadd.f32 %v8962_v29, %v5542_v52  ;;  %v6549_v28 = vunpack.c.l.bf16 %v6653_v45  ;;  %v6550_v54 = vunpack.c.h.bf16 %v6653_v45  ;;  %v9039_v33 = vpop.f32.mrf.mxu1 }
 0x29c   : > { %v4191_v7 = vpack.c.b16 %v4173_v60, %v4172_v31  ;;  %v2203_v17 = vadd.f32 %v9028_v20, %v2187_v49  ;;  %v2347_v14 = vsel %vm1223_vm4, %v2344_v21, %v2346_v61  ;;  %v2704_v11 = vunpack.c.l.bf16 %v6078_v8  ;;  %v9479_v61 = vld [vmem:[#allocation71_spill] sm:$0xff] }
 0x29d   : > { %5667 = vmatmul.bf16.gmra.mxu0 %v4287_v59  ;;  %v6579_v29 = vpack.c.bf16 %v5631_v15, %v5629_v4  ;;  %v5757_v53 = vadd.f32 %v5756_v57, %v5631_v15  ;;  %v5796_v58 = vmul.f32 %v5631_v15, %v5631_v15  ;;  %v2414_v5 = vsel %vm1162_vm5, %v2347_v14, 0.0 }
 0x29e   : > { %5578 = vmatmul.bf16.gmra.mxu3 %v4191_v7  ;;  %v2219_v2 = vmax.f32 %v2203_v17, 0.0  ;;  %v2446_v46 = vpack.c.bf16 %v2414_v5, %v2414_v5  ;;  %v2542_v9 = vmul.f32 %v8808_v39, %v6549_v28  ;;  %v2543_v45 = vmul.f32 %v8808_v39, %v6550_v54  ;;  %v9480_v28 = vld [vmem:[#allocation27_spill] sm:$0xff] }
 0x29f   : > { %6658 = vst [vmem:[%s8756_s27 + $0x28] sm:$0xff] %v6579_v29   ;;  %v5827_v42 = vadd.f32 %v5826_v19, %v5796_v58  ;;  %v2720_v31 = vmul.f32 %v8808_v39, %v2704_v11  ;;  %v3264_v22 = vunpack.c.l.bf16 %v6094_v23  ;;  %v5456_v4 = vadd.f32 %v5455_v18, %v5367_v10  ;;  %v9052_v19 = vpop.f32.mrf.mxu0 }
 0x2a0   : > { %v2343_v57 = vrot.slane %v2219_v2, 2  ;;  %v4015_v52 = vunpack.c.l.b16 %v2446_v46  ;;  %v2574_v8 = vadd.f32 %v9028_v20, %v2542_v9  ;;  %v2575_v60 = vadd.f32 %v9028_v20, %v2543_v45  ;;  %v5460_v29 = vpop.f32.mrf.mxu2 }
 0x2a1   : > { %v2736_v49 = vadd.f32 %v9028_v20, %v2720_v31  ;;  %v3280_v36 = vmul.f32 %v8808_v39, %v3264_v22  ;;  %v5545_v44 = vadd.f32 %v9000_v26, %v5456_v4  ;;  %v5280_v59 = vadd.f32 %v9479_v61, %v8616_v63 }
 0x2a2   : > { %v2345_v15 = vsel %vm1223_vm4, %v2343_v57, %v2344_v21  ;;  %v2606_v18 = vmax.f32 %v2574_v8, 0.0  ;;  %v2607_v10 = vmax.f32 %v2575_v60, 0.0  ;;  %v5283_v54 = vadd.f32 %v9480_v28, %v8252_v16 }
 0x2a3   : > { %v2445_v7 = vpack.c.bf16 %v2345_v15, %v2345_v15  ;;  %v2752_v17 = vmax.f32 %v2736_v49, 0.0  ;;  %v3296_v14 = vadd.f32 %v9028_v20, %v3280_v36  ;;  %v9059_v39 = vadd.f32 %v8993_v47, %v5545_v44  ;;  %v9065_v46 = vpop.f32.mrf.mxu1 }
 0x2a4   : > { %v2638_v26 = vsel %vm440_vm0, %v2606_v18, 0.0  ;;  %v2671_v63 = vpack.c.bf16 %v2607_v10, %v2607_v10  ;;  %v2844_v11 = vpack.c.bf16 %v2606_v18, %v2606_v18  ;;  %v3433_v23 = vrot.slane %v2607_v10, 2  ;;  %v9063_v21 = vpop.f32.mrf.mxu3 }
 0x2a5   : > { %v4014_v58 = vunpack.c.l.b16 %v2445_v7  ;;  %v2670_v5 = vpack.c.bf16 %v2638_v26, %v2638_v26  ;;  %v2846_v2 = vpack.c.bf16 %v2752_v17, %v2752_v17  ;;  %v3312_v16 = vmax.f32 %v3296_v14, 0.0 }
 0x2a6   : > { %v3187_v9 = vshrl.u32 %v2844_v11, 16  ;;  %v3190_v45 = vshll.u32 %v2844_v11, 16  ;;  %v4111_v31 = vunpack.c.l.b16 %v2671_v63  ;;  %v3196_v47 = vshll.u32 %v2671_v63, 16 }
 0x2a7   : > { %v4032_v22 = vpack.c.b16 %v4015_v52, %v4014_v58  ;;  %v4110_v4 = vunpack.c.l.b16 %v2670_v5  ;;  %v3200_v13 = vshrl.u32 %v2671_v63, 16  ;;  %v3206_v57 = vshll.u32 %v2846_v2, 16  ;;  %v6031_v58 = vld [vmem:[%s6786_s8 + $0xc0] sm:$0xe]  ;;  %v5640_v5 = vpop.f32.mrf.mxu0 }
 0x2a8   : > { %v3189_v8 = vrot.slane %v3187_v9, 4  ;;  %v3192_v60 = vrot.slane %v3190_v45, 5  ;;  %v3198_v49 = vrot.slane %v3196_v47, 5  ;;  %v3432_v36 = vrot.slane %v3312_v16, 2 }
 0x2a9   : > { %5405 = vmatmul.bf16.gmra.mxu1 %v4032_v22  ;;  %v4128_v44 = vpack.c.b16 %v4111_v31, %v4110_v4  ;;  %v3202_v61 = vrot.slane %v3200_v13, 4  ;;  %v3208_v15 = vrot.slane %v3206_v57, 5  ;;  %v3435_v18 = vrot.slane %v2752_v17, 2  ;;  %v9481_v13 = vld [vmem:[#allocation22_spill] sm:$0xff] }
 0x2aa   : > { %v3193_v10 = vor.u32 %v3192_v60, %v3189_v8  ;;  %v3434_v28 = vsel %vm1223_vm4, %v3432_v36, %v3433_v23  ;;  %v5758_v7 = vadd.f32 %v5757_v53, %v9059_v39  ;;  %v5797_v52 = vmul.f32 %v9059_v39, %v9059_v39  ;;  %v5462_v53 = vpop.f32.mrf.mxu2 }
 0x2ab   : > { %5494 = vmatmul.bf16.gmra.mxu2 %v4128_v44  ;;  %v3203_v14 = vor.u32 %v3202_v61, %v3198_v49  ;;  %v3436_v26 = vsel %vm1223_vm4, %v3433_v23, %v3435_v18  ;;  %v3534_v63 = vpack.c.bf16 %v3434_v28, %v3434_v28  ;;  %v5369_v11 = vadd.f32 %v9006_v25, %v5280_v59  ;;  %v5376_v23 = vpop.f32.mrf.mxu1 }
 0x2ac   : > { %v3194_v2 = vrot.slane %v3193_v10, 4  ;;  %v3503_v17 = vsel %vm1162_vm5, %v3436_v26, 0.0  ;;  %v5828_v16 = vadd.f32 %v5827_v42, %v5797_v52  ;;  %v5372_v9 = vadd.f32 %v9039_v33, %v5283_v54  ;;  %v5551_v45 = vpop.f32.mrf.mxu3 }
 0x2ad   : > { %v3204_v31 = vrot.slane %v3203_v14, 4  ;;  %v3535_v47 = vpack.c.bf16 %v3503_v17, %v3503_v17  ;;  %v4270_v22 = vunpack.c.l.b16 %v3534_v63  ;;  %v5458_v4 = vadd.f32 %v9033_v37, %v5369_v11  ;;  %v6717_v37 = vld [vmem:[%s9179_s1] ss:$0 sm:$0xff] }
 0x2ae   : > { %v3199_v25 = vsel %vm7267_vm3, %v3194_v2, %v3198_v49  ;;  %v2172_v59 = vunpack.c.l.bf16 %v6031_v58  ;;  %v2349_v57 = vrot.slane %v9481_v13, 2  ;;  %v2351_v8 = vrot.slane %v8269_v12, 2  ;;  %v9482_v12 = vld [vmem:[#allocation28_spill] sm:$0xff]  ;;  %v9484_v58 = vld [vmem:[#allocation75_spill] sm:$0xff] }
 0x2af   : > { %v3209_v42 = vsel %vm7267_vm3, %v3204_v31, %v3208_v15  ;;  %v4174_v33 = vunpack.c.l.b16 %v3199_v25  ;;  %v4271_v54 = vunpack.c.l.b16 %v3535_v47  ;;  %v5547_v60 = vadd.f32 %v9035_v62, %v5458_v4 }
 0x2b0   : > { %v4175_v36 = vunpack.c.l.b16 %v3209_v42  ;;  %v2188_v44 = vmul.f32 %v6717_v37, %v2172_v59  ;;  %v2352_v49 = vsel %vm1223_vm4, %v2349_v57, %v2351_v8  ;;  %v5461_v61 = vadd.f32 %v5460_v29, %v5372_v9  ;;  %v9485_v59 = vld [vmem:[#allocation77_spill] sm:$0xff] }
 0x2b1   : > { %v4288_v18 = vpack.c.b16 %v4271_v54, %v4270_v22  ;;  %v5636_v10 = vadd.f32 %v9011_v48, %v5547_v60  ;;  %v5285_v50 = vadd.f32 %v9482_v12, %v8666_v0  ;;  %v2416_v62 = vsel %vm1162_vm5, %v2352_v49, 0.0  ;;  %v9486_v60 = vld [vmem:[#allocation4_spill] sm:$0xff] }
 0x2b2   : > { %v4192_v15 = vpack.c.b16 %v4175_v36, %v4174_v33  ;;  %v2204_v28 = vadd.f32 %v9028_v20, %v2188_v44  ;;  %v5550_v52 = vadd.f32 %v9063_v21, %v5461_v61  ;;  %v5201_v48 = vadd.f32 %v8310_v40, %v8679_v27  ;;  %v9483_v20 = vld [vmem:[#allocation76_spill] sm:$0xff]  ;;  %v5465_v2 = vpop.f32.mrf.mxu2 }
 0x2b3   : > { %5672 = vmatmul.bf16.gmra.mxu0 %v4288_v18  ;;  %v6584_v14 = vpack.c.bf16 %v5636_v10, %v9059_v39  ;;  %v5759_v26 = vadd.f32 %v5758_v7, %v5636_v10  ;;  %v5798_v29 = vmul.f32 %v5636_v10, %v5636_v10  ;;  %v5374_v63 = vadd.f32 %v9065_v46, %v5285_v50  ;;  %v5643_v46 = vpop.f32.mrf.mxu0  ;;  %v5378_v40 = vpop.f32.mrf.mxu1 }
 0x2b4   : > { %5583 = vmatmul.bf16.gmra.mxu3 %v4192_v15  ;;  %v2220_v0 = vmax.f32 %v2204_v28, 0.0  ;;  %v5639_v11 = vadd.f32 %v9052_v19, %v5550_v52  ;;  %v5288_v6 = vadd.f32 %v9484_v58, %v9483_v20  ;;  %v2448_v17 = vpack.c.bf16 %v2416_v62, %v2416_v62  ;;  %v9487_v52 = vld [vmem:[#allocation42_spill] sm:$0xff] }
 0x2b5   : > { %6659 = vst [vmem:[%s8756_s27 + $0x30] sm:$0xff] %v6584_v14   ;;  %v5829_v21 = vadd.f32 %v5828_v16, %v5798_v29  ;;  %v5463_v9 = vadd.f32 %v5462_v53, %v5374_v63  ;;  %v5290_v13 = vadd.f32 %v9485_v59, %v5201_v48  ;;  %v5028_v14 = vadd.f32 %v8328_v3, %v9487_v52  ;;  %v9488_v48 = vld [vmem:[#allocation29_spill] sm:$0xff]  ;;  %v9492_v52 = vld [vmem:[#allocation31_spill] sm:$0xff] }
 0x2b6   : > { %v2348_v39 = vrot.slane %v2220_v0, 2  ;;  %v5760_v7 = vadd.f32 %v5759_v26, %v5639_v11  ;;  %v5799_v31 = vmul.f32 %v5639_v11, %v5639_v11  ;;  %v5377_v47 = vadd.f32 %v5376_v23, %v5288_v6  ;;  %v5554_v22 = vpop.f32.mrf.mxu3 }
 0x2b7   : > { %v5552_v4 = vadd.f32 %v5551_v45, %v5463_v9  ;;  %v4017_v42 = vunpack.c.l.b16 %v2448_v17  ;;  %v5379_v53 = vadd.f32 %v5378_v40, %v5290_v13  ;;  %v5293_v58 = vadd.f32 %v8340_v1, %v8366_v38 }
 0x2b8   : > { %v2350_v27 = vsel %vm1223_vm4, %v2348_v39, %v2349_v57  ;;  %v5830_v25 = vadd.f32 %v5829_v21, %v5799_v31  ;;  %v5466_v19 = vadd.f32 %v5465_v2, %v5377_v47 }
 0x2b9   : > { %v2447_v8 = vpack.c.bf16 %v2350_v27, %v2350_v27  ;;  %v5641_v16 = vadd.f32 %v5640_v5, %v5552_v4 }
 0x2ba   : > { %v5555_v33 = vadd.f32 %v5554_v22, %v5466_v19  ;;  %v5467_v44 = vpop.f32.mrf.mxu2  ;;  %v9489_v19 = vld [vmem:[#allocation48_spill] sm:$0xff] }
 0x2bb   : > { %v4016_v54 = vunpack.c.l.b16 %v2447_v8  ;;  %5499 = vmatmul.bf16.gmra.mxu2 %v9486_v60  ;;  %v6589_v23 = vpack.c.bf16 %v5641_v16, %v5639_v11  ;;  %v5761_v36 = vadd.f32 %v5760_v7, %v5641_v16  ;;  %v5800_v37 = vmul.f32 %v5641_v16, %v5641_v16  ;;  %v5645_v15 = vpop.f32.mrf.mxu0  ;;  %v5381_v62 = vpop.f32.mrf.mxu1 }
 0x2bc   : > { %v5644_v45 = vadd.f32 %v5643_v46, %v5555_v33  ;;  %v5468_v61 = vadd.f32 %v5467_v44, %v5379_v53  ;;  %v5117_v11 = vadd.f32 %v8354_v35, %v5028_v14  ;;  %v5382_v6 = vadd.f32 %v5381_v62, %v5293_v58 }
 0x2bd   : > { %v4033_v49 = vpack.c.b16 %v4017_v42, %v4016_v54  ;;  %6660 = vst [vmem:[%s8756_s27 + $0x38] sm:$0xff] %v6589_v23   ;;  %v5831_v57 = vadd.f32 %v5830_v25, %v5800_v37  ;;  %v5033_v59 = vadd.f32 %v8382_v34, %v9489_v19  ;;  %v5298_v53 = vadd.f32 %v8390_v41, %v8421_v51 }
 0x2be   : > { %v5762_v18 = vadd.f32 %v5761_v36, %v5644_v45  ;;  %v5801_v10 = vmul.f32 %v5644_v45, %v5644_v45  ;;  %v5556_v12 = vpop.f32.mrf.mxu3  ;;  %v5206_v2 = vadd.f32 %v8368_v43, %v5117_v11 }
 0x2bf   : > { %5410 = vmatmul.bf16.gmra.mxu1 %v4033_v49  ;;  %v5557_v5 = vadd.f32 %v5556_v12, %v5468_v61  ;;  %v5122_v16 = vadd.f32 %v8407_v56, %v5033_v59  ;;  %v9497_v59 = vld [vmem:[#allocation37_spill] sm:$0xff] }
 0x2c0   : > { %v5832_v50 = vadd.f32 %v5831_v57, %v5801_v10  ;;  %v5295_v7 = vadd.f32 %v8372_v30, %v5206_v2 }
 0x2c1   : > { %v5646_v28 = vadd.f32 %v5645_v15, %v5557_v5 }
 0x2c3   : > { %5677 = vmatmul.bf16.gmra.mxu0 %v9486_v60  ;;  %v6594_v26 = vpack.c.bf16 %v5646_v28, %v5644_v45  ;;  %v5763_v29 = vadd.f32 %v5762_v18, %v5646_v28  ;;  %v5802_v63 = vmul.f32 %v5646_v28, %v5646_v28  ;;  %v5470_v0 = vpop.f32.mrf.mxu2  ;;  %v5383_v9 = vpop.f32.mrf.mxu1  ;;  %v5211_v60 = vadd.f32 %v8427_v32, %v5122_v16  ;;  %v9491_v32 = vld [vmem:[#allocation50_spill] sm:$0xff] }
 0x2c4   : > { %5588 = vmatmul.bf16.gmra.mxu3 %v9488_v48  ;;  %v5471_v21 = vadd.f32 %v5470_v0, %v5382_v6  ;;  %v5648_v3 = vpop.f32.mrf.mxu0  ;;  %v5384_v46 = vadd.f32 %v5383_v9, %v5295_v7  ;;  %v9493_v48 = vld [vmem:[#allocation35_spill] sm:$0xff]  ;;  %v9494_v0 = vld [vmem:[#allocation30_spill] sm:$0xff]  ;;  %v9496_v7 = vld [vmem:[#allocation20_spill] sm:$0xff] }
 0x2c5   : > { %6661 = vst [vmem:[%s8756_s27 + $0x40] sm:$0xff] %v6594_v26   ;;  %v5833_v20 = vadd.f32 %v5832_v50, %v5802_v63  ;;  %v5300_v34 = vadd.f32 %v8425_v55, %v5211_v60  ;;  %v9490_v50 = vld [vmem:[#allocation55_spill] sm:$0xff]  ;;  %v5303_v11 = vadd.f32 %v9494_v0, %v9493_v48  ;;  %v9495_v6 = vld [vmem:[#allocation78_spill] sm:$0xff]  ;;  %v9505_v0 = vld [vmem:[#allocation40_spill] sm:$0xff] }
 0x2c6   : > { %v5038_v15 = vadd.f32 %v9491_v32, %v9490_v50 }
 0x2c8   : > { %v5127_v14 = vadd.f32 %v9492_v52, %v5038_v15 }
 0x2ca   : > { %v5216_v2 = vadd.f32 %v9495_v6, %v5127_v14 }
 0x2cb   : > { %v5472_v31 = vpop.f32.mrf.mxu2 }
 0x2cc   : > { %v5559_v17 = vpop.f32.mrf.mxu3  ;;  %v5473_v4 = vadd.f32 %v5472_v31, %v5384_v46  ;;  %v5650_v38 = vpop.f32.mrf.mxu0  ;;  %v5305_v31 = vadd.f32 %v9496_v7, %v5216_v2 }
 0x2cd   : > { %v5560_v39 = vadd.f32 %v5559_v17, %v5471_v21 }
 0x2cf   : > { %v5649_v47 = vadd.f32 %v5648_v3, %v5560_v39 }
 0x2d0   : > { %v5386_v43 = vpop.f32.mrf.mxu1 }
 0x2d1   : > { %v5764_v35 = vadd.f32 %v5763_v29, %v5649_v47  ;;  %v5803_v22 = vmul.f32 %v5649_v47, %v5649_v47  ;;  %v5387_v54 = vadd.f32 %v5386_v43, %v5298_v53  ;;  %v9499_v53 = vld [vmem:[#allocation32_spill] sm:$0xff] }
 0x2d3   : > { %v5834_v40 = vadd.f32 %v5833_v20, %v5803_v22 }
 0x2d4   : > { %v5561_v27 = vpop.f32.mrf.mxu3 }
 0x2d5   : > { %v5562_v1 = vadd.f32 %v5561_v27, %v5473_v4 }
 0x2d7   : > { %v5651_v25 = vadd.f32 %v5650_v38, %v5562_v1 }
 0x2d8   : > { %v5475_v30 = vpop.f32.mrf.mxu2  ;;  %v5388_v45 = vpop.f32.mrf.mxu1 }
 0x2d9   : > { %v6599_v13 = vpack.c.bf16 %v5651_v25, %v5649_v47  ;;  %v5765_v8 = vadd.f32 %v5764_v35, %v5651_v25  ;;  %v5804_v42 = vmul.f32 %v5651_v25, %v5651_v25  ;;  %v5476_v23 = vadd.f32 %v5475_v30, %v5387_v54 }
 0x2da   : > { %v5653_v36 = vpop.f32.mrf.mxu0  ;;  %v5389_v61 = vadd.f32 %v5388_v45, %v5300_v34 }
 0x2db   : > { %6662 = vst [vmem:[%s8756_s27 + $0x48] sm:$0xff] %v6599_v13   ;;  %v5835_v33 = vadd.f32 %v5834_v40, %v5804_v42  ;;  %v9498_v13 = vld [vmem:[#allocation14_spill] sm:$0xff] }
 0x2e0   : > { %v5477_v49 = vpop.f32.mrf.mxu2 }
 0x2e1   : > { %v5478_v10 = vadd.f32 %v5477_v49, %v5389_v61 }
 0x2e2   : > { %v5564_v37 = vpop.f32.mrf.mxu3  ;;  %v5655_v41 = vpop.f32.mrf.mxu0 }
 0x2e3   : > { %v5565_v44 = vadd.f32 %v5564_v37, %v5476_v23  ;;  %v9500_v23 = vld [vmem:[#allocation34_spill] sm:$0xff] }
 0x2e5   : > { %v5654_v57 = vadd.f32 %v5653_v36, %v5565_v44  ;;  %v9501_v36 = vld [vmem:[#allocation10_spill] sm:$0xff] }
 0x2e6   : > { %v5391_v28 = vpop.f32.mrf.mxu1  ;;  %v5308_v37 = vadd.f32 %v9501_v36, %v9500_v23  ;;  %v9512_v23 = vld [vmem:[#allocation47_spill] sm:$0xff] }
 0x2e7   : > { %v5766_v18 = vadd.f32 %v5765_v8, %v5654_v57  ;;  %v5805_v56 = vmul.f32 %v5654_v57, %v5654_v57  ;;  %v5392_v58 = vadd.f32 %v5391_v28, %v5303_v11  ;;  %v5043_v8 = vadd.f32 %v9498_v13, %v9497_v59 }
 0x2e9   : > { %v5836_v12 = vadd.f32 %v5835_v33, %v5805_v56  ;;  %v5132_v54 = vadd.f32 %v9499_v53, %v5043_v8  ;;  %v9502_v56 = vld [vmem:[#allocation33_spill] sm:$0xff] }
 0x2ea   : > { %v5566_v5 = vpop.f32.mrf.mxu3 }
 0x2eb   : > { %v5567_v51 = vadd.f32 %v5566_v5, %v5478_v10  ;;  %v5221_v44 = vadd.f32 %v8534_v24, %v5132_v54 }
 0x2ec   : > { %v5480_v26 = vpop.f32.mrf.mxu2 }
 0x2ed   : > { %v5656_v62 = vadd.f32 %v5655_v41, %v5567_v51  ;;  %v5481_v21 = vadd.f32 %v5480_v26, %v5392_v58  ;;  %v5310_v10 = vadd.f32 %v9502_v56, %v5221_v44  ;;  %v9503_v26 = vld [vmem:[#allocation43_spill] sm:$0xff]  ;;  %v9507_v58 = vld [vmem:[#allocation16_spill] sm:$0xff] }
 0x2ee   : > { %v5658_v3 = vpop.f32.mrf.mxu0  ;;  %v5393_v9 = vpop.f32.mrf.mxu1 }
 0x2ef   : > { %v6604_v55 = vpack.c.bf16 %v5656_v62, %v5654_v57  ;;  %v5767_v29 = vadd.f32 %v5766_v18, %v5656_v62  ;;  %v5806_v63 = vmul.f32 %v5656_v62, %v5656_v62  ;;  %v5394_v35 = vadd.f32 %v5393_v9, %v5305_v31 }
 0x2f1   : > { %6663 = vst [vmem:[%s8756_s27 + $0x50] sm:$0xff] %v6604_v55   ;;  %v5837_v20 = vadd.f32 %v5836_v12, %v5806_v63  ;;  %v9504_v55 = vld [vmem:[#allocation41_spill] sm:$0xff] }
 0x2f4   : > { %v5482_v47 = vpop.f32.mrf.mxu2 }
 0x2f5   : > { %v5483_v40 = vadd.f32 %v5482_v47, %v5394_v35 }
 0x2f6   : > { %v5569_v17 = vpop.f32.mrf.mxu3  ;;  %v5660_v25 = vpop.f32.mrf.mxu0 }
 0x2f7   : > { %v5570_v39 = vadd.f32 %v5569_v17, %v5481_v21  ;;  %v9508_v21 = vld [vmem:[#allocation39_spill] sm:$0xff] }
 0x2f9   : > { %v5659_v46 = vadd.f32 %v5658_v3, %v5570_v39 }
 0x2fb   : > { %v5768_v22 = vadd.f32 %v5767_v29, %v5659_v46  ;;  %v5807_v4 = vmul.f32 %v5659_v46, %v5659_v46  ;;  %v5396_v19 = vpop.f32.mrf.mxu1  ;;  %v5048_v29 = vadd.f32 %v9504_v55, %v9503_v26 }
 0x2fc   : > { %v5397_v45 = vadd.f32 %v5396_v19, %v5308_v37  ;;  %v9513_v37 = vld [vmem:[#allocation46_spill] sm:$0xff] }
 0x2fd   : > { %v5838_v27 = vadd.f32 %v5837_v20, %v5807_v4  ;;  %v5137_v11 = vadd.f32 %v9505_v0, %v5048_v29  ;;  %v9506_v20 = vld [vmem:[#allocation3_spill] sm:$0xff]  ;;  %v9517_v29 = vld [vmem:[#allocation56_spill] sm:$0xff] }
 0x2fe   : > { %v5571_v1 = vpop.f32.mrf.mxu3  ;;  %v5313_v6 = vadd.f32 %v9507_v58, %v9506_v20  ;;  %v9519_v58 = vld [vmem:[#allocation79_spill] sm:$0xff] }
 0x2ff   : > { %v5572_v38 = vadd.f32 %v5571_v1, %v5483_v40  ;;  %v5226_v3 = vadd.f32 %v9508_v21, %v5137_v11  ;;  %v9520_v21 = vld [vmem:[#allocation54_spill] sm:$0xff] }
 0x301   : > { %v5661_v43 = vadd.f32 %v5660_v25, %v5572_v38 }
 0x303   : > { %v6609_v42 = vpack.c.bf16 %v5661_v43, %v5659_v46  ;;  %v5769_v30 = vadd.f32 %v5768_v22, %v5661_v43  ;;  %v5808_v16 = vmul.f32 %v5661_v43, %v5661_v43  ;;  %v5485_v33 = vpop.f32.mrf.mxu2  ;;  %v5398_v57 = vpop.f32.mrf.mxu1  ;;  %v9509_v46 = vld [vmem:[#allocation38_spill] sm:$0xff] }
 0x304   : > { %v5486_v34 = vadd.f32 %v5485_v33, %v5397_v45  ;;  %v5399_v41 = vadd.f32 %v5398_v57, %v5310_v10  ;;  %v5315_v35 = vadd.f32 %v9509_v46, %v5226_v3  ;;  %v9511_v33 = vld [vmem:[#allocation45_spill] sm:$0xff]  ;;  %v9514_v45 = vld [vmem:[#allocation44_spill] sm:$0xff] }
 0x305   : > { %6664 = vst [vmem:[%s8756_s27 + $0x58] sm:$0xff] %v6609_v42   ;;  %v5839_v60 = vadd.f32 %v5838_v27, %v5808_v16  ;;  %v5663_v49 = vpop.f32.mrf.mxu0  ;;  %v9510_v16 = vld [vmem:[#allocation49_spill] sm:$0xff]  ;;  %v5318_v44 = vadd.f32 %v9514_v45, %v9513_v37 }
 0x306   : > { %v5053_v53 = vadd.f32 %v9511_v33, %v9510_v16  ;;  %v9521_v3 = vld [vmem:[#allocation53_spill] sm:$0xff] }
 0x308   : > { %v5142_v36 = vadd.f32 %v9512_v23, %v5053_v53 }
 0x30b   : > { %v5487_v12 = vpop.f32.mrf.mxu2 }
 0x30c   : > { %v5574_v61 = vpop.f32.mrf.mxu3  ;;  %v5488_v32 = vadd.f32 %v5487_v12, %v5399_v41 }
 0x30d   : > { %v5575_v18 = vadd.f32 %v5574_v61, %v5486_v34  ;;  %v5665_v28 = vpop.f32.mrf.mxu0  ;;  %v9515_v61 = vld [vmem:[#allocation52_spill] sm:$0xff] }
 0x30f   : > { %v5664_v5 = vadd.f32 %v5663_v49, %v5575_v18  ;;  %v5231_v18 = vadd.f32 %v9515_v61, %v5142_v36 }
 0x310   : > { %v5401_v14 = vpop.f32.mrf.mxu1 }
 0x311   : > { %v5770_v51 = vadd.f32 %v5769_v30, %v5664_v5  ;;  %v5809_v50 = vmul.f32 %v5664_v5, %v5664_v5  ;;  %v5402_v2 = vadd.f32 %v5401_v14, %v5313_v6 }
 0x313   : > { %v5840_v15 = vadd.f32 %v5839_v60, %v5809_v50 }
 0x314   : > { %v5576_v62 = vpop.f32.mrf.mxu3 }
 0x315   : > { %v5577_v52 = vadd.f32 %v5576_v62, %v5488_v32 }
 0x317   : > { %v5666_v24 = vadd.f32 %v5665_v28, %v5577_v52 }
 0x318   : > { %v5490_v48 = vpop.f32.mrf.mxu2  ;;  %v5403_v39 = vpop.f32.mrf.mxu1 }
 0x319   : > { %v6614_v63 = vpack.c.bf16 %v5666_v24, %v5664_v5  ;;  %v5491_v9 = vadd.f32 %v5490_v48, %v5402_v2  ;;  %v5810_v31 = vmul.f32 %v5666_v24, %v5666_v24  ;;  %v5771_v4 = vadd.f32 %v5770_v51, %v5666_v24  ;;  %v9516_v51 = vld [vmem:[#allocation13_spill] sm:$0xff] }
 0x31a   : > { %v5668_v17 = vpop.f32.mrf.mxu0  ;;  %v5404_v27 = vadd.f32 %v5403_v39, %v5315_v35  ;;  %v5320_v50 = vadd.f32 %v9516_v51, %v5231_v18 }
 0x31b   : > { %6665 = vst [vmem:[%s8756_s27 + $0x60] sm:$0xff] %v6614_v63   ;;  %v5841_v1 = vadd.f32 %v5840_v15, %v5810_v31  ;;  %v9518_v63 = vld [vmem:[#allocation51_spill] sm:$0xff] }
 0x31c   : > { %v5058_v48 = vadd.f32 %v9518_v63, %v9517_v29 }
 0x31e   : > { %v5147_v6 = vadd.f32 %v9519_v58, %v5058_v48 }
 0x320   : > { %v5492_v22 = vpop.f32.mrf.mxu2 }
 0x321   : > { %v5579_v7 = vpop.f32.mrf.mxu3  ;;  %v5493_v43 = vadd.f32 %v5492_v22, %v5404_v27 }
 0x322   : > { %v5580_v47 = vadd.f32 %v5579_v7, %v5491_v9  ;;  %v5670_v59 = vpop.f32.mrf.mxu0  ;;  %v9522_v7 = vld [vmem:[#allocation58_spill] sm:$0xff] }
 0x323   : > { %v5236_v31 = vadd.f32 %v9522_v7, %v5147_v6 }
 0x324   : > { %v5669_v40 = vadd.f32 %v5668_v17, %v5580_v47  ;;  %v5323_v17 = vadd.f32 %v9521_v3, %v9520_v21 }
 0x326   : > { %v5772_v38 = vadd.f32 %v5771_v4, %v5669_v40  ;;  %v5811_v25 = vmul.f32 %v5669_v40, %v5669_v40  ;;  %v5406_v8 = vpop.f32.mrf.mxu1 }
 0x327   : > { %v5407_v34 = vadd.f32 %v5406_v8, %v5318_v44 }
 0x328   : > { %v5842_v19 = vadd.f32 %v5841_v1, %v5811_v25  ;;  %v9523_v1 = vld [vmem:[#allocation36_spill] sm:$0xff] }
 0x329   : > { %v5581_v13 = vpop.f32.mrf.mxu3 }
 0x32a   : > { %v5582_v42 = vadd.f32 %v5581_v13, %v5493_v43 }
 0x32c   : > { %v5671_v30 = vadd.f32 %v5670_v59, %v5582_v42 }
 0x32e   : > { %v6619_v54 = vpack.c.bf16 %v5671_v30, %v5669_v40  ;;  %v5495_v60 = vpop.f32.mrf.mxu2  ;;  %v5408_v57 = vpop.f32.mrf.mxu1  ;;  %v5812_v5 = vmul.f32 %v5671_v30, %v5671_v30  ;;  %v5773_v32 = vadd.f32 %v5772_v38, %v5671_v30  ;;  %v5325_v38 = vadd.f32 %v9523_v1, %v5236_v31 }
 0x32f   : > { %v5496_v56 = vadd.f32 %v5495_v60, %v5407_v34  ;;  %v5409_v28 = vadd.f32 %v5408_v57, %v5320_v50 }
 0x330   : > { %6666 = vst [vmem:[%s8756_s27 + $0x68] sm:$0xff] %v6619_v54   ;;  %v5673_v49 = vpop.f32.mrf.mxu0  ;;  %v5843_v62 = vadd.f32 %v5842_v19, %v5812_v5 }
 0x336   : > { %v5497_v10 = vpop.f32.mrf.mxu2 }
 0x337   : > { %v5584_v12 = vpop.f32.mrf.mxu3  ;;  %v5498_v26 = vadd.f32 %v5497_v10, %v5409_v28 }
 0x338   : > { %v5585_v41 = vadd.f32 %v5584_v12, %v5496_v56  ;;  %v5675_v24 = vpop.f32.mrf.mxu0 }
 0x33a   : > { %v5674_v15 = vadd.f32 %v5673_v49, %v5585_v41 }
 0x33c   : > { %v5774_v52 = vadd.f32 %v5773_v32, %v5674_v15  ;;  %v5813_v14 = vmul.f32 %v5674_v15, %v5674_v15  ;;  %v5411_v55 = vpop.f32.mrf.mxu1 }
 0x33d   : > { %v5412_v39 = vadd.f32 %v5411_v55, %v5323_v17 }
 0x33e   : > { %v5844_v0 = vadd.f32 %v5843_v62, %v5813_v14  ;;  %v5500_v20 = vpop.f32.mrf.mxu2 }
 0x33f   : > { %v5586_v11 = vpop.f32.mrf.mxu3  ;;  %v5501_v46 = vadd.f32 %v5500_v20, %v5412_v39 }
 0x340   : > { %v5587_v2 = vadd.f32 %v5586_v11, %v5498_v26  ;;  %v5678_v35 = vpop.f32.mrf.mxu0 }
 0x342   : > { %v5676_v9 = vadd.f32 %v5675_v24, %v5587_v2 }
 0x344   : > { %v6624_v47 = vpack.c.bf16 %v5676_v9, %v5674_v15  ;;  %v5413_v4 = vpop.f32.mrf.mxu1  ;;  %v5814_v40 = vmul.f32 %v5676_v9, %v5676_v9  ;;  %v5775_v43 = vadd.f32 %v5774_v52, %v5676_v9 }
 0x345   : > { %v5414_v59 = vadd.f32 %v5413_v4, %v5325_v38 }
 0x346   : > { %6667 = vst [vmem:[%s8756_s27 + $0x70] sm:$0xff] %v6624_v47   ;;  %v5502_v25 = vpop.f32.mrf.mxu2  ;;  %v5845_v13 = vadd.f32 %v5844_v0, %v5814_v40 }
 0x347   : > { %v5589_v22 = vpop.f32.mrf.mxu3  ;;  %v5503_v30 = vadd.f32 %v5502_v25, %v5414_v59 }
 0x348   : > { %v5590_v27 = vadd.f32 %v5589_v22, %v5501_v46  ;;  %v5680_v54 = vpop.f32.mrf.mxu0 }
 0x34a   : > { %v5679_v19 = vadd.f32 %v5678_v35, %v5590_v27 }
 0x34c   : > { %v5776_v8 = vadd.f32 %v5775_v43, %v5679_v19  ;;  %v5815_v42 = vmul.f32 %v5679_v19, %v5679_v19 }
 0x34e   : > { %v5846_v16 = vadd.f32 %v5845_v13, %v5815_v42 }
 0x34f   : > { %v5591_v33 = vpop.f32.mrf.mxu3 }
 0x350   : > { %v5592_v53 = vadd.f32 %v5591_v33, %v5503_v30 }
 0x352   : > { %v5681_v60 = vadd.f32 %v5680_v54, %v5592_v53 }
 0x354   : > { %v6629_v23 = vpack.c.bf16 %v5681_v60, %v5679_v19  ;;  %v5777_v36 = vadd.f32 %v5776_v8, %v5681_v60  ;;  %v5816_v37 = vmul.f32 %v5681_v60, %v5681_v60 }
 0x356   : > { %6668 = vst [vmem:[%s8756_s27 + $0x78] sm:$0xff] %v6629_v23   ;;  %v5778_v45 = vrot.slane %v5777_v36, 4  ;;  %v5847_v44 = vadd.f32 %v5846_v16, %v5816_v37 }
 0x358   : > { %v5779_v34 = vadd.f32 %v5778_v45, %v5777_v36  ;;  %v5848_v49 = vrot.slane %v5847_v44, 4 }
 0x35a   : > { %v5780_v57 = vrot.slane %v5779_v34, 2  ;;  %v5849_v61 = vadd.f32 %v5848_v49, %v5847_v44 }
 0x35c   : > { %v5781_v18 = vadd.f32 %v5780_v57, %v5779_v34  ;;  %v5850_v56 = vrot.slane %v5849_v61, 2 }
 0x35e   : > { %v5782_v10 = vrot.slane %v5781_v18, 1  ;;  %v5851_v12 = vadd.f32 %v5850_v56, %v5849_v61 }
 0x360   : > { %v5783_v5 = vadd.f32 %v5782_v10, %v5781_v18  ;;  %v5852_v41 = vrot.slane %v5851_v12, 1 }
 0x362   : > { %5784 = vst [vmem:[%s265_s12] sm:$0x1] %v5783_v5  ;;  %v5853_v51 = vadd.f32 %v5852_v41, %v5851_v12 }
 0x364   : > { %5854 = vst [vmem:[%s268_s15] sm:$0x1] %v5853_v51 }
 0x365 PF: > { %s17_s21 = sadd.s32 1, %s6724_s21  }
 0x366   : > { %p14_p4 = scmp.ge.s32.totalorder %s17_s21, 4  }
 0x368   :  { %16 = sbr.rel (!%p14_p4) target bundleno = 1 (0x1), region = 92 }

</bundles_post_ra>
